<compile_context>
chip_gen: v7x
topology: tpu7x:2x2x1
jax: 0.10.0
libtpu: 0.0.40
codegen_flags: <defaults>
</compile_context>

<pallas_src>
import functools
import math

import jax
import jax.numpy as jnp
from jax.experimental import pallas as pl
from jax.experimental.pallas import tpu as pltpu


_NEG_INF = -1e30      # plain Python float -> trace-time literal, NOT a captured array


def _round_up(x, m):
    return ((x + m - 1) // m) * m


# ----------------------------- in-kernel helpers ------------------------------
def _layernorm(x, g, b):
    mu = jnp.mean(x, axis=-1, keepdims=True)
    xc = x - mu
    var = jnp.mean(xc * xc, axis=-1, keepdims=True)
    return xc * jax.lax.rsqrt(var + 1e-5) * g + b


def _mha(x_q, x_kv, key_mask, p, num_heads):
    """Cross multi-head attention with packed projections.

    x_q: (Lq, D), x_kv: (Lk, D), key_mask: (1, Lk) with 1.0 == padded key.
    """
    D = x_q.shape[-1]
    dh = D // num_heads
    scale = 1.0 / math.sqrt(dh)

    q = jnp.dot(x_q, p["wq"][...], preferred_element_type=jnp.float32) + p["bq"][...]
    kv = jnp.dot(x_kv, p["wkv"][...], preferred_element_type=jnp.float32) + p["bkv"][...]
    k = kv[:, :D]
    v = kv[:, D:]

    wo = p["wo"][...]
    out = jnp.zeros((x_q.shape[0], D), jnp.float32)
    for h in range(num_heads):                     # static unroll; H is small
        lo, hi = h * dh, (h + 1) * dh
        qh = q[:, lo:hi]
        kh = k[:, lo:hi]
        vh = v[:, lo:hi]
        s = jnp.dot(qh, kh.T, preferred_element_type=jnp.float32) * scale      # (Lq, Lk)
        # TODO(synk): fully-masked key rows give a uniform distribution over
        # padded keys here (torch nn.MultiheadAttention would produce NaN).
        s = jnp.where(key_mask > 0.5, _NEG_INF, s)
        s = s - jnp.max(s, axis=-1, keepdims=True)
        e = jnp.exp(s)
        pr = e * pl.reciprocal(jnp.sum(e, axis=-1, keepdims=True), approx=True)
        ctx = jnp.dot(pr, vh, preferred_element_type=jnp.float32)              # (Lq, dh)
        out = out + jnp.dot(ctx, wo[lo:hi, :], preferred_element_type=jnp.float32)
    return out + p["bo"][...]


def _ffn(x, p):
    h = jnp.dot(x, p["w1"][...], preferred_element_type=jnp.float32) + p["b1"][...]
    h = jnp.maximum(h, 0.0)
    return jnp.dot(h, p["w2"][...], preferred_element_type=jnp.float32) + p["b2"][...]


# ------------------------------ fused forward kernel ---------------------------
def _make_forward_kernel(treedef, n_params, num_layers, num_heads):
    def kernel(prot_ref, comp_ref, pm_ref, cm_ref, pmc_ref, *refs):
        w = jax.tree_util.tree_unflatten(treedef, refs[:n_params])
        aff_ref = refs[n_params]
        pair_ref = refs[n_params + 1]

        prot = prot_ref[0]          # (Lp, D)
        comp = comp_ref[0]          # (Lc, D)
        pmask = pm_ref[0]           # (1, Lp)   1.0 == padded
        cmask = cm_ref[0]           # (1, Lc)
        pmask_col = pmc_ref[0]      # (Lp, 1)

        lay = w["layer"]
        for _ in range(num_layers):  # _get_clones => identical params, reused
            # prot attends to comp
            a = _mha(prot, comp, cmask, lay["p_attn"], num_heads)
            prot = _layernorm(prot + a, lay["p_ln1"]["g"][...], lay["p_ln1"]["b"][...])
            a = _ffn(prot, lay["p_ffn"])
            prot = _layernorm(prot + a, lay["p_ln2"]["g"][...], lay["p_ln2"]["b"][...])
            # comp attends to (updated) prot
            a = _mha(comp, prot, pmask, lay["c_attn"], num_heads)
            comp = _layernorm(comp + a, lay["c_ln1"]["g"][...], lay["c_ln1"]["b"][...])
            a = _ffn(comp, lay["c_ffn"])
            comp = _layernorm(comp + a, lay["c_ln2"]["g"][...], lay["c_ln2"]["b"][...])

        # shared final norm (norm_prot is norm_comp in the torch module)
        g = w["norm"]["g"][...]
        b = w["norm"]["b"][...]
        prot = _layernorm(prot, g, b)
        comp = _layernorm(comp, g, b)

        # ---- affinity head: masked mean-pool -> linear -> scalar ----
        pv = 1.0 - pmask            # (1, Lp) valid flags
        cv = 1.0 - cmask            # (1, Lc)
        p_cnt = jnp.maximum(jnp.sum(pv, axis=-1, keepdims=True), 1.0)   # (1, 1)
        c_cnt = jnp.maximum(jnp.sum(cv, axis=-1, keepdims=True), 1.0)   # (1, 1)
        ppool = (jnp.dot(pv, prot, preferred_element_type=jnp.float32)
                 * pl.reciprocal(p_cnt, approx=True))
        cpool = (jnp.dot(cv, comp, preferred_element_type=jnp.float32)
                 * pl.reciprocal(c_cnt, approx=True))
        aff = (jnp.dot(ppool, w["affinity"]["wp"][...], preferred_element_type=jnp.float32)
               + jnp.dot(cpool, w["affinity"]["wc"][...], preferred_element_type=jnp.float32)
               + w["affinity"]["b"][...])
        aff_ref[0] = aff            # (1, 1)

        # ---- pairwise head: sigmoid(prot @ W @ comp^T + b), masked ----
        t = jnp.dot(prot, w["pairwise"]["w"][...], preferred_element_type=jnp.float32)
        s = jnp.dot(t, comp.T, preferred_element_type=jnp.float32) + w["pairwise"]["b"][...]
        sig = pl.reciprocal(1.0 + jnp.exp(-s), approx=True)
        valid = (1.0 - pmask_col) * cv            # (Lp, Lc)
        pair_ref[0] = sig * valid                 # lane-dense store (Lc padded to 128)

    return kernel


# --------------------------------- wrapper -------------------------------------
def attention_predictor_forward(params, prot, comp,
                                prot_key_padding_mask, comp_key_padding_mask,
                                num_layers=2, num_heads=2):
    f32 = jnp.float32
    B, Lp, D = prot.shape
    Lc = comp.shape[1]
    assert D % num_heads == 0

    Lp_pad = _round_up(Lp, 8)          # sublane-aligned rows
    Lc_pad = _round_up(Lc, 128)        # lane-dense pairwise output last dim

    prot_p = jnp.pad(prot.astype(f32), ((0, 0), (0, Lp_pad - Lp), (0, 0)))
    comp_p = jnp.pad(comp.astype(f32), ((0, 0), (0, Lc_pad - Lc), (0, 0)))
    pmask = jnp.pad(prot_key_padding_mask.astype(f32).reshape(B, Lp),
                    ((0, 0), (0, Lp_pad - Lp)), constant_values=1.0)
    cmask = jnp.pad(comp_key_padding_mask.astype(f32).reshape(B, Lc),
                    ((0, 0), (0, Lc_pad - Lc)), constant_values=1.0)

    flat_params, treedef = jax.tree_util.tree_flatten(params)
    kernel = _make_forward_kernel(treedef, len(flat_params), num_layers, num_heads)

    def seq_spec(L):
        return pl.BlockSpec((1, L, D), lambda bidx: (bidx, 0, 0))

    # all parameters are 2-D; constant index map => DMA'd once for the whole grid
    w_specs = [pl.BlockSpec(p.shape, lambda bidx: (0, 0)) for p in flat_params]

    aff, pair = pl.pallas_call(
        kernel,
        out_shape=(jax.ShapeDtypeStruct((B, 1, 1), f32),
                   jax.ShapeDtypeStruct((B, Lp_pad, Lc_pad), f32)),
        grid=(B,),
        in_specs=[seq_spec(Lp_pad), seq_spec(Lc_pad),
                  pl.BlockSpec((1, 1, Lp_pad), lambda bidx: (bidx, 0, 0)),
                  pl.BlockSpec((1, 1, Lc_pad), lambda bidx: (bidx, 0, 0)),
                  pl.BlockSpec((1, Lp_pad, 1), lambda bidx: (bidx, 0, 0))] + w_specs,
        out_specs=(pl.BlockSpec((1, 1, 1), lambda bidx: (bidx, 0, 0)),
                   pl.BlockSpec((1, Lp_pad, Lc_pad), lambda bidx: (bidx, 0, 0))),
        compiler_params=pltpu.CompilerParams(dimension_semantics=("parallel",)),
    )(prot_p, comp_p,
      pmask.reshape(B, 1, Lp_pad), cmask.reshape(B, 1, Lc_pad),
      pmask.reshape(B, Lp_pad, 1),
      *flat_params)

    # TODO(synk): dropout inside the torch sub-layers is identity in eval mode
    # and is therefore omitted here.
    return aff, pair[:, :Lp, :Lc]


# ---------------------------- parameter initialization --------------------------
def _init_attn(key, D):
    ks = jax.random.split(key, 6)
    s = 0.1
    n = jax.random.normal
    return dict(
        wq=s * n(ks[0], (D, D), jnp.float32),
        bq=s * n(ks[1], (1, D), jnp.float32),
        wkv=s * n(ks[2], (D, 2 * D), jnp.float32),   # packed K/V projection
        bkv=s * n(ks[3], (1, 2 * D), jnp.float32),
        wo=s * n(ks[4], (D, D), jnp.float32),
        bo=s * n(ks[5], (1, D), jnp.float32),
    )


def _init_ffn(key, D, F):
    ks = jax.random.split(key, 4)
    s = 0.1
    n = jax.random.normal
    return dict(
        w1=s * n(ks[0], (D, F), jnp.float32),
        b1=s * n(ks[1], (1, F), jnp.float32),
        w2=s * n(ks[2], (F, D), jnp.float32),
        b2=s * n(ks[3], (1, D), jnp.float32),
    )


def _init_ln(D):
    return dict(g=jnp.ones((1, D), jnp.float32), b=jnp.zeros((1, D), jnp.float32))


def init_attention_predictor_params(key, D, F):
    ks = jax.random.split(key, 8)
    # one encoder layer's params; _get_clones deep-copies => all layers identical
    layer = dict(
        p_attn=_init_attn(ks[0], D), p_ln1=_init_ln(D),
        p_ffn=_init_ffn(ks[1], D, F), p_ln2=_init_ln(D),
        c_attn=_init_attn(ks[2], D), c_ln1=_init_ln(D),
        c_ffn=_init_ffn(ks[3], D, F), c_ln2=_init_ln(D),
    )
    s = 0.1
    n = jax.random.normal
    aff = dict(
        wp=s * n(ks[4], (D, 1), jnp.float32),
        wc=s * n(ks[5], (D, 1), jnp.float32),
        b=s * n(ks[6], (1, 1), jnp.float32),
    )
    pw = dict(
        w=s * n(ks[7], (D, D), jnp.float32),
        b=jnp.zeros((1, 1), jnp.float32),
    )
    norm = _init_ln(D)   # shared by norm_prot and norm_comp (same object in torch)
    return dict(layer=layer, norm=norm, affinity=aff, pairwise=pw)


# ------------------------------------ demo --------------------------------------
if __name__ == "__main__":
    B, Lp, Lc, D, H, F = 2, 8, 6, 32, 2, 64
    key = jax.random.PRNGKey(0)
    kp, kc, kparams = jax.random.split(key, 3)

    prot = jax.random.normal(kp, (B, Lp, D), jnp.float32)
    comp = jax.random.normal(kc, (B, Lc, D), jnp.float32)
    # key padding masks: 1.0 == padded (ignored), same meaning as torch bool masks.
    prot_mask = jnp.zeros((B, Lp), jnp.float32).at[0, Lp - 1].set(1.0)
    comp_mask = jnp.zeros((B, Lc), jnp.float32).at[1, Lc - 2:].set(1.0)

    params = init_attention_predictor_params(kparams, D, F)

    fwd = jax.jit(functools.partial(attention_predictor_forward,
                                    num_layers=2, num_heads=H))
    affinity, pairwise = fwd(params, prot, comp, prot_mask, comp_mask)
    jax.block_until_ready(affinity)
    jax.block_until_ready(pairwise)

    assert affinity.shape == (B, 1, 1)
    assert pairwise.shape == (B, Lp, Lc)
    assert bool(jnp.all(jnp.isfinite(affinity)))
    assert bool(jnp.all(jnp.isfinite(pairwise)))
    print("KERNEL_OK")
</pallas_src>

<mosaic_0001>
module attributes {stable_mosaic.version = 11 : i64} {
  func.func @kernel(%arg0: i32, %arg1: memref<1x8x32xf32, #tpu.memory_space<vmem>>, %arg2: memref<1x128x32xf32, #tpu.memory_space<vmem>>, %arg3: memref<1x1x8xf32, #tpu.memory_space<vmem>>, %arg4: memref<1x1x128xf32, #tpu.memory_space<vmem>>, %arg5: memref<1x8x1xf32, #tpu.memory_space<vmem>>, %arg6: memref<1x1xf32, #tpu.memory_space<vmem>>, %arg7: memref<32x1xf32, #tpu.memory_space<vmem>>, %arg8: memref<32x1xf32, #tpu.memory_space<vmem>>, %arg9: memref<1x64xf32, #tpu.memory_space<vmem>>, %arg10: memref<1x32xf32, #tpu.memory_space<vmem>>, %arg11: memref<1x32xf32, #tpu.memory_space<vmem>>, %arg12: memref<32x64xf32, #tpu.memory_space<vmem>>, %arg13: memref<32x32xf32, #tpu.memory_space<vmem>>, %arg14: memref<32x32xf32, #tpu.memory_space<vmem>>, %arg15: memref<1x64xf32, #tpu.memory_space<vmem>>, %arg16: memref<1x32xf32, #tpu.memory_space<vmem>>, %arg17: memref<32x64xf32, #tpu.memory_space<vmem>>, %arg18: memref<64x32xf32, #tpu.memory_space<vmem>>, %arg19: memref<1x32xf32, #tpu.memory_space<vmem>>, %arg20: memref<1x32xf32, #tpu.memory_space<vmem>>, %arg21: memref<1x32xf32, #tpu.memory_space<vmem>>, %arg22: memref<1x32xf32, #tpu.memory_space<vmem>>, %arg23: memref<1x64xf32, #tpu.memory_space<vmem>>, %arg24: memref<1x32xf32, #tpu.memory_space<vmem>>, %arg25: memref<1x32xf32, #tpu.memory_space<vmem>>, %arg26: memref<32x64xf32, #tpu.memory_space<vmem>>, %arg27: memref<32x32xf32, #tpu.memory_space<vmem>>, %arg28: memref<32x32xf32, #tpu.memory_space<vmem>>, %arg29: memref<1x64xf32, #tpu.memory_space<vmem>>, %arg30: memref<1x32xf32, #tpu.memory_space<vmem>>, %arg31: memref<32x64xf32, #tpu.memory_space<vmem>>, %arg32: memref<64x32xf32, #tpu.memory_space<vmem>>, %arg33: memref<1x32xf32, #tpu.memory_space<vmem>>, %arg34: memref<1x32xf32, #tpu.memory_space<vmem>>, %arg35: memref<1x32xf32, #tpu.memory_space<vmem>>, %arg36: memref<1x32xf32, #tpu.memory_space<vmem>>, %arg37: memref<1x32xf32, #tpu.memory_space<vmem>>, %arg38: memref<1x32xf32, #tpu.memory_space<vmem>>, %arg39: memref<1x1xf32, #tpu.memory_space<vmem>>, %arg40: memref<32x32xf32, #tpu.memory_space<vmem>>, %arg41: memref<1x1x1xf32, #tpu.memory_space<vmem>>, %arg42: memref<1x8x128xf32, #tpu.memory_space<vmem>>) attributes {dimension_semantics = [#tpu.dimension_semantics<parallel>], iteration_bounds = array<i64: 2>, scalar_prefetch = 0 : i64, scratch_operands = 0 : i64, tpu.core_type = #tpu.core_type<tc>, window_params = [{transform_indices = @transform_0, window_bounds = array<i64: 1, 8, 32>}, {transform_indices = @transform_1, window_bounds = array<i64: 1, 128, 32>}, {transform_indices = @transform_2, window_bounds = array<i64: 1, 1, 8>}, {transform_indices = @transform_3, window_bounds = array<i64: 1, 1, 128>}, {transform_indices = @transform_4, window_bounds = array<i64: 1, 8, 1>}, {pipeline_mode = #tpu.pipeline_mode<synchronous>, transform_indices = @transform_5, window_bounds = array<i64: 1, 1>}, {pipeline_mode = #tpu.pipeline_mode<synchronous>, transform_indices = @transform_6, window_bounds = array<i64: 32, 1>}, {pipeline_mode = #tpu.pipeline_mode<synchronous>, transform_indices = @transform_7, window_bounds = array<i64: 32, 1>}, {pipeline_mode = #tpu.pipeline_mode<synchronous>, transform_indices = @transform_8, window_bounds = array<i64: 1, 64>}, {pipeline_mode = #tpu.pipeline_mode<synchronous>, transform_indices = @transform_9, window_bounds = array<i64: 1, 32>}, {pipeline_mode = #tpu.pipeline_mode<synchronous>, transform_indices = @transform_10, window_bounds = array<i64: 1, 32>}, {pipeline_mode = #tpu.pipeline_mode<synchronous>, transform_indices = @transform_11, window_bounds = array<i64: 32, 64>}, {pipeline_mode = #tpu.pipeline_mode<synchronous>, transform_indices = @transform_12, window_bounds = array<i64: 32, 32>}, {pipeline_mode = #tpu.pipeline_mode<synchronous>, transform_indices = @transform_13, window_bounds = array<i64: 32, 32>}, {pipeline_mode = #tpu.pipeline_mode<synchronous>, transform_indices = @transform_14, window_bounds = array<i64: 1, 64>}, {pipeline_mode = #tpu.pipeline_mode<synchronous>, transform_indices = @transform_15, window_bounds = array<i64: 1, 32>}, {pipeline_mode = #tpu.pipeline_mode<synchronous>, transform_indices = @transform_16, window_bounds = array<i64: 32, 64>}, {pipeline_mode = #tpu.pipeline_mode<synchronous>, transform_indices = @transform_17, window_bounds = array<i64: 64, 32>}, {pipeline_mode = #tpu.pipeline_mode<synchronous>, transform_indices = @transform_18, window_bounds = array<i64: 1, 32>}, {pipeline_mode = #tpu.pipeline_mode<synchronous>, transform_indices = @transform_19, window_bounds = array<i64: 1, 32>}, {pipeline_mode = #tpu.pipeline_mode<synchronous>, transform_indices = @transform_20, window_bounds = array<i64: 1, 32>}, {pipeline_mode = #tpu.pipeline_mode<synchronous>, transform_indices = @transform_21, window_bounds = array<i64: 1, 32>}, {pipeline_mode = #tpu.pipeline_mode<synchronous>, transform_indices = @transform_22, window_bounds = array<i64: 1, 64>}, {pipeline_mode = #tpu.pipeline_mode<synchronous>, transform_indices = @transform_23, window_bounds = array<i64: 1, 32>}, {pipeline_mode = #tpu.pipeline_mode<synchronous>, transform_indices = @transform_24, window_bounds = array<i64: 1, 32>}, {pipeline_mode = #tpu.pipeline_mode<synchronous>, transform_indices = @transform_25, window_bounds = array<i64: 32, 64>}, {pipeline_mode = #tpu.pipeline_mode<synchronous>, transform_indices = @transform_26, window_bounds = array<i64: 32, 32>}, {pipeline_mode = #tpu.pipeline_mode<synchronous>, transform_indices = @transform_27, window_bounds = array<i64: 32, 32>}, {pipeline_mode = #tpu.pipeline_mode<synchronous>, transform_indices = @transform_28, window_bounds = array<i64: 1, 64>}, {pipeline_mode = #tpu.pipeline_mode<synchronous>, transform_indices = @transform_29, window_bounds = array<i64: 1, 32>}, {pipeline_mode = #tpu.pipeline_mode<synchronous>, transform_indices = @transform_30, window_bounds = array<i64: 32, 64>}, {pipeline_mode = #tpu.pipeline_mode<synchronous>, transform_indices = @transform_31, window_bounds = array<i64: 64, 32>}, {pipeline_mode = #tpu.pipeline_mode<synchronous>, transform_indices = @transform_32, window_bounds = array<i64: 1, 32>}, {pipeline_mode = #tpu.pipeline_mode<synchronous>, transform_indices = @transform_33, window_bounds = array<i64: 1, 32>}, {pipeline_mode = #tpu.pipeline_mode<synchronous>, transform_indices = @transform_34, window_bounds = array<i64: 1, 32>}, {pipeline_mode = #tpu.pipeline_mode<synchronous>, transform_indices = @transform_35, window_bounds = array<i64: 1, 32>}, {pipeline_mode = #tpu.pipeline_mode<synchronous>, transform_indices = @transform_36, window_bounds = array<i64: 1, 32>}, {pipeline_mode = #tpu.pipeline_mode<synchronous>, transform_indices = @transform_37, window_bounds = array<i64: 1, 32>}, {pipeline_mode = #tpu.pipeline_mode<synchronous>, transform_indices = @transform_38, window_bounds = array<i64: 1, 1>}, {pipeline_mode = #tpu.pipeline_mode<synchronous>, transform_indices = @transform_39, window_bounds = array<i64: 32, 32>}, {transform_indices = @transform_40, window_bounds = array<i64: 1, 1, 1>}, {transform_indices = @transform_41, window_bounds = array<i64: 1, 8, 128>}]} {
    %c0 = arith.constant 0 : index
    %c0_0 = arith.constant 0 : index
    %c0_1 = arith.constant 0 : index
    %0 = vector.load %arg1[%c0, %c0_0, %c0_1] : memref<1x8x32xf32, #tpu.memory_space<vmem>>, vector<1x8x32xf32>
    %1 = vector.shape_cast %0 : vector<1x8x32xf32> to vector<8x32xf32>
    %c0_2 = arith.constant 0 : index
    %c0_3 = arith.constant 0 : index
    %c0_4 = arith.constant 0 : index
    %2 = vector.load %arg2[%c0_2, %c0_3, %c0_4] : memref<1x128x32xf32, #tpu.memory_space<vmem>>, vector<1x128x32xf32>
    %3 = vector.shape_cast %2 : vector<1x128x32xf32> to vector<128x32xf32>
    %c0_5 = arith.constant 0 : index
    %c0_6 = arith.constant 0 : index
    %c0_7 = arith.constant 0 : index
    %4 = vector.load %arg3[%c0_5, %c0_6, %c0_7] : memref<1x1x8xf32, #tpu.memory_space<vmem>>, vector<1x1x8xf32>
    %5 = vector.shape_cast %4 : vector<1x1x8xf32> to vector<1x8xf32>
    %c0_8 = arith.constant 0 : index
    %c0_9 = arith.constant 0 : index
    %c0_10 = arith.constant 0 : index
    %6 = vector.load %arg4[%c0_8, %c0_9, %c0_10] : memref<1x1x128xf32, #tpu.memory_space<vmem>>, vector<1x1x128xf32>
    %7 = vector.shape_cast %6 : vector<1x1x128xf32> to vector<1x128xf32>
    %c0_11 = arith.constant 0 : index
    %c0_12 = arith.constant 0 : index
    %c0_13 = arith.constant 0 : index
    %8 = vector.load %arg5[%c0_11, %c0_12, %c0_13] : memref<1x8x1xf32, #tpu.memory_space<vmem>>, vector<1x8x1xf32>
    %9 = vector.shape_cast %8 : vector<1x8x1xf32> to vector<8x1xf32>
    %c0_14 = arith.constant 0 : index
    %c0_15 = arith.constant 0 : index
    %10 = vector.load %arg28[%c0_14, %c0_15] : memref<32x32xf32, #tpu.memory_space<vmem>>, vector<32x32xf32>
    %cst = arith.constant dense<0.000000e+00> : vector<8x32xf32>
    %11 = tpu.matmul %1, %10, %cst {dimension_numbers = #tpu.dot_dimension_numbers<[1], [0], [0], [1], [0, 0, 1, 1], [], []>} : vector<8x32xf32>, vector<32x32xf32>, vector<8x32xf32> -> vector<8x32xf32>
    %c0_16 = arith.constant 0 : index
    %c0_17 = arith.constant 0 : index
    %12 = vector.load %arg25[%c0_16, %c0_17] : memref<1x32xf32, #tpu.memory_space<vmem>>, vector<1x32xf32>
    %13 = vector.broadcast %12 : vector<1x32xf32> to vector<8x32xf32>
    %14 = arith.addf %11, %13 : vector<8x32xf32>
    %c0_18 = arith.constant 0 : index
    %c0_19 = arith.constant 0 : index
    %15 = vector.load %arg26[%c0_18, %c0_19] : memref<32x64xf32, #tpu.memory_space<vmem>>, vector<32x64xf32>
    %cst_20 = arith.constant dense<0.000000e+00> : vector<128x64xf32>
    %16 = tpu.matmul %3, %15, %cst_20 {dimension_numbers = #tpu.dot_dimension_numbers<[1], [0], [0], [1], [0, 0, 1, 1], [], []>} : vector<128x32xf32>, vector<32x64xf32>, vector<128x64xf32> -> vector<128x64xf32>
    %c0_21 = arith.constant 0 : index
    %c0_22 = arith.constant 0 : index
    %17 = vector.load %arg23[%c0_21, %c0_22] : memref<1x64xf32, #tpu.memory_space<vmem>>, vector<1x64xf32>
    %18 = vector.broadcast %17 : vector<1x64xf32> to vector<128x64xf32>
    %19 = arith.addf %16, %18 : vector<128x64xf32>
    %20 = vector.extract_strided_slice %19 {offsets = [0, 0], sizes = [128, 32], strides = [1, 1]} : vector<128x64xf32> to vector<128x32xf32>
    %21 = vector.extract_strided_slice %19 {offsets = [0, 32], sizes = [128, 32], strides = [1, 1]} : vector<128x64xf32> to vector<128x32xf32>
    %c0_23 = arith.constant 0 : index
    %c0_24 = arith.constant 0 : index
    %22 = vector.load %arg27[%c0_23, %c0_24] : memref<32x32xf32, #tpu.memory_space<vmem>>, vector<32x32xf32>
    %cst_25 = arith.constant 0.000000e+00 : f32
    %23 = vector.broadcast %cst_25 : f32 to vector<8x32xf32>
    %24 = vector.extract_strided_slice %14 {offsets = [0, 0], sizes = [8, 16], strides = [1, 1]} : vector<8x32xf32> to vector<8x16xf32>
    %25 = vector.extract_strided_slice %20 {offsets = [0, 0], sizes = [128, 16], strides = [1, 1]} : vector<128x32xf32> to vector<128x16xf32>
    %26 = vector.extract_strided_slice %21 {offsets = [0, 0], sizes = [128, 16], strides = [1, 1]} : vector<128x32xf32> to vector<128x16xf32>
    %27 = tpu.transpose %25, [1, 0] : vector<128x16xf32> -> vector<16x128xf32>
    %cst_26 = arith.constant dense<0.000000e+00> : vector<8x128xf32>
    %28 = tpu.matmul %24, %27, %cst_26 {dimension_numbers = #tpu.dot_dimension_numbers<[1], [0], [0], [1], [0, 0, 1, 1], [], []>} : vector<8x16xf32>, vector<16x128xf32>, vector<8x128xf32> -> vector<8x128xf32>
    %cst_27 = arith.constant 2.500000e-01 : f32
    %29 = vector.broadcast %cst_27 : f32 to vector<8x128xf32>
    %30 = arith.mulf %28, %29 : vector<8x128xf32>
    %cst_28 = arith.constant 5.000000e-01 : f32
    %31 = vector.broadcast %cst_28 : f32 to vector<1x128xf32>
    %32 = arith.cmpf ogt, %7, %31 : vector<1x128xf32>
    %cst_29 = arith.constant -1.000000e+30 : f32
    %33 = vector.shape_cast %32 : vector<1x128xi1> to vector<1x128xi1>
    %34 = vector.broadcast %33 : vector<1x128xi1> to vector<8x128xi1>
    %35 = vector.broadcast %cst_29 : f32 to vector<8x128xf32>
    %36 = arith.select %34, %35, %30 : vector<8x128xi1>, vector<8x128xf32>
    %cst_30 = arith.constant dense<0xFF800000> : vector<8xf32>
    %37 = vector.multi_reduction <maximumf>, %36, %cst_30 [1] : vector<8x128xf32> to vector<8xf32>
    %38 = vector.shape_cast %37 : vector<8xf32> to vector<8x1xf32>
    %39 = vector.broadcast %38 : vector<8x1xf32> to vector<8x128xf32>
    %40 = arith.subf %36, %39 : vector<8x128xf32>
    %41 = math.exp %40 : vector<8x128xf32>
    %cst_31 = arith.constant dense<0.000000e+00> : vector<8xf32>
    %42 = vector.multi_reduction <add>, %41, %cst_31 [1] : vector<8x128xf32> to vector<8xf32>
    %43 = vector.shape_cast %42 : vector<8xf32> to vector<8x1xf32>
    %44 = tpu.reciprocal %43 {approx = true} : vector<8x1xf32> -> vector<8x1xf32>
    %45 = vector.broadcast %44 : vector<8x1xf32> to vector<8x128xf32>
    %46 = arith.mulf %41, %45 : vector<8x128xf32>
    %cst_32 = arith.constant dense<0.000000e+00> : vector<8x16xf32>
    %47 = tpu.matmul %46, %26, %cst_32 {dimension_numbers = #tpu.dot_dimension_numbers<[1], [0], [0], [1], [0, 0, 1, 1], [], []>} : vector<8x128xf32>, vector<128x16xf32>, vector<8x16xf32> -> vector<8x16xf32>
    %48 = vector.extract_strided_slice %22 {offsets = [0, 0], sizes = [16, 32], strides = [1, 1]} : vector<32x32xf32> to vector<16x32xf32>
    %cst_33 = arith.constant dense<0.000000e+00> : vector<8x32xf32>
    %49 = tpu.matmul %47, %48, %cst_33 {dimension_numbers = #tpu.dot_dimension_numbers<[1], [0], [0], [1], [0, 0, 1, 1], [], []>} : vector<8x16xf32>, vector<16x32xf32>, vector<8x32xf32> -> vector<8x32xf32>
    %50 = arith.addf %23, %49 : vector<8x32xf32>
    %51 = vector.extract_strided_slice %14 {offsets = [0, 16], sizes = [8, 16], strides = [1, 1]} : vector<8x32xf32> to vector<8x16xf32>
    %52 = vector.extract_strided_slice %20 {offsets = [0, 16], sizes = [128, 16], strides = [1, 1]} : vector<128x32xf32> to vector<128x16xf32>
    %53 = vector.extract_strided_slice %21 {offsets = [0, 16], sizes = [128, 16], strides = [1, 1]} : vector<128x32xf32> to vector<128x16xf32>
    %54 = tpu.transpose %52, [1, 0] : vector<128x16xf32> -> vector<16x128xf32>
    %cst_34 = arith.constant dense<0.000000e+00> : vector<8x128xf32>
    %55 = tpu.matmul %51, %54, %cst_34 {dimension_numbers = #tpu.dot_dimension_numbers<[1], [0], [0], [1], [0, 0, 1, 1], [], []>} : vector<8x16xf32>, vector<16x128xf32>, vector<8x128xf32> -> vector<8x128xf32>
    %cst_35 = arith.constant 2.500000e-01 : f32
    %56 = vector.broadcast %cst_35 : f32 to vector<8x128xf32>
    %57 = arith.mulf %55, %56 : vector<8x128xf32>
    %cst_36 = arith.constant 5.000000e-01 : f32
    %58 = vector.broadcast %cst_36 : f32 to vector<1x128xf32>
    %59 = arith.cmpf ogt, %7, %58 : vector<1x128xf32>
    %cst_37 = arith.constant -1.000000e+30 : f32
    %60 = vector.shape_cast %59 : vector<1x128xi1> to vector<1x128xi1>
    %61 = vector.broadcast %60 : vector<1x128xi1> to vector<8x128xi1>
    %62 = vector.broadcast %cst_37 : f32 to vector<8x128xf32>
    %63 = arith.select %61, %62, %57 : vector<8x128xi1>, vector<8x128xf32>
    %cst_38 = arith.constant dense<0xFF800000> : vector<8xf32>
    %64 = vector.multi_reduction <maximumf>, %63, %cst_38 [1] : vector<8x128xf32> to vector<8xf32>
    %65 = vector.shape_cast %64 : vector<8xf32> to vector<8x1xf32>
    %66 = vector.broadcast %65 : vector<8x1xf32> to vector<8x128xf32>
    %67 = arith.subf %63, %66 : vector<8x128xf32>
    %68 = math.exp %67 : vector<8x128xf32>
    %cst_39 = arith.constant dense<0.000000e+00> : vector<8xf32>
    %69 = vector.multi_reduction <add>, %68, %cst_39 [1] : vector<8x128xf32> to vector<8xf32>
    %70 = vector.shape_cast %69 : vector<8xf32> to vector<8x1xf32>
    %71 = tpu.reciprocal %70 {approx = true} : vector<8x1xf32> -> vector<8x1xf32>
    %72 = vector.broadcast %71 : vector<8x1xf32> to vector<8x128xf32>
    %73 = arith.mulf %68, %72 : vector<8x128xf32>
    %cst_40 = arith.constant dense<0.000000e+00> : vector<8x16xf32>
    %74 = tpu.matmul %73, %53, %cst_40 {dimension_numbers = #tpu.dot_dimension_numbers<[1], [0], [0], [1], [0, 0, 1, 1], [], []>} : vector<8x128xf32>, vector<128x16xf32>, vector<8x16xf32> -> vector<8x16xf32>
    %75 = vector.extract_strided_slice %22 {offsets = [16, 0], sizes = [16, 32], strides = [1, 1]} : vector<32x32xf32> to vector<16x32xf32>
    %cst_41 = arith.constant dense<0.000000e+00> : vector<8x32xf32>
    %76 = tpu.matmul %74, %75, %cst_41 {dimension_numbers = #tpu.dot_dimension_numbers<[1], [0], [0], [1], [0, 0, 1, 1], [], []>} : vector<8x16xf32>, vector<16x32xf32>, vector<8x32xf32> -> vector<8x32xf32>
    %77 = arith.addf %50, %76 : vector<8x32xf32>
    %c0_42 = arith.constant 0 : index
    %c0_43 = arith.constant 0 : index
    %78 = vector.load %arg24[%c0_42, %c0_43] : memref<1x32xf32, #tpu.memory_space<vmem>>, vector<1x32xf32>
    %79 = vector.broadcast %78 : vector<1x32xf32> to vector<8x32xf32>
    %80 = arith.addf %77, %79 : vector<8x32xf32>
    %81 = arith.addf %1, %80 : vector<8x32xf32>
    %c0_44 = arith.constant 0 : index
    %c0_45 = arith.constant 0 : index
    %82 = vector.load %arg34[%c0_44, %c0_45] : memref<1x32xf32, #tpu.memory_space<vmem>>, vector<1x32xf32>
    %c0_46 = arith.constant 0 : index
    %c0_47 = arith.constant 0 : index
    %83 = vector.load %arg33[%c0_46, %c0_47] : memref<1x32xf32, #tpu.memory_space<vmem>>, vector<1x32xf32>
    %cst_48 = arith.constant dense<0.000000e+00> : vector<8xf32>
    %84 = vector.multi_reduction <add>, %81, %cst_48 [1] : vector<8x32xf32> to vector<8xf32>
    %85 = vector.shape_cast %84 : vector<8xf32> to vector<8x1xf32>
    %cst_49 = arith.constant 3.200000e+01 : f32
    %86 = vector.broadcast %cst_49 : f32 to vector<8x1xf32>
    %87 = arith.divf %85, %86 : vector<8x1xf32>
    %88 = vector.broadcast %87 : vector<8x1xf32> to vector<8x32xf32>
    %89 = arith.subf %81, %88 : vector<8x32xf32>
    %90 = arith.mulf %89, %89 : vector<8x32xf32>
    %cst_50 = arith.constant dense<0.000000e+00> : vector<8xf32>
    %91 = vector.multi_reduction <add>, %90, %cst_50 [1] : vector<8x32xf32> to vector<8xf32>
    %92 = vector.shape_cast %91 : vector<8xf32> to vector<8x1xf32>
    %cst_51 = arith.constant 3.200000e+01 : f32
    %93 = vector.broadcast %cst_51 : f32 to vector<8x1xf32>
    %94 = arith.divf %92, %93 : vector<8x1xf32>
    %cst_52 = arith.constant 9.99999974E-6 : f32
    %95 = vector.broadcast %cst_52 : f32 to vector<8x1xf32>
    %96 = arith.addf %94, %95 : vector<8x1xf32>
    %97 = math.rsqrt %96 : vector<8x1xf32>
    %98 = vector.broadcast %97 : vector<8x1xf32> to vector<8x32xf32>
    %99 = arith.mulf %89, %98 : vector<8x32xf32>
    %100 = vector.broadcast %82 : vector<1x32xf32> to vector<8x32xf32>
    %101 = arith.mulf %99, %100 : vector<8x32xf32>
    %102 = vector.broadcast %83 : vector<1x32xf32> to vector<8x32xf32>
    %103 = arith.addf %101, %102 : vector<8x32xf32>
    %c0_53 = arith.constant 0 : index
    %c0_54 = arith.constant 0 : index
    %104 = vector.load %arg31[%c0_53, %c0_54] : memref<32x64xf32, #tpu.memory_space<vmem>>, vector<32x64xf32>
    %cst_55 = arith.constant dense<0.000000e+00> : vector<8x64xf32>
    %105 = tpu.matmul %103, %104, %cst_55 {dimension_numbers = #tpu.dot_dimension_numbers<[1], [0], [0], [1], [0, 0, 1, 1], [], []>} : vector<8x32xf32>, vector<32x64xf32>, vector<8x64xf32> -> vector<8x64xf32>
    %c0_56 = arith.constant 0 : index
    %c0_57 = arith.constant 0 : index
    %106 = vector.load %arg29[%c0_56, %c0_57] : memref<1x64xf32, #tpu.memory_space<vmem>>, vector<1x64xf32>
    %107 = vector.broadcast %106 : vector<1x64xf32> to vector<8x64xf32>
    %108 = arith.addf %105, %107 : vector<8x64xf32>
    %cst_58 = arith.constant 0.000000e+00 : f32
    %109 = vector.broadcast %cst_58 : f32 to vector<8x64xf32>
    %110 = arith.maximumf %108, %109 : vector<8x64xf32>
    %c0_59 = arith.constant 0 : index
    %c0_60 = arith.constant 0 : index
    %111 = vector.load %arg32[%c0_59, %c0_60] : memref<64x32xf32, #tpu.memory_space<vmem>>, vector<64x32xf32>
    %cst_61 = arith.constant dense<0.000000e+00> : vector<8x32xf32>
    %112 = tpu.matmul %110, %111, %cst_61 {dimension_numbers = #tpu.dot_dimension_numbers<[1], [0], [0], [1], [0, 0, 1, 1], [], []>} : vector<8x64xf32>, vector<64x32xf32>, vector<8x32xf32> -> vector<8x32xf32>
    %c0_62 = arith.constant 0 : index
    %c0_63 = arith.constant 0 : index
    %113 = vector.load %arg30[%c0_62, %c0_63] : memref<1x32xf32, #tpu.memory_space<vmem>>, vector<1x32xf32>
    %114 = vector.broadcast %113 : vector<1x32xf32> to vector<8x32xf32>
    %115 = arith.addf %112, %114 : vector<8x32xf32>
    %116 = arith.addf %103, %115 : vector<8x32xf32>
    %c0_64 = arith.constant 0 : index
    %c0_65 = arith.constant 0 : index
    %117 = vector.load %arg36[%c0_64, %c0_65] : memref<1x32xf32, #tpu.memory_space<vmem>>, vector<1x32xf32>
    %c0_66 = arith.constant 0 : index
    %c0_67 = arith.constant 0 : index
    %118 = vector.load %arg35[%c0_66, %c0_67] : memref<1x32xf32, #tpu.memory_space<vmem>>, vector<1x32xf32>
    %cst_68 = arith.constant dense<0.000000e+00> : vector<8xf32>
    %119 = vector.multi_reduction <add>, %116, %cst_68 [1] : vector<8x32xf32> to vector<8xf32>
    %120 = vector.shape_cast %119 : vector<8xf32> to vector<8x1xf32>
    %cst_69 = arith.constant 3.200000e+01 : f32
    %121 = vector.broadcast %cst_69 : f32 to vector<8x1xf32>
    %122 = arith.divf %120, %121 : vector<8x1xf32>
    %123 = vector.broadcast %122 : vector<8x1xf32> to vector<8x32xf32>
    %124 = arith.subf %116, %123 : vector<8x32xf32>
    %125 = arith.mulf %124, %124 : vector<8x32xf32>
    %cst_70 = arith.constant dense<0.000000e+00> : vector<8xf32>
    %126 = vector.multi_reduction <add>, %125, %cst_70 [1] : vector<8x32xf32> to vector<8xf32>
    %127 = vector.shape_cast %126 : vector<8xf32> to vector<8x1xf32>
    %cst_71 = arith.constant 3.200000e+01 : f32
    %128 = vector.broadcast %cst_71 : f32 to vector<8x1xf32>
    %129 = arith.divf %127, %128 : vector<8x1xf32>
    %cst_72 = arith.constant 9.99999974E-6 : f32
    %130 = vector.broadcast %cst_72 : f32 to vector<8x1xf32>
    %131 = arith.addf %129, %130 : vector<8x1xf32>
    %132 = math.rsqrt %131 : vector<8x1xf32>
    %133 = vector.broadcast %132 : vector<8x1xf32> to vector<8x32xf32>
    %134 = arith.mulf %124, %133 : vector<8x32xf32>
    %135 = vector.broadcast %117 : vector<1x32xf32> to vector<8x32xf32>
    %136 = arith.mulf %134, %135 : vector<8x32xf32>
    %137 = vector.broadcast %118 : vector<1x32xf32> to vector<8x32xf32>
    %138 = arith.addf %136, %137 : vector<8x32xf32>
    %c0_73 = arith.constant 0 : index
    %c0_74 = arith.constant 0 : index
    %139 = vector.load %arg14[%c0_73, %c0_74] : memref<32x32xf32, #tpu.memory_space<vmem>>, vector<32x32xf32>
    %cst_75 = arith.constant dense<0.000000e+00> : vector<128x32xf32>
    %140 = tpu.matmul %3, %139, %cst_75 {dimension_numbers = #tpu.dot_dimension_numbers<[1], [0], [0], [1], [0, 0, 1, 1], [], []>} : vector<128x32xf32>, vector<32x32xf32>, vector<128x32xf32> -> vector<128x32xf32>
    %c0_76 = arith.constant 0 : index
    %c0_77 = arith.constant 0 : index
    %141 = vector.load %arg11[%c0_76, %c0_77] : memref<1x32xf32, #tpu.memory_space<vmem>>, vector<1x32xf32>
    %142 = vector.broadcast %141 : vector<1x32xf32> to vector<128x32xf32>
    %143 = arith.addf %140, %142 : vector<128x32xf32>
    %c0_78 = arith.constant 0 : index
    %c0_79 = arith.constant 0 : index
    %144 = vector.load %arg12[%c0_78, %c0_79] : memref<32x64xf32, #tpu.memory_space<vmem>>, vector<32x64xf32>
    %cst_80 = arith.constant dense<0.000000e+00> : vector<8x64xf32>
    %145 = tpu.matmul %138, %144, %cst_80 {dimension_numbers = #tpu.dot_dimension_numbers<[1], [0], [0], [1], [0, 0, 1, 1], [], []>} : vector<8x32xf32>, vector<32x64xf32>, vector<8x64xf32> -> vector<8x64xf32>
    %c0_81 = arith.constant 0 : index
    %c0_82 = arith.constant 0 : index
    %146 = vector.load %arg9[%c0_81, %c0_82] : memref<1x64xf32, #tpu.memory_space<vmem>>, vector<1x64xf32>
    %147 = vector.broadcast %146 : vector<1x64xf32> to vector<8x64xf32>
    %148 = arith.addf %145, %147 : vector<8x64xf32>
    %149 = vector.extract_strided_slice %148 {offsets = [0, 0], sizes = [8, 32], strides = [1, 1]} : vector<8x64xf32> to vector<8x32xf32>
    %150 = vector.extract_strided_slice %148 {offsets = [0, 32], sizes = [8, 32], strides = [1, 1]} : vector<8x64xf32> to vector<8x32xf32>
    %c0_83 = arith.constant 0 : index
    %c0_84 = arith.constant 0 : index
    %151 = vector.load %arg13[%c0_83, %c0_84] : memref<32x32xf32, #tpu.memory_space<vmem>>, vector<32x32xf32>
    %cst_85 = arith.constant 0.000000e+00 : f32
    %152 = vector.broadcast %cst_85 : f32 to vector<128x32xf32>
    %153 = vector.extract_strided_slice %143 {offsets = [0, 0], sizes = [128, 16], strides = [1, 1]} : vector<128x32xf32> to vector<128x16xf32>
    %154 = vector.extract_strided_slice %149 {offsets = [0, 0], sizes = [8, 16], strides = [1, 1]} : vector<8x32xf32> to vector<8x16xf32>
    %155 = vector.extract_strided_slice %150 {offsets = [0, 0], sizes = [8, 16], strides = [1, 1]} : vector<8x32xf32> to vector<8x16xf32>
    %156 = tpu.transpose %154, [1, 0] : vector<8x16xf32> -> vector<16x8xf32>
    %cst_86 = arith.constant dense<0.000000e+00> : vector<128x8xf32>
    %157 = tpu.matmul %153, %156, %cst_86 {dimension_numbers = #tpu.dot_dimension_numbers<[1], [0], [0], [1], [0, 0, 1, 1], [], []>} : vector<128x16xf32>, vector<16x8xf32>, vector<128x8xf32> -> vector<128x8xf32>
    %cst_87 = arith.constant 2.500000e-01 : f32
    %158 = vector.broadcast %cst_87 : f32 to vector<128x8xf32>
    %159 = arith.mulf %157, %158 : vector<128x8xf32>
    %cst_88 = arith.constant 5.000000e-01 : f32
    %160 = vector.broadcast %cst_88 : f32 to vector<1x8xf32>
    %161 = arith.cmpf ogt, %5, %160 : vector<1x8xf32>
    %cst_89 = arith.constant -1.000000e+30 : f32
    %162 = vector.shape_cast %161 : vector<1x8xi1> to vector<1x8xi1>
    %163 = vector.broadcast %162 : vector<1x8xi1> to vector<128x8xi1>
    %164 = vector.broadcast %cst_89 : f32 to vector<128x8xf32>
    %165 = arith.select %163, %164, %159 : vector<128x8xi1>, vector<128x8xf32>
    %cst_90 = arith.constant dense<0xFF800000> : vector<128xf32>
    %166 = vector.multi_reduction <maximumf>, %165, %cst_90 [1] : vector<128x8xf32> to vector<128xf32>
    %167 = vector.shape_cast %166 : vector<128xf32> to vector<128x1xf32>
    %168 = vector.broadcast %167 : vector<128x1xf32> to vector<128x8xf32>
    %169 = arith.subf %165, %168 : vector<128x8xf32>
    %170 = math.exp %169 : vector<128x8xf32>
    %cst_91 = arith.constant dense<0.000000e+00> : vector<128xf32>
    %171 = vector.multi_reduction <add>, %170, %cst_91 [1] : vector<128x8xf32> to vector<128xf32>
    %172 = vector.shape_cast %171 : vector<128xf32> to vector<128x1xf32>
    %173 = tpu.reciprocal %172 {approx = true} : vector<128x1xf32> -> vector<128x1xf32>
    %174 = vector.broadcast %173 : vector<128x1xf32> to vector<128x8xf32>
    %175 = arith.mulf %170, %174 : vector<128x8xf32>
    %cst_92 = arith.constant dense<0.000000e+00> : vector<128x16xf32>
    %176 = tpu.matmul %175, %155, %cst_92 {dimension_numbers = #tpu.dot_dimension_numbers<[1], [0], [0], [1], [0, 0, 1, 1], [], []>} : vector<128x8xf32>, vector<8x16xf32>, vector<128x16xf32> -> vector<128x16xf32>
    %177 = vector.extract_strided_slice %151 {offsets = [0, 0], sizes = [16, 32], strides = [1, 1]} : vector<32x32xf32> to vector<16x32xf32>
    %cst_93 = arith.constant dense<0.000000e+00> : vector<128x32xf32>
    %178 = tpu.matmul %176, %177, %cst_93 {dimension_numbers = #tpu.dot_dimension_numbers<[1], [0], [0], [1], [0, 0, 1, 1], [], []>} : vector<128x16xf32>, vector<16x32xf32>, vector<128x32xf32> -> vector<128x32xf32>
    %179 = arith.addf %152, %178 : vector<128x32xf32>
    %180 = vector.extract_strided_slice %143 {offsets = [0, 16], sizes = [128, 16], strides = [1, 1]} : vector<128x32xf32> to vector<128x16xf32>
    %181 = vector.extract_strided_slice %149 {offsets = [0, 16], sizes = [8, 16], strides = [1, 1]} : vector<8x32xf32> to vector<8x16xf32>
    %182 = vector.extract_strided_slice %150 {offsets = [0, 16], sizes = [8, 16], strides = [1, 1]} : vector<8x32xf32> to vector<8x16xf32>
    %183 = tpu.transpose %181, [1, 0] : vector<8x16xf32> -> vector<16x8xf32>
    %cst_94 = arith.constant dense<0.000000e+00> : vector<128x8xf32>
    %184 = tpu.matmul %180, %183, %cst_94 {dimension_numbers = #tpu.dot_dimension_numbers<[1], [0], [0], [1], [0, 0, 1, 1], [], []>} : vector<128x16xf32>, vector<16x8xf32>, vector<128x8xf32> -> vector<128x8xf32>
    %cst_95 = arith.constant 2.500000e-01 : f32
    %185 = vector.broadcast %cst_95 : f32 to vector<128x8xf32>
    %186 = arith.mulf %184, %185 : vector<128x8xf32>
    %cst_96 = arith.constant 5.000000e-01 : f32
    %187 = vector.broadcast %cst_96 : f32 to vector<1x8xf32>
    %188 = arith.cmpf ogt, %5, %187 : vector<1x8xf32>
    %cst_97 = arith.constant -1.000000e+30 : f32
    %189 = vector.shape_cast %188 : vector<1x8xi1> to vector<1x8xi1>
    %190 = vector.broadcast %189 : vector<1x8xi1> to vector<128x8xi1>
    %191 = vector.broadcast %cst_97 : f32 to vector<128x8xf32>
    %192 = arith.select %190, %191, %186 : vector<128x8xi1>, vector<128x8xf32>
    %cst_98 = arith.constant dense<0xFF800000> : vector<128xf32>
    %193 = vector.multi_reduction <maximumf>, %192, %cst_98 [1] : vector<128x8xf32> to vector<128xf32>
    %194 = vector.shape_cast %193 : vector<128xf32> to vector<128x1xf32>
    %195 = vector.broadcast %194 : vector<128x1xf32> to vector<128x8xf32>
    %196 = arith.subf %192, %195 : vector<128x8xf32>
    %197 = math.exp %196 : vector<128x8xf32>
    %cst_99 = arith.constant dense<0.000000e+00> : vector<128xf32>
    %198 = vector.multi_reduction <add>, %197, %cst_99 [1] : vector<128x8xf32> to vector<128xf32>
    %199 = vector.shape_cast %198 : vector<128xf32> to vector<128x1xf32>
    %200 = tpu.reciprocal %199 {approx = true} : vector<128x1xf32> -> vector<128x1xf32>
    %201 = vector.broadcast %200 : vector<128x1xf32> to vector<128x8xf32>
    %202 = arith.mulf %197, %201 : vector<128x8xf32>
    %cst_100 = arith.constant dense<0.000000e+00> : vector<128x16xf32>
    %203 = tpu.matmul %202, %182, %cst_100 {dimension_numbers = #tpu.dot_dimension_numbers<[1], [0], [0], [1], [0, 0, 1, 1], [], []>} : vector<128x8xf32>, vector<8x16xf32>, vector<128x16xf32> -> vector<128x16xf32>
    %204 = vector.extract_strided_slice %151 {offsets = [16, 0], sizes = [16, 32], strides = [1, 1]} : vector<32x32xf32> to vector<16x32xf32>
    %cst_101 = arith.constant dense<0.000000e+00> : vector<128x32xf32>
    %205 = tpu.matmul %203, %204, %cst_101 {dimension_numbers = #tpu.dot_dimension_numbers<[1], [0], [0], [1], [0, 0, 1, 1], [], []>} : vector<128x16xf32>, vector<16x32xf32>, vector<128x32xf32> -> vector<128x32xf32>
    %206 = arith.addf %179, %205 : vector<128x32xf32>
    %c0_102 = arith.constant 0 : index
    %c0_103 = arith.constant 0 : index
    %207 = vector.load %arg10[%c0_102, %c0_103] : memref<1x32xf32, #tpu.memory_space<vmem>>, vector<1x32xf32>
    %208 = vector.broadcast %207 : vector<1x32xf32> to vector<128x32xf32>
    %209 = arith.addf %206, %208 : vector<128x32xf32>
    %210 = arith.addf %3, %209 : vector<128x32xf32>
    %c0_104 = arith.constant 0 : index
    %c0_105 = arith.constant 0 : index
    %211 = vector.load %arg20[%c0_104, %c0_105] : memref<1x32xf32, #tpu.memory_space<vmem>>, vector<1x32xf32>
    %c0_106 = arith.constant 0 : index
    %c0_107 = arith.constant 0 : index
    %212 = vector.load %arg19[%c0_106, %c0_107] : memref<1x32xf32, #tpu.memory_space<vmem>>, vector<1x32xf32>
    %cst_108 = arith.constant dense<0.000000e+00> : vector<128xf32>
    %213 = vector.multi_reduction <add>, %210, %cst_108 [1] : vector<128x32xf32> to vector<128xf32>
    %214 = vector.shape_cast %213 : vector<128xf32> to vector<128x1xf32>
    %cst_109 = arith.constant 3.200000e+01 : f32
    %215 = vector.broadcast %cst_109 : f32 to vector<128x1xf32>
    %216 = arith.divf %214, %215 : vector<128x1xf32>
    %217 = vector.broadcast %216 : vector<128x1xf32> to vector<128x32xf32>
    %218 = arith.subf %210, %217 : vector<128x32xf32>
    %219 = arith.mulf %218, %218 : vector<128x32xf32>
    %cst_110 = arith.constant dense<0.000000e+00> : vector<128xf32>
    %220 = vector.multi_reduction <add>, %219, %cst_110 [1] : vector<128x32xf32> to vector<128xf32>
    %221 = vector.shape_cast %220 : vector<128xf32> to vector<128x1xf32>
    %cst_111 = arith.constant 3.200000e+01 : f32
    %222 = vector.broadcast %cst_111 : f32 to vector<128x1xf32>
    %223 = arith.divf %221, %222 : vector<128x1xf32>
    %cst_112 = arith.constant 9.99999974E-6 : f32
    %224 = vector.broadcast %cst_112 : f32 to vector<128x1xf32>
    %225 = arith.addf %223, %224 : vector<128x1xf32>
    %226 = math.rsqrt %225 : vector<128x1xf32>
    %227 = vector.broadcast %226 : vector<128x1xf32> to vector<128x32xf32>
    %228 = arith.mulf %218, %227 : vector<128x32xf32>
    %229 = vector.broadcast %211 : vector<1x32xf32> to vector<128x32xf32>
    %230 = arith.mulf %228, %229 : vector<128x32xf32>
    %231 = vector.broadcast %212 : vector<1x32xf32> to vector<128x32xf32>
    %232 = arith.addf %230, %231 : vector<128x32xf32>
    %c0_113 = arith.constant 0 : index
    %c0_114 = arith.constant 0 : index
    %233 = vector.load %arg17[%c0_113, %c0_114] : memref<32x64xf32, #tpu.memory_space<vmem>>, vector<32x64xf32>
    %cst_115 = arith.constant dense<0.000000e+00> : vector<128x64xf32>
    %234 = tpu.matmul %232, %233, %cst_115 {dimension_numbers = #tpu.dot_dimension_numbers<[1], [0], [0], [1], [0, 0, 1, 1], [], []>} : vector<128x32xf32>, vector<32x64xf32>, vector<128x64xf32> -> vector<128x64xf32>
    %c0_116 = arith.constant 0 : index
    %c0_117 = arith.constant 0 : index
    %235 = vector.load %arg15[%c0_116, %c0_117] : memref<1x64xf32, #tpu.memory_space<vmem>>, vector<1x64xf32>
    %236 = vector.broadcast %235 : vector<1x64xf32> to vector<128x64xf32>
    %237 = arith.addf %234, %236 : vector<128x64xf32>
    %cst_118 = arith.constant 0.000000e+00 : f32
    %238 = vector.broadcast %cst_118 : f32 to vector<128x64xf32>
    %239 = arith.maximumf %237, %238 : vector<128x64xf32>
    %c0_119 = arith.constant 0 : index
    %c0_120 = arith.constant 0 : index
    %240 = vector.load %arg18[%c0_119, %c0_120] : memref<64x32xf32, #tpu.memory_space<vmem>>, vector<64x32xf32>
    %cst_121 = arith.constant dense<0.000000e+00> : vector<128x32xf32>
    %241 = tpu.matmul %239, %240, %cst_121 {dimension_numbers = #tpu.dot_dimension_numbers<[1], [0], [0], [1], [0, 0, 1, 1], [], []>} : vector<128x64xf32>, vector<64x32xf32>, vector<128x32xf32> -> vector<128x32xf32>
    %c0_122 = arith.constant 0 : index
    %c0_123 = arith.constant 0 : index
    %242 = vector.load %arg16[%c0_122, %c0_123] : memref<1x32xf32, #tpu.memory_space<vmem>>, vector<1x32xf32>
    %243 = vector.broadcast %242 : vector<1x32xf32> to vector<128x32xf32>
    %244 = arith.addf %241, %243 : vector<128x32xf32>
    %245 = arith.addf %232, %244 : vector<128x32xf32>
    %c0_124 = arith.constant 0 : index
    %c0_125 = arith.constant 0 : index
    %246 = vector.load %arg22[%c0_124, %c0_125] : memref<1x32xf32, #tpu.memory_space<vmem>>, vector<1x32xf32>
    %c0_126 = arith.constant 0 : index
    %c0_127 = arith.constant 0 : index
    %247 = vector.load %arg21[%c0_126, %c0_127] : memref<1x32xf32, #tpu.memory_space<vmem>>, vector<1x32xf32>
    %cst_128 = arith.constant dense<0.000000e+00> : vector<128xf32>
    %248 = vector.multi_reduction <add>, %245, %cst_128 [1] : vector<128x32xf32> to vector<128xf32>
    %249 = vector.shape_cast %248 : vector<128xf32> to vector<128x1xf32>
    %cst_129 = arith.constant 3.200000e+01 : f32
    %250 = vector.broadcast %cst_129 : f32 to vector<128x1xf32>
    %251 = arith.divf %249, %250 : vector<128x1xf32>
    %252 = vector.broadcast %251 : vector<128x1xf32> to vector<128x32xf32>
    %253 = arith.subf %245, %252 : vector<128x32xf32>
    %254 = arith.mulf %253, %253 : vector<128x32xf32>
    %cst_130 = arith.constant dense<0.000000e+00> : vector<128xf32>
    %255 = vector.multi_reduction <add>, %254, %cst_130 [1] : vector<128x32xf32> to vector<128xf32>
    %256 = vector.shape_cast %255 : vector<128xf32> to vector<128x1xf32>
    %cst_131 = arith.constant 3.200000e+01 : f32
    %257 = vector.broadcast %cst_131 : f32 to vector<128x1xf32>
    %258 = arith.divf %256, %257 : vector<128x1xf32>
    %cst_132 = arith.constant 9.99999974E-6 : f32
    %259 = vector.broadcast %cst_132 : f32 to vector<128x1xf32>
    %260 = arith.addf %258, %259 : vector<128x1xf32>
    %261 = math.rsqrt %260 : vector<128x1xf32>
    %262 = vector.broadcast %261 : vector<128x1xf32> to vector<128x32xf32>
    %263 = arith.mulf %253, %262 : vector<128x32xf32>
    %264 = vector.broadcast %246 : vector<1x32xf32> to vector<128x32xf32>
    %265 = arith.mulf %263, %264 : vector<128x32xf32>
    %266 = vector.broadcast %247 : vector<1x32xf32> to vector<128x32xf32>
    %267 = arith.addf %265, %266 : vector<128x32xf32>
    %c0_133 = arith.constant 0 : index
    %c0_134 = arith.constant 0 : index
    %268 = vector.load %arg28[%c0_133, %c0_134] : memref<32x32xf32, #tpu.memory_space<vmem>>, vector<32x32xf32>
    %cst_135 = arith.constant dense<0.000000e+00> : vector<8x32xf32>
    %269 = tpu.matmul %138, %268, %cst_135 {dimension_numbers = #tpu.dot_dimension_numbers<[1], [0], [0], [1], [0, 0, 1, 1], [], []>} : vector<8x32xf32>, vector<32x32xf32>, vector<8x32xf32> -> vector<8x32xf32>
    %c0_136 = arith.constant 0 : index
    %c0_137 = arith.constant 0 : index
    %270 = vector.load %arg25[%c0_136, %c0_137] : memref<1x32xf32, #tpu.memory_space<vmem>>, vector<1x32xf32>
    %271 = vector.broadcast %270 : vector<1x32xf32> to vector<8x32xf32>
    %272 = arith.addf %269, %271 : vector<8x32xf32>
    %c0_138 = arith.constant 0 : index
    %c0_139 = arith.constant 0 : index
    %273 = vector.load %arg26[%c0_138, %c0_139] : memref<32x64xf32, #tpu.memory_space<vmem>>, vector<32x64xf32>
    %cst_140 = arith.constant dense<0.000000e+00> : vector<128x64xf32>
    %274 = tpu.matmul %267, %273, %cst_140 {dimension_numbers = #tpu.dot_dimension_numbers<[1], [0], [0], [1], [0, 0, 1, 1], [], []>} : vector<128x32xf32>, vector<32x64xf32>, vector<128x64xf32> -> vector<128x64xf32>
    %c0_141 = arith.constant 0 : index
    %c0_142 = arith.constant 0 : index
    %275 = vector.load %arg23[%c0_141, %c0_142] : memref<1x64xf32, #tpu.memory_space<vmem>>, vector<1x64xf32>
    %276 = vector.broadcast %275 : vector<1x64xf32> to vector<128x64xf32>
    %277 = arith.addf %274, %276 : vector<128x64xf32>
    %278 = vector.extract_strided_slice %277 {offsets = [0, 0], sizes = [128, 32], strides = [1, 1]} : vector<128x64xf32> to vector<128x32xf32>
    %279 = vector.extract_strided_slice %277 {offsets = [0, 32], sizes = [128, 32], strides = [1, 1]} : vector<128x64xf32> to vector<128x32xf32>
    %c0_143 = arith.constant 0 : index
    %c0_144 = arith.constant 0 : index
    %280 = vector.load %arg27[%c0_143, %c0_144] : memref<32x32xf32, #tpu.memory_space<vmem>>, vector<32x32xf32>
    %cst_145 = arith.constant 0.000000e+00 : f32
    %281 = vector.broadcast %cst_145 : f32 to vector<8x32xf32>
    %282 = vector.extract_strided_slice %272 {offsets = [0, 0], sizes = [8, 16], strides = [1, 1]} : vector<8x32xf32> to vector<8x16xf32>
    %283 = vector.extract_strided_slice %278 {offsets = [0, 0], sizes = [128, 16], strides = [1, 1]} : vector<128x32xf32> to vector<128x16xf32>
    %284 = vector.extract_strided_slice %279 {offsets = [0, 0], sizes = [128, 16], strides = [1, 1]} : vector<128x32xf32> to vector<128x16xf32>
    %285 = tpu.transpose %283, [1, 0] : vector<128x16xf32> -> vector<16x128xf32>
    %cst_146 = arith.constant dense<0.000000e+00> : vector<8x128xf32>
    %286 = tpu.matmul %282, %285, %cst_146 {dimension_numbers = #tpu.dot_dimension_numbers<[1], [0], [0], [1], [0, 0, 1, 1], [], []>} : vector<8x16xf32>, vector<16x128xf32>, vector<8x128xf32> -> vector<8x128xf32>
    %cst_147 = arith.constant 2.500000e-01 : f32
    %287 = vector.broadcast %cst_147 : f32 to vector<8x128xf32>
    %288 = arith.mulf %286, %287 : vector<8x128xf32>
    %cst_148 = arith.constant 5.000000e-01 : f32
    %289 = vector.broadcast %cst_148 : f32 to vector<1x128xf32>
    %290 = arith.cmpf ogt, %7, %289 : vector<1x128xf32>
    %cst_149 = arith.constant -1.000000e+30 : f32
    %291 = vector.shape_cast %290 : vector<1x128xi1> to vector<1x128xi1>
    %292 = vector.broadcast %291 : vector<1x128xi1> to vector<8x128xi1>
    %293 = vector.broadcast %cst_149 : f32 to vector<8x128xf32>
    %294 = arith.select %292, %293, %288 : vector<8x128xi1>, vector<8x128xf32>
    %cst_150 = arith.constant dense<0xFF800000> : vector<8xf32>
    %295 = vector.multi_reduction <maximumf>, %294, %cst_150 [1] : vector<8x128xf32> to vector<8xf32>
    %296 = vector.shape_cast %295 : vector<8xf32> to vector<8x1xf32>
    %297 = vector.broadcast %296 : vector<8x1xf32> to vector<8x128xf32>
    %298 = arith.subf %294, %297 : vector<8x128xf32>
    %299 = math.exp %298 : vector<8x128xf32>
    %cst_151 = arith.constant dense<0.000000e+00> : vector<8xf32>
    %300 = vector.multi_reduction <add>, %299, %cst_151 [1] : vector<8x128xf32> to vector<8xf32>
    %301 = vector.shape_cast %300 : vector<8xf32> to vector<8x1xf32>
    %302 = tpu.reciprocal %301 {approx = true} : vector<8x1xf32> -> vector<8x1xf32>
    %303 = vector.broadcast %302 : vector<8x1xf32> to vector<8x128xf32>
    %304 = arith.mulf %299, %303 : vector<8x128xf32>
    %cst_152 = arith.constant dense<0.000000e+00> : vector<8x16xf32>
    %305 = tpu.matmul %304, %284, %cst_152 {dimension_numbers = #tpu.dot_dimension_numbers<[1], [0], [0], [1], [0, 0, 1, 1], [], []>} : vector<8x128xf32>, vector<128x16xf32>, vector<8x16xf32> -> vector<8x16xf32>
    %306 = vector.extract_strided_slice %280 {offsets = [0, 0], sizes = [16, 32], strides = [1, 1]} : vector<32x32xf32> to vector<16x32xf32>
    %cst_153 = arith.constant dense<0.000000e+00> : vector<8x32xf32>
    %307 = tpu.matmul %305, %306, %cst_153 {dimension_numbers = #tpu.dot_dimension_numbers<[1], [0], [0], [1], [0, 0, 1, 1], [], []>} : vector<8x16xf32>, vector<16x32xf32>, vector<8x32xf32> -> vector<8x32xf32>
    %308 = arith.addf %281, %307 : vector<8x32xf32>
    %309 = vector.extract_strided_slice %272 {offsets = [0, 16], sizes = [8, 16], strides = [1, 1]} : vector<8x32xf32> to vector<8x16xf32>
    %310 = vector.extract_strided_slice %278 {offsets = [0, 16], sizes = [128, 16], strides = [1, 1]} : vector<128x32xf32> to vector<128x16xf32>
    %311 = vector.extract_strided_slice %279 {offsets = [0, 16], sizes = [128, 16], strides = [1, 1]} : vector<128x32xf32> to vector<128x16xf32>
    %312 = tpu.transpose %310, [1, 0] : vector<128x16xf32> -> vector<16x128xf32>
    %cst_154 = arith.constant dense<0.000000e+00> : vector<8x128xf32>
    %313 = tpu.matmul %309, %312, %cst_154 {dimension_numbers = #tpu.dot_dimension_numbers<[1], [0], [0], [1], [0, 0, 1, 1], [], []>} : vector<8x16xf32>, vector<16x128xf32>, vector<8x128xf32> -> vector<8x128xf32>
    %cst_155 = arith.constant 2.500000e-01 : f32
    %314 = vector.broadcast %cst_155 : f32 to vector<8x128xf32>
    %315 = arith.mulf %313, %314 : vector<8x128xf32>
    %cst_156 = arith.constant 5.000000e-01 : f32
    %316 = vector.broadcast %cst_156 : f32 to vector<1x128xf32>
    %317 = arith.cmpf ogt, %7, %316 : vector<1x128xf32>
    %cst_157 = arith.constant -1.000000e+30 : f32
    %318 = vector.shape_cast %317 : vector<1x128xi1> to vector<1x128xi1>
    %319 = vector.broadcast %318 : vector<1x128xi1> to vector<8x128xi1>
    %320 = vector.broadcast %cst_157 : f32 to vector<8x128xf32>
    %321 = arith.select %319, %320, %315 : vector<8x128xi1>, vector<8x128xf32>
    %cst_158 = arith.constant dense<0xFF800000> : vector<8xf32>
    %322 = vector.multi_reduction <maximumf>, %321, %cst_158 [1] : vector<8x128xf32> to vector<8xf32>
    %323 = vector.shape_cast %322 : vector<8xf32> to vector<8x1xf32>
    %324 = vector.broadcast %323 : vector<8x1xf32> to vector<8x128xf32>
    %325 = arith.subf %321, %324 : vector<8x128xf32>
    %326 = math.exp %325 : vector<8x128xf32>
    %cst_159 = arith.constant dense<0.000000e+00> : vector<8xf32>
    %327 = vector.multi_reduction <add>, %326, %cst_159 [1] : vector<8x128xf32> to vector<8xf32>
    %328 = vector.shape_cast %327 : vector<8xf32> to vector<8x1xf32>
    %329 = tpu.reciprocal %328 {approx = true} : vector<8x1xf32> -> vector<8x1xf32>
    %330 = vector.broadcast %329 : vector<8x1xf32> to vector<8x128xf32>
    %331 = arith.mulf %326, %330 : vector<8x128xf32>
    %cst_160 = arith.constant dense<0.000000e+00> : vector<8x16xf32>
    %332 = tpu.matmul %331, %311, %cst_160 {dimension_numbers = #tpu.dot_dimension_numbers<[1], [0], [0], [1], [0, 0, 1, 1], [], []>} : vector<8x128xf32>, vector<128x16xf32>, vector<8x16xf32> -> vector<8x16xf32>
    %333 = vector.extract_strided_slice %280 {offsets = [16, 0], sizes = [16, 32], strides = [1, 1]} : vector<32x32xf32> to vector<16x32xf32>
    %cst_161 = arith.constant dense<0.000000e+00> : vector<8x32xf32>
    %334 = tpu.matmul %332, %333, %cst_161 {dimension_numbers = #tpu.dot_dimension_numbers<[1], [0], [0], [1], [0, 0, 1, 1], [], []>} : vector<8x16xf32>, vector<16x32xf32>, vector<8x32xf32> -> vector<8x32xf32>
    %335 = arith.addf %308, %334 : vector<8x32xf32>
    %c0_162 = arith.constant 0 : index
    %c0_163 = arith.constant 0 : index
    %336 = vector.load %arg24[%c0_162, %c0_163] : memref<1x32xf32, #tpu.memory_space<vmem>>, vector<1x32xf32>
    %337 = vector.broadcast %336 : vector<1x32xf32> to vector<8x32xf32>
    %338 = arith.addf %335, %337 : vector<8x32xf32>
    %339 = arith.addf %138, %338 : vector<8x32xf32>
    %c0_164 = arith.constant 0 : index
    %c0_165 = arith.constant 0 : index
    %340 = vector.load %arg34[%c0_164, %c0_165] : memref<1x32xf32, #tpu.memory_space<vmem>>, vector<1x32xf32>
    %c0_166 = arith.constant 0 : index
    %c0_167 = arith.constant 0 : index
    %341 = vector.load %arg33[%c0_166, %c0_167] : memref<1x32xf32, #tpu.memory_space<vmem>>, vector<1x32xf32>
    %cst_168 = arith.constant dense<0.000000e+00> : vector<8xf32>
    %342 = vector.multi_reduction <add>, %339, %cst_168 [1] : vector<8x32xf32> to vector<8xf32>
    %343 = vector.shape_cast %342 : vector<8xf32> to vector<8x1xf32>
    %cst_169 = arith.constant 3.200000e+01 : f32
    %344 = vector.broadcast %cst_169 : f32 to vector<8x1xf32>
    %345 = arith.divf %343, %344 : vector<8x1xf32>
    %346 = vector.broadcast %345 : vector<8x1xf32> to vector<8x32xf32>
    %347 = arith.subf %339, %346 : vector<8x32xf32>
    %348 = arith.mulf %347, %347 : vector<8x32xf32>
    %cst_170 = arith.constant dense<0.000000e+00> : vector<8xf32>
    %349 = vector.multi_reduction <add>, %348, %cst_170 [1] : vector<8x32xf32> to vector<8xf32>
    %350 = vector.shape_cast %349 : vector<8xf32> to vector<8x1xf32>
    %cst_171 = arith.constant 3.200000e+01 : f32
    %351 = vector.broadcast %cst_171 : f32 to vector<8x1xf32>
    %352 = arith.divf %350, %351 : vector<8x1xf32>
    %cst_172 = arith.constant 9.99999974E-6 : f32
    %353 = vector.broadcast %cst_172 : f32 to vector<8x1xf32>
    %354 = arith.addf %352, %353 : vector<8x1xf32>
    %355 = math.rsqrt %354 : vector<8x1xf32>
    %356 = vector.broadcast %355 : vector<8x1xf32> to vector<8x32xf32>
    %357 = arith.mulf %347, %356 : vector<8x32xf32>
    %358 = vector.broadcast %340 : vector<1x32xf32> to vector<8x32xf32>
    %359 = arith.mulf %357, %358 : vector<8x32xf32>
    %360 = vector.broadcast %341 : vector<1x32xf32> to vector<8x32xf32>
    %361 = arith.addf %359, %360 : vector<8x32xf32>
    %c0_173 = arith.constant 0 : index
    %c0_174 = arith.constant 0 : index
    %362 = vector.load %arg31[%c0_173, %c0_174] : memref<32x64xf32, #tpu.memory_space<vmem>>, vector<32x64xf32>
    %cst_175 = arith.constant dense<0.000000e+00> : vector<8x64xf32>
    %363 = tpu.matmul %361, %362, %cst_175 {dimension_numbers = #tpu.dot_dimension_numbers<[1], [0], [0], [1], [0, 0, 1, 1], [], []>} : vector<8x32xf32>, vector<32x64xf32>, vector<8x64xf32> -> vector<8x64xf32>
    %c0_176 = arith.constant 0 : index
    %c0_177 = arith.constant 0 : index
    %364 = vector.load %arg29[%c0_176, %c0_177] : memref<1x64xf32, #tpu.memory_space<vmem>>, vector<1x64xf32>
    %365 = vector.broadcast %364 : vector<1x64xf32> to vector<8x64xf32>
    %366 = arith.addf %363, %365 : vector<8x64xf32>
    %cst_178 = arith.constant 0.000000e+00 : f32
    %367 = vector.broadcast %cst_178 : f32 to vector<8x64xf32>
    %368 = arith.maximumf %366, %367 : vector<8x64xf32>
    %c0_179 = arith.constant 0 : index
    %c0_180 = arith.constant 0 : index
    %369 = vector.load %arg32[%c0_179, %c0_180] : memref<64x32xf32, #tpu.memory_space<vmem>>, vector<64x32xf32>
    %cst_181 = arith.constant dense<0.000000e+00> : vector<8x32xf32>
    %370 = tpu.matmul %368, %369, %cst_181 {dimension_numbers = #tpu.dot_dimension_numbers<[1], [0], [0], [1], [0, 0, 1, 1], [], []>} : vector<8x64xf32>, vector<64x32xf32>, vector<8x32xf32> -> vector<8x32xf32>
    %c0_182 = arith.constant 0 : index
    %c0_183 = arith.constant 0 : index
    %371 = vector.load %arg30[%c0_182, %c0_183] : memref<1x32xf32, #tpu.memory_space<vmem>>, vector<1x32xf32>
    %372 = vector.broadcast %371 : vector<1x32xf32> to vector<8x32xf32>
    %373 = arith.addf %370, %372 : vector<8x32xf32>
    %374 = arith.addf %361, %373 : vector<8x32xf32>
    %c0_184 = arith.constant 0 : index
    %c0_185 = arith.constant 0 : index
    %375 = vector.load %arg36[%c0_184, %c0_185] : memref<1x32xf32, #tpu.memory_space<vmem>>, vector<1x32xf32>
    %c0_186 = arith.constant 0 : index
    %c0_187 = arith.constant 0 : index
    %376 = vector.load %arg35[%c0_186, %c0_187] : memref<1x32xf32, #tpu.memory_space<vmem>>, vector<1x32xf32>
    %cst_188 = arith.constant dense<0.000000e+00> : vector<8xf32>
    %377 = vector.multi_reduction <add>, %374, %cst_188 [1] : vector<8x32xf32> to vector<8xf32>
    %378 = vector.shape_cast %377 : vector<8xf32> to vector<8x1xf32>
    %cst_189 = arith.constant 3.200000e+01 : f32
    %379 = vector.broadcast %cst_189 : f32 to vector<8x1xf32>
    %380 = arith.divf %378, %379 : vector<8x1xf32>
    %381 = vector.broadcast %380 : vector<8x1xf32> to vector<8x32xf32>
    %382 = arith.subf %374, %381 : vector<8x32xf32>
    %383 = arith.mulf %382, %382 : vector<8x32xf32>
    %cst_190 = arith.constant dense<0.000000e+00> : vector<8xf32>
    %384 = vector.multi_reduction <add>, %383, %cst_190 [1] : vector<8x32xf32> to vector<8xf32>
    %385 = vector.shape_cast %384 : vector<8xf32> to vector<8x1xf32>
    %cst_191 = arith.constant 3.200000e+01 : f32
    %386 = vector.broadcast %cst_191 : f32 to vector<8x1xf32>
    %387 = arith.divf %385, %386 : vector<8x1xf32>
    %cst_192 = arith.constant 9.99999974E-6 : f32
    %388 = vector.broadcast %cst_192 : f32 to vector<8x1xf32>
    %389 = arith.addf %387, %388 : vector<8x1xf32>
    %390 = math.rsqrt %389 : vector<8x1xf32>
    %391 = vector.broadcast %390 : vector<8x1xf32> to vector<8x32xf32>
    %392 = arith.mulf %382, %391 : vector<8x32xf32>
    %393 = vector.broadcast %375 : vector<1x32xf32> to vector<8x32xf32>
    %394 = arith.mulf %392, %393 : vector<8x32xf32>
    %395 = vector.broadcast %376 : vector<1x32xf32> to vector<8x32xf32>
    %396 = arith.addf %394, %395 : vector<8x32xf32>
    %c0_193 = arith.constant 0 : index
    %c0_194 = arith.constant 0 : index
    %397 = vector.load %arg14[%c0_193, %c0_194] : memref<32x32xf32, #tpu.memory_space<vmem>>, vector<32x32xf32>
    %cst_195 = arith.constant dense<0.000000e+00> : vector<128x32xf32>
    %398 = tpu.matmul %267, %397, %cst_195 {dimension_numbers = #tpu.dot_dimension_numbers<[1], [0], [0], [1], [0, 0, 1, 1], [], []>} : vector<128x32xf32>, vector<32x32xf32>, vector<128x32xf32> -> vector<128x32xf32>
    %c0_196 = arith.constant 0 : index
    %c0_197 = arith.constant 0 : index
    %399 = vector.load %arg11[%c0_196, %c0_197] : memref<1x32xf32, #tpu.memory_space<vmem>>, vector<1x32xf32>
    %400 = vector.broadcast %399 : vector<1x32xf32> to vector<128x32xf32>
    %401 = arith.addf %398, %400 : vector<128x32xf32>
    %c0_198 = arith.constant 0 : index
    %c0_199 = arith.constant 0 : index
    %402 = vector.load %arg12[%c0_198, %c0_199] : memref<32x64xf32, #tpu.memory_space<vmem>>, vector<32x64xf32>
    %cst_200 = arith.constant dense<0.000000e+00> : vector<8x64xf32>
    %403 = tpu.matmul %396, %402, %cst_200 {dimension_numbers = #tpu.dot_dimension_numbers<[1], [0], [0], [1], [0, 0, 1, 1], [], []>} : vector<8x32xf32>, vector<32x64xf32>, vector<8x64xf32> -> vector<8x64xf32>
    %c0_201 = arith.constant 0 : index
    %c0_202 = arith.constant 0 : index
    %404 = vector.load %arg9[%c0_201, %c0_202] : memref<1x64xf32, #tpu.memory_space<vmem>>, vector<1x64xf32>
    %405 = vector.broadcast %404 : vector<1x64xf32> to vector<8x64xf32>
    %406 = arith.addf %403, %405 : vector<8x64xf32>
    %407 = vector.extract_strided_slice %406 {offsets = [0, 0], sizes = [8, 32], strides = [1, 1]} : vector<8x64xf32> to vector<8x32xf32>
    %408 = vector.extract_strided_slice %406 {offsets = [0, 32], sizes = [8, 32], strides = [1, 1]} : vector<8x64xf32> to vector<8x32xf32>
    %c0_203 = arith.constant 0 : index
    %c0_204 = arith.constant 0 : index
    %409 = vector.load %arg13[%c0_203, %c0_204] : memref<32x32xf32, #tpu.memory_space<vmem>>, vector<32x32xf32>
    %cst_205 = arith.constant 0.000000e+00 : f32
    %410 = vector.broadcast %cst_205 : f32 to vector<128x32xf32>
    %411 = vector.extract_strided_slice %401 {offsets = [0, 0], sizes = [128, 16], strides = [1, 1]} : vector<128x32xf32> to vector<128x16xf32>
    %412 = vector.extract_strided_slice %407 {offsets = [0, 0], sizes = [8, 16], strides = [1, 1]} : vector<8x32xf32> to vector<8x16xf32>
    %413 = vector.extract_strided_slice %408 {offsets = [0, 0], sizes = [8, 16], strides = [1, 1]} : vector<8x32xf32> to vector<8x16xf32>
    %414 = tpu.transpose %412, [1, 0] : vector<8x16xf32> -> vector<16x8xf32>
    %cst_206 = arith.constant dense<0.000000e+00> : vector<128x8xf32>
    %415 = tpu.matmul %411, %414, %cst_206 {dimension_numbers = #tpu.dot_dimension_numbers<[1], [0], [0], [1], [0, 0, 1, 1], [], []>} : vector<128x16xf32>, vector<16x8xf32>, vector<128x8xf32> -> vector<128x8xf32>
    %cst_207 = arith.constant 2.500000e-01 : f32
    %416 = vector.broadcast %cst_207 : f32 to vector<128x8xf32>
    %417 = arith.mulf %415, %416 : vector<128x8xf32>
    %cst_208 = arith.constant 5.000000e-01 : f32
    %418 = vector.broadcast %cst_208 : f32 to vector<1x8xf32>
    %419 = arith.cmpf ogt, %5, %418 : vector<1x8xf32>
    %cst_209 = arith.constant -1.000000e+30 : f32
    %420 = vector.shape_cast %419 : vector<1x8xi1> to vector<1x8xi1>
    %421 = vector.broadcast %420 : vector<1x8xi1> to vector<128x8xi1>
    %422 = vector.broadcast %cst_209 : f32 to vector<128x8xf32>
    %423 = arith.select %421, %422, %417 : vector<128x8xi1>, vector<128x8xf32>
    %cst_210 = arith.constant dense<0xFF800000> : vector<128xf32>
    %424 = vector.multi_reduction <maximumf>, %423, %cst_210 [1] : vector<128x8xf32> to vector<128xf32>
    %425 = vector.shape_cast %424 : vector<128xf32> to vector<128x1xf32>
    %426 = vector.broadcast %425 : vector<128x1xf32> to vector<128x8xf32>
    %427 = arith.subf %423, %426 : vector<128x8xf32>
    %428 = math.exp %427 : vector<128x8xf32>
    %cst_211 = arith.constant dense<0.000000e+00> : vector<128xf32>
    %429 = vector.multi_reduction <add>, %428, %cst_211 [1] : vector<128x8xf32> to vector<128xf32>
    %430 = vector.shape_cast %429 : vector<128xf32> to vector<128x1xf32>
    %431 = tpu.reciprocal %430 {approx = true} : vector<128x1xf32> -> vector<128x1xf32>
    %432 = vector.broadcast %431 : vector<128x1xf32> to vector<128x8xf32>
    %433 = arith.mulf %428, %432 : vector<128x8xf32>
    %cst_212 = arith.constant dense<0.000000e+00> : vector<128x16xf32>
    %434 = tpu.matmul %433, %413, %cst_212 {dimension_numbers = #tpu.dot_dimension_numbers<[1], [0], [0], [1], [0, 0, 1, 1], [], []>} : vector<128x8xf32>, vector<8x16xf32>, vector<128x16xf32> -> vector<128x16xf32>
    %435 = vector.extract_strided_slice %409 {offsets = [0, 0], sizes = [16, 32], strides = [1, 1]} : vector<32x32xf32> to vector<16x32xf32>
    %cst_213 = arith.constant dense<0.000000e+00> : vector<128x32xf32>
    %436 = tpu.matmul %434, %435, %cst_213 {dimension_numbers = #tpu.dot_dimension_numbers<[1], [0], [0], [1], [0, 0, 1, 1], [], []>} : vector<128x16xf32>, vector<16x32xf32>, vector<128x32xf32> -> vector<128x32xf32>
    %437 = arith.addf %410, %436 : vector<128x32xf32>
    %438 = vector.extract_strided_slice %401 {offsets = [0, 16], sizes = [128, 16], strides = [1, 1]} : vector<128x32xf32> to vector<128x16xf32>
    %439 = vector.extract_strided_slice %407 {offsets = [0, 16], sizes = [8, 16], strides = [1, 1]} : vector<8x32xf32> to vector<8x16xf32>
    %440 = vector.extract_strided_slice %408 {offsets = [0, 16], sizes = [8, 16], strides = [1, 1]} : vector<8x32xf32> to vector<8x16xf32>
    %441 = tpu.transpose %439, [1, 0] : vector<8x16xf32> -> vector<16x8xf32>
    %cst_214 = arith.constant dense<0.000000e+00> : vector<128x8xf32>
    %442 = tpu.matmul %438, %441, %cst_214 {dimension_numbers = #tpu.dot_dimension_numbers<[1], [0], [0], [1], [0, 0, 1, 1], [], []>} : vector<128x16xf32>, vector<16x8xf32>, vector<128x8xf32> -> vector<128x8xf32>
    %cst_215 = arith.constant 2.500000e-01 : f32
    %443 = vector.broadcast %cst_215 : f32 to vector<128x8xf32>
    %444 = arith.mulf %442, %443 : vector<128x8xf32>
    %cst_216 = arith.constant 5.000000e-01 : f32
    %445 = vector.broadcast %cst_216 : f32 to vector<1x8xf32>
    %446 = arith.cmpf ogt, %5, %445 : vector<1x8xf32>
    %cst_217 = arith.constant -1.000000e+30 : f32
    %447 = vector.shape_cast %446 : vector<1x8xi1> to vector<1x8xi1>
    %448 = vector.broadcast %447 : vector<1x8xi1> to vector<128x8xi1>
    %449 = vector.broadcast %cst_217 : f32 to vector<128x8xf32>
    %450 = arith.select %448, %449, %444 : vector<128x8xi1>, vector<128x8xf32>
    %cst_218 = arith.constant dense<0xFF800000> : vector<128xf32>
    %451 = vector.multi_reduction <maximumf>, %450, %cst_218 [1] : vector<128x8xf32> to vector<128xf32>
    %452 = vector.shape_cast %451 : vector<128xf32> to vector<128x1xf32>
    %453 = vector.broadcast %452 : vector<128x1xf32> to vector<128x8xf32>
    %454 = arith.subf %450, %453 : vector<128x8xf32>
    %455 = math.exp %454 : vector<128x8xf32>
    %cst_219 = arith.constant dense<0.000000e+00> : vector<128xf32>
    %456 = vector.multi_reduction <add>, %455, %cst_219 [1] : vector<128x8xf32> to vector<128xf32>
    %457 = vector.shape_cast %456 : vector<128xf32> to vector<128x1xf32>
    %458 = tpu.reciprocal %457 {approx = true} : vector<128x1xf32> -> vector<128x1xf32>
    %459 = vector.broadcast %458 : vector<128x1xf32> to vector<128x8xf32>
    %460 = arith.mulf %455, %459 : vector<128x8xf32>
    %cst_220 = arith.constant dense<0.000000e+00> : vector<128x16xf32>
    %461 = tpu.matmul %460, %440, %cst_220 {dimension_numbers = #tpu.dot_dimension_numbers<[1], [0], [0], [1], [0, 0, 1, 1], [], []>} : vector<128x8xf32>, vector<8x16xf32>, vector<128x16xf32> -> vector<128x16xf32>
    %462 = vector.extract_strided_slice %409 {offsets = [16, 0], sizes = [16, 32], strides = [1, 1]} : vector<32x32xf32> to vector<16x32xf32>
    %cst_221 = arith.constant dense<0.000000e+00> : vector<128x32xf32>
    %463 = tpu.matmul %461, %462, %cst_221 {dimension_numbers = #tpu.dot_dimension_numbers<[1], [0], [0], [1], [0, 0, 1, 1], [], []>} : vector<128x16xf32>, vector<16x32xf32>, vector<128x32xf32> -> vector<128x32xf32>
    %464 = arith.addf %437, %463 : vector<128x32xf32>
    %c0_222 = arith.constant 0 : index
    %c0_223 = arith.constant 0 : index
    %465 = vector.load %arg10[%c0_222, %c0_223] : memref<1x32xf32, #tpu.memory_space<vmem>>, vector<1x32xf32>
    %466 = vector.broadcast %465 : vector<1x32xf32> to vector<128x32xf32>
    %467 = arith.addf %464, %466 : vector<128x32xf32>
    %468 = arith.addf %267, %467 : vector<128x32xf32>
    %c0_224 = arith.constant 0 : index
    %c0_225 = arith.constant 0 : index
    %469 = vector.load %arg20[%c0_224, %c0_225] : memref<1x32xf32, #tpu.memory_space<vmem>>, vector<1x32xf32>
    %c0_226 = arith.constant 0 : index
    %c0_227 = arith.constant 0 : index
    %470 = vector.load %arg19[%c0_226, %c0_227] : memref<1x32xf32, #tpu.memory_space<vmem>>, vector<1x32xf32>
    %cst_228 = arith.constant dense<0.000000e+00> : vector<128xf32>
    %471 = vector.multi_reduction <add>, %468, %cst_228 [1] : vector<128x32xf32> to vector<128xf32>
    %472 = vector.shape_cast %471 : vector<128xf32> to vector<128x1xf32>
    %cst_229 = arith.constant 3.200000e+01 : f32
    %473 = vector.broadcast %cst_229 : f32 to vector<128x1xf32>
    %474 = arith.divf %472, %473 : vector<128x1xf32>
    %475 = vector.broadcast %474 : vector<128x1xf32> to vector<128x32xf32>
    %476 = arith.subf %468, %475 : vector<128x32xf32>
    %477 = arith.mulf %476, %476 : vector<128x32xf32>
    %cst_230 = arith.constant dense<0.000000e+00> : vector<128xf32>
    %478 = vector.multi_reduction <add>, %477, %cst_230 [1] : vector<128x32xf32> to vector<128xf32>
    %479 = vector.shape_cast %478 : vector<128xf32> to vector<128x1xf32>
    %cst_231 = arith.constant 3.200000e+01 : f32
    %480 = vector.broadcast %cst_231 : f32 to vector<128x1xf32>
    %481 = arith.divf %479, %480 : vector<128x1xf32>
    %cst_232 = arith.constant 9.99999974E-6 : f32
    %482 = vector.broadcast %cst_232 : f32 to vector<128x1xf32>
    %483 = arith.addf %481, %482 : vector<128x1xf32>
    %484 = math.rsqrt %483 : vector<128x1xf32>
    %485 = vector.broadcast %484 : vector<128x1xf32> to vector<128x32xf32>
    %486 = arith.mulf %476, %485 : vector<128x32xf32>
    %487 = vector.broadcast %469 : vector<1x32xf32> to vector<128x32xf32>
    %488 = arith.mulf %486, %487 : vector<128x32xf32>
    %489 = vector.broadcast %470 : vector<1x32xf32> to vector<128x32xf32>
    %490 = arith.addf %488, %489 : vector<128x32xf32>
    %c0_233 = arith.constant 0 : index
    %c0_234 = arith.constant 0 : index
    %491 = vector.load %arg17[%c0_233, %c0_234] : memref<32x64xf32, #tpu.memory_space<vmem>>, vector<32x64xf32>
    %cst_235 = arith.constant dense<0.000000e+00> : vector<128x64xf32>
    %492 = tpu.matmul %490, %491, %cst_235 {dimension_numbers = #tpu.dot_dimension_numbers<[1], [0], [0], [1], [0, 0, 1, 1], [], []>} : vector<128x32xf32>, vector<32x64xf32>, vector<128x64xf32> -> vector<128x64xf32>
    %c0_236 = arith.constant 0 : index
    %c0_237 = arith.constant 0 : index
    %493 = vector.load %arg15[%c0_236, %c0_237] : memref<1x64xf32, #tpu.memory_space<vmem>>, vector<1x64xf32>
    %494 = vector.broadcast %493 : vector<1x64xf32> to vector<128x64xf32>
    %495 = arith.addf %492, %494 : vector<128x64xf32>
    %cst_238 = arith.constant 0.000000e+00 : f32
    %496 = vector.broadcast %cst_238 : f32 to vector<128x64xf32>
    %497 = arith.maximumf %495, %496 : vector<128x64xf32>
    %c0_239 = arith.constant 0 : index
    %c0_240 = arith.constant 0 : index
    %498 = vector.load %arg18[%c0_239, %c0_240] : memref<64x32xf32, #tpu.memory_space<vmem>>, vector<64x32xf32>
    %cst_241 = arith.constant dense<0.000000e+00> : vector<128x32xf32>
    %499 = tpu.matmul %497, %498, %cst_241 {dimension_numbers = #tpu.dot_dimension_numbers<[1], [0], [0], [1], [0, 0, 1, 1], [], []>} : vector<128x64xf32>, vector<64x32xf32>, vector<128x32xf32> -> vector<128x32xf32>
    %c0_242 = arith.constant 0 : index
    %c0_243 = arith.constant 0 : index
    %500 = vector.load %arg16[%c0_242, %c0_243] : memref<1x32xf32, #tpu.memory_space<vmem>>, vector<1x32xf32>
    %501 = vector.broadcast %500 : vector<1x32xf32> to vector<128x32xf32>
    %502 = arith.addf %499, %501 : vector<128x32xf32>
    %503 = arith.addf %490, %502 : vector<128x32xf32>
    %c0_244 = arith.constant 0 : index
    %c0_245 = arith.constant 0 : index
    %504 = vector.load %arg22[%c0_244, %c0_245] : memref<1x32xf32, #tpu.memory_space<vmem>>, vector<1x32xf32>
    %c0_246 = arith.constant 0 : index
    %c0_247 = arith.constant 0 : index
    %505 = vector.load %arg21[%c0_246, %c0_247] : memref<1x32xf32, #tpu.memory_space<vmem>>, vector<1x32xf32>
    %cst_248 = arith.constant dense<0.000000e+00> : vector<128xf32>
    %506 = vector.multi_reduction <add>, %503, %cst_248 [1] : vector<128x32xf32> to vector<128xf32>
    %507 = vector.shape_cast %506 : vector<128xf32> to vector<128x1xf32>
    %cst_249 = arith.constant 3.200000e+01 : f32
    %508 = vector.broadcast %cst_249 : f32 to vector<128x1xf32>
    %509 = arith.divf %507, %508 : vector<128x1xf32>
    %510 = vector.broadcast %509 : vector<128x1xf32> to vector<128x32xf32>
    %511 = arith.subf %503, %510 : vector<128x32xf32>
    %512 = arith.mulf %511, %511 : vector<128x32xf32>
    %cst_250 = arith.constant dense<0.000000e+00> : vector<128xf32>
    %513 = vector.multi_reduction <add>, %512, %cst_250 [1] : vector<128x32xf32> to vector<128xf32>
    %514 = vector.shape_cast %513 : vector<128xf32> to vector<128x1xf32>
    %cst_251 = arith.constant 3.200000e+01 : f32
    %515 = vector.broadcast %cst_251 : f32 to vector<128x1xf32>
    %516 = arith.divf %514, %515 : vector<128x1xf32>
    %cst_252 = arith.constant 9.99999974E-6 : f32
    %517 = vector.broadcast %cst_252 : f32 to vector<128x1xf32>
    %518 = arith.addf %516, %517 : vector<128x1xf32>
    %519 = math.rsqrt %518 : vector<128x1xf32>
    %520 = vector.broadcast %519 : vector<128x1xf32> to vector<128x32xf32>
    %521 = arith.mulf %511, %520 : vector<128x32xf32>
    %522 = vector.broadcast %504 : vector<1x32xf32> to vector<128x32xf32>
    %523 = arith.mulf %521, %522 : vector<128x32xf32>
    %524 = vector.broadcast %505 : vector<1x32xf32> to vector<128x32xf32>
    %525 = arith.addf %523, %524 : vector<128x32xf32>
    %c0_253 = arith.constant 0 : index
    %c0_254 = arith.constant 0 : index
    %526 = vector.load %arg38[%c0_253, %c0_254] : memref<1x32xf32, #tpu.memory_space<vmem>>, vector<1x32xf32>
    %c0_255 = arith.constant 0 : index
    %c0_256 = arith.constant 0 : index
    %527 = vector.load %arg37[%c0_255, %c0_256] : memref<1x32xf32, #tpu.memory_space<vmem>>, vector<1x32xf32>
    %cst_257 = arith.constant dense<0.000000e+00> : vector<8xf32>
    %528 = vector.multi_reduction <add>, %396, %cst_257 [1] : vector<8x32xf32> to vector<8xf32>
    %529 = vector.shape_cast %528 : vector<8xf32> to vector<8x1xf32>
    %cst_258 = arith.constant 3.200000e+01 : f32
    %530 = vector.broadcast %cst_258 : f32 to vector<8x1xf32>
    %531 = arith.divf %529, %530 : vector<8x1xf32>
    %532 = vector.broadcast %531 : vector<8x1xf32> to vector<8x32xf32>
    %533 = arith.subf %396, %532 : vector<8x32xf32>
    %534 = arith.mulf %533, %533 : vector<8x32xf32>
    %cst_259 = arith.constant dense<0.000000e+00> : vector<8xf32>
    %535 = vector.multi_reduction <add>, %534, %cst_259 [1] : vector<8x32xf32> to vector<8xf32>
    %536 = vector.shape_cast %535 : vector<8xf32> to vector<8x1xf32>
    %cst_260 = arith.constant 3.200000e+01 : f32
    %537 = vector.broadcast %cst_260 : f32 to vector<8x1xf32>
    %538 = arith.divf %536, %537 : vector<8x1xf32>
    %cst_261 = arith.constant 9.99999974E-6 : f32
    %539 = vector.broadcast %cst_261 : f32 to vector<8x1xf32>
    %540 = arith.addf %538, %539 : vector<8x1xf32>
    %541 = math.rsqrt %540 : vector<8x1xf32>
    %542 = vector.broadcast %541 : vector<8x1xf32> to vector<8x32xf32>
    %543 = arith.mulf %533, %542 : vector<8x32xf32>
    %544 = vector.broadcast %526 : vector<1x32xf32> to vector<8x32xf32>
    %545 = arith.mulf %543, %544 : vector<8x32xf32>
    %546 = vector.broadcast %527 : vector<1x32xf32> to vector<8x32xf32>
    %547 = arith.addf %545, %546 : vector<8x32xf32>
    %cst_262 = arith.constant dense<0.000000e+00> : vector<128xf32>
    %548 = vector.multi_reduction <add>, %525, %cst_262 [1] : vector<128x32xf32> to vector<128xf32>
    %549 = vector.shape_cast %548 : vector<128xf32> to vector<128x1xf32>
    %cst_263 = arith.constant 3.200000e+01 : f32
    %550 = vector.broadcast %cst_263 : f32 to vector<128x1xf32>
    %551 = arith.divf %549, %550 : vector<128x1xf32>
    %552 = vector.broadcast %551 : vector<128x1xf32> to vector<128x32xf32>
    %553 = arith.subf %525, %552 : vector<128x32xf32>
    %554 = arith.mulf %553, %553 : vector<128x32xf32>
    %cst_264 = arith.constant dense<0.000000e+00> : vector<128xf32>
    %555 = vector.multi_reduction <add>, %554, %cst_264 [1] : vector<128x32xf32> to vector<128xf32>
    %556 = vector.shape_cast %555 : vector<128xf32> to vector<128x1xf32>
    %cst_265 = arith.constant 3.200000e+01 : f32
    %557 = vector.broadcast %cst_265 : f32 to vector<128x1xf32>
    %558 = arith.divf %556, %557 : vector<128x1xf32>
    %cst_266 = arith.constant 9.99999974E-6 : f32
    %559 = vector.broadcast %cst_266 : f32 to vector<128x1xf32>
    %560 = arith.addf %558, %559 : vector<128x1xf32>
    %561 = math.rsqrt %560 : vector<128x1xf32>
    %562 = vector.broadcast %561 : vector<128x1xf32> to vector<128x32xf32>
    %563 = arith.mulf %553, %562 : vector<128x32xf32>
    %564 = vector.broadcast %526 : vector<1x32xf32> to vector<128x32xf32>
    %565 = arith.mulf %563, %564 : vector<128x32xf32>
    %566 = vector.broadcast %527 : vector<1x32xf32> to vector<128x32xf32>
    %567 = arith.addf %565, %566 : vector<128x32xf32>
    %cst_267 = arith.constant 1.000000e+00 : f32
    %568 = vector.broadcast %cst_267 : f32 to vector<1x8xf32>
    %569 = arith.subf %568, %5 : vector<1x8xf32>
    %cst_268 = arith.constant 1.000000e+00 : f32
    %570 = vector.broadcast %cst_268 : f32 to vector<1x128xf32>
    %571 = arith.subf %570, %7 : vector<1x128xf32>
    %cst_269 = arith.constant dense<0.000000e+00> : vector<1xf32>
    %572 = vector.multi_reduction <add>, %569, %cst_269 [1] : vector<1x8xf32> to vector<1xf32>
    %573 = vector.shape_cast %572 : vector<1xf32> to vector<1x1xf32>
    %cst_270 = arith.constant 1.000000e+00 : f32
    %574 = vector.broadcast %cst_270 : f32 to vector<1x1xf32>
    %575 = arith.maximumf %573, %574 : vector<1x1xf32>
    %cst_271 = arith.constant dense<0.000000e+00> : vector<1xf32>
    %576 = vector.multi_reduction <add>, %571, %cst_271 [1] : vector<1x128xf32> to vector<1xf32>
    %577 = vector.shape_cast %576 : vector<1xf32> to vector<1x1xf32>
    %cst_272 = arith.constant 1.000000e+00 : f32
    %578 = vector.broadcast %cst_272 : f32 to vector<1x1xf32>
    %579 = arith.maximumf %577, %578 : vector<1x1xf32>
    %cst_273 = arith.constant dense<0.000000e+00> : vector<1x32xf32>
    %580 = tpu.matmul %569, %547, %cst_273 {dimension_numbers = #tpu.dot_dimension_numbers<[1], [0], [0], [1], [0, 0, 1, 1], [], []>} : vector<1x8xf32>, vector<8x32xf32>, vector<1x32xf32> -> vector<1x32xf32>
    %581 = tpu.reciprocal %575 {approx = true} : vector<1x1xf32> -> vector<1x1xf32>
    %582 = vector.broadcast %581 : vector<1x1xf32> to vector<1x32xf32>
    %583 = arith.mulf %580, %582 : vector<1x32xf32>
    %cst_274 = arith.constant dense<0.000000e+00> : vector<1x32xf32>
    %584 = tpu.matmul %571, %567, %cst_274 {dimension_numbers = #tpu.dot_dimension_numbers<[1], [0], [0], [1], [0, 0, 1, 1], [], []>} : vector<1x128xf32>, vector<128x32xf32>, vector<1x32xf32> -> vector<1x32xf32>
    %585 = tpu.reciprocal %579 {approx = true} : vector<1x1xf32> -> vector<1x1xf32>
    %586 = vector.broadcast %585 : vector<1x1xf32> to vector<1x32xf32>
    %587 = arith.mulf %584, %586 : vector<1x32xf32>
    %c0_275 = arith.constant 0 : index
    %c0_276 = arith.constant 0 : index
    %588 = vector.load %arg8[%c0_275, %c0_276] : memref<32x1xf32, #tpu.memory_space<vmem>>, vector<32x1xf32>
    %cst_277 = arith.constant dense<0.000000e+00> : vector<1x1xf32>
    %589 = tpu.matmul %583, %588, %cst_277 {dimension_numbers = #tpu.dot_dimension_numbers<[1], [0], [0], [1], [0, 0, 1, 1], [], []>} : vector<1x32xf32>, vector<32x1xf32>, vector<1x1xf32> -> vector<1x1xf32>
    %c0_278 = arith.constant 0 : index
    %c0_279 = arith.constant 0 : index
    %590 = vector.load %arg7[%c0_278, %c0_279] : memref<32x1xf32, #tpu.memory_space<vmem>>, vector<32x1xf32>
    %cst_280 = arith.constant dense<0.000000e+00> : vector<1x1xf32>
    %591 = tpu.matmul %587, %590, %cst_280 {dimension_numbers = #tpu.dot_dimension_numbers<[1], [0], [0], [1], [0, 0, 1, 1], [], []>} : vector<1x32xf32>, vector<32x1xf32>, vector<1x1xf32> -> vector<1x1xf32>
    %592 = arith.addf %589, %591 : vector<1x1xf32>
    %c0_281 = arith.constant 0 : index
    %c0_282 = arith.constant 0 : index
    %593 = vector.load %arg6[%c0_281, %c0_282] : memref<1x1xf32, #tpu.memory_space<vmem>>, vector<1x1xf32>
    %594 = arith.addf %592, %593 : vector<1x1xf32>
    %c0_283 = arith.constant 0 : index
    %c0_284 = arith.constant 0 : index
    %c0_285 = arith.constant 0 : index
    %595 = vector.load %arg41[%c0_283, %c0_284, %c0_285] : memref<1x1x1xf32, #tpu.memory_space<vmem>>, vector<1x1x1xf32>
    %596 = vector.shape_cast %595 : vector<1x1x1xf32> to vector<1x1xf32>
    %597 = vector.shape_cast %594 : vector<1x1xf32> to vector<1x1x1xf32>
    tpu.vector_store %arg41[%c0_283, %c0_284, %c0_285], %597 {strides = array<i32>} : memref<1x1x1xf32, #tpu.memory_space<vmem>>, vector<1x1x1xf32>,
    %c0_286 = arith.constant 0 : index
    %c0_287 = arith.constant 0 : index
    %598 = vector.load %arg40[%c0_286, %c0_287] : memref<32x32xf32, #tpu.memory_space<vmem>>, vector<32x32xf32>
    %cst_288 = arith.constant dense<0.000000e+00> : vector<8x32xf32>
    %599 = tpu.matmul %547, %598, %cst_288 {dimension_numbers = #tpu.dot_dimension_numbers<[1], [0], [0], [1], [0, 0, 1, 1], [], []>} : vector<8x32xf32>, vector<32x32xf32>, vector<8x32xf32> -> vector<8x32xf32>
    %600 = tpu.transpose %567, [1, 0] : vector<128x32xf32> -> vector<32x128xf32>
    %cst_289 = arith.constant dense<0.000000e+00> : vector<8x128xf32>
    %601 = tpu.matmul %599, %600, %cst_289 {dimension_numbers = #tpu.dot_dimension_numbers<[1], [0], [0], [1], [0, 0, 1, 1], [], []>} : vector<8x32xf32>, vector<32x128xf32>, vector<8x128xf32> -> vector<8x128xf32>
    %c0_290 = arith.constant 0 : index
    %c0_291 = arith.constant 0 : index
    %602 = vector.load %arg39[%c0_290, %c0_291] : memref<1x1xf32, #tpu.memory_space<vmem>>, vector<1x1xf32>
    %603 = vector.broadcast %602 : vector<1x1xf32> to vector<8x128xf32>
    %604 = arith.addf %601, %603 : vector<8x128xf32>
    %cst_292 = arith.constant 0.000000e+00 : f32
    %605 = vector.broadcast %cst_292 : f32 to vector<8x128xf32>
    %606 = arith.subf %605, %604 : vector<8x128xf32>
    %607 = math.exp %606 : vector<8x128xf32>
    %cst_293 = arith.constant 1.000000e+00 : f32
    %608 = vector.broadcast %cst_293 : f32 to vector<8x128xf32>
    %609 = arith.addf %608, %607 : vector<8x128xf32>
    %610 = tpu.reciprocal %609 {approx = true} : vector<8x128xf32> -> vector<8x128xf32>
    %cst_294 = arith.constant 1.000000e+00 : f32
    %611 = vector.broadcast %cst_294 : f32 to vector<8x1xf32>
    %612 = arith.subf %611, %9 : vector<8x1xf32>
    %613 = vector.broadcast %612 : vector<8x1xf32> to vector<8x128xf32>
    %614 = vector.broadcast %571 : vector<1x128xf32> to vector<8x128xf32>
    %615 = arith.mulf %613, %614 : vector<8x128xf32>
    %616 = arith.mulf %610, %615 : vector<8x128xf32>
    %c0_295 = arith.constant 0 : index
    %c0_296 = arith.constant 0 : index
    %c0_297 = arith.constant 0 : index
    %617 = vector.load %arg42[%c0_295, %c0_296, %c0_297] : memref<1x8x128xf32, #tpu.memory_space<vmem>>, vector<1x8x128xf32>
    %618 = vector.shape_cast %617 : vector<1x8x128xf32> to vector<8x128xf32>
    %619 = vector.shape_cast %616 : vector<8x128xf32> to vector<1x8x128xf32>
    tpu.vector_store %arg42[%c0_295, %c0_296, %c0_297], %619 {strides = array<i32>} : memref<1x8x128xf32, #tpu.memory_space<vmem>>, vector<1x8x128xf32>,
    return
  }
  func.func @transform_0(%arg0: i32) -> (i32, i32, i32) {
    %c0_i32 = arith.constant 0 : i32
    %c0_i32_0 = arith.constant 0 : i32
    %c0_i32_1 = arith.constant 0 : i32
    return %arg0, %c0_i32, %c0_i32_0 : i32, i32, i32
  }
  func.func @transform_1(%arg0: i32) -> (i32, i32, i32) {
    %c0_i32 = arith.constant 0 : i32
    %c0_i32_0 = arith.constant 0 : i32
    %c0_i32_1 = arith.constant 0 : i32
    return %arg0, %c0_i32, %c0_i32_0 : i32, i32, i32
  }
  func.func @transform_2(%arg0: i32) -> (i32, i32, i32) {
    %c0_i32 = arith.constant 0 : i32
    %c0_i32_0 = arith.constant 0 : i32
    %c0_i32_1 = arith.constant 0 : i32
    return %arg0, %c0_i32, %c0_i32_0 : i32, i32, i32
  }
  func.func @transform_3(%arg0: i32) -> (i32, i32, i32) {
    %c0_i32 = arith.constant 0 : i32
    %c0_i32_0 = arith.constant 0 : i32
    %c0_i32_1 = arith.constant 0 : i32
    return %arg0, %c0_i32, %c0_i32_0 : i32, i32, i32
  }
  func.func @transform_4(%arg0: i32) -> (i32, i32, i32) {
    %c0_i32 = arith.constant 0 : i32
    %c0_i32_0 = arith.constant 0 : i32
    %c0_i32_1 = arith.constant 0 : i32
    return %arg0, %c0_i32, %c0_i32_0 : i32, i32, i32
  }
  func.func @transform_5(%arg0: i32) -> (i32, i32) {
    %c0_i32 = arith.constant 0 : i32
    %c0_i32_0 = arith.constant 0 : i32
    %c0_i32_1 = arith.constant 0 : i32
    return %c0_i32, %c0_i32_0 : i32, i32
  }
  func.func @transform_6(%arg0: i32) -> (i32, i32) {
    %c0_i32 = arith.constant 0 : i32
    %c0_i32_0 = arith.constant 0 : i32
    %c0_i32_1 = arith.constant 0 : i32
    return %c0_i32, %c0_i32_0 : i32, i32
  }
  func.func @transform_7(%arg0: i32) -> (i32, i32) {
    %c0_i32 = arith.constant 0 : i32
    %c0_i32_0 = arith.constant 0 : i32
    %c0_i32_1 = arith.constant 0 : i32
    return %c0_i32, %c0_i32_0 : i32, i32
  }
  func.func @transform_8(%arg0: i32) -> (i32, i32) {
    %c0_i32 = arith.constant 0 : i32
    %c0_i32_0 = arith.constant 0 : i32
    %c0_i32_1 = arith.constant 0 : i32
    return %c0_i32, %c0_i32_0 : i32, i32
  }
  func.func @transform_9(%arg0: i32) -> (i32, i32) {
    %c0_i32 = arith.constant 0 : i32
    %c0_i32_0 = arith.constant 0 : i32
    %c0_i32_1 = arith.constant 0 : i32
    return %c0_i32, %c0_i32_0 : i32, i32
  }
  func.func @transform_10(%arg0: i32) -> (i32, i32) {
    %c0_i32 = arith.constant 0 : i32
    %c0_i32_0 = arith.constant 0 : i32
    %c0_i32_1 = arith.constant 0 : i32
    return %c0_i32, %c0_i32_0 : i32, i32
  }
  func.func @transform_11(%arg0: i32) -> (i32, i32) {
    %c0_i32 = arith.constant 0 : i32
    %c0_i32_0 = arith.constant 0 : i32
    %c0_i32_1 = arith.constant 0 : i32
    return %c0_i32, %c0_i32_0 : i32, i32
  }
  func.func @transform_12(%arg0: i32) -> (i32, i32) {
    %c0_i32 = arith.constant 0 : i32
    %c0_i32_0 = arith.constant 0 : i32
    %c0_i32_1 = arith.constant 0 : i32
    return %c0_i32, %c0_i32_0 : i32, i32
  }
  func.func @transform_13(%arg0: i32) -> (i32, i32) {
    %c0_i32 = arith.constant 0 : i32
    %c0_i32_0 = arith.constant 0 : i32
    %c0_i32_1 = arith.constant 0 : i32
    return %c0_i32, %c0_i32_0 : i32, i32
  }
  func.func @transform_14(%arg0: i32) -> (i32, i32) {
    %c0_i32 = arith.constant 0 : i32
    %c0_i32_0 = arith.constant 0 : i32
    %c0_i32_1 = arith.constant 0 : i32
    return %c0_i32, %c0_i32_0 : i32, i32
  }
  func.func @transform_15(%arg0: i32) -> (i32, i32) {
    %c0_i32 = arith.constant 0 : i32
    %c0_i32_0 = arith.constant 0 : i32
    %c0_i32_1 = arith.constant 0 : i32
    return %c0_i32, %c0_i32_0 : i32, i32
  }
  func.func @transform_16(%arg0: i32) -> (i32, i32) {
    %c0_i32 = arith.constant 0 : i32
    %c0_i32_0 = arith.constant 0 : i32
    %c0_i32_1 = arith.constant 0 : i32
    return %c0_i32, %c0_i32_0 : i32, i32
  }
  func.func @transform_17(%arg0: i32) -> (i32, i32) {
    %c0_i32 = arith.constant 0 : i32
    %c0_i32_0 = arith.constant 0 : i32
    %c0_i32_1 = arith.constant 0 : i32
    return %c0_i32, %c0_i32_0 : i32, i32
  }
  func.func @transform_18(%arg0: i32) -> (i32, i32) {
    %c0_i32 = arith.constant 0 : i32
    %c0_i32_0 = arith.constant 0 : i32
    %c0_i32_1 = arith.constant 0 : i32
    return %c0_i32, %c0_i32_0 : i32, i32
  }
  func.func @transform_19(%arg0: i32) -> (i32, i32) {
    %c0_i32 = arith.constant 0 : i32
    %c0_i32_0 = arith.constant 0 : i32
    %c0_i32_1 = arith.constant 0 : i32
    return %c0_i32, %c0_i32_0 : i32, i32
  }
  func.func @transform_20(%arg0: i32) -> (i32, i32) {
    %c0_i32 = arith.constant 0 : i32
    %c0_i32_0 = arith.constant 0 : i32
    %c0_i32_1 = arith.constant 0 : i32
    return %c0_i32, %c0_i32_0 : i32, i32
  }
  func.func @transform_21(%arg0: i32) -> (i32, i32) {
    %c0_i32 = arith.constant 0 : i32
    %c0_i32_0 = arith.constant 0 : i32
    %c0_i32_1 = arith.constant 0 : i32
    return %c0_i32, %c0_i32_0 : i32, i32
  }
  func.func @transform_22(%arg0: i32) -> (i32, i32) {
    %c0_i32 = arith.constant 0 : i32
    %c0_i32_0 = arith.constant 0 : i32
    %c0_i32_1 = arith.constant 0 : i32
    return %c0_i32, %c0_i32_0 : i32, i32
  }
  func.func @transform_23(%arg0: i32) -> (i32, i32) {
    %c0_i32 = arith.constant 0 : i32
    %c0_i32_0 = arith.constant 0 : i32
    %c0_i32_1 = arith.constant 0 : i32
    return %c0_i32, %c0_i32_0 : i32, i32
  }
  func.func @transform_24(%arg0: i32) -> (i32, i32) {
    %c0_i32 = arith.constant 0 : i32
    %c0_i32_0 = arith.constant 0 : i32
    %c0_i32_1 = arith.constant 0 : i32
    return %c0_i32, %c0_i32_0 : i32, i32
  }
  func.func @transform_25(%arg0: i32) -> (i32, i32) {
    %c0_i32 = arith.constant 0 : i32
    %c0_i32_0 = arith.constant 0 : i32
    %c0_i32_1 = arith.constant 0 : i32
    return %c0_i32, %c0_i32_0 : i32, i32
  }
  func.func @transform_26(%arg0: i32) -> (i32, i32) {
    %c0_i32 = arith.constant 0 : i32
    %c0_i32_0 = arith.constant 0 : i32
    %c0_i32_1 = arith.constant 0 : i32
    return %c0_i32, %c0_i32_0 : i32, i32
  }
  func.func @transform_27(%arg0: i32) -> (i32, i32) {
    %c0_i32 = arith.constant 0 : i32
    %c0_i32_0 = arith.constant 0 : i32
    %c0_i32_1 = arith.constant 0 : i32
    return %c0_i32, %c0_i32_0 : i32, i32
  }
  func.func @transform_28(%arg0: i32) -> (i32, i32) {
    %c0_i32 = arith.constant 0 : i32
    %c0_i32_0 = arith.constant 0 : i32
    %c0_i32_1 = arith.constant 0 : i32
    return %c0_i32, %c0_i32_0 : i32, i32
  }
  func.func @transform_29(%arg0: i32) -> (i32, i32) {
    %c0_i32 = arith.constant 0 : i32
    %c0_i32_0 = arith.constant 0 : i32
    %c0_i32_1 = arith.constant 0 : i32
    return %c0_i32, %c0_i32_0 : i32, i32
  }
  func.func @transform_30(%arg0: i32) -> (i32, i32) {
    %c0_i32 = arith.constant 0 : i32
    %c0_i32_0 = arith.constant 0 : i32
    %c0_i32_1 = arith.constant 0 : i32
    return %c0_i32, %c0_i32_0 : i32, i32
  }
  func.func @transform_31(%arg0: i32) -> (i32, i32) {
    %c0_i32 = arith.constant 0 : i32
    %c0_i32_0 = arith.constant 0 : i32
    %c0_i32_1 = arith.constant 0 : i32
    return %c0_i32, %c0_i32_0 : i32, i32
  }
  func.func @transform_32(%arg0: i32) -> (i32, i32) {
    %c0_i32 = arith.constant 0 : i32
    %c0_i32_0 = arith.constant 0 : i32
    %c0_i32_1 = arith.constant 0 : i32
    return %c0_i32, %c0_i32_0 : i32, i32
  }
  func.func @transform_33(%arg0: i32) -> (i32, i32) {
    %c0_i32 = arith.constant 0 : i32
    %c0_i32_0 = arith.constant 0 : i32
    %c0_i32_1 = arith.constant 0 : i32
    return %c0_i32, %c0_i32_0 : i32, i32
  }
  func.func @transform_34(%arg0: i32) -> (i32, i32) {
    %c0_i32 = arith.constant 0 : i32
    %c0_i32_0 = arith.constant 0 : i32
    %c0_i32_1 = arith.constant 0 : i32
    return %c0_i32, %c0_i32_0 : i32, i32
  }
  func.func @transform_35(%arg0: i32) -> (i32, i32) {
    %c0_i32 = arith.constant 0 : i32
    %c0_i32_0 = arith.constant 0 : i32
    %c0_i32_1 = arith.constant 0 : i32
    return %c0_i32, %c0_i32_0 : i32, i32
  }
  func.func @transform_36(%arg0: i32) -> (i32, i32) {
    %c0_i32 = arith.constant 0 : i32
    %c0_i32_0 = arith.constant 0 : i32
    %c0_i32_1 = arith.constant 0 : i32
    return %c0_i32, %c0_i32_0 : i32, i32
  }
  func.func @transform_37(%arg0: i32) -> (i32, i32) {
    %c0_i32 = arith.constant 0 : i32
    %c0_i32_0 = arith.constant 0 : i32
    %c0_i32_1 = arith.constant 0 : i32
    return %c0_i32, %c0_i32_0 : i32, i32
  }
  func.func @transform_38(%arg0: i32) -> (i32, i32) {
    %c0_i32 = arith.constant 0 : i32
    %c0_i32_0 = arith.constant 0 : i32
    %c0_i32_1 = arith.constant 0 : i32
    return %c0_i32, %c0_i32_0 : i32, i32
  }
  func.func @transform_39(%arg0: i32) -> (i32, i32) {
    %c0_i32 = arith.constant 0 : i32
    %c0_i32_0 = arith.constant 0 : i32
    %c0_i32_1 = arith.constant 0 : i32
    return %c0_i32, %c0_i32_0 : i32, i32
  }
  func.func @transform_40(%arg0: i32) -> (i32, i32, i32) {
    %c0_i32 = arith.constant 0 : i32
    %c0_i32_0 = arith.constant 0 : i32
    %c0_i32_1 = arith.constant 0 : i32
    return %arg0, %c0_i32, %c0_i32_0 : i32, i32, i32
  }
  func.func @transform_41(%arg0: i32) -> (i32, i32, i32) {
    %c0_i32 = arith.constant 0 : i32
    %c0_i32_0 = arith.constant 0 : i32
    %c0_i32_1 = arith.constant 0 : i32
    return %arg0, %c0_i32, %c0_i32_0 : i32, i32, i32
  }
}

</mosaic_0001>

<bundles_post_ra>
// kernel: attention_predictor_forward.1
= control target key start
LH: loop header
LB: loop body
LE: loop exit
PB: predicated region body
PF: predicated region fallthrough
CT: control target
= control target key end

     0   :  { %s13703_s6 = smov 1   ;;  %s13704_s10 = smov 2   ;;  %s17399_s0 = inlined_call_operand.smem [shape: u32[42], index: -1, kind: input, shape index: {}] }
   0x1   :  { %s13759_s5 = sld [smem:[%s17399_s0]]   ;;  %s13705_s14 = smov 3  }
   0x2   :  { %s13764_s9 = sld [smem:[%s17399_s0 + %s13703_s6]]   ;;  %s13706_s18 = smov 4  }
   0x3   :  { %s13769_s13 = sld [smem:[%s17399_s0 + %s13704_s10]]   ;;  %s13707_s22 = smov 5  }
   0x4   :  { %s13774_s17 = sld [smem:[%s17399_s0 + %s13705_s14]]   ;;  %s13708_s26 = smov 6  }
   0x5   :  { %s13779_s21 = sld [smem:[%s17399_s0 + %s13706_s18]]   ;;  %s13709_s30 = smov 7  }
   0x6   :  { %s10180_s25 = sld [smem:[%s17399_s0 + %s13707_s22]]   ;;  %s13710_s4 = smov 8  }
   0x7   :  { %17459 = sst [smem:[#allocation4_spill]] %s13759_s5  ;;  %s13711_s10 = smov 9  }
   0x8   :  { %17460 = sst [smem:[#allocation5_spill]] %s13764_s9  ;;  %s13712_s15 = smov 10  }
   0x9   :  { %17461 = sst [smem:[#allocation6_spill]] %s13769_s13  ;;  %s13713_s20 = smov 11  }
   0xa   :  { %17462 = sst [smem:[#allocation7_spill]] %s13774_s17  ;;  %s13715_s1 = smov 13  }
   0xb   :  { %17463 = sst [smem:[#allocation8_spill]] %s13779_s21  ;;  %s13716_s7 = smov 14  }
   0xc   :  { %s13787_s29 = sld [smem:[%s17399_s0 + %s13708_s26]]   ;;  %v89_v0 = vstv %s10180_s25  ;;  %s13714_s26 = smov 12  }
   0xd   :  { %s13792_s3 = sld [smem:[%s17399_s0 + %s13709_s30]]   ;;  %90 = vst [vmem:[#allocation2] sm:$0x1] %v89_v0  ;;  %s13717_s25 = smov 15  }
   0xe   :  { %s13797_s8 = sld [smem:[%s17399_s0 + %s13710_s4]]   ;;  %s13719_s27 = smov 17  }
   0xf   :  { %s13802_s14 = sld [smem:[%s17399_s0 + %s13711_s10]]   ;;  %s13720_s4 = smov 18  }
  0x10   :  { %s13807_s19 = sld [smem:[%s17399_s0 + %s13712_s15]]  }
  0x11   :  { %s13812_s24 = sld [smem:[%s17399_s0 + %s13713_s20]]   ;;  %s13718_s20 = smov 16  }
  0x12   :  { %17464 = sst [smem:[#allocation9_spill]] %s13787_s29 }
  0x13   :  { %17465 = sst [smem:[#allocation10_spill]] %s13792_s3 }
  0x14   :  { %17466 = sst [smem:[#allocation11_spill]] %s13797_s8 }
  0x15   :  { %17467 = sst [smem:[#allocation12_spill]] %s13802_s14 }
  0x16   :  { %17468 = sst [smem:[#allocation13_spill]] %s13807_s19 }
  0x17   :  { %17469 = sst [smem:[#allocation14_spill]] %s13812_s24 }
  0x18   :  { %s13817_s30 = sld [smem:[%s17399_s0 + %s13714_s26]]  }
  0x19   :  { %s13822_s6 = sld [smem:[%s17399_s0 + %s13715_s1]]  }
  0x1a   :  { %s13827_s12 = sld [smem:[%s17399_s0 + %s13716_s7]]  }
  0x1b   :  { %s13832_s18 = sld [smem:[%s17399_s0 + %s13717_s25]]   ;;  %s13721_s25 = smov 19  }
  0x1c   :  { %s13837_s26 = sld [smem:[%s17399_s0 + %s13718_s20]]   ;;  %s13722_s20 = smov 20  }
  0x1d   :  { %s13842_s2 = sld [smem:[%s17399_s0 + %s13719_s27]]   ;;  %s13723_s27 = smov 21  }
  0x1e   :  { %17470 = sst [smem:[#allocation15_spill]] %s13817_s30 }
  0x1f   :  { %17471 = sst [smem:[#allocation16_spill]] %s13822_s6 }
  0x20   :  { %17472 = sst [smem:[#allocation17_spill]] %s13827_s12 }
  0x21   :  { %17473 = sst [smem:[#allocation18_spill]] %s13832_s18 }
  0x22   :  { %17474 = sst [smem:[#allocation19_spill]] %s13837_s26 }
  0x23   :  { %17475 = sst [smem:[#allocation20_spill]] %s13842_s2 }
  0x24   :  { %s13847_s11 = sld [smem:[%s17399_s0 + %s13720_s4]]   ;;  %s13724_s4 = smov 22  }
  0x25   :  { %s13852_s21 = sld [smem:[%s17399_s0 + %s13721_s25]]   ;;  %s13725_s25 = smov 23  }
  0x26   :  { %s13857_s3 = sld [smem:[%s17399_s0 + %s13722_s20]]   ;;  %s13726_s20 = smov 24  }
  0x27   :  { %s13862_s29 = sld [smem:[%s17399_s0 + %s13723_s27]]   ;;  %s13727_s27 = smov 25  }
  0x28   :  { %s13867_s18 = sld [smem:[%s17399_s0 + %s13724_s4]]   ;;  %s13728_s4 = smov 26  }
  0x29   :  { %s13872_s12 = sld [smem:[%s17399_s0 + %s13725_s25]]   ;;  %s13729_s25 = smov 27  }
  0x2a   :  { %17476 = sst [smem:[#allocation21_spill]] %s13847_s11 }
  0x2b   :  { %17477 = sst [smem:[#allocation22_spill]] %s13852_s21 }
  0x2c   :  { %17478 = sst [smem:[#allocation23_spill]] %s13857_s3 }
  0x2d   :  { %17479 = sst [smem:[#allocation24_spill]] %s13862_s29 }
  0x2e   :  { %s13877_s3 = sld [smem:[%s17399_s0 + %s13726_s20]]   ;;  %s13730_s20 = smov 28  }
  0x2f   :  { %s13882_s29 = sld [smem:[%s17399_s0 + %s13727_s27]]   ;;  %s13731_s27 = smov 29  }
  0x30   :  { %s13887_s11 = sld [smem:[%s17399_s0 + %s13728_s4]]   ;;  %s13732_s4 = smov 30  }
  0x31   :  { %s13892_s21 = sld [smem:[%s17399_s0 + %s13729_s25]]   ;;  %s13733_s25 = smov 31  }
  0x32   :  { %s13897_s2 = sld [smem:[%s17399_s0 + %s13730_s20]]   ;;  %s13734_s20 = smov 32  }
  0x33   :  { %s13902_s26 = sld [smem:[%s17399_s0 + %s13731_s27]]   ;;  %s13735_s27 = smov 33  }
  0x34   :  { %17480 = sst [smem:[#allocation25_spill]] %s13877_s3 }
  0x35   :  { %s13907_s14 = sld [smem:[%s17399_s0 + %s13732_s4]]   ;;  %s13736_s4 = smov 34  }
  0x36   :  { %17481 = sst [smem:[#allocation26_spill]] %s13887_s11 }
  0x37   :  { %17482 = sst [smem:[#allocation27_spill]] %s13892_s21 }
  0x38   :  { %s13912_s30 = sld [smem:[%s17399_s0 + %s13733_s25]]   ;;  %s13737_s25 = smov 35  }
  0x39   :  { %17483 = sst [smem:[#allocation28_spill]] %s13902_s26 }
  0x3a   :  { %s13917_s13 = sld [smem:[%s17399_s0 + %s13734_s20]]   ;;  %s13738_s20 = smov 36  }
  0x3b   :  { %17484 = sst [smem:[#allocation29_spill]] %s13907_s14 }
  0x3c   :  { %s13922_s8 = sld [smem:[%s17399_s0 + %s13735_s27]]   ;;  %s13739_s27 = smov 37  }
  0x3d   :  { %s13927_s19 = sld [smem:[%s17399_s0 + %s13736_s4]]   ;;  %s13740_s4 = smov 39  }
  0x3e   :  { %s13932_s24 = sld [smem:[%s17399_s0 + %s13737_s25]]   ;;  %s13741_s25 = smov 40  }
  0x3f   :  { %s13937_s6 = sld [smem:[%s17399_s0 + %s13738_s20]]   ;;  %s13742_s20 = smov 41  }
  0x40   :  { %s13942_s26 = sld [smem:[%s17399_s0 + %s13739_s27]]   ;;  %s13743_s27 = smov 38  }
  0x43   :  { %17485 = sst [smem:[#allocation30_spill]] %s13927_s19 }
  0x44   :  { %17486 = sst [smem:[#allocation31_spill]] %s13932_s24 }
  0x45   :  { %17487 = sst [smem:[#allocation32_spill]] %s13937_s6 }
  0x46   :  { %17488 = sst [smem:[#allocation33_spill]] %s13942_s26 }
  0x47   :  { %s13947_s19 = sld [smem:[%s17399_s0 + %s13740_s4]]   ;;  %s13962_s4 = smov 0  }
  0x48   :  { %s13952_s24 = sld [smem:[%s17399_s0 + %s13741_s25]]  }
  0x49   :  { %s13957_s6 = sld [smem:[%s17399_s0 + %s13742_s20]]  }
  0x4a   :  { %s10213_s26 = sld [smem:[%s17399_s0 + %s13743_s27]]  }
  0x50   :  { %v91_v1 = vstv %s10213_s26 }
  0x51   :  { %92 = vst [vmem:[#allocation3] sm:$0x1] %v91_v1 }
  0x52 LB: > { %s17489_s3 = sld [smem:[#allocation25_spill]]  ;;  %s17490_s21 = sld [smem:[#allocation27_spill]]  ;;  %s13701_s4 = sphi %s13962_s4, %s98_s4  }
  0x53   : > { %s17491_s14 = sld [smem:[#allocation29_spill]]  ;;  %s17492_s11 = sld [smem:[#allocation26_spill]] }
  0x54   : > { %s10217_s7 = sadd.s32 4294967295, %s13701_s4   ;;  %p10221_p0 = scmp.ge.s32.totalorder %s13701_s4, 1 }
  0x55   : > { %p1170_p1 = scmp.lt.s32.totalorder %s13701_s4, 3 }
  0x57   : > { %p1171_p2 = pnand %p10221_p0, %p1170_p1 }
  0x59   : > { %1174 = sbr.rel (%p1171_p2) target bundleno = 11774 (0x2dfe), region = 180 }
  0x60   : > { %v1417_v2 = vld [vmem:[%s13882_s29] sm:$0xff]  ;;  %v1418_v3 = vld [vmem:[%s13882_s29 + $0x8] sm:$0xff]  ;;  %v1419_v4 = vld [vmem:[%s13882_s29 + $0x10] sm:$0xff]  ;;  %p1286_p3 = scmp.lt.s32.totalorder %s10217_s7, 1  ;;  %v17427_v7 = vmov 0.0|0.0   ;;  %s17493_s9 = sld [smem:[#allocation5_spill]] }
  0x61   : > { %v13973_v5 = vpack.c.bf16 %v1418_v3, %v1417_v2  ;;  %v1420_v6 = vld [vmem:[%s13882_s29 + $0x18] sm:$0xff]  ;;  %12411 = vmatprep.subr.bf16.mxu0 %v17427_v7  ;;  %v1332_v8 = vld [vmem:[%s17490_s21] sm:$0xff]  ;;  %v1333_v9 = vld [vmem:[%s17490_s21 + $0x8] sm:$0xff]  ;;  %vm13745_vm0 = vmmov 0   ;;  %v17425_v14 = vmov 0.0   ;;  %s17494_s5 = sld [smem:[#allocation4_spill]] }
  0x62   : > { %v13979_v10 = vpack.c.bf16 %v1420_v6, %v1419_v4  ;;  %s17566_s7 = smov (!%p1286_p3, %s10217_s7), 1  ;;  %v13983_v11 = vpack.c.bf16 %v1333_v9, %v1332_v8  ;;  %v1334_v12 = vld [vmem:[%s17490_s21 + $0x10] sm:$0xff]  ;;  %v1335_v13 = vld [vmem:[%s17490_s21 + $0x18] sm:$0xff]  ;;  %11307 = vmatprep.mubr.msk.f32.mxu0 %vm13745_vm0, %v17425_v14  ;;  %vm1343_vm1 = vcmask 261120   ;;  %v10229_v33 = vld [vmem:[%s13867_s18] ss:$0 sm:$0xff] }
  0x63   : > { %12418 = vmatprep.subr.bf16.mxu1 %v13973_v5  ;;  %s10675_s0 = sshll.u32 %s17566_s7, 7  ;;  %v13993_v15 = vpack.c.bf16 %v1335_v13, %v1334_v12  ;;  %s14001_s10 = sshll.u32 %s17566_s7, 3  ;;  %vm1625_vm2 = vcmask 130048   ;;  %vm2435_vm6 = vcmask 523264   ;;  %vm3018_vm9 = vcmask 64512   ;;  %vm17334_vm12 = vmpackc.low %vm1343_vm1, %vm1343_vm1 }
  0x64   : > { %12420 = vmatpush3.bf16.msra.mxu1 %v13973_v5  ;;  %12413 = vmatpush3.bf16.msra.mxu0 %v13983_v11  ;;  %vm14102_vm3 = vmpackc.low %vm1625_vm2, %vm1625_vm2  ;;  %s17423_s15 = smov 96   ;;  %s17497_s17 = sld [smem:[#allocation7_spill]]  ;;  %vm9518_vm10 = vcmask 1040384   ;;  %vm9513_vm11 = vcmask 57344   ;;  %vm9826_vm13 = vcmask 0  }
  0x65   : > { %12422 = vmatprep.subr.bf16.mxu1 %v13979_v10  ;;  %12414 = vmatprep.subr.bf16.mxu0 %v17427_v7  ;;  %s17421_s20 = smov 112   ;;  %s17419_s22 = smov 80  }
  0x66   : > { %s13997_s26 = scalar_lea.vmem %s17493_s9, %s10675_s0  ;;  %s17501_s23 = sld [smem:[#allocation28_spill]] }
  0x67   : > { %v14004_v16 = vld [vmem:[%s13997_s26] sm:$0xff]  ;;  %v14010_v17 = vld [vmem:[%s13997_s26 + $0x8] sm:$0xff]  ;;  %s1289_s25 = scalar_lea.vmem %s17494_s5, %s14001_s10  ;;  %v14016_v18 = vld [vmem:[%s13997_s26 + $0x10] sm:$0xff]  ;;  %s17503_s27 = sld [smem:[#allocation16_spill]] }
  0x68   : > { %11318 = vmatprep.mubr.msk.f32.mxu1 %vm1343_vm1, %v14004_v16  ;;  %12424 = vmatpush3.bf16.msra.mxu1 %v13979_v10  ;;  %v14022_v19 = vld [vmem:[%s1289_s25] sm:$0xff]  ;;  %v14027_v20 = vld [vmem:[%s13997_s26 + $0x18] sm:$0xff]  ;;  %v14041_v22 = vld [vmem:[%s13997_s26 + $0x28] sm:$0xff]  ;;  %s17504_s28 = sld [smem:[#allocation14_spill]]  ;;  %s17505_s1 = sld [smem:[#allocation13_spill]] }
  0x69   : > { %12416 = vmatpush3.bf16.msra.mxu0 %v13993_v15  ;;  %12457 = vmatprep.subr.bf16.mxu1 %v17427_v7  ;;  %v14032_v21 = vld [vmem:[%s13997_s26 + $0x20] sm:$0xff]  ;;  %v14044_v23 = vld [vmem:[%s13997_s26 + $0x30] sm:$0xff]  ;;  %v14051_v24 = vld [vmem:[%s13997_s26 + $0x38] sm:$0xff]  ;;  %s17508_s0 = sld [smem:[#allocation31_spill]]  ;;  %s17509_s25 = sld [smem:[#allocation30_spill]] }
  0x6a   : > { %12425 = vmatprep.subr.bf16.mxu0 %v17427_v7  ;;  %v14054_v25 = vld [vmem:[%s13997_s26 + $0x40] sm:$0xff]  ;;  %v14061_v26 = vld [vmem:[%s13997_s26 + $0x48] sm:$0xff]  ;;  %v14064_v27 = vld [vmem:[%s13997_s26 + $0x50] sm:$0xff]  ;;  %s14159_s16 = scalar_lea.vmem %s17497_s17, %s17566_s7  ;;  %s17516_s5 = smov 80  }
  0x6b   : > { %11319 = vmatmul.mubr.msk.f32.vlgmr.msra.gmra.mrb[0].mxu1 %vm1343_vm1, %v14010_v17  ;;  %v14071_v28 = vld [vmem:[%s13997_s26 + $0x58] sm:$0xff]  ;;  %v14074_v29 = vld [vmem:[%s13997_s26 + $0x60] sm:$0xff]  ;;  %v14081_v30 = vld [vmem:[%s13997_s26 + $0x68] sm:$0xff]  ;;  %s17517_s9 = sld [smem:[#allocation15_spill]]  ;;  %s17524_s17 = sld [smem:[#allocation21_spill]] }
  0x6c   : > { %11321 = vmatprep.mubr.msk.f32.mxu1 %vm1343_vm1, %v14016_v18  ;;  %11308 = vmatmul.mubr.msk.f32.vlgmr.msra.gmra.mrb[0].mxu0 %vm1343_vm1, %v14022_v19  ;;  %v14084_v31 = vld [vmem:[%s13997_s26 + $0x70] sm:$0xff]  ;;  %v14091_v32 = vld [vmem:[%s13997_s26 + $0x78] sm:$0xff]  ;;  %s17527_s21 = sld [smem:[#allocation17_spill]] }
  0x6d   : > { %11374 = vmatprep.mubr.msk.f32.mxu0 %vm13745_vm0, %v17425_v14 }
  0x6f   : > { %11322 = vmatmul.mubr.msk.f32.gmra.mrb[2].mxu1 %vm1343_vm1, %v14027_v20 }
  0x70   : > { %11324 = vmatprep.mubr.msk.f32.mxu1 %vm1343_vm1, %v14032_v21 }
  0x73   : > { %11325 = vmatmul.mubr.msk.f32.gmra.mrb[4].mxu1 %vm1343_vm1, %v14041_v22 }
  0x74   : > { %11327 = vmatprep.mubr.msk.f32.mxu1 %vm1343_vm1, %v14044_v23 }
  0x77   : > { %11328 = vmatmul.mubr.msk.f32.gmra.mrb[6].mxu1 %vm1343_vm1, %v14051_v24 }
  0x78   : > { %11330 = vmatprep.mubr.msk.f32.mxu1 %vm1343_vm1, %v14054_v25 }
  0x7b   : > { %11331 = vmatmul.mubr.msk.f32.gmra.mrb[8].mxu1 %vm1343_vm1, %v14061_v26 }
  0x7c   : > { %11333 = vmatprep.mubr.msk.f32.mxu1 %vm1343_vm1, %v14064_v27 }
  0x7f   : > { %11334 = vmatmul.mubr.msk.f32.gmra.mrb[10].mxu1 %vm1343_vm1, %v14071_v28 }
  0x80   : > { %11336 = vmatprep.mubr.msk.f32.mxu1 %vm1343_vm1, %v14074_v29 }
  0x83   : > { %11337 = vmatmul.mubr.msk.f32.gmra.mrb[12].mxu1 %vm1343_vm1, %v14081_v30 }
  0x84   : > { %11339 = vmatprep.mubr.msk.f32.mxu1 %vm1343_vm1, %v14084_v31 }
  0x87   : > { %11340 = vmatmul.mubr.msk.f32.gmra.mrb[14].mxu1 %vm1343_vm1, %v14091_v32 }
  0x88   : > { %11409 = vmatprep.mubr.msk.f32.mxu1 %vm13745_vm0, %v17425_v14 }
 0x13e   : > { %v11320_v34 = vpop.f32.mrb[0].mxu1 }
 0x13f   : > { %v1548_v35 = vadd.f32 %v11320_v34, %v10229_v33  ;;  %v1542_v36 = vpop.f32.mrb[1].mxu1  ;;  %v14098_v37 = vpop.f32.mrb[0].mxu0 }
 0x140   : > { %v1543_v38 = vadd.f32 %v10229_v33, %v1542_v36  ;;  %v11309_v39 = vpop.f32.mrb[1].mxu0 }
 0x142   : > { %v12426_v41 = vpack.c.bf16 %v1548_v35, %v1543_v38  ;;  %v11323_v42 = vpop.f32.mrb[2].mxu1  ;;  %v14106_v43 = vpack.i.bf16 %v1548_v35, %v1543_v38 }
 0x143   : > { %v1558_v44 = vadd.f32 %v11323_v42, %v10229_v33  ;;  %v1552_v45 = vpop.f32.mrb[3].mxu1 }
 0x144   : > { %12428 = vmatpush3.bf16.xpose.msk.msra.mxu0 %vm14102_vm3, %v12426_v41  ;;  %v1553_v46 = vadd.f32 %v10229_v33, %v1552_v45 }
 0x145   : > { %12429 = vmatprep.subr.bf16.mxu0 %v17427_v7 }
 0x146   : > { %v12430_v47 = vpack.c.bf16 %v1558_v44, %v1553_v46  ;;  %v14111_v48 = vpack.i.bf16 %v1558_v44, %v1553_v46  ;;  %v11326_v49 = vpop.f32.mrb[4].mxu1 }
 0x147   : > { %v1568_v50 = vadd.f32 %v11326_v49, %v10229_v33  ;;  %v1562_v51 = vpop.f32.mrb[5].mxu1 }
 0x148   : > { %12973 = vrot.lane.b32.xlu1 %v14111_v48, %s17423_s15  ;;  %v1563_v52 = vadd.f32 %v10229_v33, %v1562_v51  ;;  %v1750_v51 = vlaneseq }
 0x14a   : > { %v12434_v53 = vpack.c.bf16 %v1568_v50, %v1563_v52  ;;  %v14115_v54 = vpack.i.bf16 %v1568_v50, %v1563_v52  ;;  %v11329_v55 = vpop.f32.mrb[6].mxu1  ;;  %v13748_v50 = vmov 0   ;;  %v1330_v52 = vld [vmem:[%s14159_s16] sm:$0x1] }
 0x14b   : > { %v1578_v56 = vadd.f32 %v11329_v55, %v10229_v33  ;;  %v1572_v57 = vpop.f32.mrb[7].mxu1  ;;  %13207 = vset.pattern.permute.xlu1 %v13748_v50  ;;  %13208 = vset.pattern.permute.xlu0 %v13748_v50  ;;  %vm1748_vm4 = vcmp.gt.f32.partialorder %v1330_v52, 0.5 }
 0x14c   : > { %12432 = vmatpush3.bf16.xpose.msk.msra.mxu0 %vm14102_vm3, %v12430_v47  ;;  %12978 = vrot.lane.b32.xlu1 %v14115_v54, %s17423_s15  ;;  %v1573_v58 = vadd.f32 %v10229_v33, %v1572_v57 }
 0x14d   : > { %12433 = vmatprep.subr.bf16.mxu0 %v17427_v7 }
 0x14e   : > { %v12438_v59 = vpack.c.bf16 %v1578_v56, %v1573_v58  ;;  %v11332_v60 = vpop.f32.mrb[8].mxu1  ;;  %v14122_v61 = vpack.i.bf16 %v1578_v56, %v1573_v58 }
 0x14f   : > { %v1588_v62 = vadd.f32 %v11332_v60, %v10229_v33  ;;  %v1582_v63 = vpop.f32.mrb[9].mxu1 }
 0x150   : > { %v1583_v0 = vadd.f32 %v10229_v33, %v1582_v63 }
 0x152   : > { %v12442_v1 = vpack.c.bf16 %v1588_v62, %v1583_v0  ;;  %v11335_v2 = vpop.f32.mrb[10].mxu1  ;;  %v14124_v3 = vpack.i.bf16 %v1588_v62, %v1583_v0 }
 0x153   : > { %v1598_v4 = vadd.f32 %v11335_v2, %v10229_v33  ;;  %v1592_v6 = vpop.f32.mrb[11].mxu1 }
 0x154   : > { %12436 = vmatpush3.bf16.xpose.msk.msra.mxu0 %vm14102_vm3, %v12434_v53  ;;  %v1593_v8 = vadd.f32 %v10229_v33, %v1592_v6  ;;  %v1751_v53 = vshrl.u32 %v1750_v51, 7 }
 0x155   : > { %12437 = vmatprep.subr.bf16.mxu0 %v17427_v7 }
 0x156   : > { %v12446_v9 = vpack.c.bf16 %v1598_v4, %v1593_v8  ;;  %v11338_v12 = vpop.f32.mrb[12].mxu1  ;;  %v14129_v13 = vpack.i.bf16 %v1598_v4, %v1593_v8  ;;  %v14162_v55 = vsub.s32 0, %v1751_v53 }
 0x157   : > { %v1608_v34 = vadd.f32 %v11338_v12, %v10229_v33  ;;  %v1602_v35 = vpop.f32.mrb[13].mxu1 }
 0x158   : > { %v1603_v36 = vadd.f32 %v10229_v33, %v1602_v35  ;;  %17498 = vst [vmem:[#allocation34_spill] sm:$0xff] %v14162_v55 }
 0x15a   : > { %v12450_v38 = vpack.c.bf16 %v1608_v34, %v1603_v36  ;;  %v11341_v39 = vpop.f32.mrb[14].mxu1  ;;  %v14131_v41 = vpack.i.bf16 %v1608_v34, %v1603_v36 }
 0x15b   : > { %v1618_v42 = vadd.f32 %v11341_v39, %v10229_v33  ;;  %v1612_v44 = vpop.f32.mrb[15].mxu1 }
 0x15c   : > { %12440 = vmatpush3.bf16.xpose.msk.msra.mxu0 %vm14102_vm3, %v12438_v59  ;;  %v1613_v45 = vadd.f32 %v10229_v33, %v1612_v44  ;;  %v10227_v33 = vld [vmem:[%s17489_s3] ss:$0 sm:$0xff] }
 0x15d   : > { %12441 = vmatprep.subr.bf16.mxu0 %v17427_v7  ;;  %v1414_v49 = vadd.f32 %v10227_v33, %v14098_v37  ;;  %v1749_v37 = vsel %vm1748_vm4, 1, %v13748_v50 }
 0x15e   : > { %v12454_v46 = vpack.c.bf16 %v1618_v42, %v1613_v45  ;;  %v14136_v47 = vpack.i.bf16 %v1618_v42, %v1613_v45  ;;  %v1753_v56 = vrot.slane %v1749_v37, %v14162_v55 }
 0x160   : > { %vm14166_vm5 = vcmp.eq.s32.totalorder %v1753_v56, 1 }
 0x164   : > { %12444 = vmatpush3.bf16.xpose.msk.msra.mxu0 %vm14102_vm3, %v12442_v1 }
 0x165   : > { %12445 = vmatprep.subr.bf16.mxu0 %v17427_v7 }
 0x16c   : > { %12448 = vmatpush3.bf16.xpose.msk.msra.mxu0 %vm14102_vm3, %v12446_v9 }
 0x16d   : > { %12449 = vmatprep.subr.bf16.mxu0 %v17427_v7 }
 0x174   : > { %12452 = vmatpush3.bf16.xpose.msk.msra.mxu0 %vm14102_vm3, %v12450_v38 }
 0x175   : > { %12453 = vmatprep.subr.bf16.mxu0 %v17427_v7 }
 0x17c   : > { %12456 = vmatpush3.bf16.xpose.msk.msra.mxu0 %vm14102_vm3, %v12454_v46 }
 0x17d   : > { %12513 = vmatprep.subr.bf16.mxu0 %v17427_v7 }
 0x183   : > { %11375 = vmatmul.mubr.msk.f32.vlgmr.msra.gmra.mrb[2].mxu0 %vm1625_vm2, %v1414_v49 }
 0x184   : > { %11479 = vmatprep.mubr.msk.f32.mxu0 %vm13745_vm0, %v17425_v14 }
 0x1ba   : > { %v12974_v2 = vpop.permute.xlu1 %12973 }
 0x1bb   : > { %v12976_v9 = vunpack.i.h.bf16 %v12974_v2  ;;  %v12975_v12 = vunpack.i.l.bf16 %v12974_v2 }
 0x1be   : > { %v12979_v35 = vpop.permute.xlu1 %12978 }
 0x1bf   : > { %v12981_v38 = vunpack.i.h.bf16 %v12979_v35  ;;  %v12980_v39 = vunpack.i.l.bf16 %v12979_v35 }
 0x1c1   : > { %v12464_v44 = vpack.c.bf16 %v12981_v38, %v12980_v39 }
 0x256   : > { %v1743_v57 = vpop.f32.mrb[2].mxu0 }
 0x257   : > { %v1747_v59 = vmul.f32 0.25, %v1743_v57  ;;  %v11376_v60 = vpop.f32.mrb[3].mxu0 }
 0x259   : > { %v1755_v62 = vsel %vm14166_vm5, -1e+30, %v1747_v59 }
 0x25a   : > { %1756 = vmax.xlane.f32.xlu0 %v1755_v62 }
 0x270   : > { %12968 = vrot.lane.b32.xlu0 %v14106_v43, %s17423_s15 }
 0x274   : > { %12983 = vrot.lane.b32.xlu0 %v14122_v61, %s17423_s15 }
 0x278   : > { %12988 = vrot.lane.b32.xlu0 %v14124_v3, %s17423_s15 }
 0x27c   : > { %12993 = vrot.lane.b32.xlu0 %v14129_v13, %s17423_s15 }
 0x280   : > { %12998 = vrot.lane.b32.xlu0 %v14131_v41, %s17423_s15 }
 0x284   : > { %13003 = vrot.lane.b32.xlu0 %v14136_v47, %s17423_s15 }
 0x288   : > { %13013 = vrot.lane.b32.xlu0 %v14111_v48, %s17421_s20 }
 0x28c   : > { %13018 = vrot.lane.b32.xlu0 %v14115_v54, %s17421_s20 }
 0x290   : > { %13023 = vrot.lane.b32.xlu0 %v14122_v61, %s17421_s20 }
 0x294   : > { %13028 = vrot.lane.b32.xlu0 %v14124_v3, %s17421_s20 }
 0x298   : > { %13038 = vrot.lane.b32.xlu0 %v14131_v41, %s17421_s20 }
 0x29c   : > { %1883 = vrot.lane.b32.xlu0 %v1414_v49, %s17421_s20 }
 0x2a0   : > { %13048 = vrot.lane.b32.xlu0 %v14106_v43, %s17419_s22 }
 0x2a4   : > { %13053 = vrot.lane.b32.xlu0 %v14111_v48, %s17419_s22  ;;  %v12461_v48 = vpack.c.bf16 %v12976_v9, %v12975_v12 }
 0x2a8   : > { %13063 = vrot.lane.b32.xlu0 %v14122_v61, %s17419_s22 }
 0x2e7   : > { %v1757_v63 = vpop.xlane.xlu0 %1756 }
 0x2e8   : > { %v1758_v0 = vsub.f32 %v1755_v62, %v1757_v63 }
 0x2ea   : > { %v1759_v1 = vmul.f32 1.442695, %v1758_v0 }
 0x2eb   : > { %v12969_v4 = vpop.permute.xlu0 %12968 }
 0x2ec   : > { %13209 = vpow2.f32 %v1759_v1  ;;  %v12971_v6 = vunpack.i.h.bf16 %v12969_v4  ;;  %v12970_v8 = vunpack.i.l.bf16 %v12969_v4 }
 0x2ee   : > { %v12458_v34 = vpack.c.bf16 %v12971_v6, %v12970_v8 }
 0x2ef   : > { %v12984_v36 = vpop.permute.xlu0 %12983 }
 0x2f0   : > { %12459 = vmatpush3.bf16.msra.mxu1 %v12458_v34  ;;  %v12986_v45 = vunpack.i.h.bf16 %v12984_v36  ;;  %v12985_v46 = vunpack.i.l.bf16 %v12984_v36 }
 0x2f1   : > { %12460 = vmatprep.subr.bf16.mxu1 %v17427_v7 }
 0x2f2   : > { %v12467_v49 = vpack.c.bf16 %v12986_v45, %v12985_v46 }
 0x2f3   : > { %v12989_v61 = vpop.permute.xlu0 %12988 }
 0x2f4   : > { %12462 = vmatpush3.bf16.msra.mxu1 %v12461_v48  ;;  %v12991_v51 = vunpack.i.h.bf16 %v12989_v61  ;;  %v12990_v52 = vunpack.i.l.bf16 %v12989_v61 }
 0x2f5   : > { %12463 = vmatprep.subr.bf16.mxu1 %v17427_v7 }
 0x2f6   : > { %v13210_v42 = vpop.eup %13209  ;;  %v12470_v37 = vpack.c.bf16 %v12991_v51, %v12990_v52 }
 0x2f7   : > { %1761 = vadd.xlane.f32.xlu1 %v13210_v42  ;;  %v12994_v33 = vpop.permute.xlu0 %12993 }
 0x2f8   : > { %12465 = vmatpush3.bf16.msra.mxu1 %v12464_v44  ;;  %v12996_v56 = vunpack.i.h.bf16 %v12994_v33  ;;  %v12995_v57 = vunpack.i.l.bf16 %v12994_v33 }
 0x2f9   : > { %12466 = vmatprep.subr.bf16.mxu1 %v17427_v7 }
 0x2fa   : > { %v12473_v60 = vpack.c.bf16 %v12996_v56, %v12995_v57 }
 0x2fb   : > { %v12999_v53 = vpop.permute.xlu0 %12998 }
 0x2fc   : > { %12468 = vmatpush3.bf16.msra.mxu1 %v12467_v49  ;;  %v13001_v62 = vunpack.i.h.bf16 %v12999_v53  ;;  %v13000_v63 = vunpack.i.l.bf16 %v12999_v53 }
 0x2fd   : > { %12469 = vmatprep.subr.bf16.mxu1 %v17427_v7 }
 0x2fe   : > { %v12476_v1 = vpack.c.bf16 %v13001_v62, %v13000_v63 }
 0x2ff   : > { %v13004_v59 = vpop.permute.xlu0 %13003 }
 0x300   : > { %12471 = vmatpush3.bf16.msra.mxu1 %v12470_v37  ;;  %v13006_v2 = vunpack.i.h.bf16 %v13004_v59  ;;  %v13005_v4 = vunpack.i.l.bf16 %v13004_v59 }
 0x301   : > { %12472 = vmatprep.subr.bf16.mxu1 %v17427_v7 }
 0x302   : > { %v12479_v8 = vpack.c.bf16 %v13006_v2, %v13005_v4 }
 0x303   : > { %v13014_v0 = vpop.permute.xlu0 %13013 }
 0x304   : > { %12474 = vmatpush3.bf16.msra.mxu1 %v12473_v60  ;;  %v13016_v56 = vunpack.i.h.bf16 %v13014_v0  ;;  %v13015_v57 = vunpack.i.l.bf16 %v13014_v0 }
 0x305   : > { %12475 = vmatprep.subr.bf16.mxu1 %v17427_v7 }
 0x306   : > { %v12486_v59 = vpack.c.bf16 %v13016_v56, %v13015_v57 }
 0x307   : > { %v13019_v6 = vpop.permute.xlu0 %13018 }
 0x308   : > { %13008 = vrot.lane.b32.xlu1 %v14106_v43, %s17421_s20  ;;  %12477 = vmatpush3.bf16.msra.mxu1 %v12476_v1  ;;  %v13021_v60 = vunpack.i.h.bf16 %v13019_v6 }
 0x309   : > { %12478 = vmatprep.subr.bf16.mxu1 %v17427_v7 }
 0x30b   : > { %v13024_v9 = vpop.permute.xlu0 %13023 }
 0x30c   : > { %13033 = vrot.lane.b32.xlu1 %v14129_v13, %s17421_s20  ;;  %12480 = vmatpush3.bf16.msra.mxu1 %v12479_v8  ;;  %v13026_v63 = vunpack.i.h.bf16 %v13024_v9  ;;  %v13025_v1 = vunpack.i.l.bf16 %v13024_v9 }
 0x30d   : > { %12481 = vmatprep.subr.bf16.mxu1 %v17427_v7 }
 0x30e   : > { %v12494_v2 = vpack.c.bf16 %v13026_v63, %v13025_v1 }
 0x30f   : > { %v13029_v12 = vpop.permute.xlu0 %13028 }
 0x310   : > { %13043 = vrot.lane.b32.xlu1 %v14136_v47, %s17421_s20  ;;  %v13031_v0 = vunpack.i.h.bf16 %v13029_v12  ;;  %v13030_v4 = vunpack.i.l.bf16 %v13029_v12 }
 0x312   : > { %v12498_v8 = vpack.c.bf16 %v13031_v0, %v13030_v4 }
 0x313   : > { %v13039_v34 = vpop.permute.xlu0 %13038 }
 0x317   : > { %v14215_v35 = vpop.permute.xlu0 %1883 }
 0x31b   : > { %v13049_v36 = vpop.permute.xlu0 %13048 }
 0x31c   : > { %v13051_v43 = vunpack.i.h.bf16 %v13049_v36  ;;  %v13050_v48 = vunpack.i.l.bf16 %v13049_v36 }
 0x31e   : > { %v12514_v38 = vpack.c.bf16 %v13051_v43, %v13050_v48  ;;  %v13041_v48 = vunpack.i.h.bf16 %v13039_v34 }
 0x31f   : > { %v13054_v39 = vpop.permute.xlu0 %13053 }
 0x320   : > { %v13056_v61 = vunpack.i.h.bf16 %v13054_v39  ;;  %v13055_v44 = vunpack.i.l.bf16 %v13054_v39  ;;  %12515 = vmatpush3.bf16.msra.mxu0 %v12514_v38  ;;  %v13040_v38 = vunpack.i.l.bf16 %v13039_v34 }
 0x321   : > { %12516 = vmatprep.subr.bf16.mxu0 %v17427_v7 }
 0x322   : > { %v12517_v45 = vpack.c.bf16 %v13056_v61, %v13055_v44  ;;  %v12506_v12 = vpack.c.bf16 %v13041_v48, %v13040_v38 }
 0x324   : > { %12518 = vmatpush3.bf16.msra.mxu0 %v12517_v45 }
 0x325   : > { %12519 = vmatprep.subr.bf16.mxu0 %v17427_v7 }
 0x384   : > { %v1762_v46 = vpop.xlane.xlu1 %1761 }
 0x385   : > { %13211 = vrcp.f32 %v1762_v46  ;;  %v1621_v46 = vld [vmem:[%s17492_s11] sm:$0xff] }
 0x388   : > { %v13009_v33 = vpop.permute.xlu1 %13008 }
 0x389   : > { %v13011_v49 = vunpack.i.h.bf16 %v13009_v33  ;;  %v13010_v51 = vunpack.i.l.bf16 %v13009_v33  ;;  %v1622_v33 = vld [vmem:[%s17492_s11 + $0x8] sm:$0xff] }
 0x38b   : > { %v12482_v37 = vpack.c.bf16 %v13011_v49, %v13010_v51  ;;  %v14247_v49 = vpack.c.bf16 %v1622_v33, %v1621_v46 }
 0x38c   : > { %v13034_v36 = vpop.permute.xlu1 %13033 }
 0x38d   : > { %v13035_v43 = vunpack.i.l.bf16 %v13034_v36 }
 0x38f   : > { %v13212_v52 = vpop.eup %13211 }
 0x390   : > { %v1764_v53 = vmul.f32 %v13212_v52, %v13210_v42  ;;  %v13020_v42 = vunpack.i.l.bf16 %v13019_v6  ;;  %v13036_v6 = vunpack.i.h.bf16 %v13034_v36  ;;  %v13044_v39 = vpop.permute.xlu1 %13043 }
 0x391   : > { %v13046_v61 = vunpack.i.h.bf16 %v13044_v39  ;;  %v13045_v44 = vunpack.i.l.bf16 %v13044_v39 }
 0x392   : > { %11410 = vmatmul.mubr.f32.vlgmr.msra.gmra.mrb[16].mxu1 %v1764_v53  ;;  %v12490_v62 = vpack.c.bf16 %v13021_v60, %v13020_v42  ;;  %v12502_v9 = vpack.c.bf16 %v13036_v6, %v13035_v43 }
 0x393   : > { %12484 = vmatpush3.bf16.xpose.msk.msra.mxu1 %vm14102_vm3, %v12482_v37  ;;  %11444 = vmatprep.mubr.msk.f32.mxu1 %vm13745_vm0, %v17425_v14  ;;  %v12510_v45 = vpack.c.bf16 %v13046_v61, %v13045_v44 }
 0x394   : > { %12485 = vmatprep.subr.bf16.mxu1 %v17427_v7 }
 0x39b   : > { %12488 = vmatpush3.bf16.xpose.msk.msra.mxu1 %vm14102_vm3, %v12486_v59  ;;  %v13064_v59 = vpop.permute.xlu0 %13063 }
 0x39c   : > { %12489 = vmatprep.subr.bf16.mxu1 %v17427_v7  ;;  %v13065_v0 = vunpack.i.l.bf16 %v13064_v59 }
 0x3a3   : > { %12492 = vmatpush3.bf16.xpose.msk.msra.mxu1 %vm14102_vm3, %v12490_v62 }
 0x3a4   : > { %12493 = vmatprep.subr.bf16.mxu1 %v17427_v7 }
 0x3ab   : > { %12496 = vmatpush3.bf16.xpose.msk.msra.mxu1 %vm14102_vm3, %v12494_v2 }
 0x3ac   : > { %12497 = vmatprep.subr.bf16.mxu1 %v17427_v7 }
 0x3b3   : > { %12500 = vmatpush3.bf16.xpose.msk.msra.mxu1 %vm14102_vm3, %v12498_v8 }
 0x3b4   : > { %12501 = vmatprep.subr.bf16.mxu1 %v17427_v7 }
 0x3bb   : > { %12504 = vmatpush3.bf16.xpose.msk.msra.mxu1 %vm14102_vm3, %v12502_v9 }
 0x3bc   : > { %12505 = vmatprep.subr.bf16.mxu1 %v17427_v7 }
 0x3c3   : > { %12508 = vmatpush3.bf16.xpose.msk.msra.mxu1 %vm14102_vm3, %v12506_v12 }
 0x3c4   : > { %12509 = vmatprep.subr.bf16.mxu1 %v17427_v7 }
 0x3cb   : > { %12512 = vmatpush3.bf16.xpose.msk.msra.mxu1 %vm14102_vm3, %v12510_v45 }
 0x3cc   : > { %12540 = vmatprep.subr.bf16.mxu1 %v17427_v7 }
 0x3d2   : > { %11445 = vmatmul.mubr.msk.f32.vlgmr.msra.gmra.mrb[18].mxu1 %vm1625_vm2, %v14215_v35 }
 0x3d3   : > { %12542 = vmatpush3.bf16.msra.mxu1 %v14247_v49  ;;  %11493 = vmatprep.mubr.msk.f32.mxu1 %vm13745_vm0, %v17425_v14 }
 0x3d4   : > { %12549 = vmatprep.subr.bf16.mxu1 %v17427_v7 }
 0x465   : > { %v1879_v34 = vpop.f32.mrb[16].mxu1 }
 0x466   : > { %v11411_v51 = vpop.f32.mrb[17].mxu1  ;;  %11494 = vmatmul.mubr.msk.f32.vlgmr.msra.gmra.mrb[20].mxu1 %vm1625_vm2, %v1879_v34 }
 0x467   : > { %11523 = vmatprep.mubr.msk.f32.mxu1 %vm13745_vm0, %v17425_v14 }
 0x4a5   : > { %v2017_v52 = vpop.f32.mrb[18].mxu1 }
 0x4a6   : > { %v2021_v53 = vmul.f32 0.25, %v2017_v52  ;;  %v11446_v37 = vpop.f32.mrb[19].mxu1  ;;  %v1623_v52 = vld [vmem:[%s17492_s11 + $0x10] sm:$0xff] }
 0x4a8   : > { %v2022_v35 = vsel %vm14166_vm5, -1e+30, %v2021_v53  ;;  %v1624_v53 = vld [vmem:[%s17492_s11 + $0x18] sm:$0xff]  ;;  %s17522_s11 = sld [smem:[#allocation20_spill]] }
 0x4a9   : > { %2023 = vmax.xlane.f32.xlu1 %v2022_v35 }
 0x4ba   : > { %13058 = vrot.lane.b32.xlu1 %v14115_v54, %s17419_s22  ;;  %v13066_v54 = vunpack.i.h.bf16 %v13064_v59 }
 0x4be   : > { %13068 = vrot.lane.b32.xlu1 %v14124_v3, %s17419_s22 }
 0x4c2   : > { %13073 = vrot.lane.b32.xlu1 %v14129_v13, %s17419_s22  ;;  %v12523_v13 = vpack.c.bf16 %v13066_v54, %v13065_v0 }
 0x4c6   : > { %13078 = vrot.lane.b32.xlu1 %v14131_v41, %s17419_s22 }
 0x536   : > { %v2024_v56 = vpop.xlane.xlu1 %2023 }
 0x537   : > { %v2025_v57 = vsub.f32 %v2022_v35, %v2024_v56  ;;  %v14278_v35 = vpack.c.bf16 %v1624_v53, %v1623_v52  ;;  %v10283_v53 = vld [vmem:[%s13922_s8] ss:$0 sm:$0xff] }
 0x539   : > { %v2026_v60 = vmul.f32 1.442695, %v2025_v57  ;;  %v2292_v42 = vpop.f32.mrb[20].mxu1 }
 0x53a   : > { %v13059_v62 = vpop.permute.xlu1 %13058  ;;  %v11495_v63 = vpop.f32.mrb[21].mxu1 }
 0x53b   : > { %13213 = vpow2.f32 %v2026_v60  ;;  %v13061_v1 = vunpack.i.h.bf16 %v13059_v62  ;;  %v13060_v2 = vunpack.i.l.bf16 %v13059_v62  ;;  %v10282_v60 = vld [vmem:[%s13872_s12] ss:$0 sm:$0xff] }
 0x53d   : > { %v12520_v4 = vpack.c.bf16 %v13061_v1, %v13060_v2 }
 0x53e   : > { %v13069_v3 = vpop.permute.xlu1 %13068 }
 0x53f   : > { %12521 = vmatpush3.bf16.msra.mxu0 %v12520_v4  ;;  %v13071_v8 = vunpack.i.h.bf16 %v13069_v3  ;;  %v13070_v41 = vunpack.i.l.bf16 %v13069_v3 }
 0x540   : > { %12522 = vmatprep.subr.bf16.mxu0 %v17427_v7 }
 0x541   : > { %v12526_v43 = vpack.c.bf16 %v13071_v8, %v13070_v41  ;;  %v2336_v41 = vld [vmem:[%s17491_s14 + $0x8] sm:$0xff] }
 0x542   : > { %v13074_v36 = vpop.permute.xlu1 %13073 }
 0x543   : > { %12524 = vmatpush3.bf16.msra.mxu0 %v12523_v13  ;;  %v13076_v9 = vunpack.i.h.bf16 %v13074_v36  ;;  %v13075_v48 = vunpack.i.l.bf16 %v13074_v36 }
 0x544   : > { %12525 = vmatprep.subr.bf16.mxu0 %v17427_v7 }
 0x545   : > { %v13214_v6 = vpop.eup %13213  ;;  %v12529_v12 = vpack.c.bf16 %v13076_v9, %v13075_v48  ;;  %v2420_v9 = vld [vmem:[%s13912_s30] sm:$0xff]  ;;  %v2421_v48 = vld [vmem:[%s13912_s30 + $0x8] sm:$0xff] }
 0x546   : > { %2028 = vadd.xlane.f32.xlu0 %v13214_v6  ;;  %v13079_v38 = vpop.permute.xlu1 %13078 }
 0x547   : > { %12527 = vmatpush3.bf16.msra.mxu0 %v12526_v43  ;;  %v13081_v39 = vunpack.i.h.bf16 %v13079_v38  ;;  %v13080_v61 = vunpack.i.l.bf16 %v13079_v38  ;;  %v2422_v38 = vld [vmem:[%s13912_s30 + $0x10] sm:$0xff] }
 0x548   : > { %12528 = vmatprep.subr.bf16.mxu0 %v17427_v7 }
 0x549   : > { %v12532_v44 = vpack.c.bf16 %v13081_v39, %v13080_v61  ;;  %v2423_v39 = vld [vmem:[%s13912_s30 + $0x18] sm:$0xff] }
 0x54a   : > { %v14309_v61 = vpack.c.bf16 %v2423_v39, %v2422_v38 }
 0x54b   : > { %12530 = vmatpush3.bf16.msra.mxu0 %v12529_v12  ;;  %v14305_v12 = vpack.c.bf16 %v2421_v48, %v2420_v9  ;;  %v2542_v48 = vld [vmem:[%s17503_s27 + $0x18] sm:$0xff] }
 0x54c   : > { %12531 = vmatprep.subr.bf16.mxu0 %v17427_v7 }
 0x54d   : > { %12551 = vmatpush3.bf16.msra.mxu1 %v14305_v12 }
 0x54e   : > { %12552 = vmatprep.subr.bf16.mxu1 %v17427_v7 }
 0x54f   : > { %12533 = vmatpush3.bf16.msra.mxu0 %v12532_v44  ;;  %v2424_v44 = vld [vmem:[%s13912_s30 + $0x20] sm:$0xff] }
 0x550   : > { %12534 = vmatprep.subr.bf16.mxu0 %v17427_v7 }
 0x551   : > { %12554 = vmatpush3.bf16.msra.mxu1 %v14309_v61 }
 0x552   : > { %12555 = vmatprep.subr.bf16.mxu1 %v17427_v7 }
 0x55c   : > { %13083 = vrot.lane.b32.xlu0 %v14136_v47, %s17419_s22  ;;  %s17510_s22 = sld [smem:[#allocation11_spill]] }
 0x5d3   : > { %v2029_v45 = vpop.xlane.xlu0 %2028 }
 0x5d4   : > { %13215 = vrcp.f32 %v2029_v45  ;;  %v2425_v45 = vld [vmem:[%s13912_s30 + $0x28] sm:$0xff] }
 0x5d7   : > { %v13084_v46 = vpop.permute.xlu0 %13083 }
 0x5d8   : > { %v13086_v33 = vunpack.i.h.bf16 %v13084_v46  ;;  %v13085_v34 = vunpack.i.l.bf16 %v13084_v46  ;;  %v14315_v46 = vpack.c.bf16 %v2425_v45, %v2424_v44 }
 0x5da   : > { %v12535_v51 = vpack.c.bf16 %v13086_v33, %v13085_v34  ;;  %12557 = vmatpush3.bf16.msra.mxu1 %v14315_v46 }
 0x5db   : > { %12558 = vmatprep.subr.bf16.mxu1 %v17427_v7 }
 0x5dc   : > { %12536 = vmatpush3.bf16.msra.mxu0 %v12535_v51 }
 0x5dd   : > { %12537 = vmatprep.subr.bf16.mxu0 %v17427_v7 }
 0x5de   : > { %v13216_v37 = vpop.eup %13215 }
 0x5df   : > { %v2031_v56 = vmul.f32 %v13216_v37, %v13214_v6  ;;  %v2338_v6 = vld [vmem:[%s17491_s14 + $0x18] sm:$0xff] }
 0x5e1   : > { %11480 = vmatmul.mubr.f32.vlgmr.msra.gmra.mrb[4].mxu0 %v2031_v56  ;;  %v10284_v56 = vld [vmem:[%s13917_s13] ss:$0 sm:$0xff] }
 0x5e2   : > { %12539 = vmatpush3.bf16.msra.mxu0 %v14278_v35  ;;  %11486 = vmatprep.mubr.msk.f32.mxu0 %vm13745_vm0, %v17425_v14 }
 0x5e3   : > { %12543 = vmatprep.subr.bf16.mxu0 %v17427_v7 }
 0x6b4   : > { %v2146_v47 = vpop.f32.mrb[4].mxu0 }
 0x6b5   : > { %v11481_v57 = vpop.f32.mrb[5].mxu0  ;;  %11487 = vmatmul.mubr.msk.f32.vlgmr.msra.gmra.mrb[6].mxu0 %vm1625_vm2, %v2146_v47 }
 0x6b6   : > { %11504 = vmatprep.mubr.msk.f32.mxu0 %vm13745_vm0, %v17425_v14 }
 0x788   : > { %v2219_v59 = vpop.f32.mrb[6].mxu0 }
 0x789   : > { %v2293_v62 = vadd.f32 %v2292_v42, %v2219_v59  ;;  %v11488_v63 = vpop.f32.mrb[7].mxu0  ;;  %v2335_v42 = vld [vmem:[%s17491_s14] sm:$0xff]  ;;  %v2426_v59 = vld [vmem:[%s13912_s30 + $0x30] sm:$0xff] }
 0x78a   : > { %v14293_v36 = vpack.c.bf16 %v2336_v41, %v2335_v42  ;;  %v10285_v63 = vld [vmem:[%s13897_s2] ss:$0 sm:$0xff] }
 0x78b   : > { %v2303_v1 = vadd.f32 %v10282_v60, %v2293_v62  ;;  %v2427_v60 = vld [vmem:[%s13912_s30 + $0x38] sm:$0xff]  ;;  %v2539_v41 = vld [vmem:[%s17503_s27] sm:$0xff] }
 0x78c   : > { %12545 = vmatpush3.bf16.msra.mxu0 %v14293_v36  ;;  %v14327_v62 = vpack.c.bf16 %v2427_v60, %v2426_v59 }
 0x78d   : > { %v2304_v2 = vadd.f32 %v2303_v1, %v14022_v19  ;;  %12546 = vmatprep.subr.bf16.mxu0 %v17427_v7  ;;  %v2337_v19 = vld [vmem:[%s17491_s14 + $0x10] sm:$0xff]  ;;  %s17523_s14 = sld [smem:[#allocation22_spill]] }
 0x78e   : > { %v14299_v43 = vpack.c.bf16 %v2338_v6, %v2337_v19  ;;  %17502 = vst [vmem:[#allocation35_spill] sm:$0xff] %v14327_v62  ;;  %12560 = vmatpush3.bf16.msra.mxu1 %v14327_v62  ;;  %v2540_v19 = vld [vmem:[%s17503_s27 + $0x8] sm:$0xff]  ;;  %v2541_v6 = vld [vmem:[%s17503_s27 + $0x10] sm:$0xff]  ;;  %s17531_s27 = sld [smem:[#allocation23_spill]] }
 0x78f   : > { %v2307_v54 = vsel %vm1343_vm1, %v2304_v2, 0.0  ;;  %12569 = vmatprep.subr.bf16.mxu1 %v17427_v7  ;;  %v14340_v9 = vpack.c.bf16 %v2540_v19, %v2539_v41  ;;  %v14343_v38 = vpack.c.bf16 %v2542_v48, %v2541_v6 }
 0x790   : > { %2308 = vadd.xlane.f32.xlu1 %v2307_v54  ;;  %12548 = vmatpush3.bf16.msra.mxu0 %v14299_v43 }
 0x791   : > { %12562 = vmatprep.subr.bf16.mxu0 %v14340_v9 }
 0x81d   : > { %v2309_v0 = vpop.xlane.xlu1 %2308 }
 0x81e   : > { %v2311_v4 = vmul.f32 0.03125, %v2309_v0 }
 0x820   : > { %v2312_v3 = vsub.f32 %v2304_v2, %v2311_v4 }
 0x822   : > { %v2313_v13 = vmul.f32 %v2312_v3, %v2312_v3 }
 0x824   : > { %v2314_v8 = vsel %vm1343_vm1, %v2313_v13, 0.0 }
 0x825   : > { %2315 = vadd.xlane.f32.xlu0 %v2314_v8 }
 0x8b2   : > { %v2316_v33 = vpop.xlane.xlu0 %2315 }
 0x8b3   : > { %v2317_v34 = vmul.f32 0.03125, %v2316_v33 }
 0x8b5   : > { %v2318_v51 = vadd.f32 1e-05, %v2317_v34 }
 0x8b7   : > { %13217 = vrsqrt.f32 %v2318_v51 }
 0x8c1   : > { %v13218_v52 = vpop.eup %13217 }
 0x8c2   : > { %v2320_v37 = vmul.f32 %v13218_v52, %v2312_v3 }
 0x8c4   : > { %v2327_v47 = vmul.f32 %v10283_v53, %v2320_v37 }
 0x8c6   : > { %v2334_v57 = vadd.f32 %v10284_v56, %v2327_v47 }
 0x8c8   : > { %11505 = vmatmul.mubr.msk.f32.vlgmr.msra.gmra.mrb[8].mxu0 %vm1343_vm1, %v2334_v57 }
 0x8c9   : > { %11534 = vmatprep.mubr.msk.f32.mxu0 %vm1343_vm1, %v14004_v16  ;;  %v10287_v16 = vld [vmem:[%s17501_s23] ss:$0 sm:$0xff]  ;;  %12564 = vmatpush3.bf16.msra.mxu0 %v14340_v9 }
 0x8ca   : > { %12566 = vmatprep.subr.bf16.mxu0 %v14343_v38 }
 0x8cd   : > { %12568 = vmatpush3.bf16.msra.mxu0 %v14343_v38 }
 0x8d0   : > { %11535 = vmatmul.mubr.msk.f32.vlgmr.msra.gmra.mrb[10].mxu0 %vm1343_vm1, %v14010_v17 }
 0x8d1   : > { %11537 = vmatprep.mubr.msk.f32.mxu0 %vm1343_vm1, %v14016_v18 }
 0x8d4   : > { %11538 = vmatmul.mubr.msk.f32.gmra.mrb[12].mxu0 %vm1343_vm1, %v14027_v20 }
 0x8d5   : > { %11540 = vmatprep.mubr.msk.f32.mxu0 %vm1343_vm1, %v14032_v21 }
 0x8d8   : > { %11541 = vmatmul.mubr.msk.f32.gmra.mrb[14].mxu0 %vm1343_vm1, %v14041_v22 }
 0x8d9   : > { %11543 = vmatprep.mubr.msk.f32.mxu0 %vm1343_vm1, %v14044_v23  ;;  %v2695_v23 = vld [vmem:[%s17504_s28] sm:$0xff] }
 0x8dc   : > { %11544 = vmatmul.mubr.msk.f32.gmra.mrb[16].mxu0 %vm1343_vm1, %v14051_v24  ;;  %v2696_v24 = vld [vmem:[%s17504_s28 + $0x8] sm:$0xff] }
 0x8dd   : > { %11546 = vmatprep.mubr.msk.f32.mxu0 %vm1343_vm1, %v14054_v25  ;;  %v14382_v25 = vpack.c.bf16 %v2696_v24, %v2695_v23 }
 0x8df   : > { %17506 = vst [vmem:[#allocation36_spill] sm:$0xff] %v14382_v25 }
 0x8e0   : > { %11547 = vmatmul.mubr.msk.f32.gmra.mrb[18].mxu0 %vm1343_vm1, %v14061_v26  ;;  %v2697_v26 = vld [vmem:[%s17504_s28 + $0x10] sm:$0xff] }
 0x8e1   : > { %11549 = vmatprep.mubr.msk.f32.mxu0 %vm1343_vm1, %v14064_v27  ;;  %v2698_v27 = vld [vmem:[%s17504_s28 + $0x18] sm:$0xff] }
 0x8e4   : > { %11550 = vmatmul.mubr.msk.f32.gmra.mrb[20].mxu0 %vm1343_vm1, %v14071_v28  ;;  %v14388_v28 = vpack.c.bf16 %v2698_v27, %v2697_v26 }
 0x8e5   : > { %11552 = vmatprep.mubr.msk.f32.mxu0 %vm1343_vm1, %v14074_v29  ;;  %v14392_v29 = vld [vmem:[%s17505_s1] ss:$0 sm:$0xff] }
 0x8e6   : > { %17507 = vst [vmem:[#allocation37_spill] sm:$0xff] %v14388_v28 }
 0x8e8   : > { %11553 = vmatmul.mubr.msk.f32.gmra.mrb[22].mxu0 %vm1343_vm1, %v14081_v30 }
 0x8e9   : > { %11555 = vmatprep.mubr.msk.f32.mxu0 %vm1343_vm1, %v14084_v31 }
 0x8ec   : > { %11556 = vmatmul.mubr.msk.f32.gmra.mrb[24].mxu0 %vm1343_vm1, %v14091_v32 }
 0x99b   : > { %v2415_v1 = vpop.f32.mrb[8].mxu0 }
 0x99c   : > { %v2416_v2 = vadd.f32 %v10285_v63, %v2415_v1  ;;  %v11506_v54 = vpop.f32.mrb[9].mxu0  ;;  %v10289_v63 = vld [vmem:[%s17508_s0] ss:$0 sm:$0xff] }
 0x99e   : > { %v2419_v0 = vmax.f32 %v2416_v2, 0.0  ;;  %v10290_v2 = vld [vmem:[%s17509_s25] ss:$0 sm:$0xff] }
 0x9a0   : > { %11524 = vmatmul.mubr.msk.f32.vlgmr.msra.gmra.mrb[22].mxu1 %vm2435_vm6, %v2419_v0 }
 0x9a1   : > { %11566 = vmatprep.mubr.msk.f32.mxu1 %vm13745_vm0, %v17425_v14  ;;  %12571 = vmatpush3.bf16.msra.mxu1 %v14382_v25 }
 0x9a2   : > { %12572 = vmatprep.subr.bf16.mxu1 %v17427_v7 }
 0x9a3   : > { %v11536_v30 = vpop.f32.mrb[10].mxu0 }
 0x9a4   : > { %v2622_v31 = vadd.f32 %v11536_v30, %v14392_v29  ;;  %v2616_v32 = vpop.f32.mrb[11].mxu0 }
 0x9a5   : > { %12574 = vmatpush3.bf16.msra.mxu1 %v14388_v28  ;;  %v2617_v39 = vadd.f32 %v14392_v29, %v2616_v32 }
 0x9a6   : > { %3393 = vrot.lane.b32.xlu1 %v2622_v31, %s17421_s20 }
 0x9a7   : > { %v11539_v44 = vpop.f32.mrb[12].mxu0  ;;  %11571 = vmatprep.mubr.msk.f32.mxu0 %vm1625_vm2, %v2617_v39 }
 0x9a8   : > { %v2626_v45 = vpop.f32.mrb[13].mxu0  ;;  %v2632_v26 = vadd.f32 %v11539_v44, %v14392_v29 }
 0x9a9   : > { %v2627_v23 = vadd.f32 %v14392_v29, %v2626_v45 }
 0x9ab   : > { %v11542_v33 = vpop.f32.mrb[14].mxu0 }
 0x9ac   : > { %v2636_v34 = vpop.f32.mrb[15].mxu0  ;;  %v2642_v30 = vadd.f32 %v11542_v33, %v14392_v29 }
 0x9ad   : > { %v2637_v51 = vadd.f32 %v14392_v29, %v2636_v34 }
 0x9af   : > { %v11545_v52 = vpop.f32.mrb[16].mxu0 }
 0x9b0   : > { %v2646_v53 = vpop.f32.mrb[17].mxu0  ;;  %v2652_v32 = vadd.f32 %v11545_v52, %v14392_v29 }
 0x9b1   : > { %v2647_v37 = vadd.f32 %v14392_v29, %v2646_v53 }
 0x9b3   : > { %v11548_v56 = vpop.f32.mrb[18].mxu0 }
 0xa18   : > { %v3394_v45 = vpop.permute.xlu1 %3393 }
 0xa73   : > { %v2505_v4 = vpop.f32.mrb[22].mxu1 }
 0xa74   : > { %v2506_v3 = vadd.f32 %v10287_v16, %v2505_v4  ;;  %v11525_v13 = vpop.f32.mrb[23].mxu1  ;;  %v2656_v16 = vpop.f32.mrb[19].mxu0 }
 0xa75   : > { %v2657_v4 = vadd.f32 %v14392_v29, %v2656_v16 }
 0xa76   : > { %v2509_v8 = vadd.f32 %v2506_v3, %v2334_v57  ;;  %v11551_v3 = vpop.f32.mrb[20].mxu0 }
 0xa77   : > { %v2666_v13 = vpop.f32.mrb[21].mxu0 }
 0xa78   : > { %v2512_v42 = vsel %vm1343_vm1, %v2509_v8, 0.0 }
 0xa79   : > { %2513 = vadd.xlane.f32.xlu0 %v2512_v42  ;;  %v11554_v42 = vpop.f32.mrb[22].mxu0 }
 0xa7a   : > { %v2676_v41 = vpop.f32.mrb[23].mxu0  ;;  %v2682_v44 = vadd.f32 %v11554_v42, %v14392_v29 }
 0xa7b   : > { %v11557_v19 = vpop.f32.mrb[24].mxu0  ;;  %v2677_v6 = vadd.f32 %v14392_v29, %v2676_v41 }
 0xa7c   : > { %v2686_v48 = vpop.f32.mrb[25].mxu0  ;;  %v2692_v24 = vadd.f32 %v11557_v19, %v14392_v29 }
 0xb06   : > { %v2514_v17 = vpop.xlane.xlu0 %2513 }
 0xb07   : > { %v2515_v18 = vmul.f32 0.03125, %v2514_v17  ;;  %v2687_v17 = vadd.f32 %v14392_v29, %v2686_v48 }
 0xb09   : > { %v2516_v20 = vsub.f32 %v2509_v8, %v2515_v18  ;;  %v2667_v8 = vadd.f32 %v14392_v29, %v2666_v13  ;;  %v10308_v18 = vld [vmem:[%s17510_s22] ss:$0 sm:$0xff] }
 0xb0b   : > { %v2517_v21 = vmul.f32 %v2516_v20, %v2516_v20 }
 0xb0d   : > { %v2518_v22 = vsel %vm1343_vm1, %v2517_v21, 0.0 }
 0xb0e   : > { %2519 = vadd.xlane.f32.xlu0 %v2518_v22 }
 0xb24   : > { %3391 = vrot.lane.b32.xlu0 %v2617_v39, %s17421_s20  ;;  %v2672_v39 = vadd.f32 %v11551_v3, %v14392_v29  ;;  %v17512_v3 = vmov 0 }
 0xb28   : > { %3399 = vrot.lane.b32.xlu0 %v2637_v51, %s17421_s20 }
 0xb2c   : > { %3403 = vrot.lane.b32.xlu0 %v2647_v37, %s17421_s20 }
 0xb30   : > { %3407 = vrot.lane.b32.xlu0 %v2657_v4, %s17421_s20 }
 0xb34   : > { %3411 = vrot.lane.b32.xlu0 %v2667_v8, %s17421_s20 }
 0xb38   : > { %3415 = vrot.lane.b32.xlu0 %v2677_v6, %s17421_s20 }
 0xb3c   : > { %3419 = vrot.lane.b32.xlu0 %v2687_v17, %s17421_s20 }
 0xb9b   : > { %v2520_v47 = vpop.xlane.xlu0 %2519 }
 0xb9c   : > { %v2521_v57 = vmul.f32 0.03125, %v2520_v47 }
 0xb9e   : > { %v2522_v59 = vadd.f32 1e-05, %v2521_v57 }
 0xb9f   : > { %v3392_v27 = vpop.permute.xlu0 %3391 }
 0xba0   : > { %13219 = vrsqrt.f32 %v2522_v59 }
 0xba3   : > { %v3400_v33 = vpop.permute.xlu0 %3399 }
 0xbaa   : > { %v13220_v60 = vpop.eup %13219 }
 0xbab   : > { %v2524_v1 = vmul.f32 %v13220_v60, %v2516_v20 }
 0xbad   : > { %v2531_v54 = vmul.f32 %v10289_v63, %v2524_v1 }
 0xbaf   : > { %v14405_v0 = vadd.f32 %v10290_v2, %v2531_v54 }
 0xbb1   : > { %11567 = vmatmul.mubr.msk.f32.vlgmr.msra.gmra.mrb[24].mxu1 %vm1343_vm1, %v14405_v0 }
 0xbb2   : > { %11592 = vmatprep.mubr.msk.f32.mxu1 %vm1625_vm2, %v2687_v17 }
 0xc84   : > { %v2775_v20 = vpop.f32.mrb[24].mxu1 }
 0xc85   : > { %v14419_v21 = vadd.f32 %v10308_v18, %v2775_v20  ;;  %v11568_v22 = vpop.f32.mrb[25].mxu1 }
 0xc87   : > { %11569 = vmatprep.subr.msk.mxu0 %vm1625_vm2, %v14419_v21  ;;  %12877 = vmatprep.subr.msk.mxu1 %vm1625_vm2, %v14419_v21 }
 0xc88   : > { %3423 = vrot.lane.b32.xlu1 %v14419_v21, %s17421_s20  ;;  %11570 = vmatpush3.xpose.msk.msra.mxu0 %vm1625_vm2, %v14419_v21 }
 0xc89   : > { %12878 = vmatpush3.xpose.msk.msra.mxu1 %vm1625_vm2, %v14419_v21 }
 0xc8b   : > { %11572 = vmatmul.mubr.msk.f32.vlgmr.msra.gmra.mrb[26].mxu0 %vm1625_vm2, %v2622_v31  ;;  %v2662_v31 = vadd.f32 %v11548_v56, %v14392_v29  ;;  %v3404_v29 = vpop.permute.xlu0 %3403 }
 0xc8c   : > { %3395 = vrot.lane.b32.xlu1 %v2627_v23, %s17421_s20  ;;  %11574 = vmatprep.mubr.msk.f32.mxu0 %vm1625_vm2, %v2627_v23 }
 0xc8d   : > { %11593 = vmatmul.mubr.msk.f32.vlgmr.msra.gmra.mrb[26].mxu1 %vm1625_vm2, %v2692_v24 }
 0xc8e   : > { %11623 = vmatprep.mubr.msk.f32.mxu1 %vm1625_vm2, %v3392_v27 }
 0xc8f   : > { %11575 = vmatmul.mubr.msk.f32.gmra.mrb[28].mxu0 %vm1625_vm2, %v2632_v26  ;;  %v3408_v53 = vpop.permute.xlu0 %3407 }
 0xc90   : > { %3397 = vrot.lane.b32.xlu1 %v2632_v26, %s17421_s20  ;;  %11577 = vmatprep.mubr.msk.f32.mxu0 %vm1625_vm2, %v2637_v51 }
 0xc93   : > { %11578 = vmatmul.mubr.msk.f32.gmra.mrb[30].mxu0 %vm1625_vm2, %v2642_v30  ;;  %v3412_v56 = vpop.permute.xlu0 %3411 }
 0xc94   : > { %3401 = vrot.lane.b32.xlu1 %v2642_v30, %s17421_s20  ;;  %11580 = vmatprep.mubr.msk.f32.mxu0 %vm1625_vm2, %v2647_v37 }
 0xc97   : > { %11581 = vmatmul.mubr.msk.f32.gmra.mrb[32].mxu0 %vm1625_vm2, %v2652_v32  ;;  %v3416_v59 = vpop.permute.xlu0 %3415 }
 0xc98   : > { %3405 = vrot.lane.b32.xlu1 %v2652_v32, %s17421_s20  ;;  %11583 = vmatprep.mubr.msk.f32.mxu0 %vm1625_vm2, %v2657_v4 }
 0xc9b   : > { %11584 = vmatmul.mubr.msk.f32.gmra.mrb[34].mxu0 %vm1625_vm2, %v2662_v31  ;;  %v3420_v63 = vpop.permute.xlu0 %3419 }
 0xc9c   : > { %3409 = vrot.lane.b32.xlu1 %v2662_v31, %s17421_s20  ;;  %11586 = vmatprep.mubr.msk.f32.mxu0 %vm1625_vm2, %v2667_v8 }
 0xc9f   : > { %11587 = vmatmul.mubr.msk.f32.gmra.mrb[36].mxu0 %vm1625_vm2, %v2672_v39 }
 0xca0   : > { %3413 = vrot.lane.b32.xlu1 %v2672_v39, %s17421_s20  ;;  %11589 = vmatprep.mubr.msk.f32.mxu0 %vm1625_vm2, %v2677_v6 }
 0xca3   : > { %11590 = vmatmul.mubr.msk.f32.gmra.mrb[38].mxu0 %vm1625_vm2, %v2682_v44 }
 0xca4   : > { %3417 = vrot.lane.b32.xlu1 %v2682_v44, %s17421_s20 }
 0xca8   : > { %3421 = vrot.lane.b32.xlu1 %v2692_v24, %s17421_s20  ;;  %s17511_s20 = sld [smem:[#allocation6_spill]] }
 0xcae   : > { %s14481_s15 = scalar_lea.vmem %s17511_s20, %s17566_s7  ;;  %s17515_s20 = smov 96  }
 0xcaf   : > { %v1329_v54 = vld [vmem:[%s14481_s15] sm:$0x1] }
 0xcb0   : > { %vm2995_vm7 = vcmp.gt.f32.partialorder %v1329_v54, 0.5 }
 0xcb1   : > { %v2996_v16 = vsel %vm2995_vm7, 1, %v13748_v50 }
 0xcb2   : > { %v3000_v4 = vrot.slane %v2996_v16, %v14162_v55 }
 0xcb4   : > { %vm14486_vm8 = vcmp.eq.s32.totalorder %v3000_v4, 1 }
 0xcb5   : > { %v17513_v3 = vsel %vm14486_vm8, 4294967295, %v17512_v3 }
 0xcb6   : > { %17514 = vst [vmem:[#allocation38_spill] sm:$0xff] %v17513_v3 }
 0xcfa   : > { %v3424_v34 = vpop.permute.xlu1 %3423 }
 0xcfb   : > { %11621 = vmatprep.subr.msk.mxu1 %vm1625_vm2, %v3424_v34 }
 0xcfc   : > { %11622 = vmatpush3.xpose.msk.msra.mxu1 %vm1625_vm2, %v3424_v34 }
 0xcfe   : > { %v3396_v51 = vpop.permute.xlu1 %3395 }
 0xcff   : > { %11624 = vmatmul.mubr.msk.f32.vlgmr.msra.gmra.mrb[28].mxu1 %vm1625_vm2, %v3394_v45 }
 0xd00   : > { %11626 = vmatprep.mubr.msk.f32.mxu1 %vm1625_vm2, %v3396_v51 }
 0xd02   : > { %v3398_v52 = vpop.permute.xlu1 %3397 }
 0xd03   : > { %11627 = vmatmul.mubr.msk.f32.gmra.mrb[30].mxu1 %vm1625_vm2, %v3398_v52 }
 0xd04   : > { %11629 = vmatprep.mubr.msk.f32.mxu1 %vm1625_vm2, %v3400_v33 }
 0xd06   : > { %v3402_v37 = vpop.permute.xlu1 %3401 }
 0xd07   : > { %11630 = vmatmul.mubr.msk.f32.gmra.mrb[32].mxu1 %vm1625_vm2, %v3402_v37 }
 0xd08   : > { %11632 = vmatprep.mubr.msk.f32.mxu1 %vm1625_vm2, %v3404_v29 }
 0xd0a   : > { %v3406_v47 = vpop.permute.xlu1 %3405 }
 0xd0b   : > { %11633 = vmatmul.mubr.msk.f32.gmra.mrb[34].mxu1 %vm1625_vm2, %v3406_v47 }
 0xd0c   : > { %11635 = vmatprep.mubr.msk.f32.mxu1 %vm1625_vm2, %v3408_v53 }
 0xd0e   : > { %v3410_v57 = vpop.permute.xlu1 %3409 }
 0xd0f   : > { %11636 = vmatmul.mubr.msk.f32.gmra.mrb[36].mxu1 %vm1625_vm2, %v3410_v57 }
 0xd10   : > { %11638 = vmatprep.mubr.msk.f32.mxu1 %vm1625_vm2, %v3412_v56 }
 0xd12   : > { %v3414_v60 = vpop.permute.xlu1 %3413 }
 0xd13   : > { %11639 = vmatmul.mubr.msk.f32.gmra.mrb[38].mxu1 %vm1625_vm2, %v3414_v60 }
 0xd14   : > { %11641 = vmatprep.mubr.msk.f32.mxu1 %vm1625_vm2, %v3416_v59 }
 0xd16   : > { %v3418_v1 = vpop.permute.xlu1 %3417 }
 0xd17   : > { %11642 = vmatmul.mubr.msk.f32.gmra.mrb[40].mxu1 %vm1625_vm2, %v3418_v1 }
 0xd18   : > { %11644 = vmatprep.mubr.msk.f32.mxu1 %vm1625_vm2, %v3420_v63 }
 0xd1a   : > { %v3422_v2 = vpop.permute.xlu1 %3421 }
 0xd1b   : > { %11645 = vmatmul.mubr.msk.f32.gmra.mrb[42].mxu1 %vm1625_vm2, %v3422_v2 }
 0xd5e   : > { %v11573_v13 = vpop.f32.mrb[26].mxu0 }
 0xd5f   : > { %v2980_v8 = vmul.f32 0.25, %v11573_v13  ;;  %v2900_v42 = vpop.f32.mrb[27].mxu0 }
 0xd60   : > { %v2979_v41 = vmul.f32 0.25, %v2900_v42  ;;  %v11594_v19 = vpop.f32.mrb[26].mxu1 }
 0xd61   : > { %v2994_v6 = vmul.f32 0.25, %v11594_v19  ;;  %v2970_v48 = vpop.f32.mrb[27].mxu1  ;;  %v14492_v17 = vsel %vm14486_vm8, -1e+30, %v2980_v8 }
 0xd62   : > { %v11576_v18 = vpop.f32.mrb[28].mxu0  ;;  %v2993_v50 = vmul.f32 0.25, %v2970_v48  ;;  %v3022_v20 = vsel %vm3018_vm9, %v14492_v17, -inf  ;;  %v14498_v22 = vsel %vm14486_vm8, -1e+30, %v2979_v41 }
 0xd63   : > { %3023 = vmax.xlane.f32.xlu1 %v3022_v20  ;;  %v2910_v23 = vpop.f32.mrb[29].mxu0  ;;  %v3019_v24 = vsel %vm3018_vm9, %v14498_v22, -inf  ;;  %v14504_v26 = vsel %vm14486_vm8, -1e+30, %v2994_v6  ;;  %v2982_v27 = vmul.f32 0.25, %v11576_v18 }
 0xd64   : > { %3020 = vmax.xlane.f32.xlu0 %v3019_v24  ;;  %v3064_v30 = vsel %vm3018_vm9, %v14504_v26, -inf  ;;  %v14510_v32 = vsel %vm14486_vm8, -1e+30, %v2993_v50  ;;  %v2981_v33 = vmul.f32 0.25, %v2910_v23 }
 0xd65   : > { %v3061_v31 = vsel %vm3018_vm9, %v14510_v32, -inf  ;;  %v14516_v34 = vsel %vm14486_vm8, -1e+30, %v2982_v27 }
 0xd66   : > { %v11579_v39 = vpop.f32.mrb[30].mxu0  ;;  %v3028_v37 = vsel %vm3018_vm9, %v14516_v34, -inf  ;;  %v14528_v57 = vsel %vm14486_vm8, -1e+30, %v2981_v33 }
 0xd67   : > { %v2984_v44 = vmul.f32 0.25, %v11579_v39  ;;  %3065 = vmax.xlane.f32.xlu1 %v3064_v30  ;;  %v2920_v45 = vpop.f32.mrb[31].mxu0  ;;  %v3025_v2 = vsel %vm3018_vm9, %v14528_v57, -inf }
 0xd68   : > { %3062 = vmax.xlane.f32.xlu0 %v3061_v31  ;;  %v2983_v47 = vmul.f32 0.25, %v2920_v45 }
 0xd69   : > { %v14520_v29 = vsel %vm14486_vm8, -1e+30, %v2984_v44 }
 0xd6a   : > { %v11582_v51 = vpop.f32.mrb[32].mxu0  ;;  %v3034_v52 = vsel %vm3018_vm9, %v14520_v29, -inf  ;;  %v14540_v4 = vsel %vm14486_vm8, -1e+30, %v2983_v47 }
 0xd6b   : > { %v2986_v53 = vmul.f32 0.25, %v11582_v51  ;;  %3035 = vmax.xlane.f32.xlu1 %v3034_v52  ;;  %v2930_v56 = vpop.f32.mrb[33].mxu0  ;;  %v3031_v6 = vsel %vm3018_vm9, %v14540_v4, -inf }
 0xd6c   : > { %3029 = vmax.xlane.f32.xlu0 %v3028_v37  ;;  %v2985_v16 = vmul.f32 0.25, %v2930_v56 }
 0xd6d   : > { %v14532_v59 = vsel %vm14486_vm8, -1e+30, %v2986_v53 }
 0xd6e   : > { %v11585_v60 = vpop.f32.mrb[34].mxu0  ;;  %v3040_v63 = vsel %vm3018_vm9, %v14532_v59, -inf  ;;  %v14552_v18 = vsel %vm14486_vm8, -1e+30, %v2985_v16 }
 0xd6f   : > { %v2988_v1 = vmul.f32 0.25, %v11585_v60  ;;  %3041 = vmax.xlane.f32.xlu1 %v3040_v63  ;;  %v2940_v54 = vpop.f32.mrb[35].mxu0  ;;  %v3037_v31 = vsel %vm3018_vm9, %v14552_v18, -inf }
 0xd70   : > { %3026 = vmax.xlane.f32.xlu0 %v3025_v2  ;;  %v2987_v8 = vmul.f32 0.25, %v2940_v54 }
 0xd71   : > { %v14544_v13 = vsel %vm14486_vm8, -1e+30, %v2988_v1 }
 0xd72   : > { %v11588_v42 = vpop.f32.mrb[36].mxu0  ;;  %v3046_v41 = vsel %vm3018_vm9, %v14544_v13, -inf  ;;  %v14562_v27 = vsel %vm14486_vm8, -1e+30, %v2987_v8 }
 0xd73   : > { %v2990_v19 = vmul.f32 0.25, %v11588_v42  ;;  %3047 = vmax.xlane.f32.xlu1 %v3046_v41  ;;  %v2950_v48 = vpop.f32.mrb[37].mxu0  ;;  %v3043_v45 = vsel %vm3018_vm9, %v14562_v27, -inf }
 0xd74   : > { %3032 = vmax.xlane.f32.xlu0 %v3031_v6  ;;  %v2989_v20 = vmul.f32 0.25, %v2950_v48 }
 0xd75   : > { %v14556_v50 = vsel %vm14486_vm8, -1e+30, %v2990_v19 }
 0xd76   : > { %v11591_v23 = vpop.f32.mrb[38].mxu0  ;;  %v3052_v24 = vsel %vm3018_vm9, %v14556_v50, -inf  ;;  %v14576_v52 = vsel %vm14486_vm8, -1e+30, %v2989_v20 }
 0xd77   : > { %v2992_v30 = vmul.f32 0.25, %v11591_v23  ;;  %3053 = vmax.xlane.f32.xlu1 %v3052_v24  ;;  %v2960_v39 = vpop.f32.mrb[39].mxu0  ;;  %v3049_v53 = vsel %vm3018_vm9, %v14576_v52, -inf }
 0xd78   : > { %3038 = vmax.xlane.f32.xlu0 %v3037_v31  ;;  %v2991_v51 = vmul.f32 0.25, %v2960_v39 }
 0xd79   : > { %v14568_v44 = vsel %vm14486_vm8, -1e+30, %v2992_v30 }
 0xd7a   : > { %v3058_v33 = vsel %vm3018_vm9, %v14568_v44, -inf  ;;  %v14582_v37 = vsel %vm14486_vm8, -1e+30, %v2991_v51 }
 0xd7b   : > { %3059 = vmax.xlane.f32.xlu1 %v3058_v33  ;;  %v3055_v56 = vsel %vm3018_vm9, %v14582_v37, -inf }
 0xd7c   : > { %3044 = vmax.xlane.f32.xlu0 %v3043_v45 }
 0xd80   : > { %3050 = vmax.xlane.f32.xlu0 %v3049_v53 }
 0xd84   : > { %3056 = vmax.xlane.f32.xlu0 %v3055_v56 }
 0xdd2   : > { %v11625_v47 = vpop.f32.mrb[28].mxu1 }
 0xdd3   : > { %v3605_v60 = vmul.f32 0.25, %v11625_v47  ;;  %v3525_v63 = vpop.f32.mrb[29].mxu1 }
 0xdd4   : > { %v3604_v1 = vmul.f32 0.25, %v3525_v63 }
 0xdd5   : > { %v14588_v2 = vsel %vm14486_vm8, -1e+30, %v3605_v60 }
 0xdd6   : > { %v11628_v54 = vpop.f32.mrb[30].mxu1  ;;  %v3639_v16 = vsel %vm3018_vm9, %v14588_v2, -inf  ;;  %v14594_v8 = vsel %vm14486_vm8, -1e+30, %v3604_v1 }
 0xdd7   : > { %v3607_v42 = vmul.f32 0.25, %v11628_v54  ;;  %v3535_v41 = vpop.f32.mrb[31].mxu1  ;;  %3640 = vmax.xlane.f32.xlu1 %v3639_v16  ;;  %v3636_v19 = vsel %vm3018_vm9, %v14594_v8, -inf }
 0xdd8   : > { %v3606_v6 = vmul.f32 0.25, %v3535_v41  ;;  %3637 = vmax.xlane.f32.xlu0 %v3636_v19 }
 0xdd9   : > { %v14600_v48 = vsel %vm14486_vm8, -1e+30, %v3607_v42 }
 0xdda   : > { %v11631_v20 = vpop.f32.mrb[32].mxu1  ;;  %v3645_v23 = vsel %vm3018_vm9, %v14600_v48, -inf  ;;  %v14606_v24 = vsel %vm14486_vm8, -1e+30, %v3606_v6 }
 0xddb   : > { %v3609_v30 = vmul.f32 0.25, %v11631_v20  ;;  %v3545_v31 = vpop.f32.mrb[33].mxu1  ;;  %3646 = vmax.xlane.f32.xlu1 %v3645_v23  ;;  %v3642_v39 = vsel %vm3018_vm9, %v14606_v24, -inf }
 0xddc   : > { %v3608_v45 = vmul.f32 0.25, %v3545_v31  ;;  %3643 = vmax.xlane.f32.xlu0 %v3642_v39 }
 0xddd   : > { %v14612_v33 = vsel %vm14486_vm8, -1e+30, %v3609_v30 }
 0xdde   : > { %v11634_v51 = vpop.f32.mrb[34].mxu1  ;;  %v3651_v53 = vsel %vm3018_vm9, %v14612_v33, -inf  ;;  %v14618_v56 = vsel %vm14486_vm8, -1e+30, %v3608_v45 }
 0xddf   : > { %v3611_v47 = vmul.f32 0.25, %v11634_v51  ;;  %v3555_v60 = vpop.f32.mrb[35].mxu1  ;;  %3652 = vmax.xlane.f32.xlu1 %v3651_v53  ;;  %v3648_v63 = vsel %vm3018_vm9, %v14618_v56, -inf }
 0xde0   : > { %v3610_v1 = vmul.f32 0.25, %v3555_v60  ;;  %3649 = vmax.xlane.f32.xlu0 %v3648_v63 }
 0xde1   : > { %v14624_v54 = vsel %vm14486_vm8, -1e+30, %v3611_v47 }
 0xde2   : > { %v11637_v16 = vpop.f32.mrb[36].mxu1  ;;  %v3657_v42 = vsel %vm3018_vm9, %v14624_v54, -inf  ;;  %v14630_v41 = vsel %vm14486_vm8, -1e+30, %v3610_v1 }
 0xde3   : > { %v3613_v19 = vmul.f32 0.25, %v11637_v16  ;;  %v3565_v6 = vpop.f32.mrb[37].mxu1  ;;  %3658 = vmax.xlane.f32.xlu1 %v3657_v42  ;;  %v3654_v20 = vsel %vm3018_vm9, %v14630_v41, -inf }
 0xde4   : > { %v3612_v23 = vmul.f32 0.25, %v3565_v6  ;;  %3655 = vmax.xlane.f32.xlu0 %v3654_v20 }
 0xde5   : > { %v14636_v30 = vsel %vm14486_vm8, -1e+30, %v3613_v19 }
 0xde6   : > { %v11640_v31 = vpop.f32.mrb[38].mxu1  ;;  %v3663_v39 = vsel %vm3018_vm9, %v14636_v30, -inf  ;;  %v14642_v45 = vsel %vm14486_vm8, -1e+30, %v3612_v23 }
 0xde7   : > { %v3615_v51 = vmul.f32 0.25, %v11640_v31  ;;  %v3575_v53 = vpop.f32.mrb[39].mxu1  ;;  %3664 = vmax.xlane.f32.xlu1 %v3663_v39  ;;  %v3660_v47 = vsel %vm3018_vm9, %v14642_v45, -inf }
 0xde8   : > { %v3614_v60 = vmul.f32 0.25, %v3575_v53  ;;  %3661 = vmax.xlane.f32.xlu0 %v3660_v47 }
 0xde9   : > { %v14648_v63 = vsel %vm14486_vm8, -1e+30, %v3615_v51 }
 0xdea   : > { %v11643_v1 = vpop.f32.mrb[40].mxu1  ;;  %v3669_v16 = vsel %vm3018_vm9, %v14648_v63, -inf  ;;  %v14654_v42 = vsel %vm14486_vm8, -1e+30, %v3614_v60 }
 0xdeb   : > { %v3617_v19 = vmul.f32 0.25, %v11643_v1  ;;  %v3585_v6 = vpop.f32.mrb[41].mxu1  ;;  %3670 = vmax.xlane.f32.xlu1 %v3669_v16  ;;  %v3666_v20 = vsel %vm3018_vm9, %v14654_v42, -inf }
 0xdec   : > { %v3616_v23 = vmul.f32 0.25, %v3585_v6  ;;  %3667 = vmax.xlane.f32.xlu0 %v3666_v20 }
 0xded   : > { %v14660_v31 = vsel %vm14486_vm8, -1e+30, %v3617_v19 }
 0xdee   : > { %v11646_v39 = vpop.f32.mrb[42].mxu1  ;;  %v3675_v51 = vsel %vm3018_vm9, %v14660_v31, -inf  ;;  %v14666_v53 = vsel %vm14486_vm8, -1e+30, %v3616_v23 }
 0xdef   : > { %v3619_v47 = vmul.f32 0.25, %v11646_v39  ;;  %v3595_v60 = vpop.f32.mrb[43].mxu1  ;;  %3676 = vmax.xlane.f32.xlu1 %v3675_v51  ;;  %v3672_v1 = vsel %vm3018_vm9, %v14666_v53, -inf }
 0xdf0   : > { %v3618_v16 = vmul.f32 0.25, %v3595_v60  ;;  %3673 = vmax.xlane.f32.xlu0 %v3672_v1  ;;  %v3024_v6 = vpop.xlane.xlu1 %3023 }
 0xdf1   : > { %v3068_v19 = vsub.f32 %v14492_v17, %v3024_v6  ;;  %v3021_v20 = vpop.xlane.xlu0 %3020  ;;  %v14673_v14 = vsel %vm14486_vm8, -1e+30, %v3619_v47 }
 0xdf2   : > { %v3067_v7 = vsub.f32 %v14498_v22, %v3021_v20  ;;  %v3681_v23 = vsel %vm3018_vm9, %v14673_v14, -inf  ;;  %v14680_v39 = vsel %vm14486_vm8, -1e+30, %v3618_v16 }
 0xdf3   : > { %v3085_v51 = vmul.f32 1.442695, %v3068_v19  ;;  %3682 = vmax.xlane.f32.xlu1 %v3681_v23  ;;  %v3678_v60 = vsel %vm3018_vm9, %v14680_v39, -inf }
 0xdf4   : > { %v3083_v17 = vmul.f32 1.442695, %v3067_v7  ;;  %3679 = vmax.xlane.f32.xlu0 %v3678_v60  ;;  %v14684_v1 = vpop.xlane.xlu1 %3065 }
 0xdf5   : > { %13221 = vpow2.f32 %v3085_v51  ;;  %v3063_v47 = vpop.xlane.xlu0 %3062 }
 0xdf6   : > { %13223 = vpow2.f32 %v3083_v17 }
 0xdf8   : > { %v3036_v22 = vpop.xlane.xlu1 %3035 }
 0xdf9   : > { %v3072_v6 = vsub.f32 %v14520_v29, %v3036_v22  ;;  %v3030_v20 = vpop.xlane.xlu0 %3029 }
 0xdfa   : > { %v3070_v55 = vsub.f32 %v14516_v34, %v3030_v20 }
 0xdfb   : > { %v3093_v16 = vmul.f32 1.442695, %v3072_v6 }
 0xdfc   : > { %v3089_v3 = vmul.f32 1.442695, %v3070_v55  ;;  %v3042_v19 = vpop.xlane.xlu1 %3041 }
 0xdfd   : > { %v3074_v23 = vsub.f32 %v14532_v59, %v3042_v19  ;;  %v3027_v28 = vpop.xlane.xlu0 %3026 }
 0xdfe   : > { %13225 = vpow2.f32 %v3089_v3  ;;  %v3069_v7 = vsub.f32 %v14528_v57, %v3027_v28 }
 0xdff   : > { %v14690_v60 = vpop.eup %13221  ;;  %13227 = vpow2.f32 %v3093_v16  ;;  %v3097_v17 = vmul.f32 1.442695, %v3074_v23 }
 0xe00   : > { %v14692_v51 = vpop.eup %13223  ;;  %v3087_v25 = vmul.f32 1.442695, %v3069_v7  ;;  %v3048_v29 = vpop.xlane.xlu1 %3047  ;;  %v3118_v34 = vsel %vm3018_vm9, %v14690_v60, 0.0 }
 0xe01   : > { %v3076_v55 = vsub.f32 %v14544_v13, %v3048_v29  ;;  %v3033_v22 = vpop.xlane.xlu0 %3032  ;;  %3119 = vadd.xlane.f32.xlu1 %v3118_v34  ;;  %v3115_v3 = vsel %vm3018_vm9, %v14692_v51, 0.0 }
 0xe02   : > { %13229 = vpow2.f32 %v3087_v25  ;;  %v3071_v28 = vsub.f32 %v14540_v4, %v3033_v22  ;;  %3116 = vadd.xlane.f32.xlu0 %v3115_v3 }
 0xe03   : > { %13231 = vpow2.f32 %v3097_v17  ;;  %v3101_v57 = vmul.f32 1.442695, %v3076_v55 }
 0xe04   : > { %v3091_v59 = vmul.f32 1.442695, %v3071_v28  ;;  %v3054_v6 = vpop.xlane.xlu1 %3053 }
 0xe05   : > { %v3078_v20 = vsub.f32 %v14556_v50, %v3054_v6  ;;  %v3039_v16 = vpop.xlane.xlu0 %3038 }
 0xe06   : > { %13233 = vpow2.f32 %v3091_v59  ;;  %v3073_v19 = vsub.f32 %v14552_v18, %v3039_v16  ;;  %v3081_v18 = vsub.f32 %v14510_v32, %v3063_v47  ;;  %v3082_v32 = vsub.f32 %v14504_v26, %v14684_v1 }
 0xe07   : > { %13235 = vpow2.f32 %v3101_v57  ;;  %v3105_v23 = vmul.f32 1.442695, %v3078_v20 }
 0xe08   : > { %v14702_v13 = vpop.eup %13225  ;;  %v3095_v7 = vmul.f32 1.442695, %v3073_v19  ;;  %v3060_v29 = vpop.xlane.xlu1 %3059  ;;  %v3111_v47 = vmul.f32 1.442695, %v3081_v18  ;;  %v3113_v26 = vmul.f32 1.442695, %v3082_v32 }
 0xe09   : > { %v3080_v25 = vsub.f32 %v14568_v44, %v3060_v29  ;;  %v3045_v4 = vpop.xlane.xlu0 %3044  ;;  %v3124_v17 = vsel %vm3018_vm9, %v14702_v13, 0.0  ;;  %v14707_v34 = vpop.eup %13227 }
 0xe0a   : > { %13237 = vpow2.f32 %v3095_v7  ;;  %v3075_v50 = vsub.f32 %v14562_v27, %v3045_v4  ;;  %3125 = vadd.xlane.f32.xlu1 %v3124_v17  ;;  %v3130_v44 = vsel %vm3018_vm9, %v14707_v34, 0.0 }
 0xe0b   : > { %13239 = vpow2.f32 %v3105_v23  ;;  %v3109_v22 = vmul.f32 1.442695, %v3080_v25 }
 0xe0c   : > { %v14710_v55 = vpop.eup %13229  ;;  %v3099_v3 = vmul.f32 1.442695, %v3075_v50 }
 0xe0d   : > { %v3051_v28 = vpop.xlane.xlu0 %3050  ;;  %v3121_v57 = vsel %vm3018_vm9, %v14710_v55, 0.0  ;;  %v14717_v59 = vpop.eup %13231 }
 0xe0e   : > { %13241 = vpow2.f32 %v3099_v3  ;;  %v3077_v27 = vsub.f32 %v14576_v52, %v3051_v28  ;;  %3131 = vadd.xlane.f32.xlu1 %v3130_v44  ;;  %3122 = vadd.xlane.f32.xlu0 %v3121_v57  ;;  %v3136_v19 = vsel %vm3018_vm9, %v14717_v59, 0.0 }
 0xe0f   : > { %13243 = vpow2.f32 %v3109_v22 }
 0xe10   : > { %v14720_v6 = vpop.eup %13233  ;;  %v3103_v20 = vmul.f32 1.442695, %v3077_v27 }
 0xe11   : > { %v3057_v16 = vpop.xlane.xlu0 %3056  ;;  %v3127_v23 = vsel %vm3018_vm9, %v14720_v6, 0.0  ;;  %v14728_v7 = vpop.eup %13235 }
 0xe12   : > { %13245 = vpow2.f32 %v3103_v20  ;;  %v3079_v52 = vsub.f32 %v14582_v37, %v3057_v16  ;;  %3137 = vadd.xlane.f32.xlu1 %v3136_v19  ;;  %3128 = vadd.xlane.f32.xlu0 %v3127_v23  ;;  %v3142_v25 = vsel %vm3018_vm9, %v14728_v7, 0.0 }
 0xe13   : > { %13247 = vpow2.f32 %v3111_v47 }
 0xe14   : > { %v14731_v29 = vpop.eup %13237  ;;  %v3107_v1 = vmul.f32 1.442695, %v3079_v52 }
 0xe15   : > { %v3133_v4 = vsel %vm3018_vm9, %v14731_v29, 0.0  ;;  %v14737_v17 = vpop.eup %13239 }
 0xe16   : > { %13249 = vpow2.f32 %v3107_v1  ;;  %3143 = vadd.xlane.f32.xlu1 %v3142_v25  ;;  %3134 = vadd.xlane.f32.xlu0 %v3133_v4  ;;  %v3148_v37 = vsel %vm3018_vm9, %v14737_v17, 0.0 }
 0xe17   : > { %13251 = vpow2.f32 %v3113_v26 }
 0xe18   : > { %v14739_v50 = vpop.eup %13241 }
 0xe19   : > { %v3139_v18 = vsel %vm3018_vm9, %v14739_v50, 0.0  ;;  %v14745_v22 = vpop.eup %13243 }
 0xe1a   : > { %3149 = vadd.xlane.f32.xlu1 %v3148_v37  ;;  %3140 = vadd.xlane.f32.xlu0 %v3139_v18  ;;  %v3154_v28 = vsel %vm3018_vm9, %v14745_v22, 0.0 }
 0xe1c   : > { %v14747_v3 = vpop.eup %13245 }
 0xe1d   : > { %v3145_v44 = vsel %vm3018_vm9, %v14747_v3, 0.0  ;;  %v14753_v57 = vpop.eup %13247 }
 0xe1e   : > { %3155 = vadd.xlane.f32.xlu1 %v3154_v28  ;;  %3146 = vadd.xlane.f32.xlu0 %v3145_v44  ;;  %v3157_v32 = vsel %vm3018_vm9, %v14753_v57, 0.0 }
 0xe20   : > { %v14755_v27 = vpop.eup %13249 }
 0xe21   : > { %v3151_v47 = vsel %vm3018_vm9, %v14755_v27, 0.0  ;;  %v14761_v20 = vpop.eup %13251 }
 0xe22   : > { %3158 = vadd.xlane.f32.xlu1 %v3157_v32  ;;  %3152 = vadd.xlane.f32.xlu0 %v3151_v47  ;;  %v3160_v16 = vsel %vm3018_vm9, %v14761_v20, 0.0 }
 0xe26   : > { %3161 = vadd.xlane.f32.xlu1 %v3160_v16 }
 0xe38   : > { %3195 = vrot.lane.b32.xlu0 %v14419_v21, %s17515_s20 }
 0xe64   : > { %v3641_v19 = vpop.xlane.xlu1 %3640 }
 0xe65   : > { %v3685_v23 = vsub.f32 %v14588_v2, %v3641_v19  ;;  %v3638_v52 = vpop.xlane.xlu0 %3637 }
 0xe66   : > { %v3684_v26 = vsub.f32 %v14594_v8, %v3638_v52 }
 0xe67   : > { %v3702_v1 = vmul.f32 1.442695, %v3685_v23 }
 0xe68   : > { %v3700_v25 = vmul.f32 1.442695, %v3684_v26  ;;  %v3647_v4 = vpop.xlane.xlu1 %3646 }
 0xe69   : > { %13253 = vpow2.f32 %v3702_v1  ;;  %v3687_v37 = vsub.f32 %v14600_v48, %v3647_v4  ;;  %v3644_v18 = vpop.xlane.xlu0 %3643 }
 0xe6a   : > { %13255 = vpow2.f32 %v3700_v25  ;;  %v3686_v44 = vsub.f32 %v14606_v24, %v3644_v18 }
 0xe6b   : > { %v3706_v28 = vmul.f32 1.442695, %v3687_v37 }
 0xe6c   : > { %v3653_v32 = vpop.xlane.xlu1 %3652  ;;  %v3704_v2 = vmul.f32 1.442695, %v3686_v44 }
 0xe6d   : > { %v3650_v47 = vpop.xlane.xlu0 %3649  ;;  %13257 = vpow2.f32 %v3706_v28  ;;  %v3689_v19 = vsub.f32 %v14612_v33, %v3653_v32 }
 0xe6e   : > { %v3688_v16 = vsub.f32 %v14618_v56, %v3650_v47 }
 0xe6f   : > { %v3710_v48 = vmul.f32 1.442695, %v3689_v19 }
 0xe70   : > { %v3708_v8 = vmul.f32 1.442695, %v3688_v16  ;;  %v3659_v23 = vpop.xlane.xlu1 %3658 }
 0xe71   : > { %v3656_v52 = vpop.xlane.xlu0 %3655  ;;  %v3691_v1 = vsub.f32 %v14624_v54, %v3659_v23 }
 0xe72   : > { %13259 = vpow2.f32 %v3708_v8  ;;  %v3690_v37 = vsub.f32 %v14630_v41, %v3656_v52 }
 0xe73   : > { %v14773_v26 = vpop.eup %13253  ;;  %13261 = vpow2.f32 %v3704_v2  ;;  %v3714_v33 = vmul.f32 1.442695, %v3691_v1 }
 0xe74   : > { %v3665_v25 = vpop.xlane.xlu1 %3664  ;;  %v3735_v24 = vsel %vm3018_vm9, %v14773_v26, 0.0  ;;  %v14778_v4 = vpop.eup %13255  ;;  %13263 = vpow2.f32 %v3710_v48  ;;  %v3712_v32 = vmul.f32 1.442695, %v3690_v37 }
 0xe75   : > { %3736 = vadd.xlane.f32.xlu1 %v3735_v24  ;;  %v3662_v56 = vpop.xlane.xlu0 %3661  ;;  %v3732_v28 = vsel %vm3018_vm9, %v14778_v4, 0.0  ;;  %13265 = vpow2.f32 %v3714_v33  ;;  %v3693_v47 = vsub.f32 %v14636_v30, %v3665_v25 }
 0xe76   : > { %13267 = vpow2.f32 %v3712_v32  ;;  %v3692_v30 = vsub.f32 %v14642_v45, %v3662_v56 }
 0xe77   : > { %v14783_v44 = vpop.eup %13257  ;;  %v3718_v48 = vmul.f32 1.442695, %v3693_v47 }
 0xe78   : > { %v3671_v18 = vpop.xlane.xlu1 %3670  ;;  %v3741_v19 = vsel %vm3018_vm9, %v14783_v44, 0.0 }
 0xe79   : > { %3733 = vadd.xlane.f32.xlu1 %v3732_v28  ;;  %v3668_v54 = vpop.xlane.xlu0 %3667  ;;  %v3695_v32 = vsub.f32 %v14648_v63, %v3671_v18 }
 0xe7c   : > { %v14786_v16 = vpop.eup %13259  ;;  %v3677_v2 = vpop.xlane.xlu1 %3676 }
 0xe7d   : > { %v14790_v8 = vpop.eup %13261  ;;  %v3697_v41 = vsub.f32 %v14660_v31, %v3677_v2  ;;  %3742 = vadd.xlane.f32.xlu1 %v3741_v19  ;;  %v3674_v23 = vpop.xlane.xlu0 %3673  ;;  %v3744_v52 = vsel %vm3018_vm9, %v14786_v16, 0.0  ;;  %v3716_v2 = vmul.f32 1.442695, %v3692_v30 }
 0xe7e   : > { %3745 = vadd.xlane.f32.xlu0 %v3744_v52  ;;  %v3738_v24 = vsel %vm3018_vm9, %v14790_v8, 0.0  ;;  %v14798_v33 = vpop.eup %13263 }
 0xe7f   : > { %v3726_v1 = vmul.f32 1.442695, %v3697_v41  ;;  %v3747_v56 = vsel %vm3018_vm9, %v14798_v33, 0.0  ;;  %v14805_v19 = vpop.eup %13265  ;;  %v3722_v41 = vmul.f32 1.442695, %v3695_v32 }
 0xe80   : > { %v3683_v25 = vpop.xlane.xlu1 %3682  ;;  %v14810_v52 = vpop.eup %13267 }
 0xe81   : > { %13269 = vpow2.f32 %v3726_v1  ;;  %v3699_v31 = vsub.f32 %v14673_v14, %v3683_v25  ;;  %3739 = vadd.xlane.f32.xlu1 %v3738_v24  ;;  %v3680_v37 = vpop.xlane.xlu0 %3679  ;;  %v3694_v14 = vsub.f32 %v14654_v42, %v3668_v54  ;;  %v3750_v1 = vsel %vm3018_vm9, %v14810_v52, 0.0 }
 0xe82   : > { %v3698_v28 = vsub.f32 %v14680_v39, %v3680_v37  ;;  %13271 = vpow2.f32 %v3718_v48  ;;  %v3753_v39 = vsel %vm3018_vm9, %v14805_v19, 0.0  ;;  %v3696_v48 = vsub.f32 %v14666_v53, %v3674_v23 }
 0xe83   : > { %v3730_v47 = vmul.f32 1.442695, %v3699_v31  ;;  %v3720_v18 = vmul.f32 1.442695, %v3694_v14 }
 0xe84   : > { %v3728_v45 = vmul.f32 1.442695, %v3698_v28  ;;  %v3724_v54 = vmul.f32 1.442695, %v3696_v48 }
 0xe85   : > { %3748 = vadd.xlane.f32.xlu1 %v3747_v56 }
 0xe86   : > { %13273 = vpow2.f32 %v3728_v45 }
 0xe87   : > { %13275 = vpow2.f32 %v3716_v2 }
 0xe88   : > { %13277 = vpow2.f32 %v3730_v47 }
 0xe89   : > { %3754 = vadd.xlane.f32.xlu1 %v3753_v39  ;;  %13279 = vpow2.f32 %v3722_v41 }
 0xe8a   : > { %13281 = vpow2.f32 %v3720_v18 }
 0xe8b   : > { %v14812_v63 = vpop.eup %13269 }
 0xe8c   : > { %v3771_v30 = vsel %vm3018_vm9, %v14812_v63, 0.0  ;;  %v14819_v42 = vpop.eup %13271 }
 0xe8d   : > { %3772 = vadd.xlane.f32.xlu0 %v3771_v30  ;;  %3751 = vadd.xlane.f32.xlu1 %v3750_v1  ;;  %v3759_v31 = vsel %vm3018_vm9, %v14819_v42, 0.0 }
 0xe8e   : > { %v3120_v28 = vpop.xlane.xlu1 %3119 }
 0xe8f   : > { %v3117_v25 = vpop.xlane.xlu0 %3116 }
 0xe90   : > { %v14821_v24 = vpop.eup %13273  ;;  %13283 = vrcp.f32 %v3117_v25 }
 0xe91   : > { %v14825_v53 = vpop.eup %13275  ;;  %3760 = vadd.xlane.f32.xlu1 %v3759_v31  ;;  %v3774_v23 = vsel %vm3018_vm9, %v14821_v24, 0.0  ;;  %13285 = vpow2.f32 %v3724_v54 }
 0xe92   : > { %v14829_v37 = vpop.eup %13277  ;;  %3775 = vadd.xlane.f32.xlu0 %v3774_v23  ;;  %v3756_v2 = vsel %vm3018_vm9, %v14825_v53, 0.0  ;;  %13287 = vrcp.f32 %v3120_v28 }
 0xe93   : > { %v14833_v32 = vpop.eup %13279  ;;  %v3777_v47 = vsel %vm3018_vm9, %v14829_v37, 0.0 }
 0xe94   : > { %v3765_v56 = vsel %vm3018_vm9, %v14833_v32, 0.0  ;;  %v14839_v41 = vpop.eup %13281 }
 0xe95   : > { %3757 = vadd.xlane.f32.xlu1 %v3756_v2  ;;  %v3762_v30 = vsel %vm3018_vm9, %v14839_v41, 0.0 }
 0xe96   : > { %3778 = vadd.xlane.f32.xlu0 %v3777_v47 }
 0xe97   : > { %v3126_v45 = vpop.xlane.xlu1 %3125 }
 0xe99   : > { %3766 = vadd.xlane.f32.xlu1 %v3765_v56 }
 0xe9a   : > { %v13284_v14 = vpop.eup %13283 }
 0xe9b   : > { %v3123_v39 = vpop.xlane.xlu0 %3122  ;;  %v3179_v18 = vmul.f32 %v13284_v14, %v14692_v51  ;;  %v3132_v48 = vpop.xlane.xlu1 %3131 }
 0xe9c   : > { %v14844_v1 = vpop.eup %13285  ;;  %13289 = vrcp.f32 %v3123_v39 }
 0xe9d   : > { %3763 = vadd.xlane.f32.xlu1 %v3762_v30  ;;  %11597 = vmatprep.mubr.msk.f32.mxu0 %vm3018_vm9, %v3179_v18  ;;  %v3768_v25 = vsel %vm3018_vm9, %v14844_v1, 0.0  ;;  %13291 = vrcp.f32 %v3126_v45  ;;  %v13288_v30 = vpop.eup %13287 }
 0xe9e   : > { %v3180_v62 = vmul.f32 %v13288_v30, %v14690_v60 }
 0xe9f   : > { %v3129_v54 = vpop.xlane.xlu0 %3128  ;;  %v3138_v31 = vpop.xlane.xlu1 %3137 }
 0xea0   : > { %13293 = vrcp.f32 %v3129_v54 }
 0xea1   : > { %3769 = vadd.xlane.f32.xlu1 %v3768_v25  ;;  %13295 = vrcp.f32 %v3132_v48 }
 0xea3   : > { %v3135_v23 = vpop.xlane.xlu0 %3134  ;;  %v3144_v51 = vpop.xlane.xlu1 %3143 }
 0xea4   : > { %13297 = vrcp.f32 %v3135_v23 }
 0xea5   : > { %13299 = vrcp.f32 %v3138_v31 }
 0xea6   : > { %v13290_v18 = vpop.eup %13289 }
 0xea7   : > { %v3141_v2 = vpop.xlane.xlu0 %3140  ;;  %v3150_v56 = vpop.xlane.xlu1 %3149  ;;  %v3181_v45 = vmul.f32 %v13290_v18, %v14710_v55 }
 0xea8   : > { %13301 = vrcp.f32 %v3141_v2  ;;  %v13292_v39 = vpop.eup %13291 }
 0xea9   : > { %13303 = vrcp.f32 %v3144_v51 }
 0xeaa   : > { %v13294_v54 = vpop.eup %13293 }
 0xeab   : > { %v3147_v47 = vpop.xlane.xlu0 %3146  ;;  %v3156_v28 = vpop.xlane.xlu1 %3155  ;;  %v3183_v31 = vmul.f32 %v13294_v54, %v14720_v6 }
 0xeac   : > { %13305 = vrcp.f32 %v3147_v47  ;;  %v13296_v48 = vpop.eup %13295 }
 0xead   : > { %13307 = vrcp.f32 %v3150_v56  ;;  %v3184_v55 = vmul.f32 %v13296_v48, %v14707_v34 }
 0xeae   : > { %v13298_v60 = vpop.eup %13297 }
 0xeaf   : > { %v3153_v14 = vpop.xlane.xlu0 %3152  ;;  %v3159_v23 = vpop.xlane.xlu1 %3158  ;;  %v3185_v2 = vmul.f32 %v13298_v60, %v14731_v29 }
 0xeb0   : > { %13309 = vrcp.f32 %v3153_v14 }
 0xeb1   : > { %13311 = vrcp.f32 %v3156_v28 }
 0xeb2   : > { %3812 = vrot.lane.b32.xlu1 %v14419_v21, %s17516_s5  ;;  %v3182_v21 = vmul.f32 %v13292_v39, %v14702_v13  ;;  %13313 = vrcp.f32 %v3159_v23 }
 0xeb3   : > { %v3196_v25 = vpop.permute.xlu0 %3195  ;;  %v3162_v13 = vpop.xlane.xlu1 %3161 }
 0xeb4   : > { %11595 = vmatprep.subr.mxu0 %v3196_v25  ;;  %13315 = vrcp.f32 %v3162_v13 }
 0xeb5   : > { %11596 = vmatpush3.msra.mxu0 %v3196_v25 }
 0xeb6   : > { %11598 = vmatmul.mubr.msk.f32.vlgmr.msra.gmra.mrb[40].mxu0 %vm3018_vm9, %v3180_v62  ;;  %v13300_v62 = vpop.eup %13299 }
 0xeb7   : > { %11600 = vmatprep.mubr.msk.f32.mxu0 %vm3018_vm9, %v3181_v45  ;;  %v13302_v51 = vpop.eup %13301  ;;  %v3186_v6 = vmul.f32 %v13300_v62, %v14717_v59  ;;  %v2781_v62 = vld [vmem:[%s17517_s9 + $0x10] sm:$0xff] }
 0xeb8   : > { %v13304_v47 = vpop.eup %13303  ;;  %v3187_v56 = vmul.f32 %v13302_v51, %v14739_v50 }
 0xeb9   : > { %v13306_v30 = vpop.eup %13305  ;;  %v3188_v34 = vmul.f32 %v13304_v47, %v14728_v7 }
 0xeba   : > { %11601 = vmatmul.mubr.msk.f32.gmra.mrb[42].mxu0 %vm3018_vm9, %v3182_v21  ;;  %v13308_v29 = vpop.eup %13307  ;;  %v3189_v14 = vmul.f32 %v13306_v30, %v14747_v3 }
 0xebb   : > { %11603 = vmatprep.mubr.msk.f32.mxu0 %vm3018_vm9, %v3183_v31  ;;  %v13310_v18 = vpop.eup %13309  ;;  %v3190_v59 = vmul.f32 %v13308_v29, %v14737_v17 }
 0xebc   : > { %v13312_v25 = vpop.eup %13311  ;;  %v3191_v50 = vmul.f32 %v13310_v18, %v14755_v27 }
 0xebd   : > { %v13314_v28 = vpop.eup %13313  ;;  %v3192_v7 = vmul.f32 %v13312_v25, %v14745_v22 }
 0xebe   : > { %11604 = vmatmul.mubr.msk.f32.gmra.mrb[44].mxu0 %vm3018_vm9, %v3184_v55  ;;  %v13316_v39 = vpop.eup %13315  ;;  %v3193_v3 = vmul.f32 %v13314_v28, %v14753_v57 }
 0xebf   : > { %11606 = vmatprep.mubr.msk.f32.mxu0 %vm3018_vm9, %v3185_v2  ;;  %v3194_v45 = vmul.f32 %v13316_v39, %v14761_v20  ;;  %v2782_v2 = vld [vmem:[%s17517_s9 + $0x18] sm:$0xff] }
 0xec0   : > { %v14885_v51 = vpack.c.bf16 %v2782_v2, %v2781_v62 }
 0xec2   : > { %11607 = vmatmul.mubr.msk.f32.gmra.mrb[46].mxu0 %vm3018_vm9, %v3186_v6  ;;  %12576 = vmatprep.subr.bf16.mxu1 %v14885_v51 }
 0xec3   : > { %11609 = vmatprep.mubr.msk.f32.mxu0 %vm3018_vm9, %v3187_v56  ;;  %12578 = vmatpush3.bf16.msra.mxu1 %v14885_v51 }
 0xec6   : > { %11610 = vmatmul.mubr.msk.f32.gmra.mrb[48].mxu0 %vm3018_vm9, %v3188_v34 }
 0xec7   : > { %11612 = vmatprep.mubr.msk.f32.mxu0 %vm3018_vm9, %v3189_v14 }
 0xeca   : > { %11613 = vmatmul.mubr.msk.f32.gmra.mrb[50].mxu0 %vm3018_vm9, %v3190_v59 }
 0xecb   : > { %11615 = vmatprep.mubr.msk.f32.mxu0 %vm3018_vm9, %v3191_v50 }
 0xece   : > { %11616 = vmatmul.mubr.msk.f32.gmra.mrb[52].mxu0 %vm3018_vm9, %v3192_v7 }
 0xecf   : > { %11618 = vmatprep.mubr.msk.f32.mxu0 %vm3018_vm9, %v3193_v3 }
 0xed2   : > { %11619 = vmatmul.mubr.msk.f32.gmra.mrb[54].mxu0 %vm3018_vm9, %v3194_v45 }
 0xf02   : > { %v3737_v17 = vpop.xlane.xlu1 %3736 }
 0xf06   : > { %v3734_v27 = vpop.xlane.xlu1 %3733 }
 0xf07   : > { %13317 = vrcp.f32 %v3734_v27 }
 0xf08   : > { %13319 = vrcp.f32 %v3737_v17 }
 0xf0a   : > { %v3743_v54 = vpop.xlane.xlu1 %3742 }
 0xf0b   : > { %v3746_v13 = vpop.xlane.xlu0 %3745 }
 0xf0e   : > { %v3740_v21 = vpop.xlane.xlu1 %3739 }
 0xf0f   : > { %13321 = vrcp.f32 %v3740_v21 }
 0xf10   : > { %13323 = vrcp.f32 %v3743_v54 }
 0xf11   : > { %v13318_v48 = vpop.eup %13317  ;;  %13325 = vrcp.f32 %v3746_v13 }
 0xf12   : > { %v3749_v22 = vpop.xlane.xlu1 %3748  ;;  %v3796_v31 = vmul.f32 %v13318_v48, %v14778_v4  ;;  %v13320_v47 = vpop.eup %13319 }
 0xf13   : > { %13327 = vrcp.f32 %v3749_v22  ;;  %v3797_v34 = vmul.f32 %v13320_v47, %v14773_v26 }
 0xf14   : > { %11649 = vmatprep.mubr.msk.f32.mxu0 %vm3018_vm9, %v3796_v31 }
 0xf16   : > { %v3755_v57 = vpop.xlane.xlu1 %3754 }
 0xf19   : > { %v13322_v56 = vpop.eup %13321 }
 0xf1a   : > { %v3752_v60 = vpop.xlane.xlu1 %3751  ;;  %v3773_v29 = vpop.xlane.xlu0 %3772  ;;  %v3798_v18 = vmul.f32 %v13322_v56, %v14790_v8 }
 0xf1b   : > { %13329 = vrcp.f32 %v3752_v60  ;;  %v13324_v14 = vpop.eup %13323 }
 0xf1c   : > { %13331 = vrcp.f32 %v3755_v57  ;;  %v13326_v59 = vpop.eup %13325  ;;  %v3799_v25 = vmul.f32 %v13324_v14, %v14783_v44 }
 0xf1d   : > { %v13328_v50 = vpop.eup %13327  ;;  %v3800_v28 = vmul.f32 %v13326_v59, %v14786_v16 }
 0xf1e   : > { %v3761_v23 = vpop.xlane.xlu1 %3760  ;;  %v3801_v8 = vmul.f32 %v13328_v50, %v14798_v33 }
 0xf1f   : > { %v3776_v7 = vpop.xlane.xlu0 %3775 }
 0xf22   : > { %v3758_v55 = vpop.xlane.xlu1 %3757 }
 0xf23   : > { %13333 = vrcp.f32 %v3758_v55  ;;  %v3779_v44 = vpop.xlane.xlu0 %3778 }
 0xf24   : > { %13335 = vrcp.f32 %v3761_v23 }
 0xf25   : > { %v13330_v26 = vpop.eup %13329 }
 0xf26   : > { %v3767_v20 = vpop.xlane.xlu1 %3766  ;;  %v13332_v39 = vpop.eup %13331  ;;  %v3802_v3 = vmul.f32 %v13330_v26, %v14810_v52 }
 0xf27   : > { %v3803_v16 = vmul.f32 %v13332_v39, %v14805_v19 }
 0xf2a   : > { %v3764_v6 = vpop.xlane.xlu1 %3763 }
 0xf2b   : > { %13337 = vrcp.f32 %v3764_v6 }
 0xf2c   : > { %13339 = vrcp.f32 %v3767_v20 }
 0xf2d   : > { %v13334_v45 = vpop.eup %13333 }
 0xf2e   : > { %v3770_v4 = vpop.xlane.xlu1 %3769  ;;  %v13336_v17 = vpop.eup %13335  ;;  %v3804_v27 = vmul.f32 %v13334_v45, %v14825_v53 }
 0xf2f   : > { %13341 = vrcp.f32 %v3770_v4  ;;  %v3805_v33 = vmul.f32 %v13336_v17, %v14819_v42 }
 0xf30   : > { %13343 = vrcp.f32 %v3773_v29 }
 0xf31   : > { %13345 = vrcp.f32 %v3776_v7 }
 0xf32   : > { %v3813_v30 = vpop.permute.xlu1 %3812  ;;  %13347 = vrcp.f32 %v3779_v44 }
 0xf33   : > { %11647 = vmatprep.subr.mxu0 %v3813_v30 }
 0xf34   : > { %11648 = vmatpush3.msra.mxu0 %v3813_v30 }
 0xf35   : > { %11650 = vmatmul.mubr.msk.f32.vlgmr.msra.gmra.mrb[56].mxu0 %vm3018_vm9, %v3797_v34  ;;  %v13338_v54 = vpop.eup %13337  ;;  %v2780_v34 = vld [vmem:[%s17517_s9 + $0x8] sm:$0xff] }
 0xf36   : > { %11652 = vmatprep.mubr.msk.f32.mxu0 %vm3018_vm9, %v3798_v18  ;;  %v13340_v52 = vpop.eup %13339  ;;  %v3806_v21 = vmul.f32 %v13338_v54, %v14839_v41 }
 0xf37   : > { %v3807_v19 = vmul.f32 %v13340_v52, %v14833_v32 }
 0xf39   : > { %11653 = vmatmul.mubr.msk.f32.gmra.mrb[58].mxu0 %vm3018_vm9, %v3799_v25  ;;  %v13342_v48 = vpop.eup %13341 }
 0xf3a   : > { %11655 = vmatprep.mubr.msk.f32.mxu0 %vm3018_vm9, %v3800_v28  ;;  %v13344_v22 = vpop.eup %13343  ;;  %v3808_v53 = vmul.f32 %v13342_v48, %v14844_v1  ;;  %v17518_v28 = vmov 0.0|0.0  }
 0xf3b   : > { %v13346_v31 = vpop.eup %13345  ;;  %v3809_v42 = vmul.f32 %v13344_v22, %v14812_v63  ;;  %v13659_v22 = vld [vmem:[%s13997_s26] sm:$0xff] }
 0xf3c   : > { %v13348_v57 = vpop.eup %13347  ;;  %v3810_v41 = vmul.f32 %v13346_v31, %v14821_v24 }
 0xf3d   : > { %11656 = vmatmul.mubr.msk.f32.gmra.mrb[60].mxu0 %vm3018_vm9, %v3801_v8  ;;  %v3811_v60 = vmul.f32 %v13348_v57, %v14829_v37  ;;  %v2779_v37 = vld [vmem:[%s17517_s9] sm:$0xff]  ;;  %s17519_s9 = sld [smem:[#allocation12_spill]] }
 0xf3e   : > { %11658 = vmatprep.mubr.msk.f32.mxu0 %vm3018_vm9, %v3802_v3  ;;  %v14921_v14 = vpack.c.bf16 %v2780_v34, %v2779_v37 }
 0xf40   : > { %12580 = vmatprep.subr.bf16.mxu1 %v14921_v14 }
 0xf41   : > { %11659 = vmatmul.mubr.msk.f32.gmra.mrb[62].mxu0 %vm3018_vm9, %v3803_v16 }
 0xf42   : > { %11661 = vmatprep.mubr.msk.f32.mxu0 %vm3018_vm9, %v3804_v27 }
 0xf45   : > { %11662 = vmatmul.mubr.msk.f32.gmra.mrb[64].mxu0 %vm3018_vm9, %v3805_v33 }
 0xf46   : > { %11664 = vmatprep.mubr.msk.f32.mxu0 %vm3018_vm9, %v3806_v21 }
 0xf49   : > { %11665 = vmatmul.mubr.msk.f32.gmra.mrb[66].mxu0 %vm3018_vm9, %v3807_v19 }
 0xf4a   : > { %11667 = vmatprep.mubr.msk.f32.mxu0 %vm3018_vm9, %v3808_v53 }
 0xf4d   : > { %11668 = vmatmul.mubr.msk.f32.gmra.mrb[68].mxu0 %vm3018_vm9, %v3809_v42 }
 0xf4e   : > { %11670 = vmatprep.mubr.msk.f32.mxu0 %vm3018_vm9, %v3810_v41 }
 0xf51   : > { %11671 = vmatmul.mubr.msk.f32.gmra.mrb[70].mxu0 %vm3018_vm9, %v3811_v60 }
 0xf89   : > { %v11599_v32 = vpop.f32.mrb[40].mxu0 }
 0xf8a   : > { %v3312_v1 = vpop.f32.mrb[41].mxu0 }
 0xf8d   : > { %v11602_v23 = vpop.f32.mrb[42].mxu0 }
 0xf8e   : > { %v3322_v55 = vpop.f32.mrb[43].mxu0 }
 0xf91   : > { %v11605_v20 = vpop.f32.mrb[44].mxu0 }
 0xf92   : > { %v3332_v62 = vpop.f32.mrb[45].mxu0 }
 0xf95   : > { %v11608_v63 = vpop.f32.mrb[46].mxu0 }
 0xf96   : > { %v3342_v2 = vpop.f32.mrb[47].mxu0 }
 0xf99   : > { %v11611_v13 = vpop.f32.mrb[48].mxu0 }
 0xf9a   : > { %v3352_v24 = vpop.f32.mrb[49].mxu0 }
 0xf9d   : > { %v11614_v6 = vpop.f32.mrb[50].mxu0 }
 0xf9e   : > { %v3362_v4 = vpop.f32.mrb[51].mxu0 }
 0xfa1   : > { %v11617_v47 = vpop.f32.mrb[52].mxu0 }
 0xfa2   : > { %v3372_v56 = vpop.f32.mrb[53].mxu0 }
 0xfa5   : > { %v11620_v30 = vpop.f32.mrb[54].mxu0 }
 0xfa6   : > { %v3382_v29 = vpop.f32.mrb[55].mxu0 }
0x1008   : > { %v11651_v18 = vpop.f32.mrb[56].mxu0 }
0x1009   : > { %v3929_v59 = vpop.f32.mrb[57].mxu0 }
0x100a   : > { %11677 = vmatprep.mubr.msk.f32.mxu1 %vm1625_vm2, %v3929_v59 }
0x100b   : > { %11678 = vmatmul.mubr.msk.f32.vlgmr.msra.gmra.mrb[44].mxu1 %vm1625_vm2, %v11651_v18 }
0x100c   : > { %v11654_v25 = vpop.f32.mrb[58].mxu0  ;;  %12582 = vmatpush3.bf16.msra.mxu1 %v14921_v14 }
0x100d   : > { %v3939_v50 = vpop.f32.mrb[59].mxu0  ;;  %12607 = vmatprep.subr.bf16.mxu1 %v17518_v28 }
0x100e   : > { %11680 = vmatprep.mubr.msk.f32.mxu1 %vm1625_vm2, %v3939_v50 }
0x100f   : > { %11681 = vmatmul.mubr.msk.f32.gmra.mrb[46].mxu1 %vm1625_vm2, %v11654_v25 }
0x1010   : > { %v11657_v26 = vpop.f32.mrb[60].mxu0 }
0x1011   : > { %v3949_v7 = vpop.f32.mrb[61].mxu0 }
0x1012   : > { %11683 = vmatprep.mubr.msk.f32.mxu1 %vm1625_vm2, %v3949_v7 }
0x1013   : > { %11684 = vmatmul.mubr.msk.f32.gmra.mrb[48].mxu1 %vm1625_vm2, %v11657_v26 }
0x1014   : > { %v11660_v8 = vpop.f32.mrb[62].mxu0 }
0x1015   : > { %v3959_v39 = vpop.f32.mrb[63].mxu0 }
0x1016   : > { %11686 = vmatprep.mubr.msk.f32.mxu1 %vm1625_vm2, %v3959_v39 }
0x1017   : > { %11687 = vmatmul.mubr.msk.f32.gmra.mrb[50].mxu1 %vm1625_vm2, %v11660_v8  ;;  %v13665_v8 = vld [vmem:[%s13997_s26 + $0x30] sm:$0xff] }
0x1018   : > { %v11663_v3 = vpop.f32.mrb[64].mxu0 }
0x1019   : > { %v3969_v45 = vpop.f32.mrb[65].mxu0 }
0x101a   : > { %11689 = vmatprep.mubr.msk.f32.mxu1 %vm1625_vm2, %v3969_v45 }
0x101b   : > { %11690 = vmatmul.mubr.msk.f32.gmra.mrb[52].mxu1 %vm1625_vm2, %v11663_v3 }
0x101c   : > { %v11666_v44 = vpop.f32.mrb[66].mxu0 }
0x101d   : > { %v3979_v16 = vpop.f32.mrb[67].mxu0 }
0x101e   : > { %11692 = vmatprep.mubr.msk.f32.mxu1 %vm1625_vm2, %v3979_v16 }
0x101f   : > { %11693 = vmatmul.mubr.msk.f32.gmra.mrb[54].mxu1 %vm1625_vm2, %v11666_v44 }
0x1020   : > { %v11669_v17 = vpop.f32.mrb[68].mxu0 }
0x1021   : > { %v3989_v27 = vpop.f32.mrb[69].mxu0 }
0x1022   : > { %11695 = vmatprep.mubr.msk.f32.mxu1 %vm1625_vm2, %v3989_v27 }
0x1023   : > { %11696 = vmatmul.mubr.msk.f32.gmra.mrb[56].mxu1 %vm1625_vm2, %v11669_v17  ;;  %v13666_v17 = vld [vmem:[%s13997_s26 + $0x38] sm:$0xff] }
0x1024   : > { %v11672_v54 = vpop.f32.mrb[70].mxu0 }
0x1025   : > { %v3999_v33 = vpop.f32.mrb[71].mxu0 }
0x1026   : > { %11698 = vmatprep.mubr.msk.f32.mxu1 %vm1625_vm2, %v3999_v33 }
0x1027   : > { %11699 = vmatmul.mubr.msk.f32.gmra.mrb[58].mxu1 %vm1625_vm2, %v11672_v54 }
0x1028   : > { %11705 = vmatprep.mubr.msk.f32.mxu1 %vm1625_vm2, %v3312_v1 }
0x102b   : > { %11706 = vmatmul.mubr.msk.f32.vlgmr.msra.gmra.mrb[44].mxu1 %vm1625_vm2, %v11599_v32  ;;  %v13661_v32 = vld [vmem:[%s13997_s26 + $0x18] sm:$0xff] }
0x102c   : > { %11708 = vmatprep.mubr.msk.f32.mxu1 %vm1625_vm2, %v3322_v55  ;;  %12609 = vmatpush3.bf16.msra.mxu1 %v13983_v11  ;;  %v17520_v11 = vmov 0.0  }
0x102d   : > { %12610 = vmatprep.subr.bf16.mxu1 %v17518_v28 }
0x102f   : > { %11709 = vmatmul.mubr.msk.f32.gmra.mrb[46].mxu1 %vm1625_vm2, %v11602_v23 }
0x1030   : > { %11711 = vmatprep.mubr.msk.f32.mxu1 %vm1625_vm2, %v3332_v62  ;;  %12612 = vmatpush3.bf16.msra.mxu1 %v13993_v15  ;;  %v14971_v15 = vld [vmem:[%s17519_s9] ss:$0 sm:$0xff]  ;;  %v13662_v62 = vld [vmem:[%s13997_s26 + $0x10] sm:$0xff] }
0x1031   : > { %12614 = vmatprep.subr.bf16.mxu1 %v13973_v5 }
0x1033   : > { %11712 = vmatmul.mubr.msk.f32.gmra.mrb[48].mxu1 %vm1625_vm2, %v11605_v20 }
0x1034   : > { %11714 = vmatprep.mubr.msk.f32.mxu1 %vm1625_vm2, %v3342_v2 }
0x1037   : > { %11715 = vmatmul.mubr.msk.f32.gmra.mrb[50].mxu1 %vm1625_vm2, %v11608_v63 }
0x1038   : > { %11717 = vmatprep.mubr.msk.f32.mxu1 %vm1625_vm2, %v3352_v24 }
0x103b   : > { %11718 = vmatmul.mubr.msk.f32.gmra.mrb[52].mxu1 %vm1625_vm2, %v11611_v13 }
0x103c   : > { %11720 = vmatprep.mubr.msk.f32.mxu1 %vm1625_vm2, %v3362_v4 }
0x103f   : > { %11721 = vmatmul.mubr.msk.f32.gmra.mrb[54].mxu1 %vm1625_vm2, %v11614_v6 }
0x1040   : > { %11723 = vmatprep.mubr.msk.f32.mxu1 %vm1625_vm2, %v3372_v56 }
0x1043   : > { %11724 = vmatmul.mubr.msk.f32.gmra.mrb[56].mxu1 %vm1625_vm2, %v11617_v47  ;;  %v13663_v47 = vld [vmem:[%s13997_s26 + $0x20] sm:$0xff] }
0x1044   : > { %11726 = vmatprep.mubr.msk.f32.mxu1 %vm1625_vm2, %v3382_v29  ;;  %v13664_v29 = vld [vmem:[%s13997_s26 + $0x28] sm:$0xff] }
0x1047   : > { %11727 = vmatmul.mubr.msk.f32.gmra.mrb[58].mxu1 %vm1625_vm2, %v11620_v30 }
0x1048   : > { %11809 = vmatprep.mubr.msk.f32.mxu1 %vm13745_vm0, %v17520_v11 }
0x104b   : > { %11810 = vmatmul.mubr.msk.f32.vlgmr.msra.gmra.mrb[60].mxu1 %vm1343_vm1, %v14405_v0 }
0x104c   : > { %12616 = vmatpush3.bf16.msra.mxu1 %v13973_v5 }
0x104d   : > { %12618 = vmatprep.subr.bf16.mxu1 %v13979_v10 }
0x1050   : > { %12620 = vmatpush3.bf16.msra.mxu1 %v13979_v10  ;;  %v13660_v10 = vld [vmem:[%s13997_s26 + $0x8] sm:$0xff] }
0x1051   : > { %12653 = vmatprep.subr.bf16.mxu1 %v17518_v28 }
0x10fe   : > { %v11707_v52 = vpop.f32.mrb[44].mxu1 }
0x10ff   : > { %v4315_v21 = vpop.f32.mrb[45].mxu1  ;;  %v4402_v48 = vadd.f32 %v11707_v52, %v14971_v15  ;;  %v13667_v52 = vld [vmem:[%s13997_s26 + $0x68] sm:$0xff] }
0x1100   : > { %v4401_v19 = vadd.f32 %v14971_v15, %v4315_v21 }
0x1101   : > { %v14980_v57 = vadd.f32 %v13660_v10, %v4402_v48 }
0x1102   : > { %v14976_v53 = vadd.f32 %v13659_v22, %v4401_v19  ;;  %v11710_v5 = vpop.f32.mrb[46].mxu1 }
0x1103   : > { %v4404_v31 = vadd.f32 %v11710_v5, %v14971_v15  ;;  %v4325_v42 = vpop.f32.mrb[47].mxu1  ;;  %v4438_v13 = vsel %vm1343_vm1, %v14980_v57, 0.0 }
0x1104   : > { %v4403_v41 = vadd.f32 %v14971_v15, %v4325_v42  ;;  %v4435_v60 = vsel %vm1343_vm1, %v14976_v53, 0.0  ;;  %v13668_v42 = vld [vmem:[%s13997_s26 + $0x40] sm:$0xff] }
0x1105   : > { %v14986_v1 = vadd.f32 %v13661_v32, %v4404_v31  ;;  %4436 = vadd.xlane.f32.xlu0 %v4435_v60  ;;  %v13669_v60 = vld [vmem:[%s13997_s26 + $0x78] sm:$0xff] }
0x1106   : > { %v11713_v23 = vpop.f32.mrb[48].mxu1  ;;  %v14991_v63 = vadd.f32 %v13662_v62, %v4403_v41  ;;  %v13670_v62 = vld [vmem:[%s13997_s26 + $0x48] sm:$0xff] }
0x1107   : > { %v4335_v55 = vpop.f32.mrb[49].mxu1  ;;  %v4444_v20 = vsel %vm1343_vm1, %v14986_v1, 0.0  ;;  %v4406_v4 = vadd.f32 %v11713_v23, %v14971_v15 }
0x1108   : > { %v4405_v2 = vadd.f32 %v14971_v15, %v4335_v55  ;;  %4445 = vadd.xlane.f32.xlu1 %v4444_v20  ;;  %v4441_v30 = vsel %vm1343_vm1, %v14991_v63, 0.0 }
0x1109   : > { %4439 = vadd.xlane.f32.xlu0 %v4438_v13  ;;  %v15003_v18 = vadd.f32 %v13664_v29, %v4406_v4  ;;  %v13671_v4 = vld [vmem:[%s13997_s26 + $0x50] sm:$0xff] }
0x110a   : > { %v11716_v24 = vpop.f32.mrb[50].mxu1  ;;  %v14998_v56 = vadd.f32 %v13663_v47, %v4405_v2 }
0x110b   : > { %v4345_v6 = vpop.f32.mrb[51].mxu1  ;;  %v4408_v7 = vadd.f32 %v11716_v24, %v14971_v15  ;;  %v4450_v3 = vsel %vm1343_vm1, %v15003_v18, 0.0 }
0x110c   : > { %v4407_v59 = vadd.f32 %v14971_v15, %v4345_v6  ;;  %v4447_v25 = vsel %vm1343_vm1, %v14998_v56, 0.0 }
0x110d   : > { %4442 = vadd.xlane.f32.xlu0 %v4441_v30  ;;  %v15016_v27 = vadd.f32 %v13666_v17, %v4408_v7 }
0x110e   : > { %v11719_v37 = vpop.f32.mrb[52].mxu1  ;;  %v15010_v39 = vadd.f32 %v13665_v8, %v4407_v59  ;;  %v13674_v8 = vld [vmem:[%s13997_s26 + $0x70] sm:$0xff] }
0x110f   : > { %v4355_v34 = vpop.f32.mrb[53].mxu1  ;;  %v4410_v31 = vadd.f32 %v11719_v37, %v14971_v15  ;;  %v4456_v41 = vsel %vm1343_vm1, %v15016_v27, 0.0  ;;  %v13672_v37 = vld [vmem:[%s13997_s26 + $0x58] sm:$0xff] }
0x1110   : > { %v4409_v54 = vadd.f32 %v14971_v15, %v4355_v34  ;;  %v4453_v33 = vsel %vm1343_vm1, %v15010_v39, 0.0 }
0x1111   : > { %4448 = vadd.xlane.f32.xlu0 %v4447_v25  ;;  %v15041_v2 = vadd.f32 %v13670_v62, %v4410_v31  ;;  %v13673_v25 = vld [vmem:[%s13997_s26 + $0x60] sm:$0xff]  ;;  %s17521_s26 = sld [smem:[#allocation19_spill]] }
0x1112   : > { %v11722_v50 = vpop.f32.mrb[54].mxu1  ;;  %v15029_v10 = vadd.f32 %v13668_v42, %v4409_v54 }
0x1113   : > { %v4365_v26 = vpop.f32.mrb[55].mxu1  ;;  %v4412_v6 = vadd.f32 %v11722_v50, %v14971_v15  ;;  %v4462_v30 = vsel %vm1343_vm1, %v15041_v2, 0.0 }
0x1114   : > { %v4411_v13 = vadd.f32 %v14971_v15, %v4365_v26  ;;  %v4459_v24 = vsel %vm1343_vm1, %v15029_v10, 0.0 }
0x1115   : > { %4451 = vadd.xlane.f32.xlu0 %v4450_v3  ;;  %v15053_v34 = vadd.f32 %v13672_v37, %v4412_v6 }
0x1116   : > { %v11725_v45 = vpop.f32.mrb[56].mxu1  ;;  %v15048_v47 = vadd.f32 %v13671_v4, %v4411_v13 }
0x1117   : > { %v4414_v44 = vadd.f32 %v11725_v45, %v14971_v15  ;;  %v4375_v16 = vpop.f32.mrb[57].mxu1  ;;  %v4468_v7 = vsel %vm1343_vm1, %v15053_v34, 0.0 }
0x1118   : > { %v4413_v29 = vadd.f32 %v14971_v15, %v4375_v16  ;;  %v4465_v59 = vsel %vm1343_vm1, %v15048_v47, 0.0 }
0x1119   : > { %v15022_v21 = vadd.f32 %v13667_v52, %v4414_v44  ;;  %4454 = vadd.xlane.f32.xlu0 %v4453_v33 }
0x111a   : > { %v11728_v48 = vpop.f32.mrb[58].mxu1  ;;  %v15059_v26 = vadd.f32 %v13673_v25, %v4413_v29 }
0x111b   : > { %v4416_v19 = vadd.f32 %v11728_v48, %v14971_v15  ;;  %v4385_v22 = vpop.f32.mrb[59].mxu1  ;;  %v4474_v5 = vsel %vm1343_vm1, %v15022_v21, 0.0 }
0x111c   : > { %4475 = vadd.xlane.f32.xlu1 %v4474_v5  ;;  %v4415_v50 = vadd.f32 %v14971_v15, %v4385_v22  ;;  %v4471_v45 = vsel %vm1343_vm1, %v15059_v26, 0.0 }
0x111d   : > { %v15034_v32 = vadd.f32 %v13669_v60, %v4416_v19  ;;  %4457 = vadd.xlane.f32.xlu0 %v4456_v41 }
0x111e   : > { %v15036_v23 = vpop.f32.mrb[60].mxu1  ;;  %v15065_v3 = vadd.f32 %v13674_v8, %v4415_v50 }
0x111f   : > { %v11811_v55 = vpop.f32.mrb[61].mxu1  ;;  %v4480_v20 = vsel %vm1343_vm1, %v15034_v32, 0.0 }
0x1120   : > { %4481 = vadd.xlane.f32.xlu1 %v4480_v20  ;;  %v4477_v44 = vsel %vm1343_vm1, %v15065_v3, 0.0 }
0x1121   : > { %4460 = vadd.xlane.f32.xlu0 %v4459_v24 }
0x1125   : > { %4463 = vadd.xlane.f32.xlu0 %v4462_v30 }
0x1129   : > { %4466 = vadd.xlane.f32.xlu0 %v4465_v59 }
0x112d   : > { %4469 = vadd.xlane.f32.xlu0 %v4468_v7 }
0x1131   : > { %4472 = vadd.xlane.f32.xlu0 %v4471_v45 }
0x1135   : > { %4478 = vadd.xlane.f32.xlu0 %v4477_v44 }
0x1192   : > { %v4437_v16 = vpop.xlane.xlu0 %4436 }
0x1193   : > { %v4483_v17 = vmul.f32 0.03125, %v4437_v16 }
0x1195   : > { %v15072_v54 = vsub.f32 %v14976_v53, %v4483_v17  ;;  %v4446_v15 = vpop.xlane.xlu1 %4445 }
0x1196   : > { %v4486_v33 = vmul.f32 0.03125, %v4446_v15  ;;  %v4440_v52 = vpop.xlane.xlu0 %4439 }
0x1197   : > { %v4484_v48 = vmul.f32 0.03125, %v4440_v52  ;;  %v4515_v19 = vmul.f32 %v15072_v54, %v15072_v54 }
0x1198   : > { %v15077_v22 = vsub.f32 %v14986_v1, %v4486_v33 }
0x1199   : > { %v15080_v5 = vsub.f32 %v14980_v57, %v4484_v48  ;;  %v4531_v31 = vsel %vm1343_vm1, %v4515_v19, 0.0 }
0x119a   : > { %v4443_v42 = vpop.xlane.xlu0 %4442  ;;  %4532 = vadd.xlane.f32.xlu0 %v4531_v31  ;;  %v4518_v1 = vmul.f32 %v15077_v22, %v15077_v22 }
0x119b   : > { %v4485_v41 = vmul.f32 0.03125, %v4443_v42  ;;  %v4516_v53 = vmul.f32 %v15080_v5, %v15080_v5 }
0x119c   : > { %v4540_v24 = vsel %vm1343_vm1, %v4518_v1, 0.0  ;;  %v4687_v1 = vld [vmem:[%s17521_s26] sm:$0xff] }
0x119d   : > { %v15086_v60 = vsub.f32 %v14991_v63, %v4485_v41  ;;  %v4534_v55 = vsel %vm1343_vm1, %v4516_v53, 0.0 }
0x119e   : > { %v4449_v20 = vpop.xlane.xlu0 %4448  ;;  %4535 = vadd.xlane.f32.xlu1 %v4534_v55 }
0x119f   : > { %v4487_v57 = vmul.f32 0.03125, %v4449_v20  ;;  %v4517_v62 = vmul.f32 %v15086_v60, %v15086_v60  ;;  %v4688_v20 = vld [vmem:[%s17521_s26 + $0x8] sm:$0xff] }
0x11a1   : > { %v15094_v13 = vsub.f32 %v14998_v56, %v4487_v57  ;;  %v4537_v6 = vsel %vm1343_vm1, %v4517_v62, 0.0  ;;  %v15132_v57 = vpack.c.bf16 %v4688_v20, %v4687_v1 }
0x11a2   : > { %v4452_v63 = vpop.xlane.xlu0 %4451  ;;  %4541 = vadd.xlane.f32.xlu1 %v4540_v24  ;;  %4538 = vadd.xlane.f32.xlu0 %v4537_v6 }
0x11a3   : > { %v4488_v4 = vmul.f32 0.03125, %v4452_v63  ;;  %v4519_v30 = vmul.f32 %v15094_v13, %v15094_v13  ;;  %12584 = vmatprep.subr.bf16.mxu0 %v15132_v57 }
0x11a4   : > { %12586 = vmatpush3.bf16.msra.mxu0 %v15132_v57 }
0x11a5   : > { %v15101_v37 = vsub.f32 %v15003_v18, %v4488_v4  ;;  %v4543_v29 = vsel %vm1343_vm1, %v4519_v30, 0.0 }
0x11a6   : > { %v4455_v59 = vpop.xlane.xlu0 %4454  ;;  %4544 = vadd.xlane.f32.xlu0 %v4543_v29  ;;  %v4689_v29 = vld [vmem:[%s17521_s26 + $0x10] sm:$0xff] }
0x11a7   : > { %v4489_v56 = vmul.f32 0.03125, %v4455_v59  ;;  %v4520_v25 = vmul.f32 %v15101_v37, %v15101_v37  ;;  %v4690_v59 = vld [vmem:[%s17521_s26 + $0x18] sm:$0xff]  ;;  %s17530_s26 = sld [smem:[#allocation24_spill]] }
0x11a9   : > { %v15107_v50 = vsub.f32 %v15010_v39, %v4489_v56  ;;  %v4546_v7 = vsel %vm1343_vm1, %v4520_v25, 0.0  ;;  %v4476_v31 = vpop.xlane.xlu1 %4475  ;;  %v15144_v56 = vpack.c.bf16 %v4690_v59, %v4689_v29 }
0x11aa   : > { %v4458_v8 = vpop.xlane.xlu0 %4457  ;;  %4547 = vadd.xlane.f32.xlu1 %v4546_v7  ;;  %v4496_v62 = vmul.f32 0.03125, %v4476_v31 }
0x11ab   : > { %v4490_v45 = vmul.f32 0.03125, %v4458_v8  ;;  %v4521_v18 = vmul.f32 %v15107_v50, %v15107_v50  ;;  %12588 = vmatprep.subr.bf16.mxu0 %v15144_v56 }
0x11ac   : > { %12590 = vmatpush3.bf16.msra.mxu0 %v15144_v56 }
0x11ad   : > { %v15113_v44 = vsub.f32 %v15016_v27, %v4490_v45  ;;  %v4549_v16 = vsel %vm1343_vm1, %v4521_v18, 0.0  ;;  %v4482_v6 = vpop.xlane.xlu1 %4481 }
0x11ae   : > { %v4461_v17 = vpop.xlane.xlu0 %4460  ;;  %4550 = vadd.xlane.f32.xlu0 %v4549_v16  ;;  %v4498_v25 = vmul.f32 0.03125, %v4482_v6 }
0x11af   : > { %v4491_v15 = vmul.f32 0.03125, %v4461_v17  ;;  %v4522_v39 = vmul.f32 %v15113_v44, %v15113_v44 }
0x11b0   : > { %v15158_v17 = vsub.f32 %v15034_v32, %v4498_v25 }
0x11b1   : > { %v15119_v33 = vsub.f32 %v15029_v10, %v4491_v15  ;;  %v4552_v52 = vsel %vm1343_vm1, %v4522_v39, 0.0 }
0x11b2   : > { %v4464_v48 = vpop.xlane.xlu0 %4463  ;;  %4553 = vadd.xlane.f32.xlu1 %v4552_v52 }
0x11b3   : > { %v4492_v19 = vmul.f32 0.03125, %v4464_v48  ;;  %v4523_v27 = vmul.f32 %v15119_v33, %v15119_v33 }
0x11b5   : > { %v15125_v42 = vsub.f32 %v15041_v2, %v4492_v19  ;;  %v4555_v41 = vsel %vm1343_vm1, %v4523_v27, 0.0  ;;  %v4530_v27 = vmul.f32 %v15158_v17, %v15158_v17 }
0x11b6   : > { %v4467_v53 = vpop.xlane.xlu0 %4466  ;;  %4556 = vadd.xlane.f32.xlu0 %v4555_v41 }
0x11b7   : > { %v4493_v55 = vmul.f32 0.03125, %v4467_v53  ;;  %v4524_v10 = vmul.f32 %v15125_v42, %v15125_v42  ;;  %v4576_v41 = vsel %vm1343_vm1, %v4530_v27, 0.0 }
0x11b9   : > { %v15135_v24 = vsub.f32 %v15048_v47, %v4493_v55  ;;  %v4558_v2 = vsel %vm1343_vm1, %v4524_v10, 0.0  ;;  %v15147_v47 = vsub.f32 %v15022_v21, %v4496_v62  ;;  %v4908_v55 = vld [vmem:[%s17522_s11 + $0x8] sm:$0xff] }
0x11ba   : > { %v4470_v63 = vpop.xlane.xlu0 %4469  ;;  %4559 = vadd.xlane.f32.xlu1 %v4558_v2 }
0x11bb   : > { %v4494_v4 = vmul.f32 0.03125, %v4470_v63  ;;  %v4525_v30 = vmul.f32 %v15135_v24, %v15135_v24  ;;  %v4528_v15 = vmul.f32 %v15147_v47, %v15147_v47 }
0x11bd   : > { %v15150_v7 = vsub.f32 %v15053_v34, %v4494_v4  ;;  %v4561_v8 = vsel %vm1343_vm1, %v4525_v30, 0.0  ;;  %v4570_v32 = vsel %vm1343_vm1, %v4528_v15, 0.0 }
0x11be   : > { %v4473_v45 = vpop.xlane.xlu0 %4472  ;;  %4562 = vadd.xlane.f32.xlu0 %v4561_v8 }
0x11bf   : > { %v4495_v18 = vmul.f32 0.03125, %v4473_v45  ;;  %v4526_v16 = vmul.f32 %v15150_v7, %v15150_v7 }
0x11c1   : > { %v15161_v21 = vsub.f32 %v15059_v26, %v4495_v18  ;;  %v4564_v34 = vsel %vm1343_vm1, %v4526_v16, 0.0 }
0x11c2   : > { %4565 = vadd.xlane.f32.xlu1 %v4564_v34  ;;  %v4479_v39 = vpop.xlane.xlu0 %4478  ;;  %v15185_v34 = vld [vmem:[%s17523_s14] ss:$0 sm:$0xff] }
0x11c3   : > { %v4497_v52 = vmul.f32 0.03125, %v4479_v39  ;;  %v4527_v48 = vmul.f32 %v15161_v21, %v15161_v21 }
0x11c5   : > { %v15169_v19 = vsub.f32 %v15065_v3, %v4497_v52  ;;  %v4567_v26 = vsel %vm1343_vm1, %v4527_v48, 0.0  ;;  %v4907_v3 = vld [vmem:[%s17522_s11] sm:$0xff] }
0x11c6   : > { %4571 = vadd.xlane.f32.xlu1 %v4570_v32  ;;  %4568 = vadd.xlane.f32.xlu0 %v4567_v26  ;;  %v15181_v10 = vpack.c.bf16 %v4908_v55, %v4907_v3  ;;  %v15189_v32 = vld [vmem:[%s17524_s17] ss:$0 sm:$0xff] }
0x11c7   : > { %v4529_v31 = vmul.f32 %v15169_v19, %v15169_v19 }
0x11c8   : > { %12592 = vmatprep.subr.bf16.mxu0 %v15181_v10 }
0x11c9   : > { %v4573_v53 = vsel %vm1343_vm1, %v4529_v31, 0.0 }
0x11ca   : > { %4577 = vadd.xlane.f32.xlu1 %v4576_v41  ;;  %4574 = vadd.xlane.f32.xlu0 %v4573_v53 }
0x1227   : > { %v4533_v1 = vpop.xlane.xlu0 %4532 }
0x1228   : > { %v4579_v20 = vmul.f32 0.03125, %v4533_v1  ;;  %v4909_v1 = vld [vmem:[%s17522_s11 + $0x10] sm:$0xff] }
0x122a   : > { %v4595_v62 = vadd.f32 1e-05, %v4579_v20 }
0x122b   : > { %v4536_v2 = vpop.xlane.xlu1 %4535 }
0x122c   : > { %13349 = vrsqrt.f32 %v4595_v62  ;;  %v4580_v6 = vmul.f32 0.03125, %v4536_v2 }
0x122e   : > { %v4596_v63 = vadd.f32 1e-05, %v4580_v6 }
0x122f   : > { %v4542_v4 = vpop.xlane.xlu1 %4541  ;;  %v4539_v30 = vpop.xlane.xlu0 %4538 }
0x1230   : > { %13351 = vrsqrt.f32 %v4596_v63  ;;  %v4582_v29 = vmul.f32 0.03125, %v4542_v4  ;;  %v4581_v59 = vmul.f32 0.03125, %v4539_v30 }
0x1232   : > { %v4598_v25 = vadd.f32 1e-05, %v4582_v29  ;;  %v4597_v8 = vadd.f32 1e-05, %v4581_v59 }
0x1233   : > { %v4545_v45 = vpop.xlane.xlu0 %4544 }
0x1234   : > { %13353 = vrsqrt.f32 %v4598_v25  ;;  %v4583_v18 = vmul.f32 0.03125, %v4545_v45  ;;  %v4911_v25 = vld [vmem:[%s17522_s11 + $0x20] sm:$0xff] }
0x1235   : > { %13355 = vrsqrt.f32 %v4597_v8  ;;  %v4912_v8 = vld [vmem:[%s17522_s11 + $0x28] sm:$0xff] }
0x1236   : > { %v13350_v16 = vpop.eup %13349  ;;  %v4599_v15 = vadd.f32 1e-05, %v4583_v18 }
0x1237   : > { %v4548_v39 = vpop.xlane.xlu1 %4547  ;;  %v4627_v52 = vmul.f32 %v13350_v16, %v15072_v54  ;;  %v4910_v54 = vld [vmem:[%s17522_s11 + $0x18] sm:$0xff] }
0x1238   : > { %13357 = vrsqrt.f32 %v4599_v15  ;;  %v4584_v48 = vmul.f32 0.03125, %v4548_v39  ;;  %v15205_v30 = vpack.c.bf16 %v4910_v54, %v4909_v1 }
0x1239   : > { %v4649_v26 = vmul.f32 %v15185_v34, %v4627_v52 }
0x123a   : > { %v13352_v27 = vpop.eup %13351  ;;  %v4600_v31 = vadd.f32 1e-05, %v4584_v48  ;;  %17525 = vst [vmem:[#allocation39_spill] sm:$0xff] %v15205_v30 }
0x123b   : > { %v4628_v41 = vmul.f32 %v13352_v27, %v15080_v5  ;;  %v4551_v53 = vpop.xlane.xlu0 %4550  ;;  %v15194_v3 = vadd.f32 %v15189_v32, %v4649_v26 }
0x123c   : > { %13359 = vrsqrt.f32 %v4600_v31  ;;  %v4585_v55 = vmul.f32 0.03125, %v4551_v53 }
0x123d   : > { %v4650_v20 = vmul.f32 %v15185_v34, %v4628_v41  ;;  %11737 = vmatprep.mubr.msk.f32.mxu0 %vm1343_vm1, %v15194_v3 }
0x123e   : > { %v13354_v62 = vpop.eup %13353  ;;  %v4601_v2 = vadd.f32 1e-05, %v4585_v55 }
0x123f   : > { %v13356_v6 = vpop.eup %13355  ;;  %v4554_v63 = vpop.xlane.xlu1 %4553  ;;  %v15202_v5 = vadd.f32 %v15189_v32, %v4650_v20  ;;  %v4630_v4 = vmul.f32 %v13354_v62, %v15077_v22 }
0x1240   : > { %13361 = vrsqrt.f32 %v4601_v2  ;;  %v4586_v29 = vmul.f32 0.03125, %v4554_v63  ;;  %v4629_v59 = vmul.f32 %v13356_v6, %v15086_v60  ;;  %v15220_v60 = vpack.c.bf16 %v4912_v8, %v4911_v25 }
0x1241   : > { %11738 = vmatmul.mubr.msk.f32.vlgmr.msra.gmra.mrb[72].mxu0 %vm1343_vm1, %v15202_v5  ;;  %v4652_v45 = vmul.f32 %v15185_v34, %v4630_v4 }
0x1242   : > { %v13358_v18 = vpop.eup %13357  ;;  %v4602_v16 = vadd.f32 1e-05, %v4586_v29  ;;  %v4651_v15 = vmul.f32 %v15185_v34, %v4629_v59  ;;  %12594 = vmatpush3.bf16.msra.mxu0 %v15181_v10  ;;  %17526 = vst [vmem:[#allocation40_spill] sm:$0xff] %v15220_v60 }
0x1243   : > { %v4557_v22 = vpop.xlane.xlu0 %4556  ;;  %v15216_v39 = vadd.f32 %v15189_v32, %v4652_v45  ;;  %v4631_v52 = vmul.f32 %v13358_v18, %v15094_v13  ;;  %12596 = vmatprep.subr.bf16.mxu0 %v15205_v30 }
0x1244   : > { %13363 = vrsqrt.f32 %v4602_v16  ;;  %v4587_v48 = vmul.f32 0.03125, %v4557_v22  ;;  %v15223_v26 = vadd.f32 %v15189_v32, %v4651_v15 }
0x1245   : > { %v4653_v27 = vmul.f32 %v15185_v34, %v4631_v52 }
0x1246   : > { %v13360_v31 = vpop.eup %13359  ;;  %v4603_v41 = vadd.f32 1e-05, %v4587_v48  ;;  %11740 = vmatprep.mubr.msk.f32.mxu0 %vm1343_vm1, %v15223_v26  ;;  %12598 = vmatpush3.bf16.msra.mxu0 %v15205_v30 }
0x1247   : > { %11741 = vmatmul.mubr.msk.f32.gmra.mrb[74].mxu0 %vm1343_vm1, %v15216_v39  ;;  %v4560_v13 = vpop.xlane.xlu1 %4559  ;;  %v15232_v53 = vadd.f32 %v15189_v32, %v4653_v27  ;;  %v4632_v55 = vmul.f32 %v13360_v31, %v15101_v37  ;;  %12600 = vmatprep.subr.bf16.mxu0 %v15220_v60 }
0x1248   : > { %13365 = vrsqrt.f32 %v4603_v41  ;;  %v4588_v1 = vmul.f32 0.03125, %v4560_v13 }
0x1249   : > { %11743 = vmatprep.mubr.msk.f32.mxu0 %vm1343_vm1, %v15232_v53  ;;  %v4654_v54 = vmul.f32 %v15185_v34, %v4632_v55 }
0x124a   : > { %v13362_v20 = vpop.eup %13361  ;;  %v4604_v62 = vadd.f32 1e-05, %v4588_v1  ;;  %12602 = vmatpush3.bf16.msra.mxu0 %v15220_v60 }
0x124b   : > { %v4563_v2 = vpop.xlane.xlu0 %4562  ;;  %v15241_v6 = vadd.f32 %v15189_v32, %v4654_v54  ;;  %v4633_v63 = vmul.f32 %v13362_v20, %v15107_v50 }
0x124c   : > { %13367 = vrsqrt.f32 %v4604_v62  ;;  %v4589_v37 = vmul.f32 0.03125, %v4563_v2 }
0x124d   : > { %11744 = vmatmul.mubr.msk.f32.gmra.mrb[76].mxu0 %vm1343_vm1, %v15241_v6  ;;  %v4655_v4 = vmul.f32 %v15185_v34, %v4633_v63 }
0x124e   : > { %v13364_v29 = vpop.eup %13363  ;;  %v4605_v59 = vadd.f32 1e-05, %v4589_v37 }
0x124f   : > { %v4566_v25 = vpop.xlane.xlu1 %4565  ;;  %v15248_v8 = vadd.f32 %v15189_v32, %v4655_v4  ;;  %v4634_v45 = vmul.f32 %v13364_v29, %v15113_v44 }
0x1250   : > { %13369 = vrsqrt.f32 %v4605_v59  ;;  %v4590_v18 = vmul.f32 0.03125, %v4566_v25 }
0x1251   : > { %11746 = vmatprep.mubr.msk.f32.mxu0 %vm1343_vm1, %v15248_v8  ;;  %v4656_v50 = vmul.f32 %v15185_v34, %v4634_v45 }
0x1252   : > { %v13366_v16 = vpop.eup %13365  ;;  %v4606_v15 = vadd.f32 1e-05, %v4590_v18 }
0x1253   : > { %v4572_v22 = vpop.xlane.xlu1 %4571  ;;  %v4569_v52 = vpop.xlane.xlu0 %4568  ;;  %v15255_v48 = vadd.f32 %v15189_v32, %v4656_v50  ;;  %v4635_v27 = vmul.f32 %v13366_v16, %v15119_v33 }
0x1254   : > { %13371 = vrsqrt.f32 %v4606_v15  ;;  %v4592_v31 = vmul.f32 0.03125, %v4572_v22  ;;  %v4591_v41 = vmul.f32 0.03125, %v4569_v52 }
0x1255   : > { %11747 = vmatmul.mubr.msk.f32.gmra.mrb[78].mxu0 %vm1343_vm1, %v15255_v48  ;;  %v4657_v44 = vmul.f32 %v15185_v34, %v4635_v27 }
0x1256   : > { %v13368_v13 = vpop.eup %13367  ;;  %v4608_v55 = vadd.f32 1e-05, %v4592_v31  ;;  %v4607_v1 = vadd.f32 1e-05, %v4591_v41 }
0x1257   : > { %v4578_v54 = vpop.xlane.xlu1 %4577  ;;  %v4575_v20 = vpop.xlane.xlu0 %4574  ;;  %v15262_v62 = vadd.f32 %v15189_v32, %v4657_v44  ;;  %v4636_v2 = vmul.f32 %v13368_v13, %v15125_v42 }
0x1258   : > { %13373 = vrsqrt.f32 %v4608_v55  ;;  %v4594_v33 = vmul.f32 0.03125, %v4578_v54  ;;  %v4593_v63 = vmul.f32 0.03125, %v4575_v20 }
0x1259   : > { %13375 = vrsqrt.f32 %v4607_v1  ;;  %11749 = vmatprep.mubr.msk.f32.mxu0 %vm1343_vm1, %v15262_v62  ;;  %v4658_v37 = vmul.f32 %v15185_v34, %v4636_v2 }
0x125a   : > { %v13370_v4 = vpop.eup %13369  ;;  %v4610_v29 = vadd.f32 1e-05, %v4594_v33  ;;  %v4609_v59 = vadd.f32 1e-05, %v4593_v63  ;;  %v4914_v33 = vld [vmem:[%s17522_s11 + $0x38] sm:$0xff] }
0x125b   : > { %v15269_v25 = vadd.f32 %v15189_v32, %v4658_v37  ;;  %v4637_v45 = vmul.f32 %v13370_v4, %v15135_v24 }
0x125c   : > { %13377 = vrsqrt.f32 %v4610_v29 }
0x125d   : > { %13379 = vrsqrt.f32 %v4609_v59  ;;  %11750 = vmatmul.mubr.msk.f32.gmra.mrb[80].mxu0 %vm1343_vm1, %v15269_v25  ;;  %v4659_v42 = vmul.f32 %v15185_v34, %v4637_v45 }
0x125e   : > { %v13372_v18 = vpop.eup %13371 }
0x125f   : > { %v15276_v50 = vadd.f32 %v15189_v32, %v4659_v42  ;;  %v4638_v16 = vmul.f32 %v13372_v18, %v15150_v7 }
0x1261   : > { %11752 = vmatprep.mubr.msk.f32.mxu0 %vm1343_vm1, %v15276_v50  ;;  %v4660_v15 = vmul.f32 %v15185_v34, %v4638_v16 }
0x1262   : > { %v13374_v22 = vpop.eup %13373 }
0x1263   : > { %v13376_v24 = vpop.eup %13375  ;;  %v15283_v52 = vadd.f32 %v15189_v32, %v4660_v15  ;;  %v4640_v27 = vmul.f32 %v13374_v22, %v15147_v47 }
0x1264   : > { %v4639_v31 = vmul.f32 %v13376_v24, %v15161_v21 }
0x1265   : > { %11753 = vmatmul.mubr.msk.f32.gmra.mrb[82].mxu0 %vm1343_vm1, %v15283_v52  ;;  %v4662_v41 = vmul.f32 %v15185_v34, %v4640_v27 }
0x1266   : > { %v13378_v7 = vpop.eup %13377  ;;  %v4661_v44 = vmul.f32 %v15185_v34, %v4639_v31 }
0x1267   : > { %v13380_v13 = vpop.eup %13379  ;;  %v15292_v55 = vadd.f32 %v15189_v32, %v4662_v41  ;;  %v4642_v1 = vmul.f32 %v13378_v7, %v15158_v17 }
0x1268   : > { %v15296_v47 = vadd.f32 %v15189_v32, %v4661_v44  ;;  %v4641_v21 = vmul.f32 %v13380_v13, %v15169_v19  ;;  %v4913_v19 = vld [vmem:[%s17522_s11 + $0x30] sm:$0xff]  ;;  %s17529_s11 = sld [smem:[#allocation18_spill]] }
0x1269   : > { %v4664_v54 = vmul.f32 %v15185_v34, %v4642_v1  ;;  %v15317_v63 = vpack.c.bf16 %v4914_v33, %v4913_v19 }
0x126a   : > { %11755 = vmatprep.mubr.msk.f32.mxu0 %vm1343_vm1, %v15296_v47  ;;  %v4663_v20 = vmul.f32 %v15185_v34, %v4641_v21  ;;  %v10411_v34 = vld [vmem:[%s17527_s21] ss:$0 sm:$0xff] }
0x126b   : > { %11756 = vmatmul.mubr.msk.f32.gmra.mrb[84].mxu0 %vm1343_vm1, %v15292_v55  ;;  %v15306_v2 = vadd.f32 %v15189_v32, %v4664_v54  ;;  %17528 = vst [vmem:[#allocation41_spill] sm:$0xff] %v15317_v63  ;;  %12604 = vmatprep.subr.bf16.mxu0 %v15317_v63 }
0x126c   : > { %v15309_v17 = vadd.f32 %v15189_v32, %v4663_v20  ;;  %12606 = vmatpush3.bf16.msra.mxu0 %v15317_v63 }
0x126d   : > { %12621 = vmatprep.subr.bf16.mxu0 %v17518_v28 }
0x126e   : > { %11758 = vmatprep.mubr.msk.f32.mxu0 %vm1343_vm1, %v15309_v17 }
0x126f   : > { %11759 = vmatmul.mubr.msk.f32.gmra.mrb[86].mxu0 %vm1343_vm1, %v15306_v2 }
0x1314   : > { %v11739_v37 = vpop.f32.mrb[72].mxu0 }
0x1315   : > { %v4818_v32 = vadd.f32 %v11739_v37, %v10411_v34  ;;  %v4812_v4 = vpop.f32.mrb[73].mxu0 }
0x1316   : > { %v4813_v29 = vadd.f32 %v10411_v34, %v4812_v4 }
0x1317   : > { %v4892_v45 = vmax.f32 %v4818_v32, 0.0 }
0x1318   : > { %v4891_v59 = vmax.f32 %v4813_v29, 0.0 }
0x131a   : > { %v11742_v42 = vpop.f32.mrb[74].mxu0  ;;  %11777 = vmatprep.mubr.msk.f32.mxu0 %vm2435_vm6, %v4891_v59 }
0x131b   : > { %v4828_v18 = vadd.f32 %v11742_v42, %v10411_v34  ;;  %v4822_v16 = vpop.f32.mrb[75].mxu0  ;;  %11778 = vmatmul.mubr.msk.f32.vlgmr.msra.gmra.mrb[88].mxu0 %vm2435_vm6, %v4892_v45 }
0x131c   : > { %v4823_v15 = vadd.f32 %v10411_v34, %v4822_v16 }
0x131d   : > { %v4894_v24 = vmax.f32 %v4828_v18, 0.0 }
0x131e   : > { %v4893_v22 = vmax.f32 %v4823_v15, 0.0 }
0x1320   : > { %11780 = vmatprep.mubr.msk.f32.mxu0 %vm2435_vm6, %v4893_v22  ;;  %v11745_v27 = vpop.f32.mrb[76].mxu0 }
0x1321   : > { %v4838_v31 = vadd.f32 %v11745_v27, %v10411_v34  ;;  %11781 = vmatmul.mubr.msk.f32.gmra.mrb[90].mxu0 %vm2435_vm6, %v4894_v24  ;;  %v4832_v41 = vpop.f32.mrb[77].mxu0 }
0x1322   : > { %v4833_v7 = vadd.f32 %v10411_v34, %v4832_v41 }
0x1323   : > { %v4896_v13 = vmax.f32 %v4838_v31, 0.0 }
0x1324   : > { %v4895_v44 = vmax.f32 %v4833_v7, 0.0 }
0x1326   : > { %11783 = vmatprep.mubr.msk.f32.mxu0 %vm2435_vm6, %v4895_v44 }
0x1327   : > { %11784 = vmatmul.mubr.msk.f32.gmra.mrb[92].mxu0 %vm2435_vm6, %v4896_v13 }
0x1328   : > { %v11748_v1 = vpop.f32.mrb[78].mxu0 }
0x1329   : > { %v4848_v21 = vadd.f32 %v11748_v1, %v10411_v34  ;;  %v4842_v54 = vpop.f32.mrb[79].mxu0 }
0x132a   : > { %v4843_v20 = vadd.f32 %v10411_v34, %v4842_v54 }
0x132b   : > { %v4898_v33 = vmax.f32 %v4848_v21, 0.0 }
0x132c   : > { %v4897_v19 = vmax.f32 %v4843_v20, 0.0 }
0x132e   : > { %11786 = vmatprep.mubr.msk.f32.mxu0 %vm2435_vm6, %v4897_v19 }
0x132f   : > { %11787 = vmatmul.mubr.msk.f32.gmra.mrb[94].mxu0 %vm2435_vm6, %v4898_v33 }
0x1330   : > { %v11751_v37 = vpop.f32.mrb[80].mxu0 }
0x1331   : > { %v4858_v32 = vadd.f32 %v11751_v37, %v10411_v34  ;;  %v4852_v4 = vpop.f32.mrb[81].mxu0  ;;  %v15342_v37 = vld [vmem:[%s17529_s11] ss:$0 sm:$0xff] }
0x1332   : > { %v4853_v29 = vadd.f32 %v10411_v34, %v4852_v4 }
0x1333   : > { %v4900_v45 = vmax.f32 %v4858_v32, 0.0 }
0x1334   : > { %v4899_v59 = vmax.f32 %v4853_v29, 0.0 }
0x1336   : > { %11789 = vmatprep.mubr.msk.f32.mxu0 %vm2435_vm6, %v4899_v59 }
0x1337   : > { %11790 = vmatmul.mubr.msk.f32.gmra.mrb[96].mxu0 %vm2435_vm6, %v4900_v45 }
0x1338   : > { %v11754_v42 = vpop.f32.mrb[82].mxu0 }
0x1339   : > { %v4868_v18 = vadd.f32 %v11754_v42, %v10411_v34  ;;  %v4862_v16 = vpop.f32.mrb[83].mxu0 }
0x133a   : > { %v4863_v15 = vadd.f32 %v10411_v34, %v4862_v16 }
0x133b   : > { %v4902_v24 = vmax.f32 %v4868_v18, 0.0 }
0x133c   : > { %v4901_v22 = vmax.f32 %v4863_v15, 0.0 }
0x133e   : > { %v11757_v27 = vpop.f32.mrb[84].mxu0  ;;  %11792 = vmatprep.mubr.msk.f32.mxu0 %vm2435_vm6, %v4901_v22 }
0x133f   : > { %v4878_v31 = vadd.f32 %v11757_v27, %v10411_v34  ;;  %v4872_v41 = vpop.f32.mrb[85].mxu0  ;;  %11793 = vmatmul.mubr.msk.f32.gmra.mrb[98].mxu0 %vm2435_vm6, %v4902_v24 }
0x1340   : > { %v4873_v7 = vadd.f32 %v10411_v34, %v4872_v41 }
0x1341   : > { %v4904_v1 = vmax.f32 %v4878_v31, 0.0 }
0x1342   : > { %v4903_v44 = vmax.f32 %v4873_v7, 0.0  ;;  %v11760_v13 = vpop.f32.mrb[86].mxu0 }
0x1343   : > { %v4888_v21 = vadd.f32 %v11760_v13, %v10411_v34  ;;  %v4882_v54 = vpop.f32.mrb[87].mxu0 }
0x1344   : > { %v4883_v20 = vadd.f32 %v10411_v34, %v4882_v54  ;;  %11795 = vmatprep.mubr.msk.f32.mxu0 %vm2435_vm6, %v4903_v44 }
0x1345   : > { %11796 = vmatmul.mubr.msk.f32.gmra.mrb[100].mxu0 %vm2435_vm6, %v4904_v1  ;;  %v4906_v33 = vmax.f32 %v4888_v21, 0.0 }
0x1346   : > { %v4905_v19 = vmax.f32 %v4883_v20, 0.0 }
0x1348   : > { %11798 = vmatprep.mubr.msk.f32.mxu0 %vm2435_vm6, %v4905_v19 }
0x1349   : > { %11799 = vmatmul.mubr.msk.f32.gmra.mrb[102].mxu0 %vm2435_vm6, %v4906_v33 }
0x134a   : > { %11876 = vmatprep.mubr.msk.f32.mxu0 %vm13745_vm0, %v17520_v11 }
0x13ee   : > { %v11779_v32 = vpop.f32.mrb[88].mxu0 }
0x13ef   : > { %v5042_v4 = vadd.f32 %v11779_v32, %v15342_v37  ;;  %v5036_v29 = vpop.f32.mrb[89].mxu0 }
0x13f0   : > { %v5037_v34 = vadd.f32 %v15342_v37, %v5036_v29 }
0x13f1   : > { %v15347_v59 = vadd.f32 %v5042_v4, %v15202_v5 }
0x13f2   : > { %v15350_v45 = vadd.f32 %v5037_v34, %v15194_v3 }
0x13f3   : > { %v5136_v42 = vsel %vm1343_vm1, %v15347_v59, 0.0 }
0x13f4   : > { %v11782_v18 = vpop.f32.mrb[90].mxu0  ;;  %5137 = vadd.xlane.f32.xlu1 %v5136_v42  ;;  %v5133_v16 = vsel %vm1343_vm1, %v15350_v45, 0.0 }
0x13f5   : > { %v5052_v15 = vadd.f32 %v11782_v18, %v15342_v37  ;;  %v5046_v22 = vpop.f32.mrb[91].mxu0  ;;  %5134 = vadd.xlane.f32.xlu0 %v5133_v16 }
0x13f6   : > { %v5047_v24 = vadd.f32 %v15342_v37, %v5046_v22 }
0x13f7   : > { %v15359_v5 = vadd.f32 %v5052_v15, %v15216_v39 }
0x13f8   : > { %v15362_v3 = vadd.f32 %v5047_v24, %v15223_v26 }
0x13f9   : > { %v5142_v27 = vsel %vm1343_vm1, %v15359_v5, 0.0 }
0x13fa   : > { %5143 = vadd.xlane.f32.xlu1 %v5142_v27  ;;  %v11785_v31 = vpop.f32.mrb[92].mxu0  ;;  %v5139_v41 = vsel %vm1343_vm1, %v15362_v3, 0.0 }
0x13fb   : > { %v5062_v7 = vadd.f32 %v11785_v31, %v15342_v37  ;;  %5140 = vadd.xlane.f32.xlu0 %v5139_v41  ;;  %v5056_v44 = vpop.f32.mrb[93].mxu0 }
0x13fc   : > { %v5057_v13 = vadd.f32 %v15342_v37, %v5056_v44 }
0x13fd   : > { %v15371_v39 = vadd.f32 %v5062_v7, %v15241_v6 }
0x13fe   : > { %v15374_v26 = vadd.f32 %v5057_v13, %v15232_v53 }
0x13ff   : > { %v5148_v1 = vsel %vm1343_vm1, %v15371_v39, 0.0 }
0x1400   : > { %5149 = vadd.xlane.f32.xlu1 %v5148_v1  ;;  %v5145_v21 = vsel %vm1343_vm1, %v15374_v26, 0.0 }
0x1401   : > { %5146 = vadd.xlane.f32.xlu0 %v5145_v21 }
0x1402   : > { %v11788_v54 = vpop.f32.mrb[94].mxu0 }
0x1403   : > { %v5072_v20 = vadd.f32 %v11788_v54, %v15342_v37  ;;  %v5066_v19 = vpop.f32.mrb[95].mxu0 }
0x1404   : > { %v5067_v33 = vadd.f32 %v15342_v37, %v5066_v19 }
0x1405   : > { %v15383_v6 = vadd.f32 %v5072_v20, %v15255_v48 }
0x1406   : > { %v15386_v53 = vadd.f32 %v5067_v33, %v15248_v8 }
0x1407   : > { %v5154_v32 = vsel %vm1343_vm1, %v15383_v6, 0.0 }
0x1408   : > { %5155 = vadd.xlane.f32.xlu1 %v5154_v32  ;;  %v5151_v4 = vsel %vm1343_vm1, %v15386_v53, 0.0 }
0x1409   : > { %5152 = vadd.xlane.f32.xlu0 %v5151_v4 }
0x140a   : > { %v11791_v29 = vpop.f32.mrb[96].mxu0 }
0x140b   : > { %v5082_v34 = vadd.f32 %v11791_v29, %v15342_v37  ;;  %v5076_v42 = vpop.f32.mrb[97].mxu0 }
0x140c   : > { %v5077_v18 = vadd.f32 %v15342_v37, %v5076_v42 }
0x140d   : > { %v15395_v48 = vadd.f32 %v5082_v34, %v15269_v25 }
0x140e   : > { %v15398_v8 = vadd.f32 %v5077_v18, %v15262_v62 }
0x140f   : > { %v5160_v16 = vsel %vm1343_vm1, %v15395_v48, 0.0 }
0x1410   : > { %5161 = vadd.xlane.f32.xlu1 %v5160_v16  ;;  %v5157_v15 = vsel %vm1343_vm1, %v15398_v8, 0.0 }
0x1411   : > { %5158 = vadd.xlane.f32.xlu0 %v5157_v15 }
0x1412   : > { %v11794_v22 = vpop.f32.mrb[98].mxu0 }
0x1413   : > { %v5092_v24 = vadd.f32 %v11794_v22, %v15342_v37  ;;  %v5086_v27 = vpop.f32.mrb[99].mxu0 }
0x1414   : > { %v5087_v31 = vadd.f32 %v15342_v37, %v5086_v27 }
0x1415   : > { %v15407_v25 = vadd.f32 %v5092_v24, %v15283_v52 }
0x1416   : > { %v15410_v62 = vadd.f32 %v5087_v31, %v15276_v50 }
0x1417   : > { %v5166_v41 = vsel %vm1343_vm1, %v15407_v25, 0.0 }
0x1418   : > { %v11797_v7 = vpop.f32.mrb[100].mxu0  ;;  %5167 = vadd.xlane.f32.xlu1 %v5166_v41  ;;  %v5163_v44 = vsel %vm1343_vm1, %v15410_v62, 0.0 }
0x1419   : > { %v5102_v13 = vadd.f32 %v11797_v7, %v15342_v37  ;;  %v5096_v1 = vpop.f32.mrb[101].mxu0  ;;  %5164 = vadd.xlane.f32.xlu0 %v5163_v44 }
0x141a   : > { %v5097_v21 = vadd.f32 %v15342_v37, %v5096_v1 }
0x141b   : > { %v15419_v52 = vadd.f32 %v5102_v13, %v15292_v55 }
0x141c   : > { %v15422_v50 = vadd.f32 %v5097_v21, %v15296_v47  ;;  %v11800_v54 = vpop.f32.mrb[102].mxu0 }
0x141d   : > { %v5112_v20 = vadd.f32 %v11800_v54, %v15342_v37  ;;  %v5106_v19 = vpop.f32.mrb[103].mxu0  ;;  %v5172_v33 = vsel %vm1343_vm1, %v15419_v52, 0.0 }
0x141e   : > { %v5107_v32 = vadd.f32 %v15342_v37, %v5106_v19  ;;  %5173 = vadd.xlane.f32.xlu1 %v5172_v33  ;;  %v5169_v4 = vsel %vm1343_vm1, %v15422_v50, 0.0 }
0x141f   : > { %v15431_v29 = vadd.f32 %v5112_v20, %v15306_v2  ;;  %5170 = vadd.xlane.f32.xlu0 %v5169_v4 }
0x1420   : > { %v15434_v55 = vadd.f32 %v5107_v32, %v15309_v17 }
0x1421   : > { %v5178_v47 = vsel %vm1343_vm1, %v15431_v29, 0.0 }
0x1422   : > { %5179 = vadd.xlane.f32.xlu1 %v5178_v47  ;;  %v5175_v34 = vsel %vm1343_vm1, %v15434_v55, 0.0 }
0x1423   : > { %5176 = vadd.xlane.f32.xlu0 %v5175_v34 }
0x1481   : > { %v5138_v37 = vpop.xlane.xlu1 %5137 }
0x1482   : > { %v5182_v42 = vmul.f32 0.03125, %v5138_v37  ;;  %v5135_v18 = vpop.xlane.xlu0 %5134 }
0x1483   : > { %v5181_v16 = vmul.f32 0.03125, %v5135_v18 }
0x1484   : > { %v15441_v15 = vsub.f32 %v15347_v59, %v5182_v42 }
0x1485   : > { %v15444_v2 = vsub.f32 %v15350_v45, %v5181_v16 }
0x1486   : > { %v5214_v17 = vmul.f32 %v15441_v15, %v15441_v15 }
0x1487   : > { %v5144_v22 = vpop.xlane.xlu1 %5143  ;;  %v5213_v24 = vmul.f32 %v15444_v2, %v15444_v2 }
0x1488   : > { %v5184_v27 = vmul.f32 0.03125, %v5144_v22  ;;  %v5141_v31 = vpop.xlane.xlu0 %5140  ;;  %v5232_v41 = vsel %vm1343_vm1, %v5214_v17, 0.0 }
0x1489   : > { %v5183_v7 = vmul.f32 0.03125, %v5141_v31  ;;  %5233 = vadd.xlane.f32.xlu1 %v5232_v41  ;;  %v5229_v44 = vsel %vm1343_vm1, %v5213_v24, 0.0 }
0x148a   : > { %v15453_v59 = vsub.f32 %v15359_v5, %v5184_v27  ;;  %5230 = vadd.xlane.f32.xlu0 %v5229_v44 }
0x148b   : > { %v15456_v45 = vsub.f32 %v15362_v3, %v5183_v7 }
0x148c   : > { %v5216_v13 = vmul.f32 %v15453_v59, %v15453_v59 }
0x148d   : > { %v5150_v1 = vpop.xlane.xlu1 %5149  ;;  %v5215_v21 = vmul.f32 %v15456_v45, %v15456_v45 }
0x148e   : > { %v5186_v54 = vmul.f32 0.03125, %v5150_v1  ;;  %v5147_v20 = vpop.xlane.xlu0 %5146  ;;  %v5238_v19 = vsel %vm1343_vm1, %v5216_v13, 0.0 }
0x148f   : > { %v5185_v33 = vmul.f32 0.03125, %v5147_v20  ;;  %5239 = vadd.xlane.f32.xlu1 %v5238_v19  ;;  %v5235_v5 = vsel %vm1343_vm1, %v5215_v21, 0.0 }
0x1490   : > { %v15465_v32 = vsub.f32 %v15371_v39, %v5186_v54  ;;  %5236 = vadd.xlane.f32.xlu0 %v5235_v5 }
0x1491   : > { %v15468_v3 = vsub.f32 %v15374_v26, %v5185_v33 }
0x1492   : > { %v5218_v4 = vmul.f32 %v15465_v32, %v15465_v32 }
0x1493   : > { %v5217_v47 = vmul.f32 %v15468_v3, %v15468_v3 }
0x1494   : > { %v5244_v34 = vsel %vm1343_vm1, %v5218_v4, 0.0 }
0x1495   : > { %v5156_v37 = vpop.xlane.xlu1 %5155  ;;  %5245 = vadd.xlane.f32.xlu1 %v5244_v34  ;;  %v5241_v42 = vsel %vm1343_vm1, %v5217_v47, 0.0 }
0x1496   : > { %v5188_v18 = vmul.f32 0.03125, %v5156_v37  ;;  %v5153_v16 = vpop.xlane.xlu0 %5152  ;;  %5242 = vadd.xlane.f32.xlu0 %v5241_v42 }
0x1497   : > { %v5187_v39 = vmul.f32 0.03125, %v5153_v16 }
0x1498   : > { %v15477_v17 = vsub.f32 %v15383_v6, %v5188_v18 }
0x1499   : > { %v15480_v26 = vsub.f32 %v15386_v53, %v5187_v39 }
0x149a   : > { %v5220_v22 = vmul.f32 %v15477_v17, %v15477_v17 }
0x149b   : > { %v5219_v24 = vmul.f32 %v15480_v26, %v15480_v26 }
0x149c   : > { %v5250_v27 = vsel %vm1343_vm1, %v5220_v22, 0.0 }
0x149d   : > { %v5162_v31 = vpop.xlane.xlu1 %5161  ;;  %5251 = vadd.xlane.f32.xlu1 %v5250_v27  ;;  %v5247_v41 = vsel %vm1343_vm1, %v5219_v24, 0.0 }
0x149e   : > { %v5190_v7 = vmul.f32 0.03125, %v5162_v31  ;;  %v5159_v44 = vpop.xlane.xlu0 %5158  ;;  %5248 = vadd.xlane.f32.xlu0 %v5247_v41 }
0x149f   : > { %v5189_v6 = vmul.f32 0.03125, %v5159_v44 }
0x14a0   : > { %v15489_v13 = vsub.f32 %v15395_v48, %v5190_v7 }
0x14a1   : > { %v15492_v53 = vsub.f32 %v15398_v8, %v5189_v6 }
0x14a2   : > { %v5222_v1 = vmul.f32 %v15489_v13, %v15489_v13 }
0x14a3   : > { %v5221_v21 = vmul.f32 %v15492_v53, %v15492_v53 }
0x14a4   : > { %v5256_v54 = vsel %vm1343_vm1, %v5222_v1, 0.0 }
0x14a5   : > { %v5168_v20 = vpop.xlane.xlu1 %5167  ;;  %5257 = vadd.xlane.f32.xlu1 %v5256_v54  ;;  %v5253_v19 = vsel %vm1343_vm1, %v5221_v21, 0.0 }
0x14a6   : > { %v5192_v33 = vmul.f32 0.03125, %v5168_v20  ;;  %v5165_v5 = vpop.xlane.xlu0 %5164  ;;  %5254 = vadd.xlane.f32.xlu0 %v5253_v19 }
0x14a7   : > { %v5191_v48 = vmul.f32 0.03125, %v5165_v5 }
0x14a8   : > { %v15501_v4 = vsub.f32 %v15407_v25, %v5192_v33 }
0x14a9   : > { %v15504_v8 = vsub.f32 %v15410_v62, %v5191_v48 }
0x14aa   : > { %v5224_v47 = vmul.f32 %v15501_v4, %v15501_v4 }
0x14ab   : > { %v5174_v34 = vpop.xlane.xlu1 %5173  ;;  %v5223_v37 = vmul.f32 %v15504_v8, %v15504_v8 }
0x14ac   : > { %v5194_v42 = vmul.f32 0.03125, %v5174_v34  ;;  %v5171_v18 = vpop.xlane.xlu0 %5170  ;;  %v5262_v16 = vsel %vm1343_vm1, %v5224_v47, 0.0 }
0x14ad   : > { %v5193_v39 = vmul.f32 0.03125, %v5171_v18  ;;  %5263 = vadd.xlane.f32.xlu1 %v5262_v16  ;;  %v5259_v22 = vsel %vm1343_vm1, %v5223_v37, 0.0 }
0x14ae   : > { %v15513_v25 = vsub.f32 %v15419_v52, %v5194_v42  ;;  %5260 = vadd.xlane.f32.xlu0 %v5259_v22 }
0x14af   : > { %v15516_v62 = vsub.f32 %v15422_v50, %v5193_v39  ;;  %v5180_v24 = vpop.xlane.xlu1 %5179 }
0x14b0   : > { %v5196_v27 = vmul.f32 0.03125, %v5180_v24  ;;  %v5177_v31 = vpop.xlane.xlu0 %5176  ;;  %v5226_v41 = vmul.f32 %v15513_v25, %v15513_v25 }
0x14b1   : > { %v5195_v7 = vmul.f32 0.03125, %v5177_v31  ;;  %v5225_v44 = vmul.f32 %v15516_v62, %v15516_v62 }
0x14b2   : > { %v15523_v6 = vsub.f32 %v15431_v29, %v5196_v27  ;;  %v5268_v52 = vsel %vm1343_vm1, %v5226_v41, 0.0 }
0x14b3   : > { %v15527_v1 = vsub.f32 %v15434_v55, %v5195_v7  ;;  %5269 = vadd.xlane.f32.xlu1 %v5268_v52  ;;  %v5265_v50 = vsel %vm1343_vm1, %v5225_v44, 0.0  ;;  %v15537_v44 = vld [vmem:[%s17530_s26] ss:$0 sm:$0xff] }
0x14b4   : > { %5266 = vadd.xlane.f32.xlu0 %v5265_v50  ;;  %v5228_v21 = vmul.f32 %v15523_v6, %v15523_v6 }
0x14b5   : > { %v5227_v54 = vmul.f32 %v15527_v1, %v15527_v1 }
0x14b6   : > { %v5274_v20 = vsel %vm1343_vm1, %v5228_v21, 0.0 }
0x14b7   : > { %5275 = vadd.xlane.f32.xlu1 %v5274_v20  ;;  %v5271_v29 = vsel %vm1343_vm1, %v5227_v54, 0.0  ;;  %v15542_v20 = vld [vmem:[%s17531_s27] ss:$0 sm:$0xff] }
0x14b8   : > { %5272 = vadd.xlane.f32.xlu0 %v5271_v29 }
0x1516   : > { %v5234_v19 = vpop.xlane.xlu1 %5233 }
0x1517   : > { %v5278_v33 = vmul.f32 0.03125, %v5234_v19  ;;  %v5231_v55 = vpop.xlane.xlu0 %5230 }
0x1518   : > { %v5277_v5 = vmul.f32 0.03125, %v5231_v55 }
0x1519   : > { %v5294_v48 = vadd.f32 1e-05, %v5278_v33 }
0x151a   : > { %v5293_v47 = vadd.f32 1e-05, %v5277_v5 }
0x151b   : > { %13381 = vrsqrt.f32 %v5294_v48 }
0x151c   : > { %13383 = vrsqrt.f32 %v5293_v47  ;;  %v5240_v34 = vpop.xlane.xlu1 %5239 }
0x151d   : > { %v5280_v37 = vmul.f32 0.03125, %v5240_v34  ;;  %v5237_v42 = vpop.xlane.xlu0 %5236 }
0x151e   : > { %v5279_v18 = vmul.f32 0.03125, %v5237_v42 }
0x151f   : > { %v5296_v16 = vadd.f32 1e-05, %v5280_v37 }
0x1520   : > { %v5295_v39 = vadd.f32 1e-05, %v5279_v18 }
0x1521   : > { %13385 = vrsqrt.f32 %v5296_v16 }
0x1522   : > { %13387 = vrsqrt.f32 %v5295_v39  ;;  %v5246_v22 = vpop.xlane.xlu1 %5245 }
0x1523   : > { %v5282_v24 = vmul.f32 0.03125, %v5246_v22  ;;  %v5243_v27 = vpop.xlane.xlu0 %5242 }
0x1524   : > { %v5281_v31 = vmul.f32 0.03125, %v5243_v27 }
0x1525   : > { %v13382_v41 = vpop.eup %13381  ;;  %v5298_v7 = vadd.f32 1e-05, %v5282_v24 }
0x1526   : > { %v13384_v52 = vpop.eup %13383  ;;  %v5326_v50 = vmul.f32 %v13382_v41, %v15441_v15  ;;  %v5297_v21 = vadd.f32 1e-05, %v5281_v31 }
0x1527   : > { %13389 = vrsqrt.f32 %v5298_v7  ;;  %v5325_v54 = vmul.f32 %v13384_v52, %v15444_v2 }
0x1528   : > { %13391 = vrsqrt.f32 %v5297_v21  ;;  %v5348_v29 = vmul.f32 %v15537_v44, %v5326_v50 }
0x1529   : > { %v5347_v19 = vmul.f32 %v15537_v44, %v5325_v54 }
0x152a   : > { %v5252_v33 = vpop.xlane.xlu1 %5251  ;;  %v15550_v37 = vadd.f32 %v15542_v20, %v5348_v29 }
0x152b   : > { %v13386_v55 = vpop.eup %13385  ;;  %v5284_v5 = vmul.f32 0.03125, %v5252_v33  ;;  %v5249_v48 = vpop.xlane.xlu0 %5248  ;;  %v15547_v47 = vadd.f32 %v15542_v20, %v5347_v19 }
0x152c   : > { %v13388_v34 = vpop.eup %13387  ;;  %v5283_v15 = vmul.f32 0.03125, %v5249_v48  ;;  %v5328_v2 = vmul.f32 %v13386_v55, %v15453_v59 }
0x152d   : > { %v5300_v42 = vadd.f32 1e-05, %v5284_v5  ;;  %11820 = vmatprep.mubr.msk.f32.mxu1 %vm1343_vm1, %v15547_v47  ;;  %v5327_v18 = vmul.f32 %v13388_v34, %v15456_v45 }
0x152e   : > { %v5299_v16 = vadd.f32 1e-05, %v5283_v15  ;;  %11821 = vmatmul.mubr.msk.f32.vlgmr.msra.gmra.mrb[62].mxu1 %vm1343_vm1, %v15550_v37  ;;  %v5350_v39 = vmul.f32 %v15537_v44, %v5328_v2 }
0x152f   : > { %13393 = vrsqrt.f32 %v5300_v42  ;;  %v5349_v22 = vmul.f32 %v15537_v44, %v5327_v18 }
0x1530   : > { %13395 = vrsqrt.f32 %v5299_v16  ;;  %v15564_v41 = vadd.f32 %v15542_v20, %v5350_v39 }
0x1531   : > { %v13390_v24 = vpop.eup %13389  ;;  %v15561_v27 = vadd.f32 %v15542_v20, %v5349_v22 }
0x1532   : > { %v13392_v59 = vpop.eup %13391  ;;  %v5258_v31 = vpop.xlane.xlu1 %5257  ;;  %v5330_v45 = vmul.f32 %v13390_v24, %v15465_v32 }
0x1533   : > { %v5286_v7 = vmul.f32 0.03125, %v5258_v31  ;;  %11823 = vmatprep.mubr.msk.f32.mxu1 %vm1343_vm1, %v15561_v27  ;;  %v5255_v52 = vpop.xlane.xlu0 %5254  ;;  %v5329_v50 = vmul.f32 %v13392_v59, %v15468_v3 }
0x1534   : > { %11824 = vmatmul.mubr.msk.f32.gmra.mrb[64].mxu1 %vm1343_vm1, %v15564_v41  ;;  %v5285_v21 = vmul.f32 0.03125, %v5255_v52  ;;  %v5352_v54 = vmul.f32 %v15537_v44, %v5330_v45 }
0x1535   : > { %v5302_v29 = vadd.f32 1e-05, %v5286_v7  ;;  %v5351_v19 = vmul.f32 %v15537_v44, %v5329_v50 }
0x1536   : > { %v5301_v33 = vadd.f32 1e-05, %v5285_v21  ;;  %v15578_v55 = vadd.f32 %v15542_v20, %v5352_v54 }
0x1537   : > { %13397 = vrsqrt.f32 %v5302_v29  ;;  %v15575_v32 = vadd.f32 %v15542_v20, %v5351_v19 }
0x1538   : > { %13399 = vrsqrt.f32 %v5301_v33 }
0x1539   : > { %v13394_v5 = vpop.eup %13393  ;;  %11826 = vmatprep.mubr.msk.f32.mxu1 %vm1343_vm1, %v15575_v32 }
0x153a   : > { %v13396_v3 = vpop.eup %13395  ;;  %v5264_v48 = vpop.xlane.xlu1 %5263  ;;  %11827 = vmatmul.mubr.msk.f32.gmra.mrb[66].mxu1 %vm1343_vm1, %v15578_v55  ;;  %v5332_v34 = vmul.f32 %v13394_v5, %v15477_v17 }
0x153b   : > { %v5288_v15 = vmul.f32 0.03125, %v5264_v48  ;;  %v5261_v2 = vpop.xlane.xlu0 %5260  ;;  %v5331_v42 = vmul.f32 %v13396_v3, %v15480_v26 }
0x153c   : > { %v5287_v18 = vmul.f32 0.03125, %v5261_v2  ;;  %v5354_v16 = vmul.f32 %v15537_v44, %v5332_v34 }
0x153d   : > { %v5304_v39 = vadd.f32 1e-05, %v5288_v15  ;;  %v5353_v22 = vmul.f32 %v15537_v44, %v5331_v42 }
0x153e   : > { %v5303_v24 = vadd.f32 1e-05, %v5287_v18  ;;  %v15592_v45 = vadd.f32 %v15542_v20, %v5354_v16 }
0x153f   : > { %13401 = vrsqrt.f32 %v5304_v39  ;;  %v15589_v59 = vadd.f32 %v15542_v20, %v5353_v22 }
0x1540   : > { %13403 = vrsqrt.f32 %v5303_v24  ;;  %v5270_v31 = vpop.xlane.xlu1 %5269 }
0x1541   : > { %v13398_v17 = vpop.eup %13397  ;;  %v5290_v7 = vmul.f32 0.03125, %v5270_v31  ;;  %v5267_v52 = vpop.xlane.xlu0 %5266  ;;  %11829 = vmatprep.mubr.msk.f32.mxu1 %vm1343_vm1, %v15589_v59 }
0x1542   : > { %v13400_v26 = vpop.eup %13399  ;;  %v5289_v50 = vmul.f32 0.03125, %v5267_v52  ;;  %11830 = vmatmul.mubr.msk.f32.gmra.mrb[68].mxu1 %vm1343_vm1, %v15592_v45  ;;  %v5334_v21 = vmul.f32 %v13398_v17, %v15489_v13 }
0x1543   : > { %v5306_v54 = vadd.f32 1e-05, %v5290_v7  ;;  %v5333_v29 = vmul.f32 %v13400_v26, %v15492_v53 }
0x1544   : > { %v5305_v19 = vadd.f32 1e-05, %v5289_v50  ;;  %v5276_v33 = vpop.xlane.xlu1 %5275  ;;  %v5356_v5 = vmul.f32 %v15537_v44, %v5334_v21 }
0x1545   : > { %13405 = vrsqrt.f32 %v5306_v54  ;;  %v5292_v3 = vmul.f32 0.03125, %v5276_v33  ;;  %v5273_v48 = vpop.xlane.xlu0 %5272  ;;  %v5355_v34 = vmul.f32 %v15537_v44, %v5333_v29 }
0x1546   : > { %13407 = vrsqrt.f32 %v5305_v19  ;;  %v5291_v15 = vmul.f32 0.03125, %v5273_v48  ;;  %v15606_v13 = vadd.f32 %v15542_v20, %v5356_v5 }
0x1547   : > { %v5308_v2 = vadd.f32 1e-05, %v5292_v3  ;;  %v15603_v42 = vadd.f32 %v15542_v20, %v5355_v34 }
0x1548   : > { %v5307_v18 = vadd.f32 1e-05, %v5291_v15  ;;  %17533 = vst [vmem:[#allocation43_spill] sm:$0xff] %v15606_v13 }
0x1549   : > { %17532 = vst [vmem:[#allocation42_spill] sm:$0xff] %v15603_v42  ;;  %v13402_v53 = vpop.eup %13401  ;;  %13409 = vrsqrt.f32 %v5308_v2  ;;  %11832 = vmatprep.mubr.msk.f32.mxu1 %vm1343_vm1, %v15603_v42 }
0x154a   : > { %v13404_v16 = vpop.eup %13403  ;;  %13411 = vrsqrt.f32 %v5307_v18  ;;  %11833 = vmatmul.mubr.msk.f32.gmra.mrb[70].mxu1 %vm1343_vm1, %v15606_v13  ;;  %v5336_v39 = vmul.f32 %v13402_v53, %v15501_v4 }
0x154b   : > { %v5335_v22 = vmul.f32 %v13404_v16, %v15504_v8 }
0x154c   : > { %v5358_v24 = vmul.f32 %v15537_v44, %v5336_v39 }
0x154d   : > { %v5357_v31 = vmul.f32 %v15537_v44, %v5335_v22 }
0x154e   : > { %v15620_v26 = vadd.f32 %v15542_v20, %v5358_v24 }
0x154f   : > { %v13406_v17 = vpop.eup %13405  ;;  %v15617_v7 = vadd.f32 %v15542_v20, %v5357_v31 }
0x1550   : > { %v13408_v52 = vpop.eup %13407  ;;  %17535 = vst [vmem:[#allocation45_spill] sm:$0xff] %v15620_v26  ;;  %v5338_v50 = vmul.f32 %v13406_v17, %v15513_v25 }
0x1551   : > { %17534 = vst [vmem:[#allocation44_spill] sm:$0xff] %v15617_v7  ;;  %11835 = vmatprep.mubr.msk.f32.mxu1 %vm1343_vm1, %v15617_v7  ;;  %v5337_v4 = vmul.f32 %v13408_v52, %v15516_v62 }
0x1552   : > { %11836 = vmatmul.mubr.msk.f32.gmra.mrb[72].mxu1 %vm1343_vm1, %v15620_v26  ;;  %v5360_v8 = vmul.f32 %v15537_v44, %v5338_v50 }
0x1553   : > { %v13410_v21 = vpop.eup %13409  ;;  %v5359_v54 = vmul.f32 %v15537_v44, %v5337_v4 }
0x1554   : > { %v13412_v29 = vpop.eup %13411  ;;  %v5340_v19 = vmul.f32 %v13410_v21, %v15523_v6  ;;  %v15636_v5 = vadd.f32 %v15542_v20, %v5360_v8 }
0x1555   : > { %v15632_v33 = vadd.f32 %v15542_v20, %v5359_v54  ;;  %v5339_v25 = vmul.f32 %v13412_v29, %v15527_v1 }
0x1556   : > { %17536 = vst [vmem:[#allocation46_spill] sm:$0xff] %v15636_v5  ;;  %v5362_v62 = vmul.f32 %v15537_v44, %v5340_v19 }
0x1557   : > { %11838 = vmatprep.mubr.msk.f32.mxu1 %vm1343_vm1, %v15632_v33  ;;  %v5361_v3 = vmul.f32 %v15537_v44, %v5339_v25  ;;  %v13675_v44 = vld [vmem:[%s13867_s18] ss:$0 sm:$0xff] }
0x1558   : > { %11839 = vmatmul.mubr.msk.f32.gmra.mrb[74].mxu1 %vm1343_vm1, %v15636_v5  ;;  %v15648_v48 = vadd.f32 %v15542_v20, %v5362_v62 }
0x1559   : > { %v15645_v6 = vadd.f32 %v15542_v20, %v5361_v3 }
0x155a   : > { %17538 = vst [vmem:[#allocation48_spill] sm:$0xff] %v15648_v48 }
0x155b   : > { %17537 = vst [vmem:[#allocation47_spill] sm:$0xff] %v15645_v6  ;;  %11841 = vmatprep.mubr.msk.f32.mxu1 %vm1343_vm1, %v15645_v6 }
0x155c   : > { %11842 = vmatmul.mubr.msk.f32.gmra.mrb[76].mxu1 %vm1343_vm1, %v15648_v48 }
0x155d   : > { %11911 = vmatprep.mubr.msk.f32.mxu1 %vm13745_vm0, %v17520_v11 }
0x1601   : > { %v11822_v1 = vpop.f32.mrb[62].mxu1 }
0x1602   : > { %v5575_v34 = vadd.f32 %v13675_v44, %v11822_v1  ;;  %v5569_v15 = vpop.f32.mrb[63].mxu1 }
0x1603   : > { %v5570_v2 = vadd.f32 %v13675_v44, %v5569_v15 }
0x1605   : > { %v12622_v18 = vpack.c.bf16 %v5575_v34, %v5570_v2  ;;  %v15657_v53 = vpack.i.bf16 %v5575_v34, %v5570_v2 }
0x1607   : > { %v11825_v16 = vpop.f32.mrb[64].mxu1  ;;  %13088 = vrot.lane.b32.xlu1 %v15657_v53, %s17515_s20  ;;  %12624 = vmatpush3.bf16.xpose.msk.msra.mxu0 %vm14102_vm3, %v12622_v18 }
0x1608   : > { %v5585_v20 = vadd.f32 %v13675_v44, %v11825_v16  ;;  %v5579_v39 = vpop.f32.mrb[65].mxu1  ;;  %12625 = vmatprep.subr.bf16.mxu0 %v17518_v28 }
0x1609   : > { %v5580_v22 = vadd.f32 %v13675_v44, %v5579_v39 }
0x160b   : > { %v12626_v24 = vpack.c.bf16 %v5585_v20, %v5580_v22  ;;  %v15664_v31 = vpack.i.bf16 %v5585_v20, %v5580_v22 }
0x160d   : > { %v11828_v17 = vpop.f32.mrb[66].mxu1 }
0x160e   : > { %v5595_v52 = vadd.f32 %v13675_v44, %v11828_v17  ;;  %v5589_v50 = vpop.f32.mrb[67].mxu1 }
0x160f   : > { %v5590_v4 = vadd.f32 %v13675_v44, %v5589_v50  ;;  %12628 = vmatpush3.bf16.xpose.msk.msra.mxu0 %vm14102_vm3, %v12626_v24 }
0x1610   : > { %12629 = vmatprep.subr.bf16.mxu0 %v17518_v28 }
0x1611   : > { %v12630_v8 = vpack.c.bf16 %v5595_v52, %v5590_v4  ;;  %v15669_v21 = vpack.i.bf16 %v5595_v52, %v5590_v4 }
0x1613   : > { %13098 = vrot.lane.b32.xlu1 %v15669_v21, %s17515_s20 }
0x1615   : > { %v11831_v54 = vpop.f32.mrb[68].mxu1 }
0x1616   : > { %v5605_v29 = vadd.f32 %v13675_v44, %v11831_v54  ;;  %v5599_v19 = vpop.f32.mrb[69].mxu1 }
0x1617   : > { %v5600_v25 = vadd.f32 %v13675_v44, %v5599_v19  ;;  %12632 = vmatpush3.bf16.xpose.msk.msra.mxu0 %vm14102_vm3, %v12630_v8 }
0x1618   : > { %12633 = vmatprep.subr.bf16.mxu0 %v17518_v28 }
0x1619   : > { %v12634_v62 = vpack.c.bf16 %v5605_v29, %v5600_v25  ;;  %v15676_v3 = vpack.i.bf16 %v5605_v29, %v5600_v25 }
0x161d   : > { %v11834_v1 = vpop.f32.mrb[70].mxu1 }
0x161e   : > { %v5615_v34 = vadd.f32 %v13675_v44, %v11834_v1  ;;  %v5609_v15 = vpop.f32.mrb[71].mxu1 }
0x161f   : > { %v5610_v2 = vadd.f32 %v13675_v44, %v5609_v15  ;;  %12636 = vmatpush3.bf16.xpose.msk.msra.mxu0 %vm14102_vm3, %v12634_v62 }
0x1620   : > { %12637 = vmatprep.subr.bf16.mxu0 %v17518_v28 }
0x1621   : > { %v12638_v18 = vpack.c.bf16 %v5615_v34, %v5610_v2  ;;  %v15681_v16 = vpack.i.bf16 %v5615_v34, %v5610_v2 }
0x1625   : > { %v11837_v20 = vpop.f32.mrb[72].mxu1 }
0x1626   : > { %v5625_v39 = vadd.f32 %v13675_v44, %v11837_v20  ;;  %v5619_v22 = vpop.f32.mrb[73].mxu1 }
0x1627   : > { %v5620_v24 = vadd.f32 %v13675_v44, %v5619_v22  ;;  %12640 = vmatpush3.bf16.xpose.msk.msra.mxu0 %vm14102_vm3, %v12638_v18  ;;  %v13676_v18 = vld [vmem:[%s17489_s3] ss:$0 sm:$0xff]  ;;  %s17539_s3 = smov 112  }
0x1628   : > { %12641 = vmatprep.subr.bf16.mxu0 %v17518_v28  ;;  %v5452_v20 = vadd.f32 %v13676_v18, %v15036_v23 }
0x1629   : > { %v12642_v17 = vpack.c.bf16 %v5625_v39, %v5620_v24  ;;  %v15686_v52 = vpack.i.bf16 %v5625_v39, %v5620_v24 }
0x162b   : > { %v11840_v50 = vpop.f32.mrb[74].mxu1 }
0x162c   : > { %v5635_v4 = vadd.f32 %v13675_v44, %v11840_v50  ;;  %v5629_v8 = vpop.f32.mrb[75].mxu1 }
0x162d   : > { %v5630_v54 = vadd.f32 %v13675_v44, %v5629_v8 }
0x162f   : > { %v12646_v29 = vpack.c.bf16 %v5635_v4, %v5630_v54  ;;  %v11843_v19 = vpop.f32.mrb[76].mxu1  ;;  %12644 = vmatpush3.bf16.xpose.msk.msra.mxu0 %vm14102_vm3, %v12642_v17  ;;  %v15690_v25 = vpack.i.bf16 %v5635_v4, %v5630_v54 }
0x1630   : > { %v5645_v62 = vadd.f32 %v13675_v44, %v11843_v19  ;;  %v5639_v1 = vpop.f32.mrb[77].mxu1  ;;  %12645 = vmatprep.subr.bf16.mxu0 %v17518_v28 }
0x1631   : > { %v5640_v34 = vadd.f32 %v13675_v44, %v5639_v1 }
0x1633   : > { %v12650_v15 = vpack.c.bf16 %v5645_v62, %v5640_v34  ;;  %v15693_v2 = vpack.i.bf16 %v5645_v62, %v5640_v34 }
0x1637   : > { %12648 = vmatpush3.bf16.xpose.msk.msra.mxu0 %vm14102_vm3, %v12646_v29 }
0x1638   : > { %12649 = vmatprep.subr.bf16.mxu0 %v17518_v28 }
0x163f   : > { %12652 = vmatpush3.bf16.xpose.msk.msra.mxu0 %vm14102_vm3, %v12650_v15 }
0x1640   : > { %12709 = vmatprep.subr.bf16.mxu0 %v17518_v28 }
0x1646   : > { %11877 = vmatmul.mubr.msk.f32.vlgmr.msra.gmra.mrb[104].mxu0 %vm1625_vm2, %v5452_v20 }
0x1647   : > { %11981 = vmatprep.mubr.msk.f32.mxu0 %vm13745_vm0, %v17520_v11 }
0x1679   : > { %v13089_v44 = vpop.permute.xlu1 %13088 }
0x167a   : > { %v13091_v39 = vunpack.i.h.bf16 %v13089_v44  ;;  %v13090_v22 = vunpack.i.l.bf16 %v13089_v44 }
0x167c   : > { %v12654_v24 = vpack.c.bf16 %v13091_v39, %v13090_v22 }
0x167e   : > { %12655 = vmatpush3.bf16.msra.mxu1 %v12654_v24 }
0x167f   : > { %12656 = vmatprep.subr.bf16.mxu1 %v17518_v28 }
0x1685   : > { %v13099_v19 = vpop.permute.xlu1 %13098 }
0x1686   : > { %v13101_v15 = vunpack.i.h.bf16 %v13099_v19  ;;  %v13100_v18 = vunpack.i.l.bf16 %v13099_v19 }
0x1719   : > { %v5765_v17 = vpop.f32.mrb[104].mxu0 }
0x171a   : > { %v5769_v50 = vmul.f32 0.25, %v5765_v17  ;;  %v11878_v4 = vpop.f32.mrb[105].mxu0 }
0x171c   : > { %v5770_v8 = vsel %vm14166_vm5, -1e+30, %v5769_v50 }
0x171d   : > { %5771 = vmax.xlane.f32.xlu0 %v5770_v8 }
0x1733   : > { %13093 = vrot.lane.b32.xlu0 %v15664_v31, %s17515_s20 }
0x1737   : > { %13103 = vrot.lane.b32.xlu0 %v15676_v3, %s17515_s20 }
0x173b   : > { %13108 = vrot.lane.b32.xlu0 %v15681_v16, %s17515_s20 }
0x173f   : > { %13113 = vrot.lane.b32.xlu0 %v15686_v52, %s17515_s20 }
0x1743   : > { %13118 = vrot.lane.b32.xlu0 %v15690_v25, %s17515_s20 }
0x1747   : > { %13123 = vrot.lane.b32.xlu0 %v15693_v2, %s17515_s20 }
0x174b   : > { %13128 = vrot.lane.b32.xlu0 %v15657_v53, %s17539_s3 }
0x174f   : > { %13133 = vrot.lane.b32.xlu0 %v15664_v31, %s17539_s3 }
0x1753   : > { %13138 = vrot.lane.b32.xlu0 %v15669_v21, %s17539_s3 }
0x1757   : > { %13148 = vrot.lane.b32.xlu0 %v15681_v16, %s17539_s3 }
0x175b   : > { %13153 = vrot.lane.b32.xlu0 %v15686_v52, %s17539_s3 }
0x175f   : > { %13158 = vrot.lane.b32.xlu0 %v15690_v25, %s17539_s3 }
0x1763   : > { %13163 = vrot.lane.b32.xlu0 %v15693_v2, %s17539_s3 }
0x1767   : > { %5898 = vrot.lane.b32.xlu0 %v5452_v20, %s17539_s3 }
0x176b   : > { %13168 = vrot.lane.b32.xlu0 %v15657_v53, %s17516_s5  ;;  %v12660_v53 = vpack.c.bf16 %v13101_v15, %v13100_v18 }
0x176f   : > { %13173 = vrot.lane.b32.xlu0 %v15664_v31, %s17516_s5 }
0x1773   : > { %13183 = vrot.lane.b32.xlu0 %v15676_v3, %s17516_s5 }
0x17aa   : > { %v5772_v23 = vpop.xlane.xlu0 %5771 }
0x17ab   : > { %v5773_v54 = vsub.f32 %v5770_v8, %v5772_v23 }
0x17ad   : > { %v5774_v29 = vmul.f32 1.442695, %v5773_v54 }
0x17ae   : > { %v13094_v62 = vpop.permute.xlu0 %13093 }
0x17af   : > { %13413 = vpow2.f32 %v5774_v29  ;;  %v13096_v1 = vunpack.i.h.bf16 %v13094_v62  ;;  %v13095_v34 = vunpack.i.l.bf16 %v13094_v62 }
0x17b1   : > { %v12657_v20 = vpack.c.bf16 %v13096_v1, %v13095_v34 }
0x17b2   : > { %v13104_v44 = vpop.permute.xlu0 %13103 }
0x17b3   : > { %12658 = vmatpush3.bf16.msra.mxu1 %v12657_v20  ;;  %v13106_v31 = vunpack.i.h.bf16 %v13104_v44  ;;  %v13105_v39 = vunpack.i.l.bf16 %v13104_v44 }
0x17b4   : > { %12659 = vmatprep.subr.bf16.mxu1 %v17518_v28 }
0x17b5   : > { %v12663_v17 = vpack.c.bf16 %v13106_v31, %v13105_v39 }
0x17b6   : > { %v13109_v22 = vpop.permute.xlu0 %13108 }
0x17b7   : > { %12661 = vmatpush3.bf16.msra.mxu1 %v12660_v53  ;;  %v13111_v50 = vunpack.i.h.bf16 %v13109_v22  ;;  %v13110_v4 = vunpack.i.l.bf16 %v13109_v22 }
0x17b8   : > { %12662 = vmatprep.subr.bf16.mxu1 %v17518_v28 }
0x17b9   : > { %v13414_v24 = vpop.eup %13413  ;;  %v12666_v23 = vpack.c.bf16 %v13111_v50, %v13110_v4 }
0x17ba   : > { %5776 = vadd.xlane.f32.xlu1 %v13414_v24  ;;  %v13114_v8 = vpop.permute.xlu0 %13113 }
0x17bb   : > { %12664 = vmatpush3.bf16.msra.mxu1 %v12663_v17  ;;  %v13116_v54 = vunpack.i.h.bf16 %v13114_v8  ;;  %v13115_v29 = vunpack.i.l.bf16 %v13114_v8 }
0x17bc   : > { %12665 = vmatprep.subr.bf16.mxu1 %v17518_v28 }
0x17bd   : > { %v12669_v62 = vpack.c.bf16 %v13116_v54, %v13115_v29 }
0x17be   : > { %v13119_v19 = vpop.permute.xlu0 %13118 }
0x17bf   : > { %12667 = vmatpush3.bf16.msra.mxu1 %v12666_v23  ;;  %v13121_v1 = vunpack.i.h.bf16 %v13119_v19  ;;  %v13120_v34 = vunpack.i.l.bf16 %v13119_v19 }
0x17c0   : > { %12668 = vmatprep.subr.bf16.mxu1 %v17518_v28 }
0x17c1   : > { %v12672_v18 = vpack.c.bf16 %v13121_v1, %v13120_v34 }
0x17c2   : > { %v13124_v15 = vpop.permute.xlu0 %13123 }
0x17c3   : > { %12670 = vmatpush3.bf16.msra.mxu1 %v12669_v62  ;;  %v13126_v20 = vunpack.i.h.bf16 %v13124_v15  ;;  %v13125_v44 = vunpack.i.l.bf16 %v13124_v15 }
0x17c4   : > { %12671 = vmatprep.subr.bf16.mxu1 %v17518_v28 }
0x17c5   : > { %v12675_v31 = vpack.c.bf16 %v13126_v20, %v13125_v44 }
0x17c6   : > { %v13129_v53 = vpop.permute.xlu0 %13128 }
0x17c7   : > { %12673 = vmatpush3.bf16.msra.mxu1 %v12672_v18  ;;  %v13131_v20 = vunpack.i.h.bf16 %v13129_v53  ;;  %v13130_v44 = vunpack.i.l.bf16 %v13129_v53 }
0x17c8   : > { %12674 = vmatprep.subr.bf16.mxu1 %v17518_v28 }
0x17c9   : > { %v12678_v60 = vpack.c.bf16 %v13131_v20, %v13130_v44 }
0x17ca   : > { %v13134_v39 = vpop.permute.xlu0 %13133 }
0x17cb   : > { %13143 = vrot.lane.b32.xlu1 %v15676_v3, %s17539_s3  ;;  %12676 = vmatpush3.bf16.msra.mxu1 %v12675_v31 }
0x17cc   : > { %12677 = vmatprep.subr.bf16.mxu1 %v17518_v28 }
0x17ce   : > { %v13139_v22 = vpop.permute.xlu0 %13138 }
0x17cf   : > { %v13141_v53 = vunpack.i.h.bf16 %v13139_v22 }
0x17d2   : > { %v13149_v17 = vpop.permute.xlu0 %13148 }
0x17d6   : > { %v13154_v50 = vpop.permute.xlu0 %13153 }
0x17da   : > { %v13159_v4 = vpop.permute.xlu0 %13158 }
0x17db   : > { %v13161_v44 = vunpack.i.h.bf16 %v13159_v4 }
0x17de   : > { %v13164_v8 = vpop.permute.xlu0 %13163 }
0x17e2   : > { %v5899_v23 = vpop.permute.xlu0 %5898 }
0x17e6   : > { %v13169_v54 = vpop.permute.xlu0 %13168 }
0x17e7   : > { %v13171_v29 = vunpack.i.h.bf16 %v13169_v54  ;;  %v13170_v19 = vunpack.i.l.bf16 %v13169_v54  ;;  %v13136_v54 = vunpack.i.h.bf16 %v13134_v39 }
0x17e9   : > { %v12710_v62 = vpack.c.bf16 %v13171_v29, %v13170_v19  ;;  %v13135_v29 = vunpack.i.l.bf16 %v13134_v39  ;;  %v13151_v39 = vunpack.i.h.bf16 %v13149_v17 }
0x17ea   : > { %v13174_v1 = vpop.permute.xlu0 %13173 }
0x17eb   : > { %v13176_v34 = vunpack.i.h.bf16 %v13174_v1  ;;  %v13175_v15 = vunpack.i.l.bf16 %v13174_v1  ;;  %12711 = vmatpush3.bf16.msra.mxu0 %v12710_v62  ;;  %v12682_v19 = vpack.c.bf16 %v13136_v54, %v13135_v29  ;;  %v13165_v29 = vunpack.i.l.bf16 %v13164_v8 }
0x17ec   : > { %12712 = vmatprep.subr.bf16.mxu0 %v17518_v28 }
0x17ed   : > { %v12713_v3 = vpack.c.bf16 %v13176_v34, %v13175_v15  ;;  %v13150_v15 = vunpack.i.l.bf16 %v13149_v17  ;;  %v13166_v17 = vunpack.i.h.bf16 %v13164_v8 }
0x17ef   : > { %12714 = vmatpush3.bf16.msra.mxu0 %v12713_v3  ;;  %v12694_v3 = vpack.c.bf16 %v13151_v39, %v13150_v15 }
0x17f0   : > { %12715 = vmatprep.subr.bf16.mxu0 %v17518_v28 }
0x1847   : > { %v5777_v18 = vpop.xlane.xlu1 %5776 }
0x1848   : > { %13415 = vrcp.f32 %v5777_v18  ;;  %v13155_v18 = vunpack.i.l.bf16 %v13154_v50 }
0x1852   : > { %v13416_v31 = vpop.eup %13415 }
0x1853   : > { %v5779_v63 = vmul.f32 %v13416_v31, %v13414_v24  ;;  %v13140_v24 = vunpack.i.l.bf16 %v13139_v22  ;;  %v13156_v22 = vunpack.i.h.bf16 %v13154_v50  ;;  %v13160_v31 = vunpack.i.l.bf16 %v13159_v4 }
0x1855   : > { %11912 = vmatmul.mubr.f32.vlgmr.msra.gmra.mrb[78].mxu1 %v5779_v63  ;;  %v12686_v62 = vpack.c.bf16 %v13141_v53, %v13140_v24  ;;  %v13144_v63 = vpop.permute.xlu1 %13143  ;;  %v12698_v20 = vpack.c.bf16 %v13156_v22, %v13155_v18  ;;  %v12702_v54 = vpack.c.bf16 %v13161_v44, %v13160_v31 }
0x1856   : > { %12680 = vmatpush3.bf16.xpose.msk.msra.mxu1 %vm14102_vm3, %v12678_v60  ;;  %11946 = vmatprep.mubr.msk.f32.mxu1 %vm13745_vm0, %v17520_v11  ;;  %v13146_v60 = vunpack.i.h.bf16 %v13144_v63  ;;  %v13145_v1 = vunpack.i.l.bf16 %v13144_v63 }
0x1857   : > { %12681 = vmatprep.subr.bf16.mxu1 %v17518_v28 }
0x1858   : > { %v12690_v34 = vpack.c.bf16 %v13146_v60, %v13145_v1 }
0x185e   : > { %12684 = vmatpush3.bf16.xpose.msk.msra.mxu1 %vm14102_vm3, %v12682_v19  ;;  %v12706_v19 = vpack.c.bf16 %v13166_v17, %v13165_v29 }
0x185f   : > { %12685 = vmatprep.subr.bf16.mxu1 %v17518_v28 }
0x1866   : > { %12688 = vmatpush3.bf16.xpose.msk.msra.mxu1 %vm14102_vm3, %v12686_v62 }
0x1867   : > { %12689 = vmatprep.subr.bf16.mxu1 %v17518_v28 }
0x186e   : > { %12692 = vmatpush3.bf16.xpose.msk.msra.mxu1 %vm14102_vm3, %v12690_v34 }
0x186f   : > { %12693 = vmatprep.subr.bf16.mxu1 %v17518_v28 }
0x1876   : > { %12696 = vmatpush3.bf16.xpose.msk.msra.mxu1 %vm14102_vm3, %v12694_v3 }
0x1877   : > { %12697 = vmatprep.subr.bf16.mxu1 %v17518_v28 }
0x187e   : > { %12700 = vmatpush3.bf16.xpose.msk.msra.mxu1 %vm14102_vm3, %v12698_v20 }
0x187f   : > { %12701 = vmatprep.subr.bf16.mxu1 %v17518_v28 }
0x1886   : > { %12704 = vmatpush3.bf16.xpose.msk.msra.mxu1 %vm14102_vm3, %v12702_v54  ;;  %v13184_v54 = vpop.permute.xlu0 %13183 }
0x1887   : > { %12705 = vmatprep.subr.bf16.mxu1 %v17518_v28 }
0x188e   : > { %12708 = vmatpush3.bf16.xpose.msk.msra.mxu1 %vm14102_vm3, %v12706_v19  ;;  %v13186_v19 = vunpack.i.h.bf16 %v13184_v54 }
0x188f   : > { %12758 = vmatprep.subr.bf16.mxu1 %v14340_v9 }
0x1895   : > { %11947 = vmatmul.mubr.msk.f32.vlgmr.msra.gmra.mrb[80].mxu1 %vm1625_vm2, %v5899_v23 }
0x1896   : > { %12760 = vmatpush3.bf16.msra.mxu1 %v14340_v9  ;;  %12036 = vmatprep.mubr.msk.f32.mxu1 %vm1343_vm1, %v15547_v47 }
0x1897   : > { %12762 = vmatprep.subr.bf16.mxu1 %v14343_v38 }
0x189a   : > { %12764 = vmatpush3.bf16.msra.mxu1 %v14343_v38 }
0x189d   : > { %12037 = vmatmul.mubr.msk.f32.vlgmr.msra.gmra.mrb[82].mxu1 %vm1343_vm1, %v15550_v37 }
0x189e   : > { %12039 = vmatprep.mubr.msk.f32.mxu1 %vm1343_vm1, %v15561_v27 }
0x18a1   : > { %12040 = vmatmul.mubr.msk.f32.gmra.mrb[84].mxu1 %vm1343_vm1, %v15564_v41 }
0x18a2   : > { %12042 = vmatprep.mubr.msk.f32.mxu1 %vm1343_vm1, %v15575_v32 }
0x18a5   : > { %12043 = vmatmul.mubr.msk.f32.gmra.mrb[86].mxu1 %vm1343_vm1, %v15578_v55 }
0x18a6   : > { %12045 = vmatprep.mubr.msk.f32.mxu1 %vm1343_vm1, %v15589_v59 }
0x18a9   : > { %12046 = vmatmul.mubr.msk.f32.gmra.mrb[88].mxu1 %vm1343_vm1, %v15592_v45 }
0x18aa   : > { %12048 = vmatprep.mubr.msk.f32.mxu1 %vm1343_vm1, %v15603_v42 }
0x18ad   : > { %12049 = vmatmul.mubr.msk.f32.gmra.mrb[90].mxu1 %vm1343_vm1, %v15606_v13 }
0x18ae   : > { %12051 = vmatprep.mubr.msk.f32.mxu1 %vm1343_vm1, %v15617_v7 }
0x18b1   : > { %12052 = vmatmul.mubr.msk.f32.gmra.mrb[92].mxu1 %vm1343_vm1, %v15620_v26 }
0x18b2   : > { %12054 = vmatprep.mubr.msk.f32.mxu1 %vm1343_vm1, %v15632_v33 }
0x18b5   : > { %12055 = vmatmul.mubr.msk.f32.gmra.mrb[94].mxu1 %vm1343_vm1, %v15636_v5 }
0x18b6   : > { %12057 = vmatprep.mubr.msk.f32.mxu1 %vm1343_vm1, %v15645_v6 }
0x18b9   : > { %12058 = vmatmul.mubr.msk.f32.gmra.mrb[96].mxu1 %vm1343_vm1, %v15648_v48 }
0x1928   : > { %v15815_v40 = vpop.f32.mrb[78].mxu1 }
0x1929   : > { %v11913_v9 = vpop.f32.mrb[79].mxu1 }
0x192a   : > { %v13185_v9 = vunpack.i.l.bf16 %v13184_v54 }
0x1968   : > { %v6032_v38 = vpop.f32.mrb[80].mxu1 }
0x1969   : > { %v6036_v50 = vmul.f32 0.25, %v6032_v38  ;;  %v11948_v4 = vpop.f32.mrb[81].mxu1 }
0x196b   : > { %v6037_v8 = vsel %vm14166_vm5, -1e+30, %v6036_v50 }
0x196c   : > { %6038 = vmax.xlane.f32.xlu1 %v6037_v8 }
0x1970   : > { %v15819_v23 = vpop.f32.mrb[82].mxu1 }
0x1971   : > { %v15821_v53 = vpop.f32.mrb[83].mxu1 }
0x1974   : > { %v15823_v24 = vpop.f32.mrb[84].mxu1 }
0x1975   : > { %v15825_v62 = vpop.f32.mrb[85].mxu1 }
0x1978   : > { %v15827_v63 = vpop.f32.mrb[86].mxu1 }
0x1979   : > { %v15829_v60 = vpop.f32.mrb[87].mxu1 }
0x197c   : > { %v15831_v1 = vpop.f32.mrb[88].mxu1 }
0x197d   : > { %13178 = vrot.lane.b32.xlu1 %v15669_v21, %s17516_s5  ;;  %v15835_v58 = vpop.f32.mrb[89].mxu1 }
0x1980   : > { %v15837_v34 = vpop.f32.mrb[90].mxu1 }
0x1981   : > { %13188 = vrot.lane.b32.xlu1 %v15681_v16, %s17516_s5  ;;  %v15841_v39 = vpop.f32.mrb[91].mxu1 }
0x1984   : > { %v15843_v15 = vpop.f32.mrb[92].mxu1 }
0x1985   : > { %13193 = vrot.lane.b32.xlu1 %v15686_v52, %s17516_s5  ;;  %v15847_v3 = vpop.f32.mrb[93].mxu1 }
0x1988   : > { %v15849_v22 = vpop.f32.mrb[94].mxu1 }
0x1989   : > { %13198 = vrot.lane.b32.xlu1 %v15690_v25, %s17516_s5  ;;  %v15853_v21 = vpop.f32.mrb[95].mxu1  ;;  %v12719_v25 = vpack.c.bf16 %v13186_v19, %v13185_v9 }
0x198c   : > { %v15855_v18 = vpop.f32.mrb[96].mxu1 }
0x198d   : > { %v15857_v20 = vpop.f32.mrb[97].mxu1 }
0x19f9   : > { %v6039_v16 = vpop.xlane.xlu1 %6038 }
0x19fa   : > { %v6040_v44 = vsub.f32 %v6037_v8, %v6039_v16 }
0x19fc   : > { %v6041_v31 = vmul.f32 1.442695, %v6040_v44 }
0x19fd   : > { %v13179_v17 = vpop.permute.xlu1 %13178 }
0x19fe   : > { %13417 = vpow2.f32 %v6041_v31  ;;  %v13181_v52 = vunpack.i.h.bf16 %v13179_v17  ;;  %v13180_v29 = vunpack.i.l.bf16 %v13179_v17 }
0x1a00   : > { %v12716_v38 = vpack.c.bf16 %v13181_v52, %v13180_v29 }
0x1a01   : > { %v13189_v50 = vpop.permute.xlu1 %13188 }
0x1a02   : > { %12717 = vmatpush3.bf16.msra.mxu0 %v12716_v38  ;;  %v13191_v4 = vunpack.i.h.bf16 %v13189_v50  ;;  %v13190_v30 = vunpack.i.l.bf16 %v13189_v50 }
0x1a03   : > { %12718 = vmatprep.subr.bf16.mxu0 %v17518_v28 }
0x1a04   : > { %v12722_v16 = vpack.c.bf16 %v13191_v4, %v13190_v30 }
0x1a05   : > { %v13194_v48 = vpop.permute.xlu1 %13193 }
0x1a06   : > { %12720 = vmatpush3.bf16.msra.mxu0 %v12719_v25  ;;  %v13196_v44 = vunpack.i.h.bf16 %v13194_v48  ;;  %v13195_v31 = vunpack.i.l.bf16 %v13194_v48 }
0x1a07   : > { %12721 = vmatprep.subr.bf16.mxu0 %v17518_v28 }
0x1a08   : > { %v13418_v8 = vpop.eup %13417  ;;  %v12725_v54 = vpack.c.bf16 %v13196_v44, %v13195_v31 }
0x1a09   : > { %6043 = vadd.xlane.f32.xlu0 %v13418_v8  ;;  %v13199_v17 = vpop.permute.xlu1 %13198 }
0x1a0a   : > { %12723 = vmatpush3.bf16.msra.mxu0 %v12722_v16  ;;  %v13201_v52 = vunpack.i.h.bf16 %v13199_v17  ;;  %v13200_v29 = vunpack.i.l.bf16 %v13199_v17  ;;  %v13677_v17 = vld [vmem:[%s13872_s12] ss:$0 sm:$0xff] }
0x1a0b   : > { %12724 = vmatprep.subr.bf16.mxu0 %v17518_v28 }
0x1a0c   : > { %v12728_v19 = vpack.c.bf16 %v13201_v52, %v13200_v29 }
0x1a0e   : > { %12726 = vmatpush3.bf16.msra.mxu0 %v12725_v54 }
0x1a0f   : > { %12727 = vmatprep.subr.bf16.mxu0 %v17518_v28 }
0x1a12   : > { %12729 = vmatpush3.bf16.msra.mxu0 %v12728_v19 }
0x1a13   : > { %12730 = vmatprep.subr.bf16.mxu0 %v17518_v28 }
0x1a1f   : > { %13203 = vrot.lane.b32.xlu0 %v15693_v2, %s17516_s5 }
0x1a96   : > { %v6044_v30 = vpop.xlane.xlu0 %6043 }
0x1a97   : > { %13419 = vrcp.f32 %v6044_v30 }
0x1a9a   : > { %v13204_v48 = vpop.permute.xlu0 %13203 }
0x1a9b   : > { %v13206_v9 = vunpack.i.h.bf16 %v13204_v48  ;;  %v13205_v38 = vunpack.i.l.bf16 %v13204_v48 }
0x1a9d   : > { %v12731_v50 = vpack.c.bf16 %v13206_v9, %v13205_v38 }
0x1a9f   : > { %12732 = vmatpush3.bf16.msra.mxu0 %v12731_v50 }
0x1aa0   : > { %12733 = vmatprep.subr.bf16.mxu0 %v17518_v28 }
0x1aa1   : > { %v13420_v25 = vpop.eup %13419 }
0x1aa2   : > { %v6046_v4 = vmul.f32 %v13420_v25, %v13418_v8 }
0x1aa4   : > { %11982 = vmatmul.mubr.f32.vlgmr.msra.gmra.mrb[106].mxu0 %v6046_v4  ;;  %v13678_v4 = vld [vmem:[%s13922_s8] ss:$0 sm:$0xff] }
0x1aa5   : > { %12735 = vmatpush3.bf16.msra.mxu0 %v14278_v35  ;;  %11988 = vmatprep.mubr.msk.f32.mxu0 %vm13745_vm0, %v17520_v11 }
0x1aa6   : > { %12736 = vmatprep.subr.bf16.mxu0 %v17518_v28 }
0x1b77   : > { %v6161_v2 = vpop.f32.mrb[106].mxu0 }
0x1b78   : > { %v11983_v16 = vpop.f32.mrb[107].mxu0  ;;  %11989 = vmatmul.mubr.msk.f32.vlgmr.msra.gmra.mrb[108].mxu0 %vm1625_vm2, %v6161_v2  ;;  %v13679_v2 = vld [vmem:[%s13917_s13] ss:$0 sm:$0xff] }
0x1b79   : > { %12738 = vmatpush3.bf16.msra.mxu0 %v14247_v49  ;;  %11995 = vmatprep.mubr.msk.f32.mxu0 %vm13745_vm0, %v17520_v11 }
0x1b7a   : > { %12739 = vmatprep.subr.bf16.mxu0 %v17518_v28 }
0x1b7c   : > { %11996 = vmatmul.mubr.msk.f32.vlgmr.msra.gmra.mrb[110].mxu0 %vm1625_vm2, %v15815_v40 }
0x1b7d   : > { %12741 = vmatpush3.bf16.msra.mxu0 %v14293_v36  ;;  %12006 = vmatprep.mubr.msk.f32.mxu0 %vm13745_vm0, %v17520_v11 }
0x1b7e   : > { %12742 = vmatprep.subr.bf16.mxu0 %v17518_v28 }
0x1b81   : > { %12744 = vmatpush3.bf16.msra.mxu0 %v14299_v43 }
0x1b82   : > { %12745 = vmatprep.subr.bf16.mxu0 %v17518_v28 }
0x1c4b   : > { %v6234_v49 = vpop.f32.mrb[108].mxu0 }
0x1c4c   : > { %v11990_v35 = vpop.f32.mrb[109].mxu0 }
0x1c4f   : > { %v6307_v8 = vpop.f32.mrb[110].mxu0 }
0x1c50   : > { %v6308_v44 = vadd.f32 %v6307_v8, %v6234_v49  ;;  %v11997_v31 = vpop.f32.mrb[111].mxu0  ;;  %v17540_v49 = vld [vmem:[#allocation35_spill] sm:$0xff] }
0x1c52   : > { %v6311_v54 = vadd.f32 %v13677_v17, %v6308_v44  ;;  %v17541_v17 = vld [vmem:[#allocation36_spill] sm:$0xff] }
0x1c54   : > { %v6312_v40 = vadd.f32 %v6311_v54, %v14405_v0  ;;  %v13681_v54 = vld [vmem:[%s17501_s23] ss:$0 sm:$0xff] }
0x1c56   : > { %v6313_v36 = vsel %vm1343_vm1, %v6312_v40, 0.0 }
0x1c57   : > { %6314 = vadd.xlane.f32.xlu1 %v6313_v36 }
0x1ce4   : > { %v6315_v52 = vpop.xlane.xlu1 %6314 }
0x1ce5   : > { %v6316_v29 = vmul.f32 0.03125, %v6315_v52 }
0x1ce7   : > { %v6317_v19 = vsub.f32 %v6312_v40, %v6316_v29 }
0x1ce9   : > { %v6318_v43 = vmul.f32 %v6317_v19, %v6317_v19 }
0x1ceb   : > { %v6319_v30 = vsel %vm1343_vm1, %v6318_v43, 0.0 }
0x1cec   : > { %6320 = vadd.xlane.f32.xlu0 %v6319_v30 }
0x1d79   : > { %v6321_v48 = vpop.xlane.xlu0 %6320 }
0x1d7a   : > { %v6322_v9 = vmul.f32 0.03125, %v6321_v48 }
0x1d7c   : > { %v6323_v38 = vadd.f32 1e-05, %v6322_v9 }
0x1d7e   : > { %13421 = vrsqrt.f32 %v6323_v38  ;;  %v13682_v38 = vld [vmem:[%s17505_s1] ss:$0 sm:$0xff] }
0x1d88   : > { %v13422_v50 = vpop.eup %13421 }
0x1d89   : > { %v6325_v25 = vmul.f32 %v13422_v50, %v6317_v19  ;;  %v6558_v50 = vadd.f32 %v13682_v38, %v15821_v53  ;;  %v6603_v53 = vadd.f32 %v13682_v38, %v15837_v34 }
0x1d8b   : > { %v6326_v0 = vmul.f32 %v13678_v4, %v6325_v25  ;;  %v6563_v25 = vadd.f32 %v13682_v38, %v15819_v23  ;;  %v6573_v4 = vadd.f32 %v13682_v38, %v15823_v24  ;;  %v6613_v23 = vadd.f32 %v13682_v38, %v15843_v15  ;;  %v13684_v15 = vld [vmem:[%s17509_s25] ss:$0 sm:$0xff] }
0x1d8c   : > { %v6623_v24 = vadd.f32 %v13682_v38, %v15849_v22 }
0x1d8d   : > { %v6327_v16 = vadd.f32 %v13679_v2, %v6326_v0  ;;  %v6583_v0 = vadd.f32 %v13682_v38, %v15827_v63  ;;  %v6593_v2 = vadd.f32 %v13682_v38, %v15831_v1  ;;  %v6633_v63 = vadd.f32 %v13682_v38, %v15855_v18  ;;  %v13685_v18 = vld [vmem:[%s17510_s22] ss:$0 sm:$0xff] }
0x1d8f   : > { %12007 = vmatmul.mubr.msk.f32.vlgmr.msra.gmra.mrb[112].mxu0 %vm1343_vm1, %v6327_v16 }
0x1d90   : > { %12747 = vmatpush3.bf16.msra.mxu0 %v14305_v12  ;;  %12025 = vmatprep.mubr.msk.f32.mxu0 %vm13745_vm0, %v17520_v11  ;;  %v13680_v12 = vld [vmem:[%s13897_s2] ss:$0 sm:$0xff] }
0x1d91   : > { %12748 = vmatprep.subr.bf16.mxu0 %v17518_v28 }
0x1d94   : > { %12750 = vmatpush3.bf16.msra.mxu0 %v14309_v61  ;;  %v17542_v61 = vld [vmem:[#allocation37_spill] sm:$0xff] }
0x1d95   : > { %12751 = vmatprep.subr.bf16.mxu0 %v17518_v28 }
0x1d98   : > { %12753 = vmatpush3.bf16.msra.mxu0 %v14315_v46 }
0x1d99   : > { %12754 = vmatprep.subr.bf16.mxu0 %v17518_v28 }
0x1d9c   : > { %12756 = vmatpush3.bf16.msra.mxu0 %v17540_v49 }
0x1d9d   : > { %12765 = vmatprep.subr.bf16.mxu0 %v17518_v28 }
0x1e62   : > { %v6397_v35 = vpop.f32.mrb[112].mxu0 }
0x1e63   : > { %v6398_v8 = vadd.f32 %v13680_v12, %v6397_v35  ;;  %v12008_v44 = vpop.f32.mrb[113].mxu0  ;;  %v13683_v12 = vld [vmem:[%s17508_s0] ss:$0 sm:$0xff] }
0x1e65   : > { %v6401_v31 = vmax.f32 %v6398_v8, 0.0 }
0x1e67   : > { %12026 = vmatmul.mubr.msk.f32.vlgmr.msra.gmra.mrb[114].mxu0 %vm2435_vm6, %v6401_v31 }
0x1e68   : > { %12767 = vmatpush3.bf16.msra.mxu0 %v17541_v17  ;;  %12068 = vmatprep.mubr.msk.f32.mxu0 %vm13745_vm0, %v17520_v11 }
0x1e69   : > { %12768 = vmatprep.subr.bf16.mxu0 %v17518_v28 }
0x1e6c   : > { %12770 = vmatpush3.bf16.msra.mxu0 %v17542_v61  ;;  %v6568_v61 = vadd.f32 %v13682_v38, %v15825_v62  ;;  %v6598_v62 = vadd.f32 %v13682_v38, %v15841_v39  ;;  %v6628_v39 = vadd.f32 %v13682_v38, %v15857_v20 }
0x1f3a   : > { %v6471_v46 = vpop.f32.mrb[114].mxu0 }
0x1f3b   : > { %v6472_v40 = vadd.f32 %v13681_v54, %v6471_v46  ;;  %v12027_v36 = vpop.f32.mrb[115].mxu0  ;;  %v6578_v46 = vadd.f32 %v13682_v38, %v15829_v60  ;;  %v6588_v54 = vadd.f32 %v13682_v38, %v15835_v58  ;;  %v6608_v60 = vadd.f32 %v13682_v38, %v15847_v3 }
0x1f3c   : > { %v6618_v58 = vadd.f32 %v13682_v38, %v15853_v21 }
0x1f3d   : > { %v6475_v52 = vadd.f32 %v6472_v40, %v6327_v16 }
0x1f3f   : > { %v6476_v29 = vsel %vm1343_vm1, %v6475_v52, 0.0 }
0x1f40   : > { %6477 = vadd.xlane.f32.xlu0 %v6476_v29 }
0x1fcd   : > { %v6478_v19 = vpop.xlane.xlu0 %6477 }
0x1fce   : > { %v6479_v43 = vmul.f32 0.03125, %v6478_v19 }
0x1fd0   : > { %v6480_v30 = vsub.f32 %v6475_v52, %v6479_v43 }
0x1fd2   : > { %v6481_v48 = vmul.f32 %v6480_v30, %v6480_v30 }
0x1fd4   : > { %v6482_v9 = vsel %vm1343_vm1, %v6481_v48, 0.0 }
0x1fd5   : > { %6483 = vadd.xlane.f32.xlu1 %v6482_v9 }
0x1fe6   : > { %7309 = vrot.lane.b32.xlu1 %v6558_v50, %s17539_s3 }
0x1fea   : > { %7311 = vrot.lane.b32.xlu1 %v6563_v25, %s17539_s3 }
0x1fee   : > { %7315 = vrot.lane.b32.xlu1 %v6573_v4, %s17539_s3 }
0x1ff2   : > { %7319 = vrot.lane.b32.xlu1 %v6583_v0, %s17539_s3 }
0x1ff6   : > { %7323 = vrot.lane.b32.xlu1 %v6593_v2, %s17539_s3 }
0x1ffa   : > { %7327 = vrot.lane.b32.xlu1 %v6603_v53, %s17539_s3 }
0x1ffe   : > { %7331 = vrot.lane.b32.xlu1 %v6613_v23, %s17539_s3 }
0x2002   : > { %7335 = vrot.lane.b32.xlu1 %v6623_v24, %s17539_s3 }
0x2006   : > { %7339 = vrot.lane.b32.xlu1 %v6633_v63, %s17539_s3 }
0x2062   : > { %v6484_v1 = vpop.xlane.xlu1 %6483 }
0x2063   : > { %v6485_v16 = vmul.f32 0.03125, %v6484_v1 }
0x2065   : > { %v6486_v49 = vadd.f32 1e-05, %v6485_v16 }
0x2066   : > { %v7310_v3 = vpop.permute.xlu1 %7309 }
0x2067   : > { %13423 = vrsqrt.f32 %v6486_v49 }
0x206a   : > { %v7312_v21 = vpop.permute.xlu1 %7311 }
0x206e   : > { %v7316_v40 = vpop.permute.xlu1 %7315 }
0x2071   : > { %v13424_v34 = vpop.eup %13423 }
0x2072   : > { %v6488_v35 = vmul.f32 %v13424_v34, %v6480_v30  ;;  %v7320_v52 = vpop.permute.xlu1 %7319 }
0x2074   : > { %v6489_v8 = vmul.f32 %v13683_v12, %v6488_v35 }
0x2076   : > { %v15932_v44 = vadd.f32 %v13684_v15, %v6489_v8  ;;  %v7324_v29 = vpop.permute.xlu1 %7323 }
0x2078   : > { %17543 = vst [vmem:[#allocation35_spill] sm:$0xff] %v15932_v44  ;;  %12069 = vmatmul.mubr.msk.f32.vlgmr.msra.gmra.mrb[116].mxu0 %vm1343_vm1, %v15932_v44 }
0x2079   : > { %12073 = vmatprep.mubr.msk.f32.mxu0 %vm1625_vm2, %v6558_v50 }
0x207a   : > { %v7328_v30 = vpop.permute.xlu1 %7327 }
0x214b   : > { %v6705_v22 = vpop.f32.mrb[116].mxu0 }
0x214c   : > { %v15938_v31 = vadd.f32 %v13685_v18, %v6705_v22  ;;  %v12070_v17 = vpop.f32.mrb[117].mxu0 }
0x214e   : > { %7341 = vrot.lane.b32.xlu0 %v15938_v31, %s17539_s3  ;;  %12071 = vmatprep.subr.msk.mxu0 %vm1625_vm2, %v15938_v31 }
0x214f   : > { %12072 = vmatpush3.xpose.msk.msra.mxu0 %vm1625_vm2, %v15938_v31 }
0x2152   : > { %7313 = vrot.lane.b32.xlu0 %v6568_v61, %s17539_s3  ;;  %12074 = vmatmul.mubr.msk.f32.vlgmr.msra.gmra.mrb[118].mxu0 %vm1625_vm2, %v6563_v25 }
0x2153   : > { %12076 = vmatprep.mubr.msk.f32.mxu0 %vm1625_vm2, %v6568_v61 }
0x2156   : > { %7317 = vrot.lane.b32.xlu0 %v6578_v46, %s17539_s3  ;;  %12077 = vmatmul.mubr.msk.f32.gmra.mrb[120].mxu0 %vm1625_vm2, %v6573_v4 }
0x2157   : > { %12079 = vmatprep.mubr.msk.f32.mxu0 %vm1625_vm2, %v6578_v46 }
0x215a   : > { %7321 = vrot.lane.b32.xlu0 %v6588_v54, %s17539_s3  ;;  %12080 = vmatmul.mubr.msk.f32.gmra.mrb[122].mxu0 %vm1625_vm2, %v6583_v0 }
0x215b   : > { %12082 = vmatprep.mubr.msk.f32.mxu0 %vm1625_vm2, %v6588_v54 }
0x215e   : > { %7325 = vrot.lane.b32.xlu0 %v6598_v62, %s17539_s3  ;;  %12083 = vmatmul.mubr.msk.f32.gmra.mrb[124].mxu0 %vm1625_vm2, %v6593_v2 }
0x215f   : > { %12085 = vmatprep.mubr.msk.f32.mxu0 %vm1625_vm2, %v6598_v62 }
0x2162   : > { %7329 = vrot.lane.b32.xlu0 %v6608_v60, %s17539_s3  ;;  %12086 = vmatmul.mubr.msk.f32.gmra.mrb[126].mxu0 %vm1625_vm2, %v6603_v53 }
0x2163   : > { %12088 = vmatprep.mubr.msk.f32.mxu0 %vm1625_vm2, %v6608_v60 }
0x2166   : > { %7333 = vrot.lane.b32.xlu0 %v6618_v58, %s17539_s3  ;;  %12089 = vmatmul.mubr.msk.f32.gmra.mrb[128].mxu0 %vm1625_vm2, %v6613_v23 }
0x2167   : > { %12091 = vmatprep.mubr.msk.f32.mxu0 %vm1625_vm2, %v6618_v58 }
0x216a   : > { %7337 = vrot.lane.b32.xlu0 %v6628_v39, %s17539_s3  ;;  %12092 = vmatmul.mubr.msk.f32.gmra.mrb[130].mxu0 %vm1625_vm2, %v6623_v24  ;;  %s17558_s3 = sld [smem:[#allocation32_spill]] }
0x216b   : > { %12094 = vmatprep.mubr.msk.f32.mxu0 %vm1625_vm2, %v6628_v39 }
0x216e   : > { %12095 = vmatmul.mubr.msk.f32.gmra.mrb[132].mxu0 %vm1625_vm2, %v6633_v63 }
0x216f   : > { %12125 = vmatprep.mubr.msk.f32.mxu0 %vm1625_vm2, %v7310_v3 }
0x21c0   : > { %v7342_v36 = vpop.permute.xlu0 %7341 }
0x21c1   : > { %12123 = vmatprep.subr.msk.mxu0 %vm1625_vm2, %v7342_v36 }
0x21c2   : > { %12124 = vmatpush3.xpose.msk.msra.mxu0 %vm1625_vm2, %v7342_v36 }
0x21c3   : > { %12772 = vmatprep.subr.bf16.mxu0 %v14885_v51 }
0x21c4   : > { %v7314_v20 = vpop.permute.xlu0 %7313 }
0x21c5   : > { %12126 = vmatmul.mubr.msk.f32.vlgmr.msra.gmra.mrb[134].mxu0 %vm1625_vm2, %v7312_v21 }
0x21c6   : > { %12128 = vmatprep.mubr.msk.f32.mxu0 %vm1625_vm2, %v7314_v20  ;;  %12774 = vmatpush3.bf16.msra.mxu0 %v14885_v51  ;;  %v7332_v51 = vpop.permute.xlu1 %7331 }
0x21c7   : > { %12776 = vmatprep.subr.bf16.mxu0 %v14921_v14 }
0x21c8   : > { %v7318_v19 = vpop.permute.xlu0 %7317 }
0x21c9   : > { %12129 = vmatmul.mubr.msk.f32.gmra.mrb[136].mxu0 %vm1625_vm2, %v7316_v40 }
0x21ca   : > { %12131 = vmatprep.mubr.msk.f32.mxu0 %vm1625_vm2, %v7318_v19  ;;  %v7336_v50 = vpop.permute.xlu1 %7335 }
0x21cc   : > { %v7322_v43 = vpop.permute.xlu0 %7321 }
0x21cd   : > { %12132 = vmatmul.mubr.msk.f32.gmra.mrb[138].mxu0 %vm1625_vm2, %v7320_v52 }
0x21ce   : > { %12134 = vmatprep.mubr.msk.f32.mxu0 %vm1625_vm2, %v7322_v43  ;;  %v7340_v4 = vpop.permute.xlu1 %7339 }
0x21d0   : > { %v7326_v48 = vpop.permute.xlu0 %7325 }
0x21d1   : > { %12135 = vmatmul.mubr.msk.f32.gmra.mrb[140].mxu0 %vm1625_vm2, %v7324_v29 }
0x21d2   : > { %12137 = vmatprep.mubr.msk.f32.mxu0 %vm1625_vm2, %v7326_v48 }
0x21d4   : > { %v7330_v9 = vpop.permute.xlu0 %7329 }
0x21d5   : > { %12138 = vmatmul.mubr.msk.f32.gmra.mrb[142].mxu0 %vm1625_vm2, %v7328_v30 }
0x21d6   : > { %12140 = vmatprep.mubr.msk.f32.mxu0 %vm1625_vm2, %v7330_v9 }
0x21d8   : > { %v7334_v38 = vpop.permute.xlu0 %7333 }
0x21d9   : > { %12141 = vmatmul.mubr.msk.f32.gmra.mrb[144].mxu0 %vm1625_vm2, %v7332_v51 }
0x21da   : > { %12143 = vmatprep.mubr.msk.f32.mxu0 %vm1625_vm2, %v7334_v38 }
0x21dc   : > { %v7338_v25 = vpop.permute.xlu0 %7337 }
0x21dd   : > { %12144 = vmatmul.mubr.msk.f32.gmra.mrb[146].mxu0 %vm1625_vm2, %v7336_v50 }
0x21de   : > { %12146 = vmatprep.mubr.msk.f32.mxu0 %vm1625_vm2, %v7338_v25 }
0x21e1   : > { %12147 = vmatmul.mubr.msk.f32.gmra.mrb[148].mxu0 %vm1625_vm2, %v7340_v4 }
0x2225   : > { %v12075_v0 = vpop.f32.mrb[118].mxu0 }
0x2226   : > { %v6906_v2 = vmul.f32 0.25, %v12075_v0  ;;  %v6826_v53 = vpop.f32.mrb[119].mxu0 }
0x2227   : > { %v6905_v23 = vmul.f32 0.25, %v6826_v53 }
0x2228   : > { %v15998_v63 = vsel %vm14486_vm8, -1e+30, %v6906_v2 }
0x2229   : > { %v16002_v1 = vsel %vm14486_vm8, -1e+30, %v6905_v23  ;;  %v12078_v16 = vpop.f32.mrb[120].mxu0  ;;  %v6940_v49 = vsel %vm3018_vm9, %v15998_v63, -inf }
0x222a   : > { %v6908_v34 = vmul.f32 0.25, %v12078_v16  ;;  %6941 = vmax.xlane.f32.xlu1 %v6940_v49  ;;  %v6836_v35 = vpop.f32.mrb[121].mxu0  ;;  %v6937_v12 = vsel %vm3018_vm9, %v16002_v1, -inf }
0x222b   : > { %v6907_v8 = vmul.f32 0.25, %v6836_v35  ;;  %6938 = vmax.xlane.f32.xlu0 %v6937_v12 }
0x222c   : > { %v16010_v15 = vsel %vm14486_vm8, -1e+30, %v6908_v34 }
0x222d   : > { %v12081_v22 = vpop.f32.mrb[122].mxu0  ;;  %v6946_v18 = vsel %vm3018_vm9, %v16010_v15, -inf  ;;  %v16016_v61 = vsel %vm14486_vm8, -1e+30, %v6907_v8 }
0x222e   : > { %v6846_v17 = vpop.f32.mrb[123].mxu0  ;;  %v6910_v46 = vmul.f32 0.25, %v12081_v22  ;;  %v6943_v39 = vsel %vm3018_vm9, %v16016_v61, -inf }
0x222f   : > { %v6909_v54 = vmul.f32 0.25, %v6846_v17  ;;  %6947 = vmax.xlane.f32.xlu0 %v6946_v18 }
0x2230   : > { %v16028_v21 = vsel %vm14486_vm8, -1e+30, %v6910_v46 }
0x2231   : > { %v16020_v62 = vsel %vm14486_vm8, -1e+30, %v6909_v54  ;;  %v12084_v60 = vpop.f32.mrb[124].mxu0  ;;  %v6952_v19 = vsel %vm3018_vm9, %v16028_v21, -inf }
0x2232   : > { %v6856_v58 = vpop.f32.mrb[125].mxu0  ;;  %v6949_v3 = vsel %vm3018_vm9, %v16020_v62, -inf  ;;  %v6912_v40 = vmul.f32 0.25, %v12084_v60 }
0x2233   : > { %v6911_v36 = vmul.f32 0.25, %v6856_v58  ;;  %6944 = vmax.xlane.f32.xlu0 %v6943_v39  ;;  %6950 = vmax.xlane.f32.xlu1 %v6949_v3 }
0x2234   : > { %v16040_v30 = vsel %vm14486_vm8, -1e+30, %v6912_v40 }
0x2235   : > { %v16032_v52 = vsel %vm14486_vm8, -1e+30, %v6911_v36  ;;  %v12087_v20 = vpop.f32.mrb[126].mxu0  ;;  %v6958_v25 = vsel %vm3018_vm9, %v16040_v30, -inf }
0x2236   : > { %v6866_v29 = vpop.f32.mrb[127].mxu0  ;;  %v6955_v43 = vsel %vm3018_vm9, %v16032_v52, -inf  ;;  %v6914_v48 = vmul.f32 0.25, %v12087_v20 }
0x2237   : > { %v6913_v51 = vmul.f32 0.25, %v6866_v29  ;;  %6953 = vmax.xlane.f32.xlu0 %v6952_v19  ;;  %6956 = vmax.xlane.f32.xlu1 %v6955_v43 }
0x2238   : > { %v16052_v0 = vsel %vm14486_vm8, -1e+30, %v6914_v48 }
0x2239   : > { %v16044_v9 = vsel %vm14486_vm8, -1e+30, %v6913_v51  ;;  %v12090_v38 = vpop.f32.mrb[128].mxu0  ;;  %v6964_v34 = vsel %vm3018_vm9, %v16052_v0, -inf }
0x223a   : > { %v6876_v50 = vpop.f32.mrb[129].mxu0  ;;  %v6961_v4 = vsel %vm3018_vm9, %v16044_v9, -inf  ;;  %v6916_v2 = vmul.f32 0.25, %v12090_v38 }
0x223b   : > { %v6915_v53 = vmul.f32 0.25, %v6876_v50  ;;  %6959 = vmax.xlane.f32.xlu0 %v6958_v25  ;;  %6962 = vmax.xlane.f32.xlu1 %v6961_v4 }
0x223c   : > { %v16064_v12 = vsel %vm14486_vm8, -1e+30, %v6916_v2 }
0x223d   : > { %v16056_v23 = vsel %vm14486_vm8, -1e+30, %v6915_v53  ;;  %v12093_v16 = vpop.f32.mrb[130].mxu0  ;;  %v6970_v54 = vsel %vm3018_vm9, %v16064_v12, -inf }
0x223e   : > { %v6886_v49 = vpop.f32.mrb[131].mxu0  ;;  %v6967_v35 = vsel %vm3018_vm9, %v16056_v23, -inf  ;;  %v6918_v8 = vmul.f32 0.25, %v12093_v16 }
0x223f   : > { %v6917_v22 = vmul.f32 0.25, %v6886_v49  ;;  %6965 = vmax.xlane.f32.xlu0 %v6964_v34  ;;  %6968 = vmax.xlane.f32.xlu1 %v6967_v35 }
0x2240   : > { %v16076_v58 = vsel %vm14486_vm8, -1e+30, %v6918_v8 }
0x2241   : > { %v16068_v18 = vsel %vm14486_vm8, -1e+30, %v6917_v22  ;;  %v12096_v17 = vpop.f32.mrb[132].mxu0  ;;  %v6976_v36 = vsel %vm3018_vm9, %v16076_v58, -inf }
0x2242   : > { %v6896_v46 = vpop.f32.mrb[133].mxu0  ;;  %v6973_v60 = vsel %vm3018_vm9, %v16068_v18, -inf  ;;  %v6920_v39 = vmul.f32 0.25, %v12096_v17 }
0x2243   : > { %v6919_v3 = vmul.f32 0.25, %v6896_v46  ;;  %6971 = vmax.xlane.f32.xlu0 %v6970_v54  ;;  %6974 = vmax.xlane.f32.xlu1 %v6973_v60 }
0x2244   : > { %v16088_v29 = vsel %vm14486_vm8, -1e+30, %v6920_v39 }
0x2245   : > { %v16080_v40 = vsel %vm14486_vm8, -1e+30, %v6919_v3  ;;  %v6982_v19 = vsel %vm3018_vm9, %v16088_v29, -inf }
0x2246   : > { %v6979_v20 = vsel %vm3018_vm9, %v16080_v40, -inf }
0x2247   : > { %6977 = vmax.xlane.f32.xlu0 %v6976_v36  ;;  %6980 = vmax.xlane.f32.xlu1 %v6979_v20 }
0x224b   : > { %6983 = vmax.xlane.f32.xlu0 %v6982_v19 }
0x2298   : > { %v12127_v43 = vpop.f32.mrb[134].mxu0 }
0x2299   : > { %v7523_v48 = vmul.f32 0.25, %v12127_v43  ;;  %v7443_v51 = vpop.f32.mrb[135].mxu0 }
0x229a   : > { %v7522_v38 = vmul.f32 0.25, %v7443_v51 }
0x229b   : > { %v16094_v50 = vsel %vm14486_vm8, -1e+30, %v7523_v48 }
0x229c   : > { %v16098_v25 = vsel %vm14486_vm8, -1e+30, %v7522_v38  ;;  %v12130_v4 = vpop.f32.mrb[136].mxu0  ;;  %v7557_v2 = vsel %vm3018_vm9, %v16094_v50, -inf }
0x229d   : > { %v7525_v53 = vmul.f32 0.25, %v12130_v4  ;;  %7558 = vmax.xlane.f32.xlu0 %v7557_v2  ;;  %v7453_v16 = vpop.f32.mrb[137].mxu0  ;;  %v7554_v49 = vsel %vm3018_vm9, %v16098_v25, -inf }
0x229e   : > { %v7524_v34 = vmul.f32 0.25, %v7453_v16  ;;  %7555 = vmax.xlane.f32.xlu1 %v7554_v49 }
0x229f   : > { %v16106_v35 = vsel %vm14486_vm8, -1e+30, %v7525_v53 }
0x22a0   : > { %v16110_v8 = vsel %vm14486_vm8, -1e+30, %v7524_v34  ;;  %v12133_v22 = vpop.f32.mrb[138].mxu0  ;;  %v7563_v17 = vsel %vm3018_vm9, %v16106_v35, -inf }
0x22a1   : > { %v7527_v46 = vmul.f32 0.25, %v12133_v22  ;;  %7564 = vmax.xlane.f32.xlu0 %v7563_v17  ;;  %v7463_v54 = vpop.f32.mrb[139].mxu0  ;;  %v7560_v60 = vsel %vm3018_vm9, %v16110_v8, -inf }
0x22a2   : > { %v7526_v39 = vmul.f32 0.25, %v7463_v54  ;;  %7561 = vmax.xlane.f32.xlu1 %v7560_v60 }
0x22a3   : > { %v16118_v3 = vsel %vm14486_vm8, -1e+30, %v7527_v46 }
0x22a4   : > { %v16122_v36 = vsel %vm14486_vm8, -1e+30, %v7526_v39  ;;  %v12136_v20 = vpop.f32.mrb[140].mxu0  ;;  %v7569_v19 = vsel %vm3018_vm9, %v16118_v3, -inf }
0x22a5   : > { %v7529_v43 = vmul.f32 0.25, %v12136_v20  ;;  %7570 = vmax.xlane.f32.xlu0 %v7569_v19  ;;  %v7473_v48 = vpop.f32.mrb[141].mxu0  ;;  %v7566_v51 = vsel %vm3018_vm9, %v16122_v36, -inf }
0x22a6   : > { %v7528_v38 = vmul.f32 0.25, %v7473_v48  ;;  %7567 = vmax.xlane.f32.xlu1 %v7566_v51 }
0x22a7   : > { %v16130_v4 = vsel %vm14486_vm8, -1e+30, %v7529_v43 }
0x22a8   : > { %v16134_v2 = vsel %vm14486_vm8, -1e+30, %v7528_v38  ;;  %v12139_v53 = vpop.f32.mrb[142].mxu0  ;;  %v7575_v16 = vsel %vm3018_vm9, %v16130_v4, -inf }
0x22a9   : > { %v7531_v49 = vmul.f32 0.25, %v12139_v53  ;;  %7576 = vmax.xlane.f32.xlu0 %v7575_v16  ;;  %v7483_v34 = vpop.f32.mrb[143].mxu0  ;;  %v7572_v22 = vsel %vm3018_vm9, %v16134_v2, -inf }
0x22aa   : > { %v7530_v17 = vmul.f32 0.25, %v7483_v34  ;;  %7573 = vmax.xlane.f32.xlu1 %v7572_v22 }
0x22ab   : > { %v16142_v46 = vsel %vm14486_vm8, -1e+30, %v7531_v49 }
0x22ac   : > { %v16146_v54 = vsel %vm14486_vm8, -1e+30, %v7530_v17  ;;  %v12142_v60 = vpop.f32.mrb[144].mxu0  ;;  %v7581_v39 = vsel %vm3018_vm9, %v16142_v46, -inf }
0x22ad   : > { %v7533_v20 = vmul.f32 0.25, %v12142_v60  ;;  %7582 = vmax.xlane.f32.xlu0 %v7581_v39  ;;  %v7493_v19 = vpop.f32.mrb[145].mxu0  ;;  %v7578_v43 = vsel %vm3018_vm9, %v16146_v54, -inf }
0x22ae   : > { %v7532_v48 = vmul.f32 0.25, %v7493_v19  ;;  %7579 = vmax.xlane.f32.xlu1 %v7578_v43 }
0x22af   : > { %v16154_v51 = vsel %vm14486_vm8, -1e+30, %v7533_v20 }
0x22b0   : > { %v16158_v38 = vsel %vm14486_vm8, -1e+30, %v7532_v48  ;;  %v12145_v53 = vpop.f32.mrb[146].mxu0  ;;  %v7587_v16 = vsel %vm3018_vm9, %v16154_v51, -inf }
0x22b1   : > { %v7535_v49 = vmul.f32 0.25, %v12145_v53  ;;  %7588 = vmax.xlane.f32.xlu0 %v7587_v16  ;;  %v7503_v34 = vpop.f32.mrb[147].mxu0  ;;  %v7584_v22 = vsel %vm3018_vm9, %v16158_v38, -inf }
0x22b2   : > { %v7534_v17 = vmul.f32 0.25, %v7503_v34  ;;  %7585 = vmax.xlane.f32.xlu1 %v7584_v22 }
0x22b3   : > { %v16166_v60 = vsel %vm14486_vm8, -1e+30, %v7535_v49 }
0x22b4   : > { %v16170_v39 = vsel %vm14486_vm8, -1e+30, %v7534_v17  ;;  %v12148_v20 = vpop.f32.mrb[148].mxu0  ;;  %v7593_v19 = vsel %vm3018_vm9, %v16166_v60, -inf }
0x22b5   : > { %v7537_v43 = vmul.f32 0.25, %v12148_v20  ;;  %7594 = vmax.xlane.f32.xlu0 %v7593_v19  ;;  %v7513_v48 = vpop.f32.mrb[149].mxu0  ;;  %v7590_v53 = vsel %vm3018_vm9, %v16170_v39, -inf }
0x22b6   : > { %v7536_v16 = vmul.f32 0.25, %v7513_v48  ;;  %7591 = vmax.xlane.f32.xlu1 %v7590_v53 }
0x22b7   : > { %v16178_v49 = vsel %vm14486_vm8, -1e+30, %v7537_v43  ;;  %v6942_v34 = vpop.xlane.xlu1 %6941 }
0x22b8   : > { %v16182_v22 = vsel %vm14486_vm8, -1e+30, %v7536_v16  ;;  %v6986_v17 = vsub.f32 %v15998_v63, %v6942_v34  ;;  %v6939_v44 = vpop.xlane.xlu0 %6938  ;;  %v7599_v20 = vsel %vm3018_vm9, %v16178_v49, -inf }
0x22b9   : > { %7600 = vmax.xlane.f32.xlu0 %v7599_v20  ;;  %v7596_v19 = vsel %vm3018_vm9, %v16182_v22, -inf }
0x22ba   : > { %v7003_v48 = vmul.f32 1.442695, %v6986_v17  ;;  %7597 = vmax.xlane.f32.xlu1 %v7596_v19 }
0x22bc   : > { %13425 = vpow2.f32 %v7003_v48  ;;  %v6948_v43 = vpop.xlane.xlu0 %6947 }
0x22bd   : > { %v6988_v53 = vsub.f32 %v16010_v15, %v6948_v43 }
0x22bf   : > { %v7007_v28 = vmul.f32 1.442695, %v6988_v53 }
0x22c0   : > { %v6945_v24 = vpop.xlane.xlu0 %6944  ;;  %v6951_v16 = vpop.xlane.xlu1 %6950 }
0x22c1   : > { %13427 = vpow2.f32 %v7007_v28 }
0x22c4   : > { %v6954_v5 = vpop.xlane.xlu0 %6953  ;;  %v16190_v63 = vpop.xlane.xlu1 %6956 }
0x22c5   : > { %v6990_v34 = vsub.f32 %v16028_v21, %v6954_v5 }
0x22c6   : > { %v16193_v26 = vpop.eup %13425 }
0x22c7   : > { %v7011_v20 = vmul.f32 1.442695, %v6990_v34  ;;  %v7036_v17 = vsel %vm3018_vm9, %v16193_v26, 0.0 }
0x22c8   : > { %v6960_v19 = vpop.xlane.xlu0 %6959  ;;  %v16197_v48 = vpop.xlane.xlu1 %6962  ;;  %7037 = vadd.xlane.f32.xlu0 %v7036_v17 }
0x22c9   : > { %13429 = vpow2.f32 %v7011_v20  ;;  %v6992_v15 = vsub.f32 %v16040_v30, %v6960_v19 }
0x22cb   : > { %v16200_v43 = vpop.eup %13427  ;;  %v7015_v28 = vmul.f32 1.442695, %v6992_v15  ;;  %7113 = vrot.lane.b32.xlu1 %v15938_v31, %s17515_s20  ;;  %s17563_s20 = sld [smem:[#allocation8_spill]] }
0x22cc   : > { %v6966_v5 = vpop.xlane.xlu0 %6965  ;;  %v16204_v21 = vpop.xlane.xlu1 %6968  ;;  %v7042_v53 = vsel %vm3018_vm9, %v16200_v43, 0.0 }
0x22cd   : > { %13431 = vpow2.f32 %v7015_v28  ;;  %v6994_v34 = vsub.f32 %v16052_v0, %v6966_v5  ;;  %7043 = vadd.xlane.f32.xlu0 %v7042_v53 }
0x22cf   : > { %v7019_v17 = vmul.f32 1.442695, %v6994_v34 }
0x22d0   : > { %v6972_v20 = vpop.xlane.xlu0 %6971  ;;  %v16209_v7 = vpop.xlane.xlu1 %6974 }
0x22d1   : > { %13433 = vpow2.f32 %v7019_v17  ;;  %v6996_v30 = vsub.f32 %v16064_v12, %v6972_v20  ;;  %v6985_v17 = vsub.f32 %v16002_v1, %v6939_v44 }
0x22d3   : > { %v16212_v19 = vpop.eup %13429  ;;  %v7023_v15 = vmul.f32 1.442695, %v6996_v30 }
0x22d4   : > { %v6978_v42 = vpop.xlane.xlu0 %6977  ;;  %v6981_v6 = vpop.xlane.xlu1 %6980  ;;  %v7048_v13 = vsel %vm3018_vm9, %v16212_v19, 0.0 }
0x22d5   : > { %13435 = vpow2.f32 %v7023_v15  ;;  %v6998_v28 = vsub.f32 %v16076_v58, %v6978_v42  ;;  %7049 = vadd.xlane.f32.xlu0 %v7048_v13  ;;  %v6999_v53 = vsub.f32 %v16080_v40, %v6981_v6  ;;  %v7001_v58 = vmul.f32 1.442695, %v6985_v17 }
0x22d6   : > { %v6987_v6 = vsub.f32 %v16016_v61, %v6945_v24  ;;  %v6991_v24 = vsub.f32 %v16032_v52, %v16190_v63  ;;  %v6995_v63 = vsub.f32 %v16056_v23, %v16204_v21 }
0x22d7   : > { %v16217_v0 = vpop.eup %13431  ;;  %v7027_v5 = vmul.f32 1.442695, %v6998_v28  ;;  %v7029_v15 = vmul.f32 1.442695, %v6999_v53 }
0x22d8   : > { %v6984_v34 = vpop.xlane.xlu0 %6983  ;;  %v7054_v12 = vsel %vm3018_vm9, %v16217_v0, 0.0  ;;  %v7005_v1 = vmul.f32 1.442695, %v6987_v6 }
0x22d9   : > { %13437 = vpow2.f32 %v7027_v5  ;;  %v7000_v20 = vsub.f32 %v16088_v29, %v6984_v34  ;;  %7055 = vadd.xlane.f32.xlu0 %v7054_v12  ;;  %v6989_v29 = vsub.f32 %v16020_v62, %v6951_v16  ;;  %v7013_v62 = vmul.f32 1.442695, %v6991_v24 }
0x22da   : > { %v6993_v16 = vsub.f32 %v16044_v9, %v16197_v48  ;;  %v7021_v9 = vmul.f32 1.442695, %v6995_v63  ;;  %v6997_v48 = vsub.f32 %v16068_v18, %v16209_v7 }
0x22db   : > { %v16224_v30 = vpop.eup %13433  ;;  %v7031_v42 = vmul.f32 1.442695, %v7000_v20  ;;  %v7009_v61 = vmul.f32 1.442695, %v6989_v29 }
0x22dc   : > { %v7060_v13 = vsel %vm3018_vm9, %v16224_v30, 0.0  ;;  %v7017_v52 = vmul.f32 1.442695, %v6993_v16  ;;  %v7025_v23 = vmul.f32 1.442695, %v6997_v48 }
0x22dd   : > { %13439 = vpow2.f32 %v7031_v42  ;;  %7061 = vadd.xlane.f32.xlu0 %v7060_v13 }
0x22de   : > { %13441 = vpow2.f32 %v7029_v15 }
0x22df   : > { %v16229_v40 = vpop.eup %13435  ;;  %13443 = vpow2.f32 %v7001_v58 }
0x22e0   : > { %v7066_v44 = vsel %vm3018_vm9, %v16229_v40, 0.0  ;;  %13445 = vpow2.f32 %v7005_v1 }
0x22e1   : > { %7067 = vadd.xlane.f32.xlu0 %v7066_v44  ;;  %13447 = vpow2.f32 %v7009_v61 }
0x22e2   : > { %13449 = vpow2.f32 %v7013_v62 }
0x22e3   : > { %v16234_v28 = vpop.eup %13437  ;;  %13451 = vpow2.f32 %v7017_v52 }
0x22e4   : > { %v7072_v5 = vsel %vm3018_vm9, %v16234_v28, 0.0  ;;  %13453 = vpow2.f32 %v7021_v9 }
0x22e5   : > { %7073 = vadd.xlane.f32.xlu0 %v7072_v5  ;;  %13455 = vpow2.f32 %v7025_v23 }
0x22e7   : > { %v16240_v53 = vpop.eup %13439 }
0x22e8   : > { %v7078_v34 = vsel %vm3018_vm9, %v16240_v53, 0.0  ;;  %v16244_v12 = vpop.eup %13441 }
0x22e9   : > { %7079 = vadd.xlane.f32.xlu0 %v7078_v34  ;;  %v16248_v17 = vpop.eup %13443  ;;  %v7075_v20 = vsel %vm3018_vm9, %v16244_v12, 0.0 }
0x22ea   : > { %v7033_v15 = vsel %vm3018_vm9, %v16248_v17, 0.0  ;;  %v16256_v42 = vpop.eup %13445 }
0x22eb   : > { %v7039_v13 = vsel %vm3018_vm9, %v16256_v42, 0.0  ;;  %v16262_v58 = vpop.eup %13447 }
0x22ec   : > { %v7045_v21 = vsel %vm3018_vm9, %v16262_v58, 0.0  ;;  %v16266_v6 = vpop.eup %13449 }
0x22ed   : > { %7076 = vadd.xlane.f32.xlu0 %v7075_v20  ;;  %v7051_v44 = vsel %vm3018_vm9, %v16266_v6, 0.0  ;;  %v16270_v1 = vpop.eup %13451 }
0x22ee   : > { %v7057_v7 = vsel %vm3018_vm9, %v16270_v1, 0.0  ;;  %v16274_v18 = vpop.eup %13453 }
0x22ef   : > { %7034 = vadd.xlane.f32.xlu1 %v7033_v15  ;;  %v7063_v29 = vsel %vm3018_vm9, %v16274_v18, 0.0  ;;  %v16278_v5 = vpop.eup %13455 }
0x22f0   : > { %v7069_v61 = vsel %vm3018_vm9, %v16278_v5, 0.0 }
0x22f3   : > { %7040 = vadd.xlane.f32.xlu1 %v7039_v13 }
0x22f7   : > { %7046 = vadd.xlane.f32.xlu1 %v7045_v21 }
0x22fb   : > { %7052 = vadd.xlane.f32.xlu1 %v7051_v44 }
0x22ff   : > { %7058 = vadd.xlane.f32.xlu1 %v7057_v7 }
0x2303   : > { %7064 = vadd.xlane.f32.xlu1 %v7063_v29 }
0x2307   : > { %7070 = vadd.xlane.f32.xlu1 %v7069_v61 }
0x232a   : > { %v7559_v24 = vpop.xlane.xlu0 %7558 }
0x232b   : > { %v7603_v34 = vsub.f32 %v16094_v50, %v7559_v24  ;;  %v7556_v62 = vpop.xlane.xlu1 %7555 }
0x232c   : > { %v7602_v16 = vsub.f32 %v16098_v25, %v7556_v62 }
0x232d   : > { %v7620_v20 = vmul.f32 1.442695, %v7603_v34 }
0x232e   : > { %v7618_v52 = vmul.f32 1.442695, %v7602_v16  ;;  %v7565_v63 = vpop.xlane.xlu0 %7564 }
0x232f   : > { %13457 = vpow2.f32 %v7620_v20  ;;  %v7605_v15 = vsub.f32 %v16106_v35, %v7565_v63  ;;  %v7562_v9 = vpop.xlane.xlu1 %7561 }
0x2330   : > { %v7604_v48 = vsub.f32 %v16110_v8, %v7562_v9  ;;  %13459 = vpow2.f32 %v7618_v52 }
0x2331   : > { %v7624_v13 = vmul.f32 1.442695, %v7605_v15 }
0x2332   : > { %v7622_v23 = vmul.f32 1.442695, %v7604_v48  ;;  %v7571_v21 = vpop.xlane.xlu0 %7570 }
0x2333   : > { %v7607_v44 = vsub.f32 %v16118_v3, %v7571_v21  ;;  %v7568_v7 = vpop.xlane.xlu1 %7567 }
0x2334   : > { %13461 = vpow2.f32 %v7622_v23  ;;  %v7606_v25 = vsub.f32 %v16122_v36, %v7568_v7 }
0x2335   : > { %13463 = vpow2.f32 %v7624_v13  ;;  %v7628_v50 = vmul.f32 1.442695, %v7607_v44 }
0x2336   : > { %v7577_v29 = vpop.xlane.xlu0 %7576  ;;  %v7626_v35 = vmul.f32 1.442695, %v7606_v25 }
0x2337   : > { %v7574_v61 = vpop.xlane.xlu1 %7573  ;;  %13465 = vpow2.f32 %v7628_v50  ;;  %v7609_v8 = vsub.f32 %v16130_v4, %v7577_v29 }
0x2338   : > { %13467 = vpow2.f32 %v7626_v35  ;;  %v7608_v20 = vsub.f32 %v16134_v2, %v7574_v61 }
0x2339   : > { %v16288_v24 = vpop.eup %13457  ;;  %v7632_v16 = vmul.f32 1.442695, %v7609_v8 }
0x233a   : > { %v7653_v34 = vsel %vm3018_vm9, %v16288_v24, 0.0  ;;  %v16293_v62 = vpop.eup %13459  ;;  %v7583_v52 = vpop.xlane.xlu0 %7582  ;;  %v7630_v48 = vmul.f32 1.442695, %v7608_v20 }
0x233b   : > { %7654 = vadd.xlane.f32.xlu0 %v7653_v34  ;;  %v7580_v3 = vpop.xlane.xlu1 %7579  ;;  %v7650_v63 = vsel %vm3018_vm9, %v16293_v62, 0.0  ;;  %13469 = vpow2.f32 %v7632_v16  ;;  %v7611_v13 = vsub.f32 %v16142_v46, %v7583_v52 }
0x233c   : > { %13471 = vpow2.f32 %v7630_v48  ;;  %v7610_v50 = vsub.f32 %v16146_v54, %v7580_v3 }
0x233d   : > { %v7636_v7 = vmul.f32 1.442695, %v7611_v13 }
0x233e   : > { %v16296_v36 = vpop.eup %13461  ;;  %v7589_v25 = vpop.xlane.xlu0 %7588  ;;  %v7634_v8 = vmul.f32 1.442695, %v7610_v50 }
0x233f   : > { %v16300_v15 = vpop.eup %13463  ;;  %7651 = vadd.xlane.f32.xlu0 %v7650_v63  ;;  %v7586_v4 = vpop.xlane.xlu1 %7585  ;;  %v7656_v9 = vsel %vm3018_vm9, %v16296_v36, 0.0  ;;  %v7613_v34 = vsub.f32 %v16154_v51, %v7589_v25 }
0x2340   : > { %7657 = vadd.xlane.f32.xlu1 %v7656_v9  ;;  %v7659_v2 = vsel %vm3018_vm9, %v16300_v15, 0.0  ;;  %v7612_v20 = vsub.f32 %v16158_v38, %v7586_v4 }
0x2341   : > { %v16307_v23 = vpop.eup %13465  ;;  %v7640_v3 = vmul.f32 1.442695, %v7613_v34 }
0x2342   : > { %v7665_v61 = vsel %vm3018_vm9, %v16307_v23, 0.0  ;;  %v16313_v35 = vpop.eup %13467  ;;  %v7595_v52 = vpop.xlane.xlu0 %7594  ;;  %v7638_v51 = vmul.f32 1.442695, %v7612_v20 }
0x2343   : > { %7660 = vadd.xlane.f32.xlu0 %v7659_v2  ;;  %v7592_v21 = vpop.xlane.xlu1 %7591  ;;  %v7615_v48 = vsub.f32 %v16166_v60, %v7595_v52 }
0x2344   : > { %v7614_v44 = vsub.f32 %v16170_v39, %v7592_v21  ;;  %v7662_v39 = vsel %vm3018_vm9, %v16313_v35, 0.0 }
0x2345   : > { %v16318_v16 = vpop.eup %13469  ;;  %v7644_v4 = vmul.f32 1.442695, %v7615_v48 }
0x2346   : > { %v7642_v29 = vmul.f32 1.442695, %v7614_v44  ;;  %v7671_v63 = vsel %vm3018_vm9, %v16318_v16, 0.0  ;;  %v16323_v9 = vpop.eup %13471 }
0x2347   : > { %7666 = vadd.xlane.f32.xlu0 %v7665_v61  ;;  %v7598_v46 = vpop.xlane.xlu1 %7597  ;;  %v7668_v2 = vsel %vm3018_vm9, %v16323_v9, 0.0 }
0x2348   : > { %13473 = vpow2.f32 %v7642_v29  ;;  %v7616_v44 = vsub.f32 %v16182_v22, %v7598_v46 }
0x2349   : > { %13475 = vpow2.f32 %v7636_v7  ;;  %v7601_v7 = vpop.xlane.xlu0 %7600 }
0x234a   : > { %13477 = vpow2.f32 %v7634_v8  ;;  %v7617_v25 = vsub.f32 %v16178_v49, %v7601_v7  ;;  %v7646_v29 = vmul.f32 1.442695, %v7616_v44 }
0x234b   : > { %7663 = vadd.xlane.f32.xlu0 %v7662_v39  ;;  %v7114_v54 = vpop.permute.xlu1 %7113  ;;  %13479 = vpow2.f32 %v7640_v3 }
0x234c   : > { %12097 = vmatprep.subr.mxu1 %v7114_v54  ;;  %13481 = vpow2.f32 %v7638_v51  ;;  %v7648_v34 = vmul.f32 1.442695, %v7617_v25 }
0x234d   : > { %12098 = vmatpush3.msra.mxu1 %v7114_v54  ;;  %13483 = vpow2.f32 %v7644_v4 }
0x234e   : > { %13485 = vpow2.f32 %v7646_v29 }
0x234f   : > { %7672 = vadd.xlane.f32.xlu0 %v7671_v63  ;;  %13487 = vpow2.f32 %v7648_v34 }
0x2352   : > { %v16326_v13 = vpop.eup %13473 }
0x2353   : > { %v16330_v21 = vpop.eup %13475  ;;  %7669 = vadd.xlane.f32.xlu0 %v7668_v2  ;;  %v7686_v38 = vsel %vm3018_vm9, %v16326_v13, 0.0 }
0x2354   : > { %7687 = vadd.xlane.f32.xlu1 %v7686_v38  ;;  %v7677_v60 = vsel %vm3018_vm9, %v16330_v21, 0.0  ;;  %v16337_v50 = vpop.eup %13477 }
0x2355   : > { %v7674_v61 = vsel %vm3018_vm9, %v16337_v50, 0.0  ;;  %v16342_v8 = vpop.eup %13479  ;;  %v7038_v54 = vpop.xlane.xlu0 %7037 }
0x2356   : > { %v7683_v22 = vsel %vm3018_vm9, %v16342_v8, 0.0  ;;  %v16346_v46 = vpop.eup %13481  ;;  %13489 = vrcp.f32 %v7038_v54 }
0x2357   : > { %7678 = vadd.xlane.f32.xlu0 %v7677_v60  ;;  %v7680_v39 = vsel %vm3018_vm9, %v16346_v46, 0.0  ;;  %v16350_v49 = vpop.eup %13483 }
0x2358   : > { %v7689_v3 = vsel %vm3018_vm9, %v16350_v49, 0.0  ;;  %v16356_v20 = vpop.eup %13485 }
0x2359   : > { %v7692_v63 = vsel %vm3018_vm9, %v16356_v20, 0.0  ;;  %v16360_v51 = vpop.eup %13487 }
0x235a   : > { %v7044_v52 = vpop.xlane.xlu0 %7043  ;;  %v7695_v2 = vsel %vm3018_vm9, %v16360_v51, 0.0 }
0x235b   : > { %7675 = vadd.xlane.f32.xlu0 %v7674_v61 }
0x235f   : > { %7684 = vadd.xlane.f32.xlu0 %v7683_v22 }
0x2360   : > { %v13490_v29 = vpop.eup %13489 }
0x2362   : > { %v7050_v48 = vpop.xlane.xlu0 %7049 }
0x2363   : > { %7681 = vadd.xlane.f32.xlu0 %v7680_v39  ;;  %v7098_v39 = vmul.f32 %v13490_v29, %v16193_v26 }
0x2365   : > { %7730 = vrot.lane.b32.xlu1 %v15938_v31, %s17516_s5  ;;  %s17557_s5 = sld [smem:[#allocation33_spill]] }
0x2366   : > { %v7056_v38 = vpop.xlane.xlu0 %7055 }
0x2367   : > { %7690 = vadd.xlane.f32.xlu0 %v7689_v3 }
0x236a   : > { %v7062_v31 = vpop.xlane.xlu0 %7061 }
0x236b   : > { %7693 = vadd.xlane.f32.xlu0 %v7692_v63 }
0x236e   : > { %v7068_v44 = vpop.xlane.xlu0 %7067 }
0x236f   : > { %7696 = vadd.xlane.f32.xlu0 %v7695_v2 }
0x2372   : > { %v7074_v25 = vpop.xlane.xlu0 %7073 }
0x237c   : > { %v7035_v4 = vpop.xlane.xlu1 %7034 }
0x237d   : > { %13491 = vrcp.f32 %v7035_v4 }
0x237e   : > { %13493 = vrcp.f32 %v7044_v52  ;;  %v7080_v52 = vpop.xlane.xlu0 %7079 }
0x2380   : > { %v7041_v7 = vpop.xlane.xlu1 %7040 }
0x2381   : > { %13495 = vrcp.f32 %v7041_v7 }
0x2382   : > { %13497 = vrcp.f32 %v7050_v48  ;;  %v7077_v7 = vpop.xlane.xlu0 %7076 }
0x2384   : > { %v7047_v60 = vpop.xlane.xlu1 %7046 }
0x2385   : > { %13499 = vrcp.f32 %v7047_v60 }
0x2386   : > { %13501 = vrcp.f32 %v7056_v38 }
0x2387   : > { %v13492_v61 = vpop.eup %13491 }
0x2388   : > { %v7053_v34 = vpop.xlane.xlu1 %7052  ;;  %v7097_v22 = vmul.f32 %v13492_v61, %v16248_v17  ;;  %v13494_v54 = vpop.eup %13493 }
0x2389   : > { %13503 = vrcp.f32 %v7053_v34  ;;  %v7100_v2 = vmul.f32 %v13494_v54, %v16200_v43 }
0x238a   : > { %12099 = vmatprep.mubr.msk.f32.mxu1 %vm3018_vm9, %v7097_v22  ;;  %13505 = vrcp.f32 %v7062_v31 }
0x238b   : > { %v13496_v3 = vpop.eup %13495  ;;  %12100 = vmatmul.mubr.msk.f32.vlgmr.msra.gmra.mrb[98].mxu1 %vm3018_vm9, %v7098_v39 }
0x238c   : > { %v7059_v63 = vpop.xlane.xlu1 %7058  ;;  %v7099_v48 = vmul.f32 %v13496_v3, %v16256_v42  ;;  %v13498_v38 = vpop.eup %13497 }
0x238d   : > { %13507 = vrcp.f32 %v7059_v63  ;;  %v7102_v31 = vmul.f32 %v13498_v38, %v16212_v19 }
0x238e   : > { %12102 = vmatprep.mubr.msk.f32.mxu1 %vm3018_vm9, %v7099_v48  ;;  %13509 = vrcp.f32 %v7068_v44 }
0x238f   : > { %v13500_v17 = vpop.eup %13499  ;;  %12103 = vmatmul.mubr.msk.f32.gmra.mrb[100].mxu1 %vm3018_vm9, %v7100_v2 }
0x2390   : > { %v7065_v26 = vpop.xlane.xlu1 %7064  ;;  %v7101_v4 = vmul.f32 %v13500_v17, %v16262_v58  ;;  %v13502_v60 = vpop.eup %13501 }
0x2391   : > { %13511 = vrcp.f32 %v7065_v26  ;;  %v7104_v44 = vmul.f32 %v13502_v60, %v16217_v0 }
0x2392   : > { %12105 = vmatprep.mubr.msk.f32.mxu1 %vm3018_vm9, %v7101_v4  ;;  %13513 = vrcp.f32 %v7074_v25 }
0x2393   : > { %v13504_v42 = vpop.eup %13503  ;;  %12106 = vmatmul.mubr.msk.f32.gmra.mrb[102].mxu1 %vm3018_vm9, %v7102_v31  ;;  %13515 = vrcp.f32 %v7077_v7 }
0x2394   : > { %v7071_v43 = vpop.xlane.xlu1 %7070  ;;  %v7103_v29 = vmul.f32 %v13504_v42, %v16266_v6  ;;  %v13506_v61 = vpop.eup %13505 }
0x2395   : > { %13517 = vrcp.f32 %v7071_v43  ;;  %v7106_v25 = vmul.f32 %v13506_v61, %v16224_v30 }
0x2396   : > { %12108 = vmatprep.mubr.msk.f32.mxu1 %vm3018_vm9, %v7103_v29  ;;  %13519 = vrcp.f32 %v7080_v52 }
0x2397   : > { %v13508_v58 = vpop.eup %13507  ;;  %12109 = vmatmul.mubr.msk.f32.gmra.mrb[104].mxu1 %vm3018_vm9, %v7104_v44 }
0x2398   : > { %v7105_v19 = vmul.f32 %v13508_v58, %v16270_v1  ;;  %v13510_v34 = vpop.eup %13509 }
0x2399   : > { %v7108_v39 = vmul.f32 %v13510_v34, %v16229_v40 }
0x239a   : > { %12111 = vmatprep.mubr.msk.f32.mxu1 %vm3018_vm9, %v7105_v19 }
0x239b   : > { %v13512_v22 = vpop.eup %13511  ;;  %12112 = vmatmul.mubr.msk.f32.gmra.mrb[106].mxu1 %vm3018_vm9, %v7106_v25 }
0x239c   : > { %v7107_v6 = vmul.f32 %v13512_v22, %v16274_v18  ;;  %v13514_v0 = vpop.eup %13513 }
0x239d   : > { %v13516_v54 = vpop.eup %13515  ;;  %v7110_v30 = vmul.f32 %v13514_v0, %v16234_v28 }
0x239e   : > { %12114 = vmatprep.mubr.msk.f32.mxu1 %vm3018_vm9, %v7107_v6  ;;  %v7111_v63 = vmul.f32 %v13516_v54, %v16244_v12 }
0x239f   : > { %v13518_v3 = vpop.eup %13517  ;;  %12115 = vmatmul.mubr.msk.f32.gmra.mrb[108].mxu1 %vm3018_vm9, %v7108_v39 }
0x23a0   : > { %v7109_v1 = vmul.f32 %v13518_v3, %v16278_v5  ;;  %v13520_v52 = vpop.eup %13519 }
0x23a1   : > { %v7112_v40 = vmul.f32 %v13520_v52, %v16240_v53 }
0x23a2   : > { %12117 = vmatprep.mubr.msk.f32.mxu1 %vm3018_vm9, %v7109_v1 }
0x23a3   : > { %12118 = vmatmul.mubr.msk.f32.gmra.mrb[110].mxu1 %vm3018_vm9, %v7110_v30 }
0x23a4   : > { %12120 = vmatprep.mubr.msk.f32.mxu1 %vm3018_vm9, %v7111_v63 }
0x23a7   : > { %12121 = vmatmul.mubr.msk.f32.gmra.mrb[112].mxu1 %vm3018_vm9, %v7112_v40 }
0x23c8   : > { %v7655_v18 = vpop.xlane.xlu0 %7654 }
0x23cc   : > { %v7652_v48 = vpop.xlane.xlu0 %7651 }
0x23cd   : > { %13521 = vrcp.f32 %v7652_v48  ;;  %v7658_v28 = vpop.xlane.xlu1 %7657 }
0x23ce   : > { %13523 = vrcp.f32 %v7655_v18 }
0x23cf   : > { %13525 = vrcp.f32 %v7658_v28 }
0x23d0   : > { %v7661_v2 = vpop.xlane.xlu0 %7660 }
0x23d1   : > { %13527 = vrcp.f32 %v7661_v2 }
0x23d4   : > { %v7667_v5 = vpop.xlane.xlu0 %7666 }
0x23d7   : > { %v13522_v38 = vpop.eup %13521 }
0x23d8   : > { %v7664_v17 = vpop.xlane.xlu0 %7663  ;;  %v7714_v26 = vmul.f32 %v13522_v38, %v16293_v62  ;;  %v13524_v7 = vpop.eup %13523 }
0x23d9   : > { %13529 = vrcp.f32 %v7664_v17  ;;  %v13526_v31 = vpop.eup %13525  ;;  %v7715_v43 = vmul.f32 %v13524_v7, %v16288_v24 }
0x23da   : > { %12151 = vmatprep.mubr.msk.f32.mxu1 %vm3018_vm9, %v7714_v26  ;;  %13531 = vrcp.f32 %v7667_v5  ;;  %v7716_v29 = vmul.f32 %v13526_v31, %v16296_v36 }
0x23db   : > { %v13528_v62 = vpop.eup %13527 }
0x23dc   : > { %v7673_v12 = vpop.xlane.xlu0 %7672  ;;  %v7717_v58 = vmul.f32 %v13528_v62, %v16300_v15 }
0x23e0   : > { %v7670_v53 = vpop.xlane.xlu0 %7669 }
0x23e1   : > { %v7688_v4 = vpop.xlane.xlu1 %7687  ;;  %13533 = vrcp.f32 %v7670_v53 }
0x23e2   : > { %13535 = vrcp.f32 %v7673_v12 }
0x23e3   : > { %v13530_v44 = vpop.eup %13529 }
0x23e4   : > { %v7679_v60 = vpop.xlane.xlu0 %7678  ;;  %v13532_v24 = vpop.eup %13531  ;;  %v7718_v19 = vmul.f32 %v13530_v44, %v16313_v35 }
0x23e5   : > { %v7731_v42 = vpop.permute.xlu1 %7730  ;;  %13537 = vrcp.f32 %v7679_v60  ;;  %v7719_v34 = vmul.f32 %v13532_v24, %v16307_v23 }
0x23e6   : > { %12149 = vmatprep.subr.mxu1 %v7731_v42 }
0x23e7   : > { %12150 = vmatpush3.msra.mxu1 %v7731_v42 }
0x23e8   : > { %v7676_v61 = vpop.xlane.xlu0 %7675  ;;  %12152 = vmatmul.mubr.msk.f32.vlgmr.msra.gmra.mrb[114].mxu1 %vm3018_vm9, %v7715_v43  ;;  %12780 = vmatprep.subr.bf16.mxu1 %v15132_v57 }
0x23e9   : > { %13539 = vrcp.f32 %v7676_v61  ;;  %12154 = vmatprep.mubr.msk.f32.mxu1 %vm3018_vm9, %v7716_v29  ;;  %12782 = vmatpush3.bf16.msra.mxu1 %v15132_v57 }
0x23ea   : > { %12784 = vmatprep.subr.bf16.mxu1 %v15144_v56  ;;  %13541 = vrcp.f32 %v7688_v4 }
0x23eb   : > { %v13534_v36 = vpop.eup %13533 }
0x23ec   : > { %v7685_v25 = vpop.xlane.xlu0 %7684  ;;  %12155 = vmatmul.mubr.msk.f32.gmra.mrb[116].mxu1 %vm3018_vm9, %v7717_v58  ;;  %v13536_v57 = vpop.eup %13535  ;;  %v7720_v15 = vmul.f32 %v13534_v36, %v16323_v9 }
0x23ed   : > { %12157 = vmatprep.mubr.msk.f32.mxu1 %vm3018_vm9, %v7718_v19  ;;  %12786 = vmatpush3.bf16.msra.mxu1 %v15144_v56  ;;  %13543 = vrcp.f32 %v7685_v25  ;;  %v7721_v6 = vmul.f32 %v13536_v57, %v16318_v16 }
0x23ee   : > { %12788 = vmatprep.subr.bf16.mxu1 %v15181_v10 }
0x23ef   : > { %v13538_v35 = vpop.eup %13537 }
0x23f0   : > { %v7682_v22 = vpop.xlane.xlu0 %7681  ;;  %12158 = vmatmul.mubr.msk.f32.gmra.mrb[118].mxu1 %vm3018_vm9, %v7719_v34  ;;  %v7723_v9 = vmul.f32 %v13538_v35, %v16330_v21  ;;  %v16470_v35 = vld [vmem:[%s17519_s9] ss:$0 sm:$0xff] }
0x23f1   : > { %13545 = vrcp.f32 %v7682_v22  ;;  %12160 = vmatprep.mubr.msk.f32.mxu1 %vm3018_vm9, %v7720_v15 }
0x23f3   : > { %v13540_v0 = vpop.eup %13539 }
0x23f4   : > { %v7691_v56 = vpop.xlane.xlu0 %7690  ;;  %12161 = vmatmul.mubr.msk.f32.gmra.mrb[120].mxu1 %vm3018_vm9, %v7721_v6  ;;  %v7722_v23 = vmul.f32 %v13540_v0, %v16337_v50  ;;  %v13542_v54 = vpop.eup %13541 }
0x23f5   : > { %13547 = vrcp.f32 %v7691_v56  ;;  %v7726_v50 = vmul.f32 %v13542_v54, %v16326_v13 }
0x23f6   : > { %12163 = vmatprep.mubr.msk.f32.mxu1 %vm3018_vm9, %v7722_v23 }
0x23f7   : > { %v13544_v3 = vpop.eup %13543 }
0x23f8   : > { %v7694_v39 = vpop.xlane.xlu0 %7693  ;;  %12164 = vmatmul.mubr.msk.f32.gmra.mrb[122].mxu1 %vm3018_vm9, %v7723_v9  ;;  %v7725_v52 = vmul.f32 %v13544_v3, %v16342_v8 }
0x23f9   : > { %13549 = vrcp.f32 %v7694_v39 }
0x23fb   : > { %v13546_v1 = vpop.eup %13545 }
0x23fc   : > { %v7697_v30 = vpop.xlane.xlu0 %7696  ;;  %v7724_v16 = vmul.f32 %v13546_v1, %v16346_v46 }
0x23fd   : > { %13551 = vrcp.f32 %v7697_v30 }
0x23fe   : > { %12166 = vmatprep.mubr.msk.f32.mxu1 %vm3018_vm9, %v7724_v16 }
0x23ff   : > { %v13548_v63 = vpop.eup %13547  ;;  %12167 = vmatmul.mubr.msk.f32.gmra.mrb[124].mxu1 %vm3018_vm9, %v7725_v52 }
0x2400   : > { %12169 = vmatprep.mubr.msk.f32.mxu1 %vm3018_vm9, %v7726_v50  ;;  %v7727_v21 = vmul.f32 %v13548_v63, %v16350_v49 }
0x2403   : > { %v13550_v40 = vpop.eup %13549  ;;  %12170 = vmatmul.mubr.msk.f32.gmra.mrb[126].mxu1 %vm3018_vm9, %v7727_v21 }
0x2404   : > { %v7728_v18 = vmul.f32 %v13550_v40, %v16356_v20 }
0x2406   : > { %12172 = vmatprep.mubr.msk.f32.mxu1 %vm3018_vm9, %v7728_v18 }
0x2407   : > { %v13552_v46 = vpop.eup %13551 }
0x2408   : > { %v7729_v8 = vmul.f32 %v13552_v46, %v16360_v51 }
0x240a   : > { %12173 = vmatmul.mubr.msk.f32.gmra.mrb[128].mxu1 %vm3018_vm9, %v7729_v8 }
0x245e   : > { %v12101_v13 = vpop.f32.mrb[98].mxu1 }
0x245f   : > { %v7230_v48 = vpop.f32.mrb[99].mxu1 }
0x2462   : > { %v12104_v2 = vpop.f32.mrb[100].mxu1 }
0x2463   : > { %v7240_v5 = vpop.f32.mrb[101].mxu1 }
0x2466   : > { %v12107_v38 = vpop.f32.mrb[102].mxu1 }
0x2467   : > { %v7250_v28 = vpop.f32.mrb[103].mxu1 }
0x246a   : > { %v12110_v17 = vpop.f32.mrb[104].mxu1 }
0x246b   : > { %v7260_v49 = vpop.f32.mrb[105].mxu1 }
0x246e   : > { %v12113_v26 = vpop.f32.mrb[106].mxu1 }
0x246f   : > { %v7270_v12 = vpop.f32.mrb[107].mxu1 }
0x2472   : > { %v12116_v53 = vpop.f32.mrb[108].mxu1 }
0x2473   : > { %v7280_v4 = vpop.f32.mrb[109].mxu1 }
0x2476   : > { %v12119_v20 = vpop.f32.mrb[110].mxu1 }
0x2477   : > { %v7290_v7 = vpop.f32.mrb[111].mxu1 }
0x247a   : > { %v12122_v31 = vpop.f32.mrb[112].mxu1 }
0x247b   : > { %v7300_v60 = vpop.f32.mrb[113].mxu1 }
0x24bb   : > { %v12153_v42 = vpop.f32.mrb[114].mxu1 }
0x24bc   : > { %v7847_v51 = vpop.f32.mrb[115].mxu1 }
0x24bd   : > { %12179 = vmatprep.mubr.msk.f32.mxu0 %vm1625_vm2, %v7847_v51 }
0x24be   : > { %12180 = vmatmul.mubr.msk.f32.vlgmr.msra.gmra.mrb[150].mxu0 %vm1625_vm2, %v12153_v42 }
0x24bf   : > { %v12156_v43 = vpop.f32.mrb[116].mxu1  ;;  %12778 = vmatpush3.bf16.msra.mxu0 %v14921_v14 }
0x24c0   : > { %v7857_v62 = vpop.f32.mrb[117].mxu1  ;;  %12303 = vmatprep.subr.mxu0 %v17520_v11 }
0x24c1   : > { %12182 = vmatprep.mubr.msk.f32.mxu0 %vm1625_vm2, %v7857_v62 }
0x24c2   : > { %12183 = vmatmul.mubr.msk.f32.gmra.mrb[152].mxu0 %vm1625_vm2, %v12156_v43 }
0x24c3   : > { %v12159_v29 = vpop.f32.mrb[118].mxu1 }
0x24c4   : > { %v7867_v44 = vpop.f32.mrb[119].mxu1 }
0x24c5   : > { %12185 = vmatprep.mubr.msk.f32.mxu0 %vm1625_vm2, %v7867_v44  ;;  %v17547_v44 = vld [vmem:[#allocation42_spill] sm:$0xff] }
0x24c6   : > { %12186 = vmatmul.mubr.msk.f32.gmra.mrb[154].mxu0 %vm1625_vm2, %v12159_v29  ;;  %v17546_v29 = vld [vmem:[#allocation47_spill] sm:$0xff] }
0x24c7   : > { %v12162_v61 = vpop.f32.mrb[120].mxu1 }
0x24c8   : > { %v7877_v58 = vpop.f32.mrb[121].mxu1 }
0x24c9   : > { %12188 = vmatprep.mubr.msk.f32.mxu0 %vm1625_vm2, %v7877_v58 }
0x24ca   : > { %12189 = vmatmul.mubr.msk.f32.gmra.mrb[156].mxu0 %vm1625_vm2, %v12162_v61 }
0x24cb   : > { %v12165_v14 = vpop.f32.mrb[122].mxu1 }
0x24cc   : > { %v7887_v24 = vpop.f32.mrb[123].mxu1 }
0x24cd   : > { %12191 = vmatprep.mubr.msk.f32.mxu0 %vm1625_vm2, %v7887_v24 }
0x24ce   : > { %12192 = vmatmul.mubr.msk.f32.gmra.mrb[158].mxu0 %vm1625_vm2, %v12165_v14 }
0x24d2   : > { %v12168_v19 = vpop.f32.mrb[124].mxu1 }
0x24d3   : > { %v7897_v36 = vpop.f32.mrb[125].mxu1 }
0x24d4   : > { %12194 = vmatprep.mubr.msk.f32.mxu0 %vm1625_vm2, %v7897_v36  ;;  %v17548_v36 = vld [vmem:[#allocation44_spill] sm:$0xff] }
0x24d5   : > { %12195 = vmatmul.mubr.msk.f32.gmra.mrb[160].mxu0 %vm1625_vm2, %v12168_v19 }
0x24d6   : > { %v12171_v25 = vpop.f32.mrb[126].mxu1 }
0x24d7   : > { %v7907_v34 = vpop.f32.mrb[127].mxu1 }
0x24d8   : > { %12197 = vmatprep.mubr.msk.f32.mxu0 %vm1625_vm2, %v7907_v34 }
0x24d9   : > { %12198 = vmatmul.mubr.msk.f32.gmra.mrb[162].mxu0 %vm1625_vm2, %v12171_v25 }
0x24dd   : > { %v12174_v57 = vpop.f32.mrb[128].mxu1 }
0x24de   : > { %v7917_v15 = vpop.f32.mrb[129].mxu1 }
0x24df   : > { %12200 = vmatprep.mubr.msk.f32.mxu0 %vm1625_vm2, %v7917_v15 }
0x24e0   : > { %12201 = vmatmul.mubr.msk.f32.gmra.mrb[164].mxu0 %vm1625_vm2, %v12174_v57  ;;  %v17549_v57 = vld [vmem:[#allocation45_spill] sm:$0xff] }
0x24e1   : > { %12207 = vmatprep.mubr.msk.f32.mxu0 %vm1625_vm2, %v7230_v48 }
0x24e4   : > { %12208 = vmatmul.mubr.msk.f32.vlgmr.msra.gmra.mrb[150].mxu0 %vm1625_vm2, %v12101_v13 }
0x24e5   : > { %12210 = vmatprep.mubr.msk.f32.mxu0 %vm1625_vm2, %v7240_v5 }
0x24e8   : > { %12211 = vmatmul.mubr.msk.f32.gmra.mrb[152].mxu0 %vm1625_vm2, %v12104_v2 }
0x24e9   : > { %12213 = vmatprep.mubr.msk.f32.mxu0 %vm1625_vm2, %v7250_v28 }
0x24ec   : > { %12214 = vmatmul.mubr.msk.f32.gmra.mrb[154].mxu0 %vm1625_vm2, %v12107_v38 }
0x24ed   : > { %12216 = vmatprep.mubr.msk.f32.mxu0 %vm1625_vm2, %v7260_v49 }
0x24f0   : > { %12217 = vmatmul.mubr.msk.f32.gmra.mrb[156].mxu0 %vm1625_vm2, %v12110_v17 }
0x24f1   : > { %12219 = vmatprep.mubr.msk.f32.mxu0 %vm1625_vm2, %v7270_v12 }
0x24f4   : > { %12220 = vmatmul.mubr.msk.f32.gmra.mrb[158].mxu0 %vm1625_vm2, %v12113_v26 }
0x24f5   : > { %12222 = vmatprep.mubr.msk.f32.mxu0 %vm1625_vm2, %v7280_v4 }
0x24f8   : > { %12223 = vmatmul.mubr.msk.f32.gmra.mrb[160].mxu0 %vm1625_vm2, %v12116_v53 }
0x24f9   : > { %12225 = vmatprep.mubr.msk.f32.mxu0 %vm1625_vm2, %v7290_v7 }
0x24fc   : > { %12226 = vmatmul.mubr.msk.f32.gmra.mrb[162].mxu0 %vm1625_vm2, %v12119_v20 }
0x24fd   : > { %12228 = vmatprep.mubr.msk.f32.mxu0 %vm1625_vm2, %v7300_v60 }
0x2500   : > { %12229 = vmatmul.mubr.msk.f32.gmra.mrb[164].mxu0 %vm1625_vm2, %v12122_v31  ;;  %v17545_v31 = vld [vmem:[#allocation43_spill] sm:$0xff] }
0x2501   : > { %12305 = vmatprep.mubr.msk.f32.mxu0 %vm13745_vm0, %v17520_v11 }
0x25b7   : > { %v12209_v22 = vpop.f32.mrb[150].mxu0 }
0x25b8   : > { %v8313_v6 = vadd.f32 %v16470_v35, %v12209_v22  ;;  %v8233_v0 = vpop.f32.mrb[151].mxu0 }
0x25b9   : > { %v8312_v56 = vadd.f32 %v16470_v35, %v8233_v0  ;;  %v17550_v0 = vld [vmem:[#allocation46_spill] sm:$0xff] }
0x25ba   : > { %v16475_v23 = vadd.f32 %v8313_v6, %v15550_v37 }
0x25bb   : > { %v12212_v9 = vpop.f32.mrb[152].mxu0  ;;  %v16478_v39 = vadd.f32 %v8312_v56, %v15547_v47 }
0x25bc   : > { %v8315_v54 = vadd.f32 %v16470_v35, %v12212_v9  ;;  %v8243_v3 = vpop.f32.mrb[153].mxu0  ;;  %v8347_v1 = vsel %vm1343_vm1, %v16475_v23, 0.0 }
0x25bd   : > { %v8314_v30 = vadd.f32 %v16470_v35, %v8243_v3  ;;  %8348 = vadd.xlane.f32.xlu0 %v8347_v1  ;;  %v8344_v63 = vsel %vm1343_vm1, %v16478_v39, 0.0  ;;  %v17551_v3 = vld [vmem:[#allocation48_spill] sm:$0xff] }
0x25be   : > { %v16488_v37 = vadd.f32 %v8315_v54, %v15564_v41 }
0x25bf   : > { %v16485_v16 = vadd.f32 %v8314_v30, %v15561_v27  ;;  %v12215_v52 = vpop.f32.mrb[154].mxu0 }
0x25c0   : > { %v8317_v50 = vadd.f32 %v16470_v35, %v12215_v52  ;;  %v8253_v47 = vpop.f32.mrb[155].mxu0  ;;  %v8353_v41 = vsel %vm1343_vm1, %v16488_v37, 0.0 }
0x25c1   : > { %8345 = vadd.xlane.f32.xlu0 %v8344_v63  ;;  %v8350_v21 = vsel %vm1343_vm1, %v16485_v16, 0.0  ;;  %v8316_v27 = vadd.f32 %v16470_v35, %v8253_v47 }
0x25c2   : > { %8351 = vadd.xlane.f32.xlu1 %v8350_v21  ;;  %v16496_v18 = vadd.f32 %v8317_v50, %v15578_v55 }
0x25c3   : > { %v12218_v40 = vpop.f32.mrb[156].mxu0  ;;  %v16502_v13 = vadd.f32 %v8316_v27, %v15575_v32 }
0x25c4   : > { %v8263_v46 = vpop.f32.mrb[157].mxu0  ;;  %v8319_v48 = vadd.f32 %v16470_v35, %v12218_v40  ;;  %v8359_v5 = vsel %vm1343_vm1, %v16496_v18, 0.0 }
0x25c5   : > { %8354 = vadd.xlane.f32.xlu0 %v8353_v41  ;;  %v8318_v28 = vadd.f32 %v16470_v35, %v8263_v46  ;;  %v8356_v49 = vsel %vm1343_vm1, %v16502_v13, 0.0 }
0x25c6   : > { %v16508_v38 = vadd.f32 %v8319_v48, %v15592_v45 }
0x25c7   : > { %v12221_v8 = vpop.f32.mrb[158].mxu0  ;;  %v16514_v26 = vadd.f32 %v8318_v28, %v15589_v59 }
0x25c8   : > { %v8273_v2 = vpop.f32.mrb[159].mxu0  ;;  %v8321_v12 = vadd.f32 %v16470_v35, %v12221_v8  ;;  %v8365_v4 = vsel %vm1343_vm1, %v16508_v38, 0.0 }
0x25c9   : > { %8360 = vadd.xlane.f32.xlu0 %v8359_v5  ;;  %v8320_v42 = vadd.f32 %v16470_v35, %v8273_v2  ;;  %v8362_v51 = vsel %vm1343_vm1, %v16514_v26, 0.0 }
0x25ca   : > { %v16524_v60 = vadd.f32 %v8321_v12, %v17545_v31 }
0x25cb   : > { %v12224_v55 = vpop.f32.mrb[160].mxu0  ;;  %v16536_v61 = vadd.f32 %v8320_v42, %v17547_v44 }
0x25cc   : > { %v8283_v17 = vpop.f32.mrb[161].mxu0  ;;  %v8371_v14 = vsel %vm1343_vm1, %v16524_v60, 0.0  ;;  %v8323_v19 = vadd.f32 %v16470_v35, %v12224_v55 }
0x25cd   : > { %8357 = vadd.xlane.f32.xlu0 %v8356_v49  ;;  %v8322_v58 = vadd.f32 %v16470_v35, %v8283_v17  ;;  %v8368_v34 = vsel %vm1343_vm1, %v16536_v61, 0.0 }
0x25ce   : > { %v16550_v15 = vadd.f32 %v8323_v19, %v17549_v57 }
0x25cf   : > { %v12227_v32 = vpop.f32.mrb[162].mxu0  ;;  %v16545_v25 = vadd.f32 %v8322_v58, %v17548_v36 }
0x25d0   : > { %v8293_v53 = vpop.f32.mrb[163].mxu0  ;;  %v8325_v22 = vadd.f32 %v16470_v35, %v12227_v32  ;;  %v8377_v54 = vsel %vm1343_vm1, %v16550_v15, 0.0 }
0x25d1   : > { %v8324_v45 = vadd.f32 %v16470_v35, %v8293_v53  ;;  %8366 = vadd.xlane.f32.xlu0 %v8365_v4  ;;  %v8374_v6 = vsel %vm1343_vm1, %v16545_v25, 0.0 }
0x25d2   : > { %v16556_v56 = vadd.f32 %v8325_v22, %v17550_v0 }
0x25d3   : > { %v16521_v20 = vadd.f32 %v8324_v45, %v15632_v33  ;;  %v12230_v7 = vpop.f32.mrb[164].mxu0 }
0x25d4   : > { %v8303_v59 = vpop.f32.mrb[165].mxu0  ;;  %v8327_v9 = vadd.f32 %v16470_v35, %v12230_v7  ;;  %v8383_v30 = vsel %vm1343_vm1, %v16556_v56, 0.0 }
0x25d5   : > { %v8326_v43 = vadd.f32 %v16470_v35, %v8303_v59  ;;  %8363 = vadd.xlane.f32.xlu0 %v8362_v51  ;;  %v8380_v62 = vsel %vm1343_vm1, %v16521_v20, 0.0 }
0x25d6   : > { %8381 = vadd.xlane.f32.xlu1 %v8380_v62  ;;  %v16562_v1 = vadd.f32 %v8327_v9, %v17551_v3 }
0x25d7   : > { %v16533_v33 = vadd.f32 %v8326_v43, %v17546_v29 }
0x25d8   : > { %v8389_v52 = vsel %vm1343_vm1, %v16562_v1, 0.0 }
0x25d9   : > { %8372 = vadd.xlane.f32.xlu0 %v8371_v14  ;;  %v8386_v24 = vsel %vm1343_vm1, %v16533_v33, 0.0 }
0x25da   : > { %8387 = vadd.xlane.f32.xlu1 %v8386_v24 }
0x25dd   : > { %8369 = vadd.xlane.f32.xlu0 %v8368_v34 }
0x25e1   : > { %8375 = vadd.xlane.f32.xlu0 %v8374_v6 }
0x25e5   : > { %8378 = vadd.xlane.f32.xlu0 %v8377_v54 }
0x25e9   : > { %8384 = vadd.xlane.f32.xlu0 %v8383_v30 }
0x25ed   : > { %8390 = vadd.xlane.f32.xlu0 %v8389_v52 }
0x264a   : > { %v8349_v50 = vpop.xlane.xlu0 %8348 }
0x264b   : > { %v8393_v47 = vmul.f32 0.03125, %v8349_v50 }
0x264d   : > { %v16569_v63 = vsub.f32 %v16475_v23, %v8393_v47 }
0x264e   : > { %v8346_v35 = vpop.xlane.xlu0 %8345 }
0x264f   : > { %v8392_v21 = vmul.f32 0.03125, %v8346_v35  ;;  %v8352_v40 = vpop.xlane.xlu1 %8351  ;;  %v8425_v27 = vmul.f32 %v16569_v63, %v16569_v63 }
0x2650   : > { %v8394_v46 = vmul.f32 0.03125, %v8352_v40 }
0x2651   : > { %v16574_v41 = vsub.f32 %v16478_v39, %v8392_v21  ;;  %v8443_v8 = vsel %vm1343_vm1, %v8425_v27, 0.0 }
0x2652   : > { %v16578_v48 = vsub.f32 %v16485_v16, %v8394_v46  ;;  %v8355_v2 = vpop.xlane.xlu0 %8354  ;;  %8444 = vadd.xlane.f32.xlu0 %v8443_v8 }
0x2653   : > { %v8395_v5 = vmul.f32 0.03125, %v8355_v2  ;;  %v8424_v23 = vmul.f32 %v16574_v41, %v16574_v41 }
0x2654   : > { %v8426_v39 = vmul.f32 %v16578_v48, %v16578_v48 }
0x2655   : > { %v16583_v55 = vsub.f32 %v16488_v37, %v8395_v5  ;;  %v8440_v28 = vsel %vm1343_vm1, %v8424_v23, 0.0 }
0x2656   : > { %v8361_v17 = vpop.xlane.xlu0 %8360  ;;  %8441 = vadd.xlane.f32.xlu1 %v8440_v28  ;;  %v8446_v53 = vsel %vm1343_vm1, %v8426_v39, 0.0 }
0x2657   : > { %v8397_v49 = vmul.f32 0.03125, %v8361_v17  ;;  %v8427_v16 = vmul.f32 %v16583_v55, %v16583_v55 }
0x2659   : > { %v16591_v32 = vsub.f32 %v16496_v18, %v8397_v49  ;;  %v8449_v12 = vsel %vm1343_vm1, %v8427_v16, 0.0 }
0x265a   : > { %v8358_v37 = vpop.xlane.xlu0 %8357  ;;  %8450 = vadd.xlane.f32.xlu0 %v8449_v12  ;;  %8447 = vadd.xlane.f32.xlu1 %v8446_v53 }
0x265b   : > { %v8396_v4 = vmul.f32 0.03125, %v8358_v37  ;;  %v8429_v45 = vmul.f32 %v16591_v32, %v16591_v32 }
0x265d   : > { %v16598_v7 = vsub.f32 %v16502_v13, %v8396_v4  ;;  %v8455_v31 = vsel %vm1343_vm1, %v8429_v45, 0.0 }
0x265e   : > { %v8367_v42 = vpop.xlane.xlu0 %8366  ;;  %8456 = vadd.xlane.f32.xlu0 %v8455_v31 }
0x265f   : > { %v8399_v18 = vmul.f32 0.03125, %v8367_v42  ;;  %v8428_v59 = vmul.f32 %v16598_v7, %v16598_v7 }
0x2661   : > { %v16604_v51 = vsub.f32 %v16508_v38, %v8399_v18  ;;  %v8452_v43 = vsel %vm1343_vm1, %v8428_v59, 0.0 }
0x2662   : > { %v8364_v62 = vpop.xlane.xlu0 %8363  ;;  %8453 = vadd.xlane.f32.xlu1 %v8452_v43 }
0x2663   : > { %v8398_v29 = vmul.f32 0.03125, %v8364_v62  ;;  %v8431_v13 = vmul.f32 %v16604_v51, %v16604_v51  ;;  %v8382_v19 = vpop.xlane.xlu1 %8381 }
0x2664   : > { %v8404_v6 = vmul.f32 0.03125, %v8382_v19 }
0x2665   : > { %v16610_v44 = vsub.f32 %v16514_v26, %v8398_v29  ;;  %v8461_v58 = vsel %vm1343_vm1, %v8431_v13, 0.0 }
0x2666   : > { %v8373_v14 = vpop.xlane.xlu0 %8372  ;;  %8462 = vadd.xlane.f32.xlu0 %v8461_v58  ;;  %v16628_v52 = vsub.f32 %v16521_v20, %v8404_v6 }
0x2667   : > { %v8401_v24 = vmul.f32 0.03125, %v8373_v14  ;;  %v8430_v38 = vmul.f32 %v16610_v44, %v16610_v44  ;;  %v8388_v54 = vpop.xlane.xlu1 %8387 }
0x2668   : > { %v8406_v50 = vmul.f32 0.03125, %v8388_v54 }
0x2669   : > { %v16616_v36 = vsub.f32 %v16524_v60, %v8401_v24  ;;  %v8458_v34 = vsel %vm1343_vm1, %v8430_v38, 0.0 }
0x266a   : > { %v8370_v57 = vpop.xlane.xlu0 %8369  ;;  %8459 = vadd.xlane.f32.xlu1 %v8458_v34  ;;  %v16637_v27 = vsub.f32 %v16533_v33, %v8406_v50 }
0x266b   : > { %v8400_v22 = vmul.f32 0.03125, %v8370_v57  ;;  %v8433_v26 = vmul.f32 %v16616_v36, %v16616_v36 }
0x266d   : > { %v16622_v0 = vsub.f32 %v16536_v61, %v8400_v22  ;;  %v8467_v9 = vsel %vm1343_vm1, %v8433_v26, 0.0 }
0x266e   : > { %v8376_v3 = vpop.xlane.xlu0 %8375  ;;  %8468 = vadd.xlane.f32.xlu0 %v8467_v9 }
0x266f   : > { %v8402_v30 = vmul.f32 0.03125, %v8376_v3  ;;  %v8432_v60 = vmul.f32 %v16622_v0, %v16622_v0  ;;  %v16667_v3 = vld [vmem:[%s17523_s14] ss:$0 sm:$0xff] }
0x2671   : > { %v16631_v47 = vsub.f32 %v16545_v25, %v8402_v30  ;;  %v8464_v35 = vsel %vm1343_vm1, %v8432_v60, 0.0  ;;  %v8436_v25 = vmul.f32 %v16628_v52, %v16628_v52 }
0x2672   : > { %v8379_v61 = vpop.xlane.xlu0 %8378  ;;  %8465 = vadd.xlane.f32.xlu1 %v8464_v35 }
0x2673   : > { %v8403_v21 = vmul.f32 0.03125, %v8379_v61  ;;  %v8434_v40 = vmul.f32 %v16631_v47, %v16631_v47  ;;  %v8476_v28 = vsel %vm1343_vm1, %v8436_v25, 0.0 }
0x2675   : > { %v16640_v46 = vsub.f32 %v16550_v15, %v8403_v21  ;;  %v8470_v20 = vsel %vm1343_vm1, %v8434_v40, 0.0  ;;  %v8438_v15 = vmul.f32 %v16637_v27, %v16637_v27  ;;  %v16672_v40 = vld [vmem:[%s17524_s17] ss:$0 sm:$0xff] }
0x2676   : > { %v8385_v8 = vpop.xlane.xlu0 %8384  ;;  %8471 = vadd.xlane.f32.xlu1 %v8470_v20 }
0x2677   : > { %v8405_v2 = vmul.f32 0.03125, %v8385_v8  ;;  %v8435_v5 = vmul.f32 %v16640_v46, %v16640_v46  ;;  %v8482_v12 = vsel %vm1343_vm1, %v8438_v15, 0.0 }
0x2679   : > { %v16648_v23 = vsub.f32 %v16556_v56, %v8405_v2  ;;  %v8473_v33 = vsel %vm1343_vm1, %v8435_v5, 0.0 }
0x267a   : > { %8474 = vadd.xlane.f32.xlu0 %v8473_v33  ;;  %v8391_v39 = vpop.xlane.xlu0 %8390  ;;  %8477 = vadd.xlane.f32.xlu1 %v8476_v28 }
0x267b   : > { %v8407_v17 = vmul.f32 0.03125, %v8391_v39  ;;  %v8437_v49 = vmul.f32 %v16648_v23, %v16648_v23 }
0x267d   : > { %v16657_v16 = vsub.f32 %v16562_v1, %v8407_v17  ;;  %v8479_v56 = vsel %vm1343_vm1, %v8437_v49, 0.0 }
0x267e   : > { %8480 = vadd.xlane.f32.xlu0 %v8479_v56  ;;  %8483 = vadd.xlane.f32.xlu1 %v8482_v12  ;;  %v17552_v56 = vld [vmem:[#allocation39_spill] sm:$0xff] }
0x267f   : > { %v8439_v53 = vmul.f32 %v16657_v16, %v16657_v16 }
0x2681   : > { %v8485_v37 = vsel %vm1343_vm1, %v8439_v53, 0.0 }
0x2682   : > { %8486 = vadd.xlane.f32.xlu0 %v8485_v37 }
0x26df   : > { %v8445_v4 = vpop.xlane.xlu0 %8444 }
0x26e0   : > { %v8489_v45 = vmul.f32 0.03125, %v8445_v4 }
0x26e2   : > { %v8505_v31 = vadd.f32 1e-05, %v8489_v45 }
0x26e3   : > { %v8442_v42 = vpop.xlane.xlu1 %8441 }
0x26e4   : > { %13553 = vrsqrt.f32 %v8505_v31  ;;  %v8488_v18 = vmul.f32 0.03125, %v8442_v42  ;;  %v17553_v31 = vld [vmem:[#allocation40_spill] sm:$0xff] }
0x26e6   : > { %v8504_v1 = vadd.f32 1e-05, %v8488_v18 }
0x26e7   : > { %v8451_v59 = vpop.xlane.xlu0 %8450  ;;  %v8448_v43 = vpop.xlane.xlu1 %8447 }
0x26e8   : > { %13555 = vrsqrt.f32 %v8504_v1  ;;  %v8491_v62 = vmul.f32 0.03125, %v8451_v59  ;;  %v8490_v29 = vmul.f32 0.03125, %v8448_v43 }
0x26ea   : > { %v8507_v13 = vadd.f32 1e-05, %v8491_v62  ;;  %v8506_v58 = vadd.f32 1e-05, %v8490_v29  ;;  %v17554_v29 = vld [vmem:[#allocation41_spill] sm:$0xff] }
0x26eb   : > { %v8457_v14 = vpop.xlane.xlu0 %8456 }
0x26ec   : > { %13557 = vrsqrt.f32 %v8507_v13  ;;  %v8493_v24 = vmul.f32 0.03125, %v8457_v14 }
0x26ed   : > { %13559 = vrsqrt.f32 %v8506_v58 }
0x26ee   : > { %v13554_v38 = vpop.eup %13553  ;;  %v8509_v19 = vadd.f32 1e-05, %v8493_v24 }
0x26ef   : > { %v8454_v34 = vpop.xlane.xlu1 %8453  ;;  %v8537_v57 = vmul.f32 %v13554_v38, %v16569_v63 }
0x26f0   : > { %13561 = vrsqrt.f32 %v8509_v19  ;;  %v8492_v22 = vmul.f32 0.03125, %v8454_v34 }
0x26f1   : > { %v8553_v30 = vmul.f32 %v16667_v3, %v8537_v57 }
0x26f2   : > { %v13556_v26 = vpop.eup %13555  ;;  %v8508_v6 = vadd.f32 1e-05, %v8492_v22  ;;  %v17555_v22 = vmov 0.0|0.0  }
0x26f3   : > { %v8463_v9 = vpop.xlane.xlu0 %8462  ;;  %v8536_v54 = vmul.f32 %v13556_v26, %v16574_v41  ;;  %v16679_v41 = vadd.f32 %v16672_v40, %v8553_v30 }
0x26f4   : > { %13563 = vrsqrt.f32 %v8508_v6  ;;  %v8495_v60 = vmul.f32 0.03125, %v8463_v9 }
0x26f5   : > { %v8552_v50 = vmul.f32 %v16667_v3, %v8536_v54 }
0x26f6   : > { %v13558_v35 = vpop.eup %13557  ;;  %v8511_v61 = vadd.f32 1e-05, %v8495_v60 }
0x26f7   : > { %v13560_v21 = vpop.eup %13559  ;;  %v8460_v63 = vpop.xlane.xlu1 %8459  ;;  %v16675_v20 = vadd.f32 %v16672_v40, %v8552_v50  ;;  %v8539_v25 = vmul.f32 %v13558_v35, %v16583_v55 }
0x26f8   : > { %13565 = vrsqrt.f32 %v8511_v61  ;;  %v8494_v8 = vmul.f32 0.03125, %v8460_v63  ;;  %v8538_v2 = vmul.f32 %v13560_v21, %v16578_v48 }
0x26f9   : > { %12239 = vmatprep.mubr.msk.f32.mxu1 %vm1343_vm1, %v16675_v20  ;;  %v8555_v5 = vmul.f32 %v16667_v3, %v8539_v25 }
0x26fa   : > { %v13562_v33 = vpop.eup %13561  ;;  %v8510_v28 = vadd.f32 1e-05, %v8494_v8  ;;  %12240 = vmatmul.mubr.msk.f32.vlgmr.msra.gmra.mrb[130].mxu1 %vm1343_vm1, %v16679_v41  ;;  %v8554_v15 = vmul.f32 %v16667_v3, %v8538_v2 }
0x26fb   : > { %v8469_v55 = vpop.xlane.xlu0 %8468  ;;  %v16689_v39 = vadd.f32 %v16672_v40, %v8555_v5  ;;  %12790 = vmatpush3.bf16.msra.mxu1 %v15181_v10  ;;  %v8541_v49 = vmul.f32 %v13562_v33, %v16591_v32 }
0x26fc   : > { %13567 = vrsqrt.f32 %v8510_v28  ;;  %v8497_v48 = vmul.f32 0.03125, %v8469_v55  ;;  %v16693_v17 = vadd.f32 %v16672_v40, %v8554_v15  ;;  %12792 = vmatprep.subr.bf16.mxu1 %v17552_v56 }
0x26fd   : > { %v8557_v45 = vmul.f32 %v16667_v3, %v8541_v49 }
0x26fe   : > { %v13564_v12 = vpop.eup %13563  ;;  %v8513_v53 = vadd.f32 1e-05, %v8497_v48  ;;  %12242 = vmatprep.mubr.msk.f32.mxu1 %vm1343_vm1, %v16693_v17 }
0x26ff   : > { %12243 = vmatmul.mubr.msk.f32.gmra.mrb[132].mxu1 %vm1343_vm1, %v16689_v39  ;;  %v8466_v37 = vpop.xlane.xlu1 %8465  ;;  %v8540_v10 = vmul.f32 %v13564_v12, %v16598_v7  ;;  %v16711_v62 = vadd.f32 %v16672_v40, %v8557_v45 }
0x2700   : > { %13569 = vrsqrt.f32 %v8513_v53  ;;  %v8496_v4 = vmul.f32 0.03125, %v8466_v37  ;;  %12794 = vmatpush3.bf16.msra.mxu1 %v17552_v56 }
0x2701   : > { %v8556_v32 = vmul.f32 %v16667_v3, %v8540_v10  ;;  %12796 = vmatprep.subr.bf16.mxu1 %v17553_v31 }
0x2702   : > { %v13566_v42 = vpop.eup %13565  ;;  %v8512_v18 = vadd.f32 1e-05, %v8496_v4 }
0x2703   : > { %v8472_v1 = vpop.xlane.xlu1 %8471  ;;  %v16707_v59 = vadd.f32 %v16672_v40, %v8556_v32  ;;  %v8543_v43 = vmul.f32 %v13566_v42, %v16604_v51 }
0x2704   : > { %13571 = vrsqrt.f32 %v8512_v18  ;;  %v8498_v7 = vmul.f32 0.03125, %v8472_v1  ;;  %12798 = vmatpush3.bf16.msra.mxu1 %v17553_v31 }
0x2705   : > { %12245 = vmatprep.mubr.msk.f32.mxu1 %vm1343_vm1, %v16707_v59  ;;  %12800 = vmatprep.subr.bf16.mxu1 %v17554_v29  ;;  %v8559_v38 = vmul.f32 %v16667_v3, %v8543_v43 }
0x2706   : > { %v13568_v13 = vpop.eup %13567  ;;  %v8514_v58 = vadd.f32 1e-05, %v8498_v7  ;;  %12246 = vmatmul.mubr.msk.f32.gmra.mrb[134].mxu1 %vm1343_vm1, %v16711_v62 }
0x2707   : > { %v8475_v14 = vpop.xlane.xlu0 %8474  ;;  %v8478_v24 = vpop.xlane.xlu1 %8477  ;;  %v8542_v51 = vmul.f32 %v13568_v13, %v16610_v44  ;;  %v16728_v44 = vadd.f32 %v16672_v40, %v8559_v38 }
0x2708   : > { %13573 = vrsqrt.f32 %v8514_v58  ;;  %v8499_v19 = vmul.f32 0.03125, %v8475_v14  ;;  %v8500_v34 = vmul.f32 0.03125, %v8478_v24  ;;  %12802 = vmatpush3.bf16.msra.mxu1 %v17554_v29  ;;  %v13689_v14 = vld [vmem:[%s17527_s21] ss:$0 sm:$0xff] }
0x2709   : > { %v8558_v57 = vmul.f32 %v16667_v3, %v8542_v51  ;;  %12803 = vmatprep.subr.bf16.mxu1 %v17555_v22 }
0x270a   : > { %v13570_v26 = vpop.eup %13569  ;;  %v8515_v6 = vadd.f32 1e-05, %v8499_v19  ;;  %v8516_v9 = vadd.f32 1e-05, %v8500_v34 }
0x270b   : > { %v8481_v54 = vpop.xlane.xlu0 %8480  ;;  %v8484_v30 = vpop.xlane.xlu1 %8483  ;;  %v16725_v60 = vadd.f32 %v16672_v40, %v8558_v57  ;;  %v8545_v61 = vmul.f32 %v13570_v26, %v16616_v36 }
0x270c   : > { %13575 = vrsqrt.f32 %v8515_v6  ;;  %v8501_v50 = vmul.f32 0.03125, %v8481_v54  ;;  %v8502_v35 = vmul.f32 0.03125, %v8484_v30 }
0x270d   : > { %13577 = vrsqrt.f32 %v8516_v9  ;;  %12248 = vmatprep.mubr.msk.f32.mxu1 %vm1343_vm1, %v16725_v60  ;;  %v8561_v33 = vmul.f32 %v16667_v3, %v8545_v61 }
0x270e   : > { %v13572_v21 = vpop.eup %13571  ;;  %v8517_v63 = vadd.f32 1e-05, %v8501_v50  ;;  %v8518_v25 = vadd.f32 1e-05, %v8502_v35  ;;  %12249 = vmatmul.mubr.msk.f32.gmra.mrb[136].mxu1 %vm1343_vm1, %v16728_v44 }
0x270f   : > { %v8487_v8 = vpop.xlane.xlu0 %8486  ;;  %v8544_v2 = vmul.f32 %v13572_v21, %v16622_v0  ;;  %v16743_v49 = vadd.f32 %v16672_v40, %v8561_v33 }
0x2710   : > { %13579 = vrsqrt.f32 %v8517_v63  ;;  %v8503_v5 = vmul.f32 0.03125, %v8487_v8 }
0x2711   : > { %13581 = vrsqrt.f32 %v8518_v25  ;;  %v8560_v36 = vmul.f32 %v16667_v3, %v8544_v2 }
0x2712   : > { %v13574_v28 = vpop.eup %13573  ;;  %v8519_v15 = vadd.f32 1e-05, %v8503_v5 }
0x2713   : > { %v16739_v55 = vadd.f32 %v16672_v40, %v8560_v36  ;;  %v8546_v48 = vmul.f32 %v13574_v28, %v16631_v47 }
0x2714   : > { %13583 = vrsqrt.f32 %v8519_v15 }
0x2715   : > { %12251 = vmatprep.mubr.msk.f32.mxu1 %vm1343_vm1, %v16739_v55  ;;  %v8562_v0 = vmul.f32 %v16667_v3, %v8546_v48 }
0x2716   : > { %v13576_v56 = vpop.eup %13575  ;;  %12252 = vmatmul.mubr.msk.f32.gmra.mrb[138].mxu1 %vm1343_vm1, %v16743_v49 }
0x2717   : > { %v13578_v12 = vpop.eup %13577  ;;  %v16751_v53 = vadd.f32 %v16672_v40, %v8562_v0  ;;  %v8547_v37 = vmul.f32 %v13576_v56, %v16640_v46 }
0x2718   : > { %v8548_v47 = vmul.f32 %v13578_v12, %v16628_v52 }
0x2719   : > { %12254 = vmatprep.mubr.msk.f32.mxu1 %vm1343_vm1, %v16751_v53  ;;  %v8563_v10 = vmul.f32 %v16667_v3, %v8547_v37 }
0x271a   : > { %v13580_v4 = vpop.eup %13579  ;;  %v8564_v45 = vmul.f32 %v16667_v3, %v8548_v47 }
0x271b   : > { %v13582_v32 = vpop.eup %13581  ;;  %v16760_v31 = vadd.f32 %v16672_v40, %v8563_v10  ;;  %v8549_v42 = vmul.f32 %v13580_v4, %v16648_v23 }
0x271c   : > { %v16764_v18 = vadd.f32 %v16672_v40, %v8564_v45  ;;  %v8550_v52 = vmul.f32 %v13582_v32, %v16637_v27 }
0x271d   : > { %12255 = vmatmul.mubr.msk.f32.gmra.mrb[140].mxu1 %vm1343_vm1, %v16760_v31  ;;  %v8565_v46 = vmul.f32 %v16667_v3, %v8549_v42 }
0x271e   : > { %v13584_v1 = vpop.eup %13583  ;;  %12257 = vmatprep.mubr.msk.f32.mxu1 %vm1343_vm1, %v16764_v18  ;;  %v8566_v43 = vmul.f32 %v16667_v3, %v8550_v52 }
0x271f   : > { %v16774_v7 = vadd.f32 %v16672_v40, %v8565_v46  ;;  %v8551_v23 = vmul.f32 %v13584_v1, %v16657_v16 }
0x2720   : > { %v16778_v29 = vadd.f32 %v16672_v40, %v8566_v43 }
0x2721   : > { %12258 = vmatmul.mubr.msk.f32.gmra.mrb[142].mxu1 %vm1343_vm1, %v16774_v7  ;;  %v8567_v27 = vmul.f32 %v16667_v3, %v8551_v23 }
0x2722   : > { %12260 = vmatprep.mubr.msk.f32.mxu1 %vm1343_vm1, %v16778_v29 }
0x2723   : > { %v16786_v13 = vadd.f32 %v16672_v40, %v8567_v27 }
0x2725   : > { %12261 = vmatmul.mubr.msk.f32.gmra.mrb[144].mxu1 %vm1343_vm1, %v16786_v13 }
0x27cd   : > { %v12241_v58 = vpop.f32.mrb[130].mxu1 }
0x27ce   : > { %v8704_v16 = vadd.f32 %v13689_v14, %v12241_v58  ;;  %v8698_v24 = vpop.f32.mrb[131].mxu1 }
0x27cf   : > { %v8699_v51 = vadd.f32 %v13689_v14, %v8698_v24 }
0x27d0   : > { %v8778_v19 = vmax.f32 %v8704_v16, 0.0 }
0x27d1   : > { %v8777_v38 = vmax.f32 %v8699_v51, 0.0 }
0x27d2   : > { %v12244_v34 = vpop.f32.mrb[132].mxu1 }
0x27d3   : > { %v8714_v57 = vadd.f32 %v13689_v14, %v12244_v34  ;;  %v8708_v26 = vpop.f32.mrb[133].mxu1  ;;  %12279 = vmatprep.mubr.msk.f32.mxu1 %vm2435_vm6, %v8777_v38  ;;  %v16810_v38 = vld [vmem:[%s17529_s11] ss:$0 sm:$0xff] }
0x27d4   : > { %v8709_v3 = vadd.f32 %v13689_v14, %v8708_v26  ;;  %12280 = vmatmul.mubr.msk.f32.vlgmr.msra.gmra.mrb[146].mxu1 %vm2435_vm6, %v8778_v19 }
0x27d5   : > { %v8780_v6 = vmax.f32 %v8714_v57, 0.0 }
0x27d6   : > { %v8779_v40 = vmax.f32 %v8709_v3, 0.0 }
0x27d8   : > { %12282 = vmatprep.mubr.msk.f32.mxu1 %vm2435_vm6, %v8779_v40 }
0x27d9   : > { %12283 = vmatmul.mubr.msk.f32.gmra.mrb[148].mxu1 %vm2435_vm6, %v8780_v6  ;;  %v12247_v9 = vpop.f32.mrb[134].mxu1 }
0x27da   : > { %v8724_v54 = vadd.f32 %v13689_v14, %v12247_v9  ;;  %v8718_v30 = vpop.f32.mrb[135].mxu1 }
0x27db   : > { %v8719_v50 = vadd.f32 %v13689_v14, %v8718_v30 }
0x27dc   : > { %v8782_v61 = vmax.f32 %v8724_v54, 0.0 }
0x27dd   : > { %v8781_v35 = vmax.f32 %v8719_v50, 0.0 }
0x27df   : > { %12285 = vmatprep.mubr.msk.f32.mxu1 %vm2435_vm6, %v8781_v35 }
0x27e0   : > { %12286 = vmatmul.mubr.msk.f32.gmra.mrb[150].mxu1 %vm2435_vm6, %v8782_v61 }
0x27e1   : > { %v12250_v21 = vpop.f32.mrb[136].mxu1 }
0x27e2   : > { %v8734_v63 = vadd.f32 %v13689_v14, %v12250_v21  ;;  %v8728_v25 = vpop.f32.mrb[137].mxu1 }
0x27e3   : > { %v8729_v8 = vadd.f32 %v13689_v14, %v8728_v25 }
0x27e4   : > { %v8784_v5 = vmax.f32 %v8734_v63, 0.0 }
0x27e5   : > { %v8783_v2 = vmax.f32 %v8729_v8, 0.0 }
0x27e7   : > { %12288 = vmatprep.mubr.msk.f32.mxu1 %vm2435_vm6, %v8783_v2 }
0x27e8   : > { %12289 = vmatmul.mubr.msk.f32.gmra.mrb[152].mxu1 %vm2435_vm6, %v8784_v5 }
0x27e9   : > { %v12253_v33 = vpop.f32.mrb[138].mxu1 }
0x27ea   : > { %v8744_v36 = vadd.f32 %v13689_v14, %v12253_v33  ;;  %v8738_v28 = vpop.f32.mrb[139].mxu1 }
0x27eb   : > { %v8739_v15 = vadd.f32 %v13689_v14, %v8738_v28 }
0x27ec   : > { %v8786_v0 = vmax.f32 %v8744_v36, 0.0 }
0x27ed   : > { %v8785_v48 = vmax.f32 %v8739_v15, 0.0 }
0x27ef   : > { %12291 = vmatprep.mubr.msk.f32.mxu1 %vm2435_vm6, %v8785_v48 }
0x27f0   : > { %v12256_v56 = vpop.f32.mrb[140].mxu1  ;;  %12292 = vmatmul.mubr.msk.f32.gmra.mrb[154].mxu1 %vm2435_vm6, %v8786_v0 }
0x27f1   : > { %v8754_v12 = vadd.f32 %v13689_v14, %v12256_v56  ;;  %v8748_v37 = vpop.f32.mrb[141].mxu1 }
0x27f2   : > { %v8749_v47 = vadd.f32 %v13689_v14, %v8748_v37 }
0x27f3   : > { %v8788_v45 = vmax.f32 %v8754_v12, 0.0 }
0x27f4   : > { %v8787_v10 = vmax.f32 %v8749_v47, 0.0  ;;  %v12259_v4 = vpop.f32.mrb[142].mxu1 }
0x27f5   : > { %v8764_v32 = vadd.f32 %v13689_v14, %v12259_v4  ;;  %v8758_v42 = vpop.f32.mrb[143].mxu1 }
0x27f6   : > { %v8759_v52 = vadd.f32 %v13689_v14, %v8758_v42  ;;  %12294 = vmatprep.mubr.msk.f32.mxu1 %vm2435_vm6, %v8787_v10 }
0x27f7   : > { %12295 = vmatmul.mubr.msk.f32.gmra.mrb[156].mxu1 %vm2435_vm6, %v8788_v45  ;;  %v8790_v43 = vmax.f32 %v8764_v32, 0.0 }
0x27f8   : > { %v8789_v46 = vmax.f32 %v8759_v52, 0.0  ;;  %v12262_v1 = vpop.f32.mrb[144].mxu1 }
0x27f9   : > { %v8774_v23 = vadd.f32 %v13689_v14, %v12262_v1  ;;  %v8768_v27 = vpop.f32.mrb[145].mxu1 }
0x27fa   : > { %v8769_v58 = vadd.f32 %v13689_v14, %v8768_v27  ;;  %12297 = vmatprep.mubr.msk.f32.mxu1 %vm2435_vm6, %v8789_v46 }
0x27fb   : > { %12298 = vmatmul.mubr.msk.f32.gmra.mrb[158].mxu1 %vm2435_vm6, %v8790_v43  ;;  %v8792_v24 = vmax.f32 %v8774_v23, 0.0 }
0x27fc   : > { %v8791_v16 = vmax.f32 %v8769_v58, 0.0 }
0x27fe   : > { %12300 = vmatprep.mubr.msk.f32.mxu1 %vm2435_vm6, %v8791_v16 }
0x27ff   : > { %12301 = vmatmul.mubr.msk.f32.gmra.mrb[160].mxu1 %vm2435_vm6, %v8792_v24 }
0x2800   : > { %12340 = vmatprep.mubr.msk.f32.mxu1 %vm13745_vm0, %v17520_v11 }
0x28a7   : > { %v12281_v51 = vpop.f32.mrb[146].mxu1 }
0x28a8   : > { %v8913_v19 = vadd.f32 %v16810_v38, %v12281_v51  ;;  %v8907_v34 = vpop.f32.mrb[147].mxu1 }
0x28a9   : > { %v8908_v14 = vadd.f32 %v16810_v38, %v8907_v34 }
0x28aa   : > { %v16815_v57 = vadd.f32 %v8913_v19, %v16679_v41 }
0x28ab   : > { %v16818_v26 = vadd.f32 %v8908_v14, %v16675_v20 }
0x28ac   : > { %v12284_v3 = vpop.f32.mrb[148].mxu1  ;;  %v9005_v40 = vsel %vm1343_vm1, %v16815_v57, 0.0 }
0x28ad   : > { %v8923_v6 = vadd.f32 %v16810_v38, %v12284_v3  ;;  %v8917_v9 = vpop.f32.mrb[149].mxu1  ;;  %9006 = vadd.xlane.f32.xlu0 %v9005_v40  ;;  %v9002_v54 = vsel %vm1343_vm1, %v16818_v26, 0.0 }
0x28ae   : > { %v8918_v30 = vadd.f32 %v16810_v38, %v8917_v9  ;;  %9003 = vadd.xlane.f32.xlu1 %v9002_v54 }
0x28af   : > { %v16827_v41 = vadd.f32 %v8923_v6, %v16689_v39 }
0x28b0   : > { %v16830_v20 = vadd.f32 %v8918_v30, %v16693_v17 }
0x28b1   : > { %v9011_v50 = vsel %vm1343_vm1, %v16827_v41, 0.0 }
0x28b2   : > { %9012 = vadd.xlane.f32.xlu0 %v9011_v50  ;;  %v9008_v35 = vsel %vm1343_vm1, %v16830_v20, 0.0 }
0x28b3   : > { %9009 = vadd.xlane.f32.xlu1 %v9008_v35  ;;  %v12287_v61 = vpop.f32.mrb[150].mxu1 }
0x28b4   : > { %v8933_v21 = vadd.f32 %v16810_v38, %v12287_v61  ;;  %v8927_v63 = vpop.f32.mrb[151].mxu1 }
0x28b5   : > { %v8928_v25 = vadd.f32 %v16810_v38, %v8927_v63 }
0x28b6   : > { %v16839_v39 = vadd.f32 %v8933_v21, %v16711_v62 }
0x28b7   : > { %v16842_v17 = vadd.f32 %v8928_v25, %v16707_v59 }
0x28b8   : > { %v9017_v8 = vsel %vm1343_vm1, %v16839_v39, 0.0 }
0x28b9   : > { %9018 = vadd.xlane.f32.xlu0 %v9017_v8  ;;  %v9014_v2 = vsel %vm1343_vm1, %v16842_v17, 0.0 }
0x28ba   : > { %9015 = vadd.xlane.f32.xlu1 %v9014_v2 }
0x28bb   : > { %v12290_v5 = vpop.f32.mrb[152].mxu1 }
0x28bc   : > { %v8943_v33 = vadd.f32 %v16810_v38, %v12290_v5  ;;  %v8937_v36 = vpop.f32.mrb[153].mxu1 }
0x28bd   : > { %v8938_v28 = vadd.f32 %v16810_v38, %v8937_v36 }
0x28be   : > { %v16851_v62 = vadd.f32 %v8943_v33, %v16728_v44 }
0x28bf   : > { %v16854_v59 = vadd.f32 %v8938_v28, %v16725_v60 }
0x28c0   : > { %v9023_v15 = vsel %vm1343_vm1, %v16851_v62, 0.0 }
0x28c1   : > { %9024 = vadd.xlane.f32.xlu0 %v9023_v15  ;;  %v9020_v48 = vsel %vm1343_vm1, %v16854_v59, 0.0 }
0x28c2   : > { %9021 = vadd.xlane.f32.xlu1 %v9020_v48 }
0x28c3   : > { %v12293_v0 = vpop.f32.mrb[154].mxu1 }
0x28c4   : > { %v8953_v56 = vadd.f32 %v16810_v38, %v12293_v0  ;;  %v8947_v12 = vpop.f32.mrb[155].mxu1 }
0x28c5   : > { %v8948_v37 = vadd.f32 %v16810_v38, %v8947_v12 }
0x28c6   : > { %v16863_v44 = vadd.f32 %v8953_v56, %v16743_v49 }
0x28c7   : > { %v16866_v60 = vadd.f32 %v8948_v37, %v16739_v55 }
0x28c8   : > { %v9029_v47 = vsel %vm1343_vm1, %v16863_v44, 0.0 }
0x28c9   : > { %9030 = vadd.xlane.f32.xlu0 %v9029_v47  ;;  %v9026_v10 = vsel %vm1343_vm1, %v16866_v60, 0.0 }
0x28ca   : > { %v12296_v4 = vpop.f32.mrb[156].mxu1  ;;  %9027 = vadd.xlane.f32.xlu1 %v9026_v10 }
0x28cb   : > { %v8963_v45 = vadd.f32 %v16810_v38, %v12296_v4  ;;  %v8957_v32 = vpop.f32.mrb[157].mxu1 }
0x28cc   : > { %v8958_v42 = vadd.f32 %v16810_v38, %v8957_v32 }
0x28cd   : > { %v16875_v49 = vadd.f32 %v8963_v45, %v16760_v31 }
0x28ce   : > { %v16878_v55 = vadd.f32 %v8958_v42, %v16751_v53  ;;  %v12299_v52 = vpop.f32.mrb[158].mxu1 }
0x28cf   : > { %v8973_v46 = vadd.f32 %v16810_v38, %v12299_v52  ;;  %v8967_v1 = vpop.f32.mrb[159].mxu1  ;;  %v9035_v43 = vsel %vm1343_vm1, %v16875_v49, 0.0 }
0x28d0   : > { %v8968_v23 = vadd.f32 %v16810_v38, %v8967_v1  ;;  %9036 = vadd.xlane.f32.xlu0 %v9035_v43  ;;  %v9032_v27 = vsel %vm1343_vm1, %v16878_v55, 0.0 }
0x28d1   : > { %v16887_v58 = vadd.f32 %v8973_v46, %v16774_v7  ;;  %9033 = vadd.xlane.f32.xlu1 %v9032_v27 }
0x28d2   : > { %v16890_v53 = vadd.f32 %v8968_v23, %v16764_v18  ;;  %v12302_v31 = vpop.f32.mrb[160].mxu1 }
0x28d3   : > { %v8983_v16 = vadd.f32 %v16810_v38, %v12302_v31  ;;  %v8977_v24 = vpop.f32.mrb[161].mxu1  ;;  %v9041_v51 = vsel %vm1343_vm1, %v16887_v58, 0.0 }
0x28d4   : > { %v8978_v19 = vadd.f32 %v16810_v38, %v8977_v24  ;;  %9042 = vadd.xlane.f32.xlu0 %v9041_v51  ;;  %v9038_v34 = vsel %vm1343_vm1, %v16890_v53, 0.0 }
0x28d5   : > { %v16899_v7 = vadd.f32 %v8983_v16, %v16786_v13  ;;  %9039 = vadd.xlane.f32.xlu1 %v9038_v34 }
0x28d6   : > { %v16902_v18 = vadd.f32 %v8978_v19, %v16778_v29 }
0x28d7   : > { %v9047_v14 = vsel %vm1343_vm1, %v16899_v7, 0.0 }
0x28d8   : > { %9048 = vadd.xlane.f32.xlu0 %v9047_v14  ;;  %v9044_v3 = vsel %vm1343_vm1, %v16902_v18, 0.0 }
0x28d9   : > { %9045 = vadd.xlane.f32.xlu1 %v9044_v3 }
0x293a   : > { %v9007_v38 = vpop.xlane.xlu0 %9006 }
0x293b   : > { %v9051_v40 = vmul.f32 0.03125, %v9007_v38  ;;  %v9004_v6 = vpop.xlane.xlu1 %9003 }
0x293c   : > { %v9050_v9 = vmul.f32 0.03125, %v9004_v6 }
0x293d   : > { %v16909_v54 = vsub.f32 %v16815_v57, %v9051_v40 }
0x293e   : > { %v16912_v13 = vsub.f32 %v16818_v26, %v9050_v9 }
0x293f   : > { %v9013_v29 = vpop.xlane.xlu0 %9012  ;;  %v9083_v30 = vmul.f32 %v16909_v54, %v16909_v54 }
0x2940   : > { %v9053_v50 = vmul.f32 0.03125, %v9013_v29  ;;  %v9010_v35 = vpop.xlane.xlu1 %9009  ;;  %v9082_v61 = vmul.f32 %v16912_v13, %v16912_v13 }
0x2941   : > { %v9052_v21 = vmul.f32 0.03125, %v9010_v35  ;;  %v9101_v63 = vsel %vm1343_vm1, %v9083_v30, 0.0 }
0x2942   : > { %v16920_v25 = vsub.f32 %v16827_v41, %v9053_v50  ;;  %9102 = vadd.xlane.f32.xlu0 %v9101_v63  ;;  %v9098_v57 = vsel %vm1343_vm1, %v9082_v61, 0.0 }
0x2943   : > { %v16924_v26 = vsub.f32 %v16830_v20, %v9052_v21  ;;  %9099 = vadd.xlane.f32.xlu1 %v9098_v57 }
0x2944   : > { %v9085_v8 = vmul.f32 %v16920_v25, %v16920_v25 }
0x2945   : > { %v9084_v2 = vmul.f32 %v16924_v26, %v16924_v26 }
0x2946   : > { %v9019_v5 = vpop.xlane.xlu0 %9018  ;;  %v9107_v33 = vsel %vm1343_vm1, %v9085_v8, 0.0 }
0x2947   : > { %v9055_v36 = vmul.f32 0.03125, %v9019_v5  ;;  %9108 = vadd.xlane.f32.xlu0 %v9107_v33  ;;  %v9016_v41 = vpop.xlane.xlu1 %9015  ;;  %v9104_v28 = vsel %vm1343_vm1, %v9084_v2, 0.0 }
0x2948   : > { %v9054_v15 = vmul.f32 0.03125, %v9016_v41  ;;  %9105 = vadd.xlane.f32.xlu1 %v9104_v28 }
0x2949   : > { %v16933_v20 = vsub.f32 %v16839_v39, %v9055_v36 }
0x294a   : > { %v16936_v48 = vsub.f32 %v16842_v17, %v9054_v15 }
0x294b   : > { %v9087_v0 = vmul.f32 %v16933_v20, %v16933_v20 }
0x294c   : > { %v9086_v56 = vmul.f32 %v16936_v48, %v16936_v48 }
0x294d   : > { %v9113_v12 = vsel %vm1343_vm1, %v9087_v0, 0.0 }
0x294e   : > { %v9025_v37 = vpop.xlane.xlu0 %9024  ;;  %9114 = vadd.xlane.f32.xlu0 %v9113_v12  ;;  %v9110_v47 = vsel %vm1343_vm1, %v9086_v56, 0.0 }
0x294f   : > { %v9057_v10 = vmul.f32 0.03125, %v9025_v37  ;;  %v9022_v4 = vpop.xlane.xlu1 %9021  ;;  %9111 = vadd.xlane.f32.xlu1 %v9110_v47 }
0x2950   : > { %v9056_v39 = vmul.f32 0.03125, %v9022_v4 }
0x2951   : > { %v16945_v45 = vsub.f32 %v16851_v62, %v9057_v10 }
0x2952   : > { %v16948_v17 = vsub.f32 %v16854_v59, %v9056_v39 }
0x2953   : > { %v9089_v32 = vmul.f32 %v16945_v45, %v16945_v45 }
0x2954   : > { %v9088_v42 = vmul.f32 %v16948_v17, %v16948_v17 }
0x2955   : > { %v9119_v52 = vsel %vm1343_vm1, %v9089_v32, 0.0 }
0x2956   : > { %v9031_v46 = vpop.xlane.xlu0 %9030  ;;  %9120 = vadd.xlane.f32.xlu0 %v9119_v52  ;;  %v9116_v1 = vsel %vm1343_vm1, %v9088_v42, 0.0 }
0x2957   : > { %v9059_v43 = vmul.f32 0.03125, %v9031_v46  ;;  %v9028_v23 = vpop.xlane.xlu1 %9027  ;;  %9117 = vadd.xlane.f32.xlu1 %v9116_v1 }
0x2958   : > { %v9058_v62 = vmul.f32 0.03125, %v9028_v23 }
0x2959   : > { %v16957_v27 = vsub.f32 %v16863_v44, %v9059_v43 }
0x295a   : > { %v16960_v59 = vsub.f32 %v16866_v60, %v9058_v62 }
0x295b   : > { %v9091_v31 = vmul.f32 %v16957_v27, %v16957_v27 }
0x295c   : > { %v9090_v16 = vmul.f32 %v16960_v59, %v16960_v59 }
0x295d   : > { %v9037_v24 = vpop.xlane.xlu0 %9036  ;;  %v9125_v51 = vsel %vm1343_vm1, %v9091_v31, 0.0 }
0x295e   : > { %v9061_v19 = vmul.f32 0.03125, %v9037_v24  ;;  %v9034_v34 = vpop.xlane.xlu1 %9033  ;;  %9126 = vadd.xlane.f32.xlu0 %v9125_v51  ;;  %v9122_v14 = vsel %vm1343_vm1, %v9090_v16, 0.0 }
0x295f   : > { %v9060_v3 = vmul.f32 0.03125, %v9034_v34  ;;  %9123 = vadd.xlane.f32.xlu1 %v9122_v14 }
0x2960   : > { %v16969_v44 = vsub.f32 %v16875_v49, %v9061_v19  ;;  %v17007_v19 = vld [vmem:[%s17530_s26] ss:$0 sm:$0xff] }
0x2961   : > { %v16972_v60 = vsub.f32 %v16878_v55, %v9060_v3  ;;  %v9043_v38 = vpop.xlane.xlu0 %9042 }
0x2962   : > { %v9063_v40 = vmul.f32 0.03125, %v9043_v38  ;;  %v9040_v6 = vpop.xlane.xlu1 %9039  ;;  %v9093_v9 = vmul.f32 %v16969_v44, %v16969_v44 }
0x2963   : > { %v9062_v29 = vmul.f32 0.03125, %v9040_v6  ;;  %v9092_v30 = vmul.f32 %v16972_v60, %v16972_v60 }
0x2964   : > { %v16979_v50 = vsub.f32 %v16887_v58, %v9063_v40  ;;  %v9131_v35 = vsel %vm1343_vm1, %v9093_v9, 0.0  ;;  %v17012_v40 = vld [vmem:[%s17531_s27] ss:$0 sm:$0xff] }
0x2965   : > { %v16983_v49 = vsub.f32 %v16890_v53, %v9062_v29  ;;  %9132 = vadd.xlane.f32.xlu0 %v9131_v35  ;;  %v9049_v55 = vpop.xlane.xlu0 %9048  ;;  %v9128_v61 = vsel %vm1343_vm1, %v9092_v30, 0.0 }
0x2966   : > { %v9065_v21 = vmul.f32 0.03125, %v9049_v55  ;;  %9129 = vadd.xlane.f32.xlu1 %v9128_v61  ;;  %v9046_v63 = vpop.xlane.xlu1 %9045  ;;  %v9095_v57 = vmul.f32 %v16979_v50, %v16979_v50 }
0x2967   : > { %v9064_v8 = vmul.f32 0.03125, %v9046_v63  ;;  %v9094_v58 = vmul.f32 %v16983_v49, %v16983_v49 }
0x2968   : > { %v16991_v2 = vsub.f32 %v16899_v7, %v9065_v21  ;;  %v9137_v53 = vsel %vm1343_vm1, %v9095_v57, 0.0 }
0x2969   : > { %v16995_v5 = vsub.f32 %v16902_v18, %v9064_v8  ;;  %9138 = vadd.xlane.f32.xlu0 %v9137_v53  ;;  %v9134_v33 = vsel %vm1343_vm1, %v9094_v58, 0.0 }
0x296a   : > { %9135 = vadd.xlane.f32.xlu1 %v9134_v33  ;;  %v9097_v36 = vmul.f32 %v16991_v2, %v16991_v2 }
0x296b   : > { %v9096_v41 = vmul.f32 %v16995_v5, %v16995_v5 }
0x296c   : > { %v9143_v28 = vsel %vm1343_vm1, %v9097_v36, 0.0 }
0x296d   : > { %9144 = vadd.xlane.f32.xlu0 %v9143_v28  ;;  %v9140_v7 = vsel %vm1343_vm1, %v9096_v41, 0.0 }
0x296e   : > { %9141 = vadd.xlane.f32.xlu1 %v9140_v7 }
0x29cf   : > { %v9103_v15 = vpop.xlane.xlu0 %9102 }
0x29d0   : > { %v9147_v0 = vmul.f32 0.03125, %v9103_v15  ;;  %v9100_v18 = vpop.xlane.xlu1 %9099 }
0x29d1   : > { %v9146_v56 = vmul.f32 0.03125, %v9100_v18 }
0x29d2   : > { %v9163_v12 = vadd.f32 1e-05, %v9147_v0 }
0x29d3   : > { %v9162_v37 = vadd.f32 1e-05, %v9146_v56 }
0x29d4   : > { %13585 = vrsqrt.f32 %v9163_v12  ;;  %v9109_v47 = vpop.xlane.xlu0 %9108 }
0x29d5   : > { %13587 = vrsqrt.f32 %v9162_v37  ;;  %v9149_v10 = vmul.f32 0.03125, %v9109_v47  ;;  %v9106_v4 = vpop.xlane.xlu1 %9105 }
0x29d6   : > { %v9148_v39 = vmul.f32 0.03125, %v9106_v4 }
0x29d7   : > { %v9165_v32 = vadd.f32 1e-05, %v9149_v10 }
0x29d8   : > { %v9164_v42 = vadd.f32 1e-05, %v9148_v39 }
0x29d9   : > { %13589 = vrsqrt.f32 %v9165_v32 }
0x29da   : > { %13591 = vrsqrt.f32 %v9164_v42 }
0x29db   : > { %v9115_v52 = vpop.xlane.xlu0 %9114 }
0x29dc   : > { %v9151_v46 = vmul.f32 0.03125, %v9115_v52  ;;  %v9112_v1 = vpop.xlane.xlu1 %9111 }
0x29dd   : > { %v9150_v43 = vmul.f32 0.03125, %v9112_v1 }
0x29de   : > { %v13586_v23 = vpop.eup %13585  ;;  %v9167_v62 = vadd.f32 1e-05, %v9151_v46 }
0x29df   : > { %v13588_v31 = vpop.eup %13587  ;;  %v9166_v16 = vadd.f32 1e-05, %v9150_v43  ;;  %v9195_v24 = vmul.f32 %v13586_v23, %v16909_v54 }
0x29e0   : > { %13593 = vrsqrt.f32 %v9167_v62  ;;  %v9194_v51 = vmul.f32 %v13588_v31, %v16912_v13 }
0x29e1   : > { %13595 = vrsqrt.f32 %v9166_v16  ;;  %v9211_v34 = vmul.f32 %v17007_v19, %v9195_v24 }
0x29e2   : > { %v9210_v14 = vmul.f32 %v17007_v19, %v9194_v51 }
0x29e3   : > { %v13590_v3 = vpop.eup %13589  ;;  %v9121_v38 = vpop.xlane.xlu0 %9120  ;;  %v17015_v6 = vadd.f32 %v17012_v40, %v9211_v34 }
0x29e4   : > { %v13592_v9 = vpop.eup %13591  ;;  %v9153_v29 = vmul.f32 0.03125, %v9121_v38  ;;  %v9118_v54 = vpop.xlane.xlu1 %9117  ;;  %v17018_v30 = vadd.f32 %v17012_v40, %v9210_v14  ;;  %v9197_v13 = vmul.f32 %v13590_v3, %v16920_v25 }
0x29e5   : > { %v9152_v35 = vmul.f32 0.03125, %v9118_v54  ;;  %v9274_v55 = vsel %vm1343_vm1, %v17015_v6, 0.0  ;;  %v9196_v61 = vmul.f32 %v13592_v9, %v16924_v26 }
0x29e6   : > { %v9169_v21 = vadd.f32 1e-05, %v9153_v29  ;;  %9275 = vadd.xlane.f32.xlu0 %v9274_v55  ;;  %v9271_v63 = vsel %vm1343_vm1, %v17018_v30, 0.0  ;;  %v9213_v57 = vmul.f32 %v17007_v19, %v9197_v13 }
0x29e7   : > { %v9168_v8 = vadd.f32 1e-05, %v9152_v35  ;;  %9272 = vadd.xlane.f32.xlu1 %v9271_v63  ;;  %v9212_v58 = vmul.f32 %v17007_v19, %v9196_v61 }
0x29e8   : > { %13597 = vrsqrt.f32 %v9169_v21  ;;  %v17029_v25 = vadd.f32 %v17012_v40, %v9213_v57 }
0x29e9   : > { %13599 = vrsqrt.f32 %v9168_v8  ;;  %v17032_v53 = vadd.f32 %v17012_v40, %v9212_v58 }
0x29ea   : > { %v13594_v26 = vpop.eup %13593  ;;  %v9280_v33 = vsel %vm1343_vm1, %v17029_v25, 0.0 }
0x29eb   : > { %v13596_v36 = vpop.eup %13595  ;;  %9281 = vadd.xlane.f32.xlu0 %v9280_v33  ;;  %v9127_v41 = vpop.xlane.xlu0 %9126  ;;  %v9277_v28 = vsel %vm1343_vm1, %v17032_v53, 0.0  ;;  %v9199_v7 = vmul.f32 %v13594_v26, %v16933_v20 }
0x29ec   : > { %v9155_v15 = vmul.f32 0.03125, %v9127_v41  ;;  %9278 = vadd.xlane.f32.xlu1 %v9277_v28  ;;  %v9124_v0 = vpop.xlane.xlu1 %9123  ;;  %v9198_v18 = vmul.f32 %v13596_v36, %v16936_v48 }
0x29ed   : > { %v9154_v56 = vmul.f32 0.03125, %v9124_v0  ;;  %v9215_v12 = vmul.f32 %v17007_v19, %v9199_v7 }
0x29ee   : > { %v9171_v37 = vadd.f32 1e-05, %v9155_v15  ;;  %v9214_v47 = vmul.f32 %v17007_v19, %v9198_v18 }
0x29ef   : > { %v9170_v10 = vadd.f32 1e-05, %v9154_v56  ;;  %v17043_v4 = vadd.f32 %v17012_v40, %v9215_v12 }
0x29f0   : > { %13601 = vrsqrt.f32 %v9171_v37  ;;  %v17046_v39 = vadd.f32 %v17012_v40, %v9214_v47 }
0x29f1   : > { %13603 = vrsqrt.f32 %v9170_v10  ;;  %v9286_v20 = vsel %vm1343_vm1, %v17043_v4, 0.0 }
0x29f2   : > { %v13598_v32 = vpop.eup %13597  ;;  %9287 = vadd.xlane.f32.xlu0 %v9286_v20  ;;  %v9133_v48 = vpop.xlane.xlu0 %9132  ;;  %v9283_v42 = vsel %vm1343_vm1, %v17046_v39, 0.0 }
0x29f3   : > { %v13600_v52 = vpop.eup %13599  ;;  %v9157_v46 = vmul.f32 0.03125, %v9133_v48  ;;  %9284 = vadd.xlane.f32.xlu1 %v9283_v42  ;;  %v9130_v1 = vpop.xlane.xlu1 %9129  ;;  %v9201_v43 = vmul.f32 %v13598_v32, %v16945_v45 }
0x29f4   : > { %v9156_v23 = vmul.f32 0.03125, %v9130_v1  ;;  %v9200_v62 = vmul.f32 %v13600_v52, %v16948_v17 }
0x29f5   : > { %v9173_v31 = vadd.f32 1e-05, %v9157_v46  ;;  %v9217_v16 = vmul.f32 %v17007_v19, %v9201_v43 }
0x29f6   : > { %v9172_v24 = vadd.f32 1e-05, %v9156_v23  ;;  %v9139_v51 = vpop.xlane.xlu0 %9138  ;;  %v9216_v34 = vmul.f32 %v17007_v19, %v9200_v62 }
0x29f7   : > { %13605 = vrsqrt.f32 %v9173_v31  ;;  %v9159_v14 = vmul.f32 0.03125, %v9139_v51  ;;  %v9136_v3 = vpop.xlane.xlu1 %9135  ;;  %v17057_v38 = vadd.f32 %v17012_v40, %v9217_v16 }
0x29f8   : > { %13607 = vrsqrt.f32 %v9172_v24  ;;  %v9158_v9 = vmul.f32 0.03125, %v9136_v3  ;;  %v17060_v45 = vadd.f32 %v17012_v40, %v9216_v34  ;;  %v17556_v3 = vld [vmem:[#allocation35_spill] sm:$0xff] }
0x29f9   : > { %v9175_v29 = vadd.f32 1e-05, %v9159_v14  ;;  %v9292_v17 = vsel %vm1343_vm1, %v17057_v38, 0.0 }
0x29fa   : > { %v13602_v54 = vpop.eup %13601  ;;  %v9174_v13 = vadd.f32 1e-05, %v9158_v9  ;;  %9293 = vadd.xlane.f32.xlu0 %v9292_v17  ;;  %v9145_v35 = vpop.xlane.xlu0 %9144  ;;  %v9289_v55 = vsel %vm1343_vm1, %v17060_v45, 0.0  ;;  %v9244_v9 = vsel %vm1343_vm1, %v17556_v3, 0.0 }
0x29fb   : > { %v13604_v61 = vpop.eup %13603  ;;  %13609 = vrsqrt.f32 %v9175_v29  ;;  %v9161_v21 = vmul.f32 0.03125, %v9145_v35  ;;  %9290 = vadd.xlane.f32.xlu1 %v9289_v55  ;;  %v9142_v63 = vpop.xlane.xlu1 %9141  ;;  %v9203_v57 = vmul.f32 %v13602_v54, %v16957_v27 }
0x29fc   : > { %13611 = vrsqrt.f32 %v9174_v13  ;;  %v9160_v8 = vmul.f32 0.03125, %v9142_v63  ;;  %v9202_v58 = vmul.f32 %v13604_v61, %v16960_v59 }
0x29fd   : > { %v9177_v26 = vadd.f32 1e-05, %v9161_v21  ;;  %v9219_v33 = vmul.f32 %v17007_v19, %v9203_v57 }
0x29fe   : > { %v9176_v36 = vadd.f32 1e-05, %v9160_v8  ;;  %v9218_v41 = vmul.f32 %v17007_v19, %v9202_v58 }
0x29ff   : > { %13613 = vrsqrt.f32 %v9177_v26  ;;  %v17071_v28 = vadd.f32 %v17012_v40, %v9219_v33 }
0x2a00   : > { %13615 = vrsqrt.f32 %v9176_v36  ;;  %v17074_v7 = vadd.f32 %v17012_v40, %v9218_v41 }
0x2a01   : > { %v13606_v15 = vpop.eup %13605  ;;  %v9298_v27 = vsel %vm1343_vm1, %v17071_v28, 0.0 }
0x2a02   : > { %v13608_v0 = vpop.eup %13607  ;;  %9299 = vadd.xlane.f32.xlu0 %v9298_v27  ;;  %v9295_v59 = vsel %vm1343_vm1, %v17074_v7, 0.0  ;;  %v9205_v18 = vmul.f32 %v13606_v15, %v16969_v44 }
0x2a03   : > { %9296 = vadd.xlane.f32.xlu1 %v9295_v59  ;;  %v9204_v56 = vmul.f32 %v13608_v0, %v16972_v60 }
0x2a04   : > { %v9221_v12 = vmul.f32 %v17007_v19, %v9205_v18 }
0x2a05   : > { %v13610_v37 = vpop.eup %13609  ;;  %v9220_v47 = vmul.f32 %v17007_v19, %v9204_v56 }
0x2a06   : > { %v13612_v10 = vpop.eup %13611  ;;  %v17085_v20 = vadd.f32 %v17012_v40, %v9221_v12  ;;  %v9207_v32 = vmul.f32 %v13610_v37, %v16979_v50 }
0x2a07   : > { %v17089_v48 = vadd.f32 %v17012_v40, %v9220_v47  ;;  %v9206_v42 = vmul.f32 %v13612_v10, %v16983_v49 }
0x2a08   : > { %v9304_v44 = vsel %vm1343_vm1, %v17085_v20, 0.0  ;;  %v9223_v60 = vmul.f32 %v17007_v19, %v9207_v32 }
0x2a09   : > { %v13614_v52 = vpop.eup %13613  ;;  %9305 = vadd.xlane.f32.xlu0 %v9304_v44  ;;  %v9301_v46 = vsel %vm1343_vm1, %v17089_v48, 0.0  ;;  %v9222_v1 = vmul.f32 %v17007_v19, %v9206_v42 }
0x2a0a   : > { %v13616_v43 = vpop.eup %13615  ;;  %9302 = vadd.xlane.f32.xlu1 %v9301_v46  ;;  %v17099_v50 = vadd.f32 %v17012_v40, %v9223_v60  ;;  %v9209_v23 = vmul.f32 %v13614_v52, %v16991_v2 }
0x2a0b   : > { %v17103_v49 = vadd.f32 %v17012_v40, %v9222_v1  ;;  %v9208_v62 = vmul.f32 %v13616_v43, %v16995_v5 }
0x2a0c   : > { %v9310_v31 = vsel %vm1343_vm1, %v17099_v50, 0.0  ;;  %v9225_v16 = vmul.f32 %v17007_v19, %v9209_v23 }
0x2a0d   : > { %9311 = vadd.xlane.f32.xlu0 %v9310_v31  ;;  %v9307_v24 = vsel %vm1343_vm1, %v17103_v49, 0.0  ;;  %v9224_v51 = vmul.f32 %v17007_v19, %v9208_v62 }
0x2a0e   : > { %9308 = vadd.xlane.f32.xlu1 %v9307_v24  ;;  %v17113_v34 = vadd.f32 %v17012_v40, %v9225_v16 }
0x2a0f   : > { %v17116_v2 = vadd.f32 %v17012_v40, %v9224_v51 }
0x2a10   : > { %v9316_v5 = vsel %vm1343_vm1, %v17113_v34, 0.0 }
0x2a11   : > { %9317 = vadd.xlane.f32.xlu0 %v9316_v5  ;;  %v9313_v14 = vsel %vm1343_vm1, %v17116_v2, 0.0 }
0x2a12   : > { %9314 = vadd.xlane.f32.xlu1 %v9313_v14 }
0x2a16   : > { %9245 = vadd.xlane.f32.xlu1 %v9244_v9 }
0x2a73   : > { %v9276_v19 = vpop.xlane.xlu0 %9275 }
0x2a74   : > { %v9320_v29 = vmul.f32 0.03125, %v9276_v19  ;;  %v9273_v17 = vpop.xlane.xlu1 %9272 }
0x2a75   : > { %v9319_v54 = vmul.f32 0.03125, %v9273_v17 }
0x2a76   : > { %v17125_v13 = vsub.f32 %v17015_v6, %v9320_v29 }
0x2a77   : > { %v17128_v40 = vsub.f32 %v17018_v30, %v9319_v54 }
0x2a78   : > { %v9282_v35 = vpop.xlane.xlu0 %9281  ;;  %v9352_v55 = vmul.f32 %v17125_v13, %v17125_v13 }
0x2a79   : > { %v9322_v61 = vmul.f32 0.03125, %v9282_v35  ;;  %v9279_v21 = vpop.xlane.xlu1 %9278  ;;  %v9351_v63 = vmul.f32 %v17128_v40, %v17128_v40 }
0x2a7a   : > { %v9321_v57 = vmul.f32 0.03125, %v9279_v21  ;;  %v9370_v8 = vsel %vm1343_vm1, %v9352_v55, 0.0 }
0x2a7b   : > { %v17136_v58 = vsub.f32 %v17029_v25, %v9322_v61  ;;  %9371 = vadd.xlane.f32.xlu1 %v9370_v8  ;;  %v9367_v6 = vsel %vm1343_vm1, %v9351_v63, 0.0 }
0x2a7c   : > { %v17140_v30 = vsub.f32 %v17032_v53, %v9321_v57  ;;  %9368 = vadd.xlane.f32.xlu0 %v9367_v6 }
0x2a7d   : > { %v9354_v26 = vmul.f32 %v17136_v58, %v17136_v58 }
0x2a7e   : > { %v9353_v33 = vmul.f32 %v17140_v30, %v17140_v30 }
0x2a7f   : > { %v9288_v36 = vpop.xlane.xlu0 %9287  ;;  %v9376_v41 = vsel %vm1343_vm1, %v9354_v26, 0.0 }
0x2a80   : > { %v9324_v15 = vmul.f32 0.03125, %v9288_v36  ;;  %9377 = vadd.xlane.f32.xlu1 %v9376_v41  ;;  %v9373_v25 = vsel %vm1343_vm1, %v9353_v33, 0.0  ;;  %v9285_v27 = vpop.xlane.xlu1 %9284 }
0x2a81   : > { %9374 = vadd.xlane.f32.xlu0 %v9373_v25  ;;  %v9323_v0 = vmul.f32 0.03125, %v9285_v27 }
0x2a82   : > { %v17149_v53 = vsub.f32 %v17043_v4, %v9324_v15 }
0x2a83   : > { %v17152_v59 = vsub.f32 %v17046_v39, %v9323_v0 }
0x2a84   : > { %v9356_v18 = vmul.f32 %v17149_v53, %v17149_v53 }
0x2a85   : > { %v9355_v56 = vmul.f32 %v17152_v59, %v17152_v59 }
0x2a86   : > { %v9382_v12 = vsel %vm1343_vm1, %v9356_v18, 0.0 }
0x2a87   : > { %v9294_v37 = vpop.xlane.xlu0 %9293  ;;  %9383 = vadd.xlane.f32.xlu1 %v9382_v12  ;;  %v9379_v47 = vsel %vm1343_vm1, %v9355_v56, 0.0 }
0x2a88   : > { %v9326_v10 = vmul.f32 0.03125, %v9294_v37  ;;  %9380 = vadd.xlane.f32.xlu0 %v9379_v47  ;;  %v9291_v32 = vpop.xlane.xlu1 %9290  ;;  %v13693_v47 = vld [vmem:[%s14159_s16] sm:$0x1]  ;;  %s17562_s16 = sld [smem:[#allocation10_spill]] }
0x2a89   : > { %v9325_v4 = vmul.f32 0.03125, %v9291_v32 }
0x2a8a   : > { %v17161_v42 = vsub.f32 %v17057_v38, %v9326_v10  ;;  %v17227_v10 = vsub.f32 1.0, %v13693_v47 }
0x2a8b   : > { %v17164_v39 = vsub.f32 %v17060_v45, %v9325_v4 }
0x2a8c   : > { %v9358_v44 = vmul.f32 %v17161_v42, %v17161_v42  ;;  %v9519_v32 = vsel %vm9518_vm10, %v17227_v10, 0.0 }
0x2a8d   : > { %v9357_v60 = vmul.f32 %v17164_v39, %v17164_v39 }
0x2a8e   : > { %v9388_v52 = vsel %vm1343_vm1, %v9358_v44, 0.0 }
0x2a8f   : > { %v9300_v46 = vpop.xlane.xlu0 %9299  ;;  %9389 = vadd.xlane.f32.xlu1 %v9388_v52  ;;  %v9385_v1 = vsel %vm1343_vm1, %v9357_v60, 0.0 }
0x2a90   : > { %v9328_v43 = vmul.f32 0.03125, %v9300_v46  ;;  %9386 = vadd.xlane.f32.xlu0 %v9385_v1  ;;  %v9297_v23 = vpop.xlane.xlu1 %9296  ;;  %v17231_v46 = vld [vmem:[%s14481_s15] sm:$0x1]  ;;  %s17559_s15 = sld [smem:[#allocation9_spill]] }
0x2a91   : > { %v9327_v38 = vmul.f32 0.03125, %v9297_v23  ;;  %v9511_v1 = vsub.f32 1.0, %v17231_v46 }
0x2a92   : > { %v17173_v62 = vsub.f32 %v17071_v28, %v9328_v43 }
0x2a93   : > { %v17176_v45 = vsub.f32 %v17074_v7, %v9327_v38 }
0x2a94   : > { %v9360_v31 = vmul.f32 %v17173_v62, %v17173_v62 }
0x2a95   : > { %v9359_v16 = vmul.f32 %v17176_v45, %v17176_v45 }
0x2a96   : > { %v9306_v24 = vpop.xlane.xlu0 %9305  ;;  %v9394_v51 = vsel %vm1343_vm1, %v9360_v31, 0.0 }
0x2a97   : > { %v9330_v5 = vmul.f32 0.03125, %v9306_v24  ;;  %9395 = vadd.xlane.f32.xlu1 %v9394_v51  ;;  %v9303_v14 = vpop.xlane.xlu1 %9302  ;;  %v9391_v9 = vsel %vm1343_vm1, %v9359_v16, 0.0  ;;  %v9514_v16 = vsel %vm9513_vm11, %v9511_v1, 0.0 }
0x2a98   : > { %v9329_v19 = vmul.f32 0.03125, %v9303_v14  ;;  %9392 = vadd.xlane.f32.xlu0 %v9391_v9 }
0x2a99   : > { %v17185_v28 = vsub.f32 %v17085_v20, %v9330_v5 }
0x2a9a   : > { %v17188_v7 = vsub.f32 %v17089_v48, %v9329_v19  ;;  %v9312_v29 = vpop.xlane.xlu0 %9311 }
0x2a9b   : > { %v9332_v17 = vmul.f32 0.03125, %v9312_v29  ;;  %v9309_v54 = vpop.xlane.xlu1 %9308  ;;  %v9362_v35 = vmul.f32 %v17185_v28, %v17185_v28 }
0x2a9c   : > { %v9331_v55 = vmul.f32 0.03125, %v9309_v54  ;;  %v9361_v61 = vmul.f32 %v17188_v7, %v17188_v7 }
0x2a9d   : > { %v17195_v21 = vsub.f32 %v17099_v50, %v9332_v17  ;;  %v9400_v63 = vsel %vm1343_vm1, %v9362_v35, 0.0  ;;  %v17237_v35 = vld [vmem:[%s17557_s5] ss:$0 sm:$0xff]  ;;  %s1304_s5 = scalar_lea.vmem %s17563_s20, %s14001_s10 }
0x2a9e   : > { %v17199_v20 = vsub.f32 %v17103_v49, %v9331_v55  ;;  %v9318_v48 = vpop.xlane.xlu0 %9317  ;;  %9401 = vadd.xlane.f32.xlu1 %v9400_v63  ;;  %v9397_v57 = vsel %vm1343_vm1, %v9361_v61, 0.0 }
0x2a9f   : > { %v9334_v8 = vmul.f32 0.03125, %v9318_v48  ;;  %9398 = vadd.xlane.f32.xlu0 %v9397_v57  ;;  %v9315_v6 = vpop.xlane.xlu1 %9314  ;;  %v9364_v26 = vmul.f32 %v17195_v21, %v17195_v21  ;;  %v17242_v57 = vld [vmem:[%s17558_s3] ss:$0 sm:$0xff]  ;;  %s1307_s3 = scalar_lea.vmem %s13952_s24, %s17566_s7  ;;  %s1311_s7 = scalar_lea.vmem %s13957_s6, %s14001_s10 }
0x2aa0   : > { %v9333_v33 = vmul.f32 0.03125, %v9315_v6  ;;  %v9363_v50 = vmul.f32 %v17199_v20, %v17199_v20 }
0x2aa1   : > { %v17207_v36 = vsub.f32 %v17113_v34, %v9334_v8  ;;  %v9406_v49 = vsel %vm1343_vm1, %v9364_v26, 0.0 }
0x2aa2   : > { %v17211_v41 = vsub.f32 %v17116_v2, %v9333_v33  ;;  %9407 = vadd.xlane.f32.xlu1 %v9406_v49  ;;  %v9403_v15 = vsel %vm1343_vm1, %v9363_v50, 0.0 }
0x2aa3   : > { %9404 = vadd.xlane.f32.xlu0 %v9403_v15  ;;  %v9246_v25 = vpop.xlane.xlu1 %9245  ;;  %v9366_v27 = vmul.f32 %v17207_v36, %v17207_v36 }
0x2aa4   : > { %v9247_v0 = vmul.f32 0.03125, %v9246_v25  ;;  %v9365_v18 = vmul.f32 %v17211_v41, %v17211_v41 }
0x2aa5   : > { %v9412_v34 = vsel %vm1343_vm1, %v9366_v27, 0.0 }
0x2aa6   : > { %v17220_v56 = vsub.f32 %v17556_v3, %v9247_v0  ;;  %9413 = vadd.xlane.f32.xlu1 %v9412_v34  ;;  %v9409_v2 = vsel %vm1343_vm1, %v9365_v18, 0.0 }
0x2aa7   : > { %9410 = vadd.xlane.f32.xlu0 %v9409_v2 }
0x2aa8   : > { %v9249_v12 = vmul.f32 %v17220_v56, %v17220_v56 }
0x2aaa   : > { %v9250_v37 = vsel %vm1343_vm1, %v9249_v12, 0.0  ;;  %9520 = vadd.xlane.f32.xlu1 %v9519_v32 }
0x2aab   : > { %9251 = vadd.xlane.f32.xlu0 %v9250_v37 }
0x2aaf   : > { %9515 = vadd.xlane.f32.xlu0 %v9514_v16 }
0x2b08   : > { %v9372_v3 = vpop.xlane.xlu1 %9371 }
0x2b09   : > { %v9416_v4 = vmul.f32 0.03125, %v9372_v3  ;;  %v9369_v44 = vpop.xlane.xlu0 %9368 }
0x2b0a   : > { %v9415_v60 = vmul.f32 0.03125, %v9369_v44 }
0x2b0b   : > { %v9432_v52 = vadd.f32 1e-05, %v9416_v4 }
0x2b0c   : > { %v9431_v43 = vadd.f32 1e-05, %v9415_v60 }
0x2b0d   : > { %13617 = vrsqrt.f32 %v9432_v52  ;;  %v9378_v23 = vpop.xlane.xlu1 %9377 }
0x2b0e   : > { %13619 = vrsqrt.f32 %v9431_v43  ;;  %v9418_v38 = vmul.f32 0.03125, %v9378_v23  ;;  %v9375_v31 = vpop.xlane.xlu0 %9374 }
0x2b0f   : > { %v9417_v24 = vmul.f32 0.03125, %v9375_v31 }
0x2b10   : > { %v9434_v51 = vadd.f32 1e-05, %v9418_v38 }
0x2b11   : > { %v9433_v5 = vadd.f32 1e-05, %v9417_v24 }
0x2b12   : > { %13621 = vrsqrt.f32 %v9434_v51 }
0x2b13   : > { %13623 = vrsqrt.f32 %v9433_v5 }
0x2b14   : > { %v9384_v14 = vpop.xlane.xlu1 %9383 }
0x2b15   : > { %v9420_v9 = vmul.f32 0.03125, %v9384_v14  ;;  %v9381_v19 = vpop.xlane.xlu0 %9380 }
0x2b16   : > { %v9419_v29 = vmul.f32 0.03125, %v9381_v19 }
0x2b17   : > { %v13618_v17 = vpop.eup %13617  ;;  %v9436_v54 = vadd.f32 1e-05, %v9420_v9 }
0x2b18   : > { %v13620_v55 = vpop.eup %13619  ;;  %v9464_v61 = vmul.f32 %v13618_v17, %v17125_v13  ;;  %v9435_v63 = vadd.f32 1e-05, %v9419_v29 }
0x2b19   : > { %v9463_v48 = vmul.f32 %v13620_v55, %v17128_v40  ;;  %13625 = vrsqrt.f32 %v9436_v54 }
0x2b1a   : > { %13627 = vrsqrt.f32 %v9435_v63  ;;  %v9480_v8 = vmul.f32 %v17237_v35, %v9464_v61 }
0x2b1b   : > { %v9479_v6 = vmul.f32 %v17237_v35, %v9463_v48 }
0x2b1c   : > { %v13622_v26 = vpop.eup %13621  ;;  %v9390_v33 = vpop.xlane.xlu1 %9389  ;;  %v9496_v50 = vadd.f32 %v17242_v57, %v9480_v8 }
0x2b1d   : > { %v13624_v49 = vpop.eup %13623  ;;  %v9466_v15 = vmul.f32 %v13622_v26, %v17136_v58  ;;  %v9422_v25 = vmul.f32 0.03125, %v9390_v33  ;;  %v9387_v13 = vpop.xlane.xlu0 %9386  ;;  %v9495_v27 = vadd.f32 %v17242_v57, %v9479_v6 }
0x2b1e   : > { %v9465_v40 = vmul.f32 %v13624_v49, %v17140_v30  ;;  %v9421_v0 = vmul.f32 0.03125, %v9387_v13 }
0x2b1f   : > { %v9438_v18 = vadd.f32 1e-05, %v9422_v25  ;;  %v17250_v34 = vpack.c.bf16 %v9496_v50, %v9495_v27  ;;  %v9482_v2 = vmul.f32 %v17237_v35, %v9466_v15 }
0x2b20   : > { %v9437_v12 = vadd.f32 1e-05, %v9421_v0  ;;  %v9481_v37 = vmul.f32 %v17237_v35, %v9465_v40 }
0x2b21   : > { %13629 = vrsqrt.f32 %v9438_v18  ;;  %12805 = vmatpush3.bf16.msra.mxu1 %v17250_v34  ;;  %v9498_v58 = vadd.f32 %v17242_v57, %v9482_v2 }
0x2b22   : > { %13631 = vrsqrt.f32 %v9437_v12  ;;  %12806 = vmatprep.subr.bf16.mxu1 %v17555_v22  ;;  %v9497_v47 = vadd.f32 %v17242_v57, %v9481_v37 }
0x2b23   : > { %v13626_v30 = vpop.eup %13625 }
0x2b24   : > { %v13628_v32 = vpop.eup %13627  ;;  %v9468_v3 = vmul.f32 %v13626_v30, %v17149_v53  ;;  %v9396_v4 = vpop.xlane.xlu1 %9395  ;;  %v17259_v44 = vpack.c.bf16 %v9498_v58, %v9497_v47 }
0x2b25   : > { %v9467_v60 = vmul.f32 %v13628_v32, %v17152_v59  ;;  %v9424_v52 = vmul.f32 0.03125, %v9396_v4  ;;  %v9393_v43 = vpop.xlane.xlu0 %9392 }
0x2b26   : > { %v9423_v23 = vmul.f32 0.03125, %v9393_v43  ;;  %12808 = vmatpush3.bf16.msra.mxu1 %v17259_v44  ;;  %v9484_v38 = vmul.f32 %v17237_v35, %v9468_v3 }
0x2b27   : > { %v9440_v31 = vadd.f32 1e-05, %v9424_v52  ;;  %12809 = vmatprep.subr.bf16.mxu1 %v17555_v22  ;;  %v9483_v16 = vmul.f32 %v17237_v35, %v9467_v60 }
0x2b28   : > { %v9439_v24 = vadd.f32 1e-05, %v9423_v23  ;;  %v9500_v53 = vadd.f32 %v17242_v57, %v9484_v38 }
0x2b29   : > { %13633 = vrsqrt.f32 %v9440_v31  ;;  %v9499_v51 = vadd.f32 %v17242_v57, %v9483_v16 }
0x2b2a   : > { %13635 = vrsqrt.f32 %v9439_v24 }
0x2b2b   : > { %v13630_v59 = vpop.eup %13629  ;;  %v9402_v5 = vpop.xlane.xlu1 %9401  ;;  %v17268_v14 = vpack.c.bf16 %v9500_v53, %v9499_v51 }
0x2b2c   : > { %v13632_v9 = vpop.eup %13631  ;;  %v9470_v19 = vmul.f32 %v13630_v59, %v17161_v42  ;;  %v9426_v29 = vmul.f32 0.03125, %v9402_v5  ;;  %v9399_v17 = vpop.xlane.xlu0 %9398 }
0x2b2d   : > { %v9469_v54 = vmul.f32 %v13632_v9, %v17164_v39  ;;  %v9425_v55 = vmul.f32 0.03125, %v9399_v17  ;;  %12811 = vmatpush3.bf16.msra.mxu1 %v17268_v14 }
0x2b2e   : > { %v9442_v61 = vadd.f32 1e-05, %v9426_v29  ;;  %12812 = vmatprep.subr.bf16.mxu1 %v17555_v22  ;;  %v9486_v63 = vmul.f32 %v17237_v35, %v9470_v19 }
0x2b2f   : > { %v9441_v48 = vadd.f32 1e-05, %v9425_v55  ;;  %v9408_v8 = vpop.xlane.xlu1 %9407  ;;  %v9485_v6 = vmul.f32 %v17237_v35, %v9469_v54 }
0x2b30   : > { %13637 = vrsqrt.f32 %v9442_v61  ;;  %v9428_v26 = vmul.f32 0.03125, %v9408_v8  ;;  %v9405_v33 = vpop.xlane.xlu0 %9404  ;;  %v9502_v42 = vadd.f32 %v17242_v57, %v9486_v63 }
0x2b31   : > { %13639 = vrsqrt.f32 %v9441_v48  ;;  %v9427_v50 = vmul.f32 0.03125, %v9405_v33  ;;  %v9501_v39 = vadd.f32 %v17242_v57, %v9485_v6 }
0x2b32   : > { %v9444_v49 = vadd.f32 1e-05, %v9428_v26 }
0x2b33   : > { %v13634_v15 = vpop.eup %13633  ;;  %v9443_v25 = vadd.f32 1e-05, %v9427_v50  ;;  %v9414_v13 = vpop.xlane.xlu1 %9413  ;;  %v17278_v27 = vpack.c.bf16 %v9502_v42, %v9501_v39  ;;  %v9674_v50 = vld [vmem:[%s17559_s15] sm:$0xff]  ;;  %v9675_v39 = vld [vmem:[%s17559_s15 + $0x8] sm:$0xff] }
0x2b34   : > { %v13636_v40 = vpop.eup %13635  ;;  %v9472_v0 = vmul.f32 %v13634_v15, %v17173_v62  ;;  %13641 = vrsqrt.f32 %v9444_v49  ;;  %v9430_v18 = vmul.f32 0.03125, %v9414_v13  ;;  %v9411_v2 = vpop.xlane.xlu0 %9410  ;;  %v12828_v15 = vpack.c.bf16 %v9675_v39, %v9674_v50  ;;  %v9677_v13 = vld [vmem:[%s17559_s15 + $0x18] sm:$0xff] }
0x2b35   : > { %v9471_v12 = vmul.f32 %v13636_v40, %v17176_v45  ;;  %13643 = vrsqrt.f32 %v9443_v25  ;;  %v9429_v37 = vmul.f32 0.03125, %v9411_v2  ;;  %12814 = vmatpush3.bf16.msra.mxu1 %v17278_v27  ;;  %v9676_v25 = vld [vmem:[%s17559_s15 + $0x10] sm:$0xff] }
0x2b36   : > { %v9446_v58 = vadd.f32 1e-05, %v9430_v18  ;;  %12815 = vmatprep.subr.bf16.mxu1 %v17555_v22  ;;  %v9488_v47 = vmul.f32 %v17237_v35, %v9472_v0 }
0x2b37   : > { %v9445_v30 = vadd.f32 1e-05, %v9429_v37  ;;  %v9487_v32 = vmul.f32 %v17237_v35, %v9471_v12  ;;  %v9521_v46 = vpop.xlane.xlu1 %9520  ;;  %v9672_v12 = vld [vmem:[%s17562_s16 + $0x10] sm:$0xff]  ;;  %v9673_v37 = vld [vmem:[%s17562_s16 + $0x18] sm:$0xff] }
0x2b38   : > { %13645 = vrsqrt.f32 %v9446_v58  ;;  %v9252_v3 = vpop.xlane.xlu0 %9251  ;;  %v9504_v62 = vadd.f32 %v17242_v57, %v9488_v47 }
0x2b39   : > { %13647 = vrsqrt.f32 %v9445_v30  ;;  %v9253_v4 = vmul.f32 0.03125, %v9252_v3  ;;  %v9503_v45 = vadd.f32 %v17242_v57, %v9487_v32  ;;  %v12837_v32 = vpack.c.bf16 %v9673_v37, %v9672_v12  ;;  %v9828_v3 = vld [vmem:[%s13947_s19] sm:$0xff] }
0x2b3a   : > { %v13638_v60 = vpop.eup %13637 }
0x2b3b   : > { %v13640_v52 = vpop.eup %13639  ;;  %v9474_v43 = vmul.f32 %v13638_v60, %v17185_v28  ;;  %v9254_v23 = vadd.f32 1e-05, %v9253_v4  ;;  %v17289_v38 = vpack.c.bf16 %v9504_v62, %v9503_v45  ;;  %v9829_v62 = vld [vmem:[%s13947_s19 + $0x8] sm:$0xff]  ;;  %v9830_v60 = vld [vmem:[%s13947_s19 + $0x10] sm:$0xff] }
0x2b3c   : > { %v9473_v31 = vmul.f32 %v13640_v52, %v17188_v7  ;;  %v12840_v45 = vpack.c.bf16 %v9829_v62, %v9828_v3  ;;  %v9831_v52 = vld [vmem:[%s13947_s19 + $0x18] sm:$0xff] }
0x2b3d   : > { %13649 = vrsqrt.f32 %v9254_v23  ;;  %12817 = vmatpush3.bf16.msra.mxu1 %v17289_v38  ;;  %v9490_v16 = vmul.f32 %v17237_v35, %v9474_v43  ;;  %v12843_v43 = vpack.c.bf16 %v9831_v52, %v9830_v60  ;;  %v10655_v23 = vld [vmem:[#allocation3] ss:$0 sm:$0xff] }
0x2b3e   : > { %v13642_v24 = vpop.eup %13641  ;;  %12818 = vmatprep.subr.bf16.mxu1 %v17555_v22  ;;  %v9489_v53 = vmul.f32 %v17237_v35, %v9473_v31  ;;  %9912 = vperm.xlu1 %13207, %v10655_v23  }
0x2b3f   : > { %v13644_v51 = vpop.eup %13643  ;;  %v9476_v59 = vmul.f32 %v13642_v24, %v17195_v21  ;;  %v9506_v28 = vadd.f32 %v17242_v57, %v9490_v16 }
0x2b40   : > { %v9475_v5 = vmul.f32 %v13644_v51, %v17199_v20  ;;  %v9505_v9 = vadd.f32 %v17242_v57, %v9489_v53  ;;  %v9824_v51 = vld [vmem:[#allocation2] sm:$0x1] }
0x2b41   : > { %v9492_v7 = vmul.f32 %v17237_v35, %v9476_v59 }
0x2b42   : > { %v13646_v19 = vpop.eup %13645  ;;  %v12819_v29 = vpack.c.bf16 %v9506_v28, %v9505_v9  ;;  %v9491_v17 = vmul.f32 %v17237_v35, %v9475_v5 }
0x2b43   : > { %v13648_v54 = vpop.eup %13647  ;;  %v9478_v55 = vmul.f32 %v13646_v19, %v17207_v36  ;;  %v9508_v61 = vadd.f32 %v17242_v57, %v9492_v7 }
0x2b44   : > { %v9477_v21 = vmul.f32 %v13648_v54, %v17211_v41  ;;  %12820 = vmatpush3.bf16.msra.mxu1 %v12819_v29  ;;  %v9507_v20 = vadd.f32 %v17242_v57, %v9491_v17 }
0x2b45   : > { %12821 = vmatprep.subr.bf16.mxu1 %v17555_v22  ;;  %v9494_v63 = vmul.f32 %v17237_v35, %v9478_v55 }
0x2b46   : > { %v12822_v48 = vpack.c.bf16 %v9508_v61, %v9507_v20  ;;  %v9493_v8 = vmul.f32 %v17237_v35, %v9477_v21  ;;  %v17564_v21 = vld [vmem:[#allocation34_spill] sm:$0xff] }
0x2b47   : > { %v13650_v6 = vpop.eup %13649  ;;  %v9510_v36 = vadd.f32 %v17242_v57, %v9494_v63  ;;  %v10051_v20 = vrot.slane %v17227_v10, %v17564_v21 }
0x2b48   : > { %12823 = vmatpush3.bf16.msra.mxu1 %v12822_v48  ;;  %v9509_v26 = vadd.f32 %v17242_v57, %v9493_v8  ;;  %v9256_v41 = vmul.f32 %v13650_v6, %v17220_v56  ;;  %v12831_v56 = vpack.c.bf16 %v9677_v13, %v9676_v25 }
0x2b49   : > { %12824 = vmatprep.subr.bf16.mxu1 %v17555_v22 }
0x2b4a   : > { %v12825_v33 = vpack.c.bf16 %v9510_v36, %v9509_v26  ;;  %v9263_v42 = vmul.f32 %v17237_v35, %v9256_v41 }
0x2b4c   : > { %12826 = vmatpush3.bf16.msra.mxu1 %v12825_v33  ;;  %v17317_v49 = vadd.f32 %v17242_v57, %v9263_v42  ;;  %v9516_v57 = vpop.xlane.xlu0 %9515 }
0x2b4d   : > { %12845 = vmatprep.subr.bf16.mxu1 %v17555_v22 }
0x2b4e   : > { %12304 = vmatpush3.msra.mxu0 %v17317_v49 }
0x2b4f   : > { %12341 = vmatmul.mubr.f32.vlgmr.msra.gmra.mrb[162].mxu1 %v17227_v10  ;;  %12306 = vmatmul.mubr.msk.f32.vlgmr.msra.gmra.mrb[166].mxu0 %vm3018_vm9, %v9511_v1  ;;  %v9522_v1 = vmax.f32 %v9521_v46, 1.0 }
0x2b50   : > { %12827 = vmatprep.subr.bf16.mxu0 %v17555_v22  ;;  %12351 = vmatprep.mubr.msk.f32.mxu0 %vm13745_vm0, %v17520_v11 }
0x2b51   : > { %12829 = vmatpush3.bf16.msra.mxu0 %v12828_v15  ;;  %12408 = vmatprep.mubr.msk.f32.mxu1 %vm13745_vm0, %v17520_v11  ;;  %13651 = vrcp.f32 %v9522_v1 }
0x2b52   : > { %12830 = vmatprep.subr.bf16.mxu0 %v17555_v22 }
0x2b55   : > { %12848 = vmatpush3.bf16.xpose.msk.msra.mxu1 %vm17334_vm12, %v17250_v34  ;;  %12832 = vmatpush3.bf16.msra.mxu0 %v12831_v56  ;;  %v9517_v34 = vmax.f32 %v9516_v57, 1.0 }
0x2b56   : > { %12849 = vmatprep.subr.bf16.mxu1 %v17555_v22  ;;  %12833 = vmatprep.subr.bf16.mxu0 %v17555_v22 }
0x2b57   : > { %13653 = vrcp.f32 %v9517_v34 }
0x2b5d   : > { %12852 = vmatpush3.bf16.xpose.msk.msra.mxu1 %vm17334_vm12, %v17259_v44  ;;  %v9670_v44 = vld [vmem:[%s17562_s16] sm:$0xff] }
0x2b5e   : > { %12853 = vmatprep.subr.bf16.mxu1 %v17555_v22 }
0x2b65   : > { %12856 = vmatpush3.bf16.xpose.msk.msra.mxu1 %vm17334_vm12, %v17268_v14  ;;  %v9671_v14 = vld [vmem:[%s17562_s16 + $0x8] sm:$0xff] }
0x2b66   : > { %12857 = vmatprep.subr.bf16.mxu1 %v17555_v22  ;;  %v12834_v0 = vpack.c.bf16 %v9671_v14, %v9670_v44 }
0x2b6d   : > { %12860 = vmatpush3.bf16.xpose.msk.msra.mxu1 %vm17334_vm12, %v17278_v27  ;;  %v13652_v27 = vpop.eup %13651 }
0x2b6e   : > { %12861 = vmatprep.subr.bf16.mxu1 %v17555_v22  ;;  %v13654_v30 = vpop.eup %13653 }
0x2b75   : > { %12864 = vmatpush3.bf16.xpose.msk.msra.mxu1 %vm17334_vm12, %v17289_v38  ;;  %v1331_v38 = vld [vmem:[%s1304_s5] sm:$0xff] }
0x2b76   : > { %12865 = vmatprep.subr.bf16.mxu1 %v17555_v22  ;;  %v10041_v31 = vsub.f32 1.0, %v1331_v38 }
0x2b78   : > { %10044 = vperm.xlu0 %13208, %v10041_v31  }
0x2b7d   : > { %12868 = vmatpush3.bf16.xpose.msk.msra.mxu1 %vm17334_vm12, %v12819_v29 }
0x2b7e   : > { %12869 = vmatprep.subr.bf16.mxu1 %v17555_v22 }
0x2b85   : > { %12872 = vmatpush3.bf16.xpose.msk.msra.mxu1 %vm17334_vm12, %v12822_v48 }
0x2b86   : > { %12873 = vmatprep.subr.bf16.mxu1 %v17555_v22 }
0x2b8d   : > { %12876 = vmatpush3.bf16.xpose.msk.msra.mxu1 %vm17334_vm12, %v12825_v33 }
0x2bbd   : > { %v9913_v9 = vpop.permute.xlu1 %9912 }
0x2bf7   : > { %v10045_v63 = vpop.permute.xlu0 %10044 }
0x2bf8   : > { %v10053_v48 = vmul.f32 %v10051_v20, %v10045_v63 }
0x2c22   : > { %v9664_v40 = vpop.f32.mrb[162].mxu1  ;;  %v9592_v18 = vpop.f32.mrb[166].mxu0 }
0x2c23   : > { %v9669_v2 = vmul.f32 %v13652_v27, %v9664_v40  ;;  %v12342_v58 = vpop.f32.mrb[163].mxu1  ;;  %v12307_v47 = vpop.f32.mrb[167].mxu0  ;;  %v9597_v4 = vmul.f32 %v13654_v30, %v9592_v18 }
0x2c25   : > { %12352 = vmatmul.mubr.msk.f32.vlgmr.msra.gmra.mrb[168].mxu0 %vm1343_vm1, %v9669_v2 }
0x2c26   : > { %12835 = vmatpush3.bf16.msra.mxu0 %v12834_v0  ;;  %12362 = vmatprep.mubr.msk.f32.mxu0 %vm13745_vm0, %v17520_v11 }
0x2c27   : > { %12836 = vmatprep.subr.bf16.mxu0 %v17555_v22 }
0x2c2a   : > { %12838 = vmatpush3.bf16.msra.mxu0 %v12837_v32 }
0x2c2b   : > { %12839 = vmatprep.subr.bf16.mxu0 %v17555_v22 }
0x2c2d   : > { %12363 = vmatmul.mubr.msk.f32.vlgmr.msra.gmra.mrb[170].mxu0 %vm1343_vm1, %v9597_v4 }
0x2c2e   : > { %12841 = vmatpush3.bf16.msra.mxu0 %v12840_v45  ;;  %12373 = vmatprep.mubr.msk.f32.mxu0 %vm13745_vm0, %v17520_v11 }
0x2c2f   : > { %12842 = vmatprep.subr.bf16.mxu0 %v17555_v22 }
0x2c32   : > { %12844 = vmatpush3.bf16.msra.mxu0 %v12843_v43 }
0x2c35   : > { %12374 = vmatmul.mubr.msk.f32.vlgmr.msra.gmra.mrb[172].mxu0 %vm1343_vm1, %v17317_v49 }
0x2cf8   : > { %v9747_v16 = vpop.f32.mrb[168].mxu0 }
0x2cf9   : > { %v12353_v24 = vpop.f32.mrb[169].mxu0 }
0x2d00   : > { %v9820_v53 = vpop.f32.mrb[170].mxu0 }
0x2d01   : > { %v9821_v59 = vadd.f32 %v9820_v53, %v9747_v16  ;;  %v12364_v11 = vpop.f32.mrb[171].mxu0 }
0x2d03   : > { %v9825_v28 = vadd.f32 %v9824_v51, %v9821_v59 }
0x2d05   : > { %9827 = vst.msk [vmem:[%s1307_s3] sm:$0x1] %vm9826_vm13, %v9825_v28 }
0x2d08   : > { %v9901_v22 = vpop.f32.mrb[172].mxu0 }
0x2d09   : > { %v12375_v5 = vpop.f32.mrb[173].mxu0  ;;  %12409 = vmatmul.mubr.msk.f32.vlgmr.msra.gmra.mrb[164].mxu1 %vm1343_vm1, %v9901_v22 }
0x2ddc   : > { %v10032_v7 = vpop.f32.mrb[164].mxu1 }
0x2ddd   : > { %v10033_v19 = vadd.f32 %v10032_v7, %v9913_v9  ;;  %v12410_v29 = vpop.f32.mrb[165].mxu1 }
0x2ddf   : > { %v10036_v17 = vsub.f32 0.0, %v10033_v19 }
0x2de1   : > { %v10037_v54 = vmul.f32 1.442695, %v10036_v17 }
0x2de3   : > { %13655 = vpow2.f32 %v10037_v54 }
0x2ded   : > { %v13656_v55 = vpop.eup %13655 }
0x2dee   : > { %v10039_v61 = vadd.f32 1.0, %v13656_v55 }
0x2df0   : > { %13657 = vrcp.f32 %v10039_v61 }
0x2dfa   : > { %v13658_v8 = vpop.eup %13657 }
0x2dfb   : > { %v10054_v6 = vmul.f32 %v13658_v8, %v10053_v48 }
0x2dfd   : > { %10055 = vst [vmem:[%s1311_s7] sm:$0xff] %v10054_v6 }
0x2dfe PF: > { %s98_s4 = sadd.s32 1, %s13701_s4  }
0x2dff   : > { %p95_p4 = scmp.ge.s32.totalorder %s98_s4, 4  }
0x2e01   :  { %97 = sbr.rel (!%p95_p4) target bundleno = 82 (0x52), region = 275 }

</bundles_post_ra>
